<compile_context>
chip_gen: v7x
topology: tpu7x:2x2x1
jax: 0.10.0
libtpu: 0.0.40
codegen_flags: <defaults>
</compile_context>

<pallas_src>
import jax
import jax.numpy as jnp
from jax.experimental import pallas as pl
from jax.experimental.pallas import tpu as pltpu

# Memotion Task C intensity dims: humour(4), sarcasm(4), offense(4), motivation(2)
EMOTION_DIMS = (4, 4, 4, 2)
TOTAL_OUT = sum(EMOTION_DIMS)
LN_EPS = 1e-5          # PyTorch nn.LayerNorm default
VEC_WIDTH = 1024       # lane width of the packed bias / LN-parameter buffer
N_W = 14               # number of streamed bf16 weight operands


def _linear(x, w_bf16, b):
    # Cast activations to bf16 at the MXU input, accumulate in f32.
    return jnp.dot(x.astype(jnp.bfloat16), w_bf16,
                   preferred_element_type=jnp.float32) + b


def _layernorm(x, g, beta):
    # Single pass: var = E[x^2] - E[x]^2 (two independent cross-lane reduces).
    mu = jnp.mean(x, axis=-1, keepdims=True)
    ms = jnp.mean(x * x, axis=-1, keepdims=True)
    var = ms - mu * mu
    return (x - mu) * jax.lax.rsqrt(var + LN_EPS) * g + beta


class _VecReader:
    """Sequentially hands out (1, width) f32 rows from the packed vector buffer.

    Works on either a VMEM Ref (in-kernel: static row + lane slice) or a plain
    jnp array (pure-JAX reference). Consumption order must mirror make_params."""

    def __init__(self, vec):
        self._vec = vec
        self._i = 0

    def take(self, width):
        row = self._vec[self._i:self._i + 1, :width]
        self._i += 1
        return row


def _forward_math(img, txt, vec, next_w):
    """Post-backbone forward.

    `next_w()` yields the next bf16 weight matrix in consumption order (in the
    kernel this waits on that weight's DMA and loads it from VMEM scratch);
    `vec` is the packed f32 bias/LN/attention-diff buffer (Ref or array)."""
    vr = _VecReader(vec)

    def proj_branch(x):
        # Linear(768,768)+LN+ReLU+Dropout(id)+Linear(768,512)+LN
        w1 = next_w()
        b1 = vr.take(768); g1 = vr.take(768); be1 = vr.take(768)
        h = jnp.maximum(_layernorm(_linear(x, w1, b1), g1, be1), 0.0)
        w2 = next_w()
        b2 = vr.take(512); g2 = vr.take(512); be2 = vr.take(512)
        return _layernorm(_linear(h, w2, b2), g2, be2)

    image_features = proj_branch(img)   # (B, 512)
    text_features = proj_branch(txt)    # (B, 512)

    # fusion layer 1: concat-free — two dots on the split weight halves.
    w1a = next_w(); w1b = next_w()
    b1 = vr.take(768); g1 = vr.take(768); be1 = vr.take(768)
    pre = (jnp.dot(image_features.astype(jnp.bfloat16), w1a,
                   preferred_element_type=jnp.float32)
           + jnp.dot(text_features.astype(jnp.bfloat16), w1b,
                     preferred_element_type=jnp.float32)
           + b1)
    h = jnp.maximum(_layernorm(pre, g1, be1), 0.0)
    w2 = next_w()
    b2 = vr.take(512); g2 = vr.take(512); be2 = vr.take(512)
    fused = jnp.maximum(_layernorm(_linear(h, w2, b2), g2, be2), 0.0)   # (B, 512)

    # modality attention: Linear(512,256)+LN+ReLU then 2-way softmax.
    # softmax(logits)[:,0] == sigmoid(logit0 - logit1); only the precomputed
    # difference column w[:,0]-w[:,1] (in the vec buffer) is needed — no
    # lane-sparse (256,2) MXU pass.
    wma = next_w()
    b1 = vr.take(256); g1 = vr.take(256); be1 = vr.take(256)
    h = jnp.maximum(_layernorm(_linear(fused, wma, b1), g1, be1), 0.0)
    w_diff = vr.take(256)                               # (1, 256)
    b_diff = vr.take(1)                                 # (1, 1)
    d = jnp.sum(h * w_diff, axis=-1, keepdims=True) + b_diff
    w_img = 1.0 / (1.0 + jnp.exp(-d))                   # softmax(logits)[:, 0:1]
    w_txt = 1.0 - w_img

    multimodal = image_features * w_img + text_features * w_txt          # (B, 512)

    # shared trunk: 3x (Linear + LN + ReLU): 512 -> 512 -> 384 -> 256
    x = multimodal
    for dout in (512, 384, 256):
        w = next_w()
        b = vr.take(dout); g = vr.take(dout); be = vr.take(dout)
        x = jnp.maximum(_layernorm(_linear(x, w, b), g, be), 0.0)
    shared = x                                                           # (B, 256)

    # classifier heads: layer-1 fused across the 4 heads into one matmul.
    w1c = next_w()
    b1c = vr.take(4 * 256)
    h1_all = _linear(shared, w1c, b1c)                  # (B, 1024)
    w2_all = next_w()                                   # (1024,128) stacked layer-2
    h2s = []
    for i in range(4):
        g1 = vr.take(256); be1 = vr.take(256)
        h1 = jnp.maximum(
            _layernorm(h1_all[:, i * 256:(i + 1) * 256], g1, be1), 0.0)
        b2 = vr.take(128); g2 = vr.take(128); be2 = vr.take(128)
        w2 = w2_all[i * 256:(i + 1) * 256, :]
        h2s.append(jnp.maximum(_layernorm(_linear(h1, w2, b2), g2, be2), 0.0))
    h2_cat = jnp.concatenate(h2s, axis=1)               # (B, 512), lane-aligned

    # final layer: block-diagonal matmul, lane-padded to 128 output columns
    # (cols >= TOTAL_OUT are zero) so the weight DMA has a 128-multiple minor dim.
    w3 = next_w()                                       # (512, 128)
    b3 = vr.take(TOTAL_OUT)
    out = jnp.dot(h2_cat.astype(jnp.bfloat16), w3,
                  preferred_element_type=jnp.float32)
    return out[:, :TOTAL_OUT] + b3                      # (B, 14)


def meme_emotion_kernel(*refs):
    # refs = (img, txt, vec, w_hbm[0..N_W-1], out, w_vmem[0..N_W-1], sem)
    n_in = 3 + N_W
    img_ref, txt_ref, vec_ref = refs[:3]
    w_hbm = refs[3:n_in]
    out_ref = refs[n_in]
    w_vmem = refs[n_in + 1:n_in + 1 + N_W]
    sem = refs[n_in + 1 + N_W]

    # Issue every weight DMA up front, in consumption order; the DMA engine
    # streams later layers' weights while the MXU works on earlier layers.
    for i in range(N_W):
        pltpu.make_async_copy(w_hbm[i], w_vmem[i], sem.at[i]).start()

    state = {"i": 0}

    def next_w():
        i = state["i"]
        state["i"] = i + 1
        pltpu.make_async_copy(w_hbm[i], w_vmem[i], sem.at[i]).wait()
        return w_vmem[i][...]

    out_ref[...] = _forward_math(img_ref[...], txt_ref[...], vec_ref, next_w)


def make_params(key):
    """Deterministic synthetic weights, packed in kernel consumption order.

    Returns (vec, weights):
      vec     : (n_rows, 1024) f32 — every bias / LN gamma / LN beta plus the
                modality-attention difference column, one per row.
      weights : tuple of 14 bf16 (in, out) matrices streamed from HBM.
    """
    keys = iter(jax.random.split(key, 128))
    weights = []
    vec_rows = []

    def add_vec(v):
        vec_rows.append(jnp.pad(v, (0, VEC_WIDTH - v.shape[0])))

    def rand_lin(din, dout):
        w = jax.random.normal(next(keys), (din, dout), jnp.float32) * 0.02
        b = jax.random.normal(next(keys), (dout,), jnp.float32) * 0.01
        return w, b

    def lin(din, dout):
        w, b = rand_lin(din, dout)
        weights.append(w.astype(jnp.bfloat16))
        add_vec(b)

    def ln(d):
        add_vec(jnp.ones((d,), jnp.float32))
        add_vec(jnp.zeros((d,), jnp.float32))

    # vision_projection, text_projection
    for _ in range(2):
        lin(768, 768); ln(768)
        lin(768, 512); ln(512)

    # fusion: W1 stored as two (512,768) halves for concat-free evaluation
    w1, b1 = rand_lin(1024, 768)
    weights.append(w1[:512].astype(jnp.bfloat16))
    weights.append(w1[512:].astype(jnp.bfloat16))
    add_vec(b1); ln(768)
    lin(768, 512); ln(512)

    # modality_attention: layer 1 + precomputed softmax-difference column
    lin(512, 256); ln(256)
    w2, b2 = rand_lin(256, 2)
    add_vec(w2[:, 0] - w2[:, 1])                           # w_diff (256,)
    add_vec(jnp.array([b2[0] - b2[1]], jnp.float32))       # b_diff (1,)

    # shared_features
    lin(512, 512); ln(512)
    lin(512, 384); ln(384)
    lin(384, 256); ln(256)

    # classifier_heads: layer-1 fused (256,1024); layer-2 stacked (1024,128);
    # final layer block-diag, lane-padded to (512,128).
    h1_list = [rand_lin(256, 256) for _ in range(4)]
    weights.append(jnp.concatenate([w for w, _ in h1_list], axis=1)
                   .astype(jnp.bfloat16))
    add_vec(jnp.concatenate([b for _, b in h1_list]))

    h2_ws = []
    w3_list, b3_list = [], []
    for dim in EMOTION_DIMS:
        ln(256)                         # per-head LN on the 256-wide layer-1 slice
        w2h, b2h = rand_lin(256, 128)   # per-head layer-2
        h2_ws.append(w2h)
        add_vec(b2h)
        ln(128)
        w3, b3 = rand_lin(128, dim)
        w3_list.append(w3); b3_list.append(b3)
    weights.append(jnp.concatenate(h2_ws, axis=0).astype(jnp.bfloat16))  # (1024,128)

    w3_blk = jnp.zeros((4 * 128, 128), jnp.float32)
    col = 0
    for hi, (w3, dim) in enumerate(zip(w3_list, EMOTION_DIMS)):
        w3_blk = w3_blk.at[hi * 128:(hi + 1) * 128, col:col + dim].set(w3)
        col += dim
    weights.append(w3_blk.astype(jnp.bfloat16))
    add_vec(jnp.concatenate(b3_list))

    vec = jnp.stack(vec_rows, axis=0)
    assert len(weights) == N_W, len(weights)
    return vec, tuple(weights)


@jax.jit
def meme_emotion_forward(image_embeds, text_embeds, vec, weights):
    B = image_embeds.shape[0]
    vmem = pl.BlockSpec(memory_space=pltpu.MemorySpace.VMEM)
    hbm = pl.BlockSpec(memory_space=pl.ANY)   # raw HBM refs, streamed in-kernel
    w_scratch = [pltpu.VMEM(w.shape, w.dtype) for w in weights]
    return pl.pallas_call(
        meme_emotion_kernel,
        out_shape=jax.ShapeDtypeStruct((B, TOTAL_OUT), jnp.float32),
        in_specs=[vmem, vmem, vmem] + [hbm] * len(weights),
        out_specs=vmem,
        scratch_shapes=w_scratch + [pltpu.SemaphoreType.DMA((len(weights),))],
        compiler_params=pltpu.CompilerParams(
            vmem_limit_bytes=24 * 1024 * 1024),
    )(image_embeds, text_embeds, vec, *weights)


if __name__ == "__main__":
    key = jax.random.PRNGKey(0)
    k_img, k_txt, k_par = jax.random.split(key, 3)

    # TODO(synk): B=8 keeps the demo small; production should batch to M=128/256
    # to fill the MXU rows (weight-streaming cost is batch-independent).
    B = 8
    image_embeds = jax.random.normal(k_img, (B, 768), jnp.float32)
    text_embeds = jax.random.normal(k_txt, (B, 768), jnp.float32)
    vec, weights = make_params(k_par)

    out = meme_emotion_forward(image_embeds, text_embeds, vec, weights)
    out = jax.block_until_ready(out)

    # pure-JAX reference (same packed bf16 params, same math)
    w_iter = iter(list(weights))
    ref = _forward_math(image_embeds, text_embeds, vec, lambda: next(w_iter))
    assert out.shape == (B, TOTAL_OUT), out.shape
    max_err = float(jnp.max(jnp.abs(out - ref)))
    assert jnp.allclose(out, ref, atol=1e-2, rtol=1e-2), max_err

    print("KERNEL_OK")
</pallas_src>

<mosaic_0001>
module attributes {stable_mosaic.version = 11 : i64} {
  func.func @meme_emotion_kernel(%arg0: memref<8x768xf32, #tpu.memory_space<vmem>>, %arg1: memref<8x768xf32, #tpu.memory_space<vmem>>, %arg2: memref<54x1024xf32, #tpu.memory_space<vmem>>, %arg3: memref<768x768xbf16, #tpu.memory_space<any>>, %arg4: memref<768x512xbf16, #tpu.memory_space<any>>, %arg5: memref<768x768xbf16, #tpu.memory_space<any>>, %arg6: memref<768x512xbf16, #tpu.memory_space<any>>, %arg7: memref<512x768xbf16, #tpu.memory_space<any>>, %arg8: memref<512x768xbf16, #tpu.memory_space<any>>, %arg9: memref<768x512xbf16, #tpu.memory_space<any>>, %arg10: memref<512x256xbf16, #tpu.memory_space<any>>, %arg11: memref<512x512xbf16, #tpu.memory_space<any>>, %arg12: memref<512x384xbf16, #tpu.memory_space<any>>, %arg13: memref<384x256xbf16, #tpu.memory_space<any>>, %arg14: memref<256x1024xbf16, #tpu.memory_space<any>>, %arg15: memref<1024x128xbf16, #tpu.memory_space<any>>, %arg16: memref<512x128xbf16, #tpu.memory_space<any>>, %arg17: memref<8x14xf32, #tpu.memory_space<vmem>>, %arg18: memref<768x768xbf16, #tpu.memory_space<vmem>>, %arg19: memref<768x512xbf16, #tpu.memory_space<vmem>>, %arg20: memref<768x768xbf16, #tpu.memory_space<vmem>>, %arg21: memref<768x512xbf16, #tpu.memory_space<vmem>>, %arg22: memref<512x768xbf16, #tpu.memory_space<vmem>>, %arg23: memref<512x768xbf16, #tpu.memory_space<vmem>>, %arg24: memref<768x512xbf16, #tpu.memory_space<vmem>>, %arg25: memref<512x256xbf16, #tpu.memory_space<vmem>>, %arg26: memref<512x512xbf16, #tpu.memory_space<vmem>>, %arg27: memref<512x384xbf16, #tpu.memory_space<vmem>>, %arg28: memref<384x256xbf16, #tpu.memory_space<vmem>>, %arg29: memref<256x1024xbf16, #tpu.memory_space<vmem>>, %arg30: memref<1024x128xbf16, #tpu.memory_space<vmem>>, %arg31: memref<512x128xbf16, #tpu.memory_space<vmem>>, %arg32: memref<14x!tpu.dma_semaphore, #tpu.memory_space<semaphore_mem>>) attributes {dimension_semantics = [], scalar_prefetch = 0 : i64, scratch_operands = 15 : i64, tpu.core_type = #tpu.core_type<tc>} {
    %c0_i32 = arith.constant 0 : i32
    %0 = tpu.memref_slice %arg32[%c0_i32] : memref<14x!tpu.dma_semaphore, #tpu.memory_space<semaphore_mem>> -> memref<1x!tpu.dma_semaphore, #tpu.memory_space<semaphore_mem>>
    %1 = tpu.memref_squeeze %0 : memref<1x!tpu.dma_semaphore, #tpu.memory_space<semaphore_mem>> -> memref<!tpu.dma_semaphore, #tpu.memory_space<semaphore_mem>>
    tpu.enqueue_dma source(%arg3 : memref<768x768xbf16, #tpu.memory_space<any>>) target(%arg18 : memref<768x768xbf16, #tpu.memory_space<vmem>>) target_semaphore(%1 : memref<!tpu.dma_semaphore, #tpu.memory_space<semaphore_mem>>)
    %c1_i32 = arith.constant 1 : i32
    %2 = tpu.memref_slice %arg32[%c1_i32] : memref<14x!tpu.dma_semaphore, #tpu.memory_space<semaphore_mem>> -> memref<1x!tpu.dma_semaphore, #tpu.memory_space<semaphore_mem>>
    %3 = tpu.memref_squeeze %2 : memref<1x!tpu.dma_semaphore, #tpu.memory_space<semaphore_mem>> -> memref<!tpu.dma_semaphore, #tpu.memory_space<semaphore_mem>>
    tpu.enqueue_dma source(%arg4 : memref<768x512xbf16, #tpu.memory_space<any>>) target(%arg19 : memref<768x512xbf16, #tpu.memory_space<vmem>>) target_semaphore(%3 : memref<!tpu.dma_semaphore, #tpu.memory_space<semaphore_mem>>)
    %c2_i32 = arith.constant 2 : i32
    %4 = tpu.memref_slice %arg32[%c2_i32] : memref<14x!tpu.dma_semaphore, #tpu.memory_space<semaphore_mem>> -> memref<1x!tpu.dma_semaphore, #tpu.memory_space<semaphore_mem>>
    %5 = tpu.memref_squeeze %4 : memref<1x!tpu.dma_semaphore, #tpu.memory_space<semaphore_mem>> -> memref<!tpu.dma_semaphore, #tpu.memory_space<semaphore_mem>>
    tpu.enqueue_dma source(%arg5 : memref<768x768xbf16, #tpu.memory_space<any>>) target(%arg20 : memref<768x768xbf16, #tpu.memory_space<vmem>>) target_semaphore(%5 : memref<!tpu.dma_semaphore, #tpu.memory_space<semaphore_mem>>)
    %c3_i32 = arith.constant 3 : i32
    %6 = tpu.memref_slice %arg32[%c3_i32] : memref<14x!tpu.dma_semaphore, #tpu.memory_space<semaphore_mem>> -> memref<1x!tpu.dma_semaphore, #tpu.memory_space<semaphore_mem>>
    %7 = tpu.memref_squeeze %6 : memref<1x!tpu.dma_semaphore, #tpu.memory_space<semaphore_mem>> -> memref<!tpu.dma_semaphore, #tpu.memory_space<semaphore_mem>>
    tpu.enqueue_dma source(%arg6 : memref<768x512xbf16, #tpu.memory_space<any>>) target(%arg21 : memref<768x512xbf16, #tpu.memory_space<vmem>>) target_semaphore(%7 : memref<!tpu.dma_semaphore, #tpu.memory_space<semaphore_mem>>)
    %c4_i32 = arith.constant 4 : i32
    %8 = tpu.memref_slice %arg32[%c4_i32] : memref<14x!tpu.dma_semaphore, #tpu.memory_space<semaphore_mem>> -> memref<1x!tpu.dma_semaphore, #tpu.memory_space<semaphore_mem>>
    %9 = tpu.memref_squeeze %8 : memref<1x!tpu.dma_semaphore, #tpu.memory_space<semaphore_mem>> -> memref<!tpu.dma_semaphore, #tpu.memory_space<semaphore_mem>>
    tpu.enqueue_dma source(%arg7 : memref<512x768xbf16, #tpu.memory_space<any>>) target(%arg22 : memref<512x768xbf16, #tpu.memory_space<vmem>>) target_semaphore(%9 : memref<!tpu.dma_semaphore, #tpu.memory_space<semaphore_mem>>)
    %c5_i32 = arith.constant 5 : i32
    %10 = tpu.memref_slice %arg32[%c5_i32] : memref<14x!tpu.dma_semaphore, #tpu.memory_space<semaphore_mem>> -> memref<1x!tpu.dma_semaphore, #tpu.memory_space<semaphore_mem>>
    %11 = tpu.memref_squeeze %10 : memref<1x!tpu.dma_semaphore, #tpu.memory_space<semaphore_mem>> -> memref<!tpu.dma_semaphore, #tpu.memory_space<semaphore_mem>>
    tpu.enqueue_dma source(%arg8 : memref<512x768xbf16, #tpu.memory_space<any>>) target(%arg23 : memref<512x768xbf16, #tpu.memory_space<vmem>>) target_semaphore(%11 : memref<!tpu.dma_semaphore, #tpu.memory_space<semaphore_mem>>)
    %c6_i32 = arith.constant 6 : i32
    %12 = tpu.memref_slice %arg32[%c6_i32] : memref<14x!tpu.dma_semaphore, #tpu.memory_space<semaphore_mem>> -> memref<1x!tpu.dma_semaphore, #tpu.memory_space<semaphore_mem>>
    %13 = tpu.memref_squeeze %12 : memref<1x!tpu.dma_semaphore, #tpu.memory_space<semaphore_mem>> -> memref<!tpu.dma_semaphore, #tpu.memory_space<semaphore_mem>>
    tpu.enqueue_dma source(%arg9 : memref<768x512xbf16, #tpu.memory_space<any>>) target(%arg24 : memref<768x512xbf16, #tpu.memory_space<vmem>>) target_semaphore(%13 : memref<!tpu.dma_semaphore, #tpu.memory_space<semaphore_mem>>)
    %c7_i32 = arith.constant 7 : i32
    %14 = tpu.memref_slice %arg32[%c7_i32] : memref<14x!tpu.dma_semaphore, #tpu.memory_space<semaphore_mem>> -> memref<1x!tpu.dma_semaphore, #tpu.memory_space<semaphore_mem>>
    %15 = tpu.memref_squeeze %14 : memref<1x!tpu.dma_semaphore, #tpu.memory_space<semaphore_mem>> -> memref<!tpu.dma_semaphore, #tpu.memory_space<semaphore_mem>>
    tpu.enqueue_dma source(%arg10 : memref<512x256xbf16, #tpu.memory_space<any>>) target(%arg25 : memref<512x256xbf16, #tpu.memory_space<vmem>>) target_semaphore(%15 : memref<!tpu.dma_semaphore, #tpu.memory_space<semaphore_mem>>)
    %c8_i32 = arith.constant 8 : i32
    %16 = tpu.memref_slice %arg32[%c8_i32] : memref<14x!tpu.dma_semaphore, #tpu.memory_space<semaphore_mem>> -> memref<1x!tpu.dma_semaphore, #tpu.memory_space<semaphore_mem>>
    %17 = tpu.memref_squeeze %16 : memref<1x!tpu.dma_semaphore, #tpu.memory_space<semaphore_mem>> -> memref<!tpu.dma_semaphore, #tpu.memory_space<semaphore_mem>>
    tpu.enqueue_dma source(%arg11 : memref<512x512xbf16, #tpu.memory_space<any>>) target(%arg26 : memref<512x512xbf16, #tpu.memory_space<vmem>>) target_semaphore(%17 : memref<!tpu.dma_semaphore, #tpu.memory_space<semaphore_mem>>)
    %c9_i32 = arith.constant 9 : i32
    %18 = tpu.memref_slice %arg32[%c9_i32] : memref<14x!tpu.dma_semaphore, #tpu.memory_space<semaphore_mem>> -> memref<1x!tpu.dma_semaphore, #tpu.memory_space<semaphore_mem>>
    %19 = tpu.memref_squeeze %18 : memref<1x!tpu.dma_semaphore, #tpu.memory_space<semaphore_mem>> -> memref<!tpu.dma_semaphore, #tpu.memory_space<semaphore_mem>>
    tpu.enqueue_dma source(%arg12 : memref<512x384xbf16, #tpu.memory_space<any>>) target(%arg27 : memref<512x384xbf16, #tpu.memory_space<vmem>>) target_semaphore(%19 : memref<!tpu.dma_semaphore, #tpu.memory_space<semaphore_mem>>)
    %c10_i32 = arith.constant 10 : i32
    %20 = tpu.memref_slice %arg32[%c10_i32] : memref<14x!tpu.dma_semaphore, #tpu.memory_space<semaphore_mem>> -> memref<1x!tpu.dma_semaphore, #tpu.memory_space<semaphore_mem>>
    %21 = tpu.memref_squeeze %20 : memref<1x!tpu.dma_semaphore, #tpu.memory_space<semaphore_mem>> -> memref<!tpu.dma_semaphore, #tpu.memory_space<semaphore_mem>>
    tpu.enqueue_dma source(%arg13 : memref<384x256xbf16, #tpu.memory_space<any>>) target(%arg28 : memref<384x256xbf16, #tpu.memory_space<vmem>>) target_semaphore(%21 : memref<!tpu.dma_semaphore, #tpu.memory_space<semaphore_mem>>)
    %c11_i32 = arith.constant 11 : i32
    %22 = tpu.memref_slice %arg32[%c11_i32] : memref<14x!tpu.dma_semaphore, #tpu.memory_space<semaphore_mem>> -> memref<1x!tpu.dma_semaphore, #tpu.memory_space<semaphore_mem>>
    %23 = tpu.memref_squeeze %22 : memref<1x!tpu.dma_semaphore, #tpu.memory_space<semaphore_mem>> -> memref<!tpu.dma_semaphore, #tpu.memory_space<semaphore_mem>>
    tpu.enqueue_dma source(%arg14 : memref<256x1024xbf16, #tpu.memory_space<any>>) target(%arg29 : memref<256x1024xbf16, #tpu.memory_space<vmem>>) target_semaphore(%23 : memref<!tpu.dma_semaphore, #tpu.memory_space<semaphore_mem>>)
    %c12_i32 = arith.constant 12 : i32
    %24 = tpu.memref_slice %arg32[%c12_i32] : memref<14x!tpu.dma_semaphore, #tpu.memory_space<semaphore_mem>> -> memref<1x!tpu.dma_semaphore, #tpu.memory_space<semaphore_mem>>
    %25 = tpu.memref_squeeze %24 : memref<1x!tpu.dma_semaphore, #tpu.memory_space<semaphore_mem>> -> memref<!tpu.dma_semaphore, #tpu.memory_space<semaphore_mem>>
    tpu.enqueue_dma source(%arg15 : memref<1024x128xbf16, #tpu.memory_space<any>>) target(%arg30 : memref<1024x128xbf16, #tpu.memory_space<vmem>>) target_semaphore(%25 : memref<!tpu.dma_semaphore, #tpu.memory_space<semaphore_mem>>)
    %c13_i32 = arith.constant 13 : i32
    %26 = tpu.memref_slice %arg32[%c13_i32] : memref<14x!tpu.dma_semaphore, #tpu.memory_space<semaphore_mem>> -> memref<1x!tpu.dma_semaphore, #tpu.memory_space<semaphore_mem>>
    %27 = tpu.memref_squeeze %26 : memref<1x!tpu.dma_semaphore, #tpu.memory_space<semaphore_mem>> -> memref<!tpu.dma_semaphore, #tpu.memory_space<semaphore_mem>>
    tpu.enqueue_dma source(%arg16 : memref<512x128xbf16, #tpu.memory_space<any>>) target(%arg31 : memref<512x128xbf16, #tpu.memory_space<vmem>>) target_semaphore(%27 : memref<!tpu.dma_semaphore, #tpu.memory_space<semaphore_mem>>)
    %c0 = arith.constant 0 : index
    %c0_0 = arith.constant 0 : index
    %28 = vector.load %arg0[%c0, %c0_0] : memref<8x768xf32, #tpu.memory_space<vmem>>, vector<8x768xf32>
    %c0_1 = arith.constant 0 : index
    %c0_2 = arith.constant 0 : index
    %29 = vector.load %arg1[%c0_1, %c0_2] : memref<8x768xf32, #tpu.memory_space<vmem>>, vector<8x768xf32>
    %c0_i32_3 = arith.constant 0 : i32
    %30 = tpu.memref_slice %arg32[%c0_i32_3] : memref<14x!tpu.dma_semaphore, #tpu.memory_space<semaphore_mem>> -> memref<1x!tpu.dma_semaphore, #tpu.memory_space<semaphore_mem>>
    %31 = tpu.memref_squeeze %30 : memref<1x!tpu.dma_semaphore, #tpu.memory_space<semaphore_mem>> -> memref<!tpu.dma_semaphore, #tpu.memory_space<semaphore_mem>>
    tpu.wait_dma2 semaphore(%31 : memref<!tpu.dma_semaphore, #tpu.memory_space<semaphore_mem>>) src(%arg3 : memref<768x768xbf16, #tpu.memory_space<any>>) dst(%arg18 : memref<768x768xbf16, #tpu.memory_space<vmem>>)
    %c0_4 = arith.constant 0 : index
    %c0_5 = arith.constant 0 : index
    %32 = vector.load %arg18[%c0_4, %c0_5] : memref<768x768xbf16, #tpu.memory_space<vmem>>, vector<768x768xbf16>
    %c0_6 = arith.constant 0 : index
    %c0_7 = arith.constant 0 : index
    %33 = vector.load %arg2[%c0_6, %c0_7] : memref<54x1024xf32, #tpu.memory_space<vmem>>, vector<1x768xf32>
    %c1 = arith.constant 1 : index
    %c0_8 = arith.constant 0 : index
    %34 = vector.load %arg2[%c1, %c0_8] : memref<54x1024xf32, #tpu.memory_space<vmem>>, vector<1x768xf32>
    %c2 = arith.constant 2 : index
    %c0_9 = arith.constant 0 : index
    %35 = vector.load %arg2[%c2, %c0_9] : memref<54x1024xf32, #tpu.memory_space<vmem>>, vector<1x768xf32>
    %36 = arith.truncf %28 : vector<8x768xf32> to vector<8x768xbf16>
    %cst = arith.constant dense<0.000000e+00> : vector<8x768xf32>
    %37 = tpu.matmul %36, %32, %cst {dimension_numbers = #tpu.dot_dimension_numbers<[1], [0], [0], [1], [0, 0, 1, 1], [], []>} : vector<8x768xbf16>, vector<768x768xbf16>, vector<8x768xf32> -> vector<8x768xf32>
    %38 = vector.broadcast %33 : vector<1x768xf32> to vector<8x768xf32>
    %39 = arith.addf %37, %38 : vector<8x768xf32>
    %cst_10 = arith.constant dense<0.000000e+00> : vector<8xf32>
    %40 = vector.multi_reduction <add>, %39, %cst_10 [1] : vector<8x768xf32> to vector<8xf32>
    %41 = vector.shape_cast %40 : vector<8xf32> to vector<8x1xf32>
    %cst_11 = arith.constant 7.680000e+02 : f32
    %42 = vector.broadcast %cst_11 : f32 to vector<8x1xf32>
    %43 = arith.divf %41, %42 : vector<8x1xf32>
    %44 = arith.mulf %39, %39 : vector<8x768xf32>
    %cst_12 = arith.constant dense<0.000000e+00> : vector<8xf32>
    %45 = vector.multi_reduction <add>, %44, %cst_12 [1] : vector<8x768xf32> to vector<8xf32>
    %46 = vector.shape_cast %45 : vector<8xf32> to vector<8x1xf32>
    %cst_13 = arith.constant 7.680000e+02 : f32
    %47 = vector.broadcast %cst_13 : f32 to vector<8x1xf32>
    %48 = arith.divf %46, %47 : vector<8x1xf32>
    %49 = arith.mulf %43, %43 : vector<8x1xf32>
    %50 = arith.subf %48, %49 : vector<8x1xf32>
    %51 = vector.broadcast %43 : vector<8x1xf32> to vector<8x768xf32>
    %52 = arith.subf %39, %51 : vector<8x768xf32>
    %cst_14 = arith.constant 9.99999974E-6 : f32
    %53 = vector.broadcast %cst_14 : f32 to vector<8x1xf32>
    %54 = arith.addf %50, %53 : vector<8x1xf32>
    %55 = math.rsqrt %54 : vector<8x1xf32>
    %56 = vector.broadcast %55 : vector<8x1xf32> to vector<8x768xf32>
    %57 = arith.mulf %52, %56 : vector<8x768xf32>
    %58 = vector.broadcast %34 : vector<1x768xf32> to vector<8x768xf32>
    %59 = arith.mulf %57, %58 : vector<8x768xf32>
    %60 = vector.broadcast %35 : vector<1x768xf32> to vector<8x768xf32>
    %61 = arith.addf %59, %60 : vector<8x768xf32>
    %cst_15 = arith.constant 0.000000e+00 : f32
    %62 = vector.broadcast %cst_15 : f32 to vector<8x768xf32>
    %63 = arith.maximumf %61, %62 : vector<8x768xf32>
    %c1_i32_16 = arith.constant 1 : i32
    %64 = tpu.memref_slice %arg32[%c1_i32_16] : memref<14x!tpu.dma_semaphore, #tpu.memory_space<semaphore_mem>> -> memref<1x!tpu.dma_semaphore, #tpu.memory_space<semaphore_mem>>
    %65 = tpu.memref_squeeze %64 : memref<1x!tpu.dma_semaphore, #tpu.memory_space<semaphore_mem>> -> memref<!tpu.dma_semaphore, #tpu.memory_space<semaphore_mem>>
    tpu.wait_dma2 semaphore(%65 : memref<!tpu.dma_semaphore, #tpu.memory_space<semaphore_mem>>) src(%arg4 : memref<768x512xbf16, #tpu.memory_space<any>>) dst(%arg19 : memref<768x512xbf16, #tpu.memory_space<vmem>>)
    %c0_17 = arith.constant 0 : index
    %c0_18 = arith.constant 0 : index
    %66 = vector.load %arg19[%c0_17, %c0_18] : memref<768x512xbf16, #tpu.memory_space<vmem>>, vector<768x512xbf16>
    %c3 = arith.constant 3 : index
    %c0_19 = arith.constant 0 : index
    %67 = vector.load %arg2[%c3, %c0_19] : memref<54x1024xf32, #tpu.memory_space<vmem>>, vector<1x512xf32>
    %c4 = arith.constant 4 : index
    %c0_20 = arith.constant 0 : index
    %68 = vector.load %arg2[%c4, %c0_20] : memref<54x1024xf32, #tpu.memory_space<vmem>>, vector<1x512xf32>
    %c5 = arith.constant 5 : index
    %c0_21 = arith.constant 0 : index
    %69 = vector.load %arg2[%c5, %c0_21] : memref<54x1024xf32, #tpu.memory_space<vmem>>, vector<1x512xf32>
    %70 = arith.truncf %63 : vector<8x768xf32> to vector<8x768xbf16>
    %cst_22 = arith.constant dense<0.000000e+00> : vector<8x512xf32>
    %71 = tpu.matmul %70, %66, %cst_22 {dimension_numbers = #tpu.dot_dimension_numbers<[1], [0], [0], [1], [0, 0, 1, 1], [], []>} : vector<8x768xbf16>, vector<768x512xbf16>, vector<8x512xf32> -> vector<8x512xf32>
    %72 = vector.broadcast %67 : vector<1x512xf32> to vector<8x512xf32>
    %73 = arith.addf %71, %72 : vector<8x512xf32>
    %cst_23 = arith.constant dense<0.000000e+00> : vector<8xf32>
    %74 = vector.multi_reduction <add>, %73, %cst_23 [1] : vector<8x512xf32> to vector<8xf32>
    %75 = vector.shape_cast %74 : vector<8xf32> to vector<8x1xf32>
    %cst_24 = arith.constant 5.120000e+02 : f32
    %76 = vector.broadcast %cst_24 : f32 to vector<8x1xf32>
    %77 = arith.divf %75, %76 : vector<8x1xf32>
    %78 = arith.mulf %73, %73 : vector<8x512xf32>
    %cst_25 = arith.constant dense<0.000000e+00> : vector<8xf32>
    %79 = vector.multi_reduction <add>, %78, %cst_25 [1] : vector<8x512xf32> to vector<8xf32>
    %80 = vector.shape_cast %79 : vector<8xf32> to vector<8x1xf32>
    %cst_26 = arith.constant 5.120000e+02 : f32
    %81 = vector.broadcast %cst_26 : f32 to vector<8x1xf32>
    %82 = arith.divf %80, %81 : vector<8x1xf32>
    %83 = arith.mulf %77, %77 : vector<8x1xf32>
    %84 = arith.subf %82, %83 : vector<8x1xf32>
    %85 = vector.broadcast %77 : vector<8x1xf32> to vector<8x512xf32>
    %86 = arith.subf %73, %85 : vector<8x512xf32>
    %cst_27 = arith.constant 9.99999974E-6 : f32
    %87 = vector.broadcast %cst_27 : f32 to vector<8x1xf32>
    %88 = arith.addf %84, %87 : vector<8x1xf32>
    %89 = math.rsqrt %88 : vector<8x1xf32>
    %90 = vector.broadcast %89 : vector<8x1xf32> to vector<8x512xf32>
    %91 = arith.mulf %86, %90 : vector<8x512xf32>
    %92 = vector.broadcast %68 : vector<1x512xf32> to vector<8x512xf32>
    %93 = arith.mulf %91, %92 : vector<8x512xf32>
    %94 = vector.broadcast %69 : vector<1x512xf32> to vector<8x512xf32>
    %95 = arith.addf %93, %94 : vector<8x512xf32>
    %c2_i32_28 = arith.constant 2 : i32
    %96 = tpu.memref_slice %arg32[%c2_i32_28] : memref<14x!tpu.dma_semaphore, #tpu.memory_space<semaphore_mem>> -> memref<1x!tpu.dma_semaphore, #tpu.memory_space<semaphore_mem>>
    %97 = tpu.memref_squeeze %96 : memref<1x!tpu.dma_semaphore, #tpu.memory_space<semaphore_mem>> -> memref<!tpu.dma_semaphore, #tpu.memory_space<semaphore_mem>>
    tpu.wait_dma2 semaphore(%97 : memref<!tpu.dma_semaphore, #tpu.memory_space<semaphore_mem>>) src(%arg5 : memref<768x768xbf16, #tpu.memory_space<any>>) dst(%arg20 : memref<768x768xbf16, #tpu.memory_space<vmem>>)
    %c0_29 = arith.constant 0 : index
    %c0_30 = arith.constant 0 : index
    %98 = vector.load %arg20[%c0_29, %c0_30] : memref<768x768xbf16, #tpu.memory_space<vmem>>, vector<768x768xbf16>
    %c6 = arith.constant 6 : index
    %c0_31 = arith.constant 0 : index
    %99 = vector.load %arg2[%c6, %c0_31] : memref<54x1024xf32, #tpu.memory_space<vmem>>, vector<1x768xf32>
    %c7 = arith.constant 7 : index
    %c0_32 = arith.constant 0 : index
    %100 = vector.load %arg2[%c7, %c0_32] : memref<54x1024xf32, #tpu.memory_space<vmem>>, vector<1x768xf32>
    %c8 = arith.constant 8 : index
    %c0_33 = arith.constant 0 : index
    %101 = vector.load %arg2[%c8, %c0_33] : memref<54x1024xf32, #tpu.memory_space<vmem>>, vector<1x768xf32>
    %102 = arith.truncf %29 : vector<8x768xf32> to vector<8x768xbf16>
    %cst_34 = arith.constant dense<0.000000e+00> : vector<8x768xf32>
    %103 = tpu.matmul %102, %98, %cst_34 {dimension_numbers = #tpu.dot_dimension_numbers<[1], [0], [0], [1], [0, 0, 1, 1], [], []>} : vector<8x768xbf16>, vector<768x768xbf16>, vector<8x768xf32> -> vector<8x768xf32>
    %104 = vector.broadcast %99 : vector<1x768xf32> to vector<8x768xf32>
    %105 = arith.addf %103, %104 : vector<8x768xf32>
    %cst_35 = arith.constant dense<0.000000e+00> : vector<8xf32>
    %106 = vector.multi_reduction <add>, %105, %cst_35 [1] : vector<8x768xf32> to vector<8xf32>
    %107 = vector.shape_cast %106 : vector<8xf32> to vector<8x1xf32>
    %cst_36 = arith.constant 7.680000e+02 : f32
    %108 = vector.broadcast %cst_36 : f32 to vector<8x1xf32>
    %109 = arith.divf %107, %108 : vector<8x1xf32>
    %110 = arith.mulf %105, %105 : vector<8x768xf32>
    %cst_37 = arith.constant dense<0.000000e+00> : vector<8xf32>
    %111 = vector.multi_reduction <add>, %110, %cst_37 [1] : vector<8x768xf32> to vector<8xf32>
    %112 = vector.shape_cast %111 : vector<8xf32> to vector<8x1xf32>
    %cst_38 = arith.constant 7.680000e+02 : f32
    %113 = vector.broadcast %cst_38 : f32 to vector<8x1xf32>
    %114 = arith.divf %112, %113 : vector<8x1xf32>
    %115 = arith.mulf %109, %109 : vector<8x1xf32>
    %116 = arith.subf %114, %115 : vector<8x1xf32>
    %117 = vector.broadcast %109 : vector<8x1xf32> to vector<8x768xf32>
    %118 = arith.subf %105, %117 : vector<8x768xf32>
    %cst_39 = arith.constant 9.99999974E-6 : f32
    %119 = vector.broadcast %cst_39 : f32 to vector<8x1xf32>
    %120 = arith.addf %116, %119 : vector<8x1xf32>
    %121 = math.rsqrt %120 : vector<8x1xf32>
    %122 = vector.broadcast %121 : vector<8x1xf32> to vector<8x768xf32>
    %123 = arith.mulf %118, %122 : vector<8x768xf32>
    %124 = vector.broadcast %100 : vector<1x768xf32> to vector<8x768xf32>
    %125 = arith.mulf %123, %124 : vector<8x768xf32>
    %126 = vector.broadcast %101 : vector<1x768xf32> to vector<8x768xf32>
    %127 = arith.addf %125, %126 : vector<8x768xf32>
    %cst_40 = arith.constant 0.000000e+00 : f32
    %128 = vector.broadcast %cst_40 : f32 to vector<8x768xf32>
    %129 = arith.maximumf %127, %128 : vector<8x768xf32>
    %c3_i32_41 = arith.constant 3 : i32
    %130 = tpu.memref_slice %arg32[%c3_i32_41] : memref<14x!tpu.dma_semaphore, #tpu.memory_space<semaphore_mem>> -> memref<1x!tpu.dma_semaphore, #tpu.memory_space<semaphore_mem>>
    %131 = tpu.memref_squeeze %130 : memref<1x!tpu.dma_semaphore, #tpu.memory_space<semaphore_mem>> -> memref<!tpu.dma_semaphore, #tpu.memory_space<semaphore_mem>>
    tpu.wait_dma2 semaphore(%131 : memref<!tpu.dma_semaphore, #tpu.memory_space<semaphore_mem>>) src(%arg6 : memref<768x512xbf16, #tpu.memory_space<any>>) dst(%arg21 : memref<768x512xbf16, #tpu.memory_space<vmem>>)
    %c0_42 = arith.constant 0 : index
    %c0_43 = arith.constant 0 : index
    %132 = vector.load %arg21[%c0_42, %c0_43] : memref<768x512xbf16, #tpu.memory_space<vmem>>, vector<768x512xbf16>
    %c9 = arith.constant 9 : index
    %c0_44 = arith.constant 0 : index
    %133 = vector.load %arg2[%c9, %c0_44] : memref<54x1024xf32, #tpu.memory_space<vmem>>, vector<1x512xf32>
    %c10 = arith.constant 10 : index
    %c0_45 = arith.constant 0 : index
    %134 = vector.load %arg2[%c10, %c0_45] : memref<54x1024xf32, #tpu.memory_space<vmem>>, vector<1x512xf32>
    %c11 = arith.constant 11 : index
    %c0_46 = arith.constant 0 : index
    %135 = vector.load %arg2[%c11, %c0_46] : memref<54x1024xf32, #tpu.memory_space<vmem>>, vector<1x512xf32>
    %136 = arith.truncf %129 : vector<8x768xf32> to vector<8x768xbf16>
    %cst_47 = arith.constant dense<0.000000e+00> : vector<8x512xf32>
    %137 = tpu.matmul %136, %132, %cst_47 {dimension_numbers = #tpu.dot_dimension_numbers<[1], [0], [0], [1], [0, 0, 1, 1], [], []>} : vector<8x768xbf16>, vector<768x512xbf16>, vector<8x512xf32> -> vector<8x512xf32>
    %138 = vector.broadcast %133 : vector<1x512xf32> to vector<8x512xf32>
    %139 = arith.addf %137, %138 : vector<8x512xf32>
    %cst_48 = arith.constant dense<0.000000e+00> : vector<8xf32>
    %140 = vector.multi_reduction <add>, %139, %cst_48 [1] : vector<8x512xf32> to vector<8xf32>
    %141 = vector.shape_cast %140 : vector<8xf32> to vector<8x1xf32>
    %cst_49 = arith.constant 5.120000e+02 : f32
    %142 = vector.broadcast %cst_49 : f32 to vector<8x1xf32>
    %143 = arith.divf %141, %142 : vector<8x1xf32>
    %144 = arith.mulf %139, %139 : vector<8x512xf32>
    %cst_50 = arith.constant dense<0.000000e+00> : vector<8xf32>
    %145 = vector.multi_reduction <add>, %144, %cst_50 [1] : vector<8x512xf32> to vector<8xf32>
    %146 = vector.shape_cast %145 : vector<8xf32> to vector<8x1xf32>
    %cst_51 = arith.constant 5.120000e+02 : f32
    %147 = vector.broadcast %cst_51 : f32 to vector<8x1xf32>
    %148 = arith.divf %146, %147 : vector<8x1xf32>
    %149 = arith.mulf %143, %143 : vector<8x1xf32>
    %150 = arith.subf %148, %149 : vector<8x1xf32>
    %151 = vector.broadcast %143 : vector<8x1xf32> to vector<8x512xf32>
    %152 = arith.subf %139, %151 : vector<8x512xf32>
    %cst_52 = arith.constant 9.99999974E-6 : f32
    %153 = vector.broadcast %cst_52 : f32 to vector<8x1xf32>
    %154 = arith.addf %150, %153 : vector<8x1xf32>
    %155 = math.rsqrt %154 : vector<8x1xf32>
    %156 = vector.broadcast %155 : vector<8x1xf32> to vector<8x512xf32>
    %157 = arith.mulf %152, %156 : vector<8x512xf32>
    %158 = vector.broadcast %134 : vector<1x512xf32> to vector<8x512xf32>
    %159 = arith.mulf %157, %158 : vector<8x512xf32>
    %160 = vector.broadcast %135 : vector<1x512xf32> to vector<8x512xf32>
    %161 = arith.addf %159, %160 : vector<8x512xf32>
    %c4_i32_53 = arith.constant 4 : i32
    %162 = tpu.memref_slice %arg32[%c4_i32_53] : memref<14x!tpu.dma_semaphore, #tpu.memory_space<semaphore_mem>> -> memref<1x!tpu.dma_semaphore, #tpu.memory_space<semaphore_mem>>
    %163 = tpu.memref_squeeze %162 : memref<1x!tpu.dma_semaphore, #tpu.memory_space<semaphore_mem>> -> memref<!tpu.dma_semaphore, #tpu.memory_space<semaphore_mem>>
    tpu.wait_dma2 semaphore(%163 : memref<!tpu.dma_semaphore, #tpu.memory_space<semaphore_mem>>) src(%arg7 : memref<512x768xbf16, #tpu.memory_space<any>>) dst(%arg22 : memref<512x768xbf16, #tpu.memory_space<vmem>>)
    %c0_54 = arith.constant 0 : index
    %c0_55 = arith.constant 0 : index
    %164 = vector.load %arg22[%c0_54, %c0_55] : memref<512x768xbf16, #tpu.memory_space<vmem>>, vector<512x768xbf16>
    %c5_i32_56 = arith.constant 5 : i32
    %165 = tpu.memref_slice %arg32[%c5_i32_56] : memref<14x!tpu.dma_semaphore, #tpu.memory_space<semaphore_mem>> -> memref<1x!tpu.dma_semaphore, #tpu.memory_space<semaphore_mem>>
    %166 = tpu.memref_squeeze %165 : memref<1x!tpu.dma_semaphore, #tpu.memory_space<semaphore_mem>> -> memref<!tpu.dma_semaphore, #tpu.memory_space<semaphore_mem>>
    tpu.wait_dma2 semaphore(%166 : memref<!tpu.dma_semaphore, #tpu.memory_space<semaphore_mem>>) src(%arg8 : memref<512x768xbf16, #tpu.memory_space<any>>) dst(%arg23 : memref<512x768xbf16, #tpu.memory_space<vmem>>)
    %c0_57 = arith.constant 0 : index
    %c0_58 = arith.constant 0 : index
    %167 = vector.load %arg23[%c0_57, %c0_58] : memref<512x768xbf16, #tpu.memory_space<vmem>>, vector<512x768xbf16>
    %c12 = arith.constant 12 : index
    %c0_59 = arith.constant 0 : index
    %168 = vector.load %arg2[%c12, %c0_59] : memref<54x1024xf32, #tpu.memory_space<vmem>>, vector<1x768xf32>
    %c13 = arith.constant 13 : index
    %c0_60 = arith.constant 0 : index
    %169 = vector.load %arg2[%c13, %c0_60] : memref<54x1024xf32, #tpu.memory_space<vmem>>, vector<1x768xf32>
    %c14 = arith.constant 14 : index
    %c0_61 = arith.constant 0 : index
    %170 = vector.load %arg2[%c14, %c0_61] : memref<54x1024xf32, #tpu.memory_space<vmem>>, vector<1x768xf32>
    %171 = arith.truncf %95 : vector<8x512xf32> to vector<8x512xbf16>
    %cst_62 = arith.constant dense<0.000000e+00> : vector<8x768xf32>
    %172 = tpu.matmul %171, %164, %cst_62 {dimension_numbers = #tpu.dot_dimension_numbers<[1], [0], [0], [1], [0, 0, 1, 1], [], []>} : vector<8x512xbf16>, vector<512x768xbf16>, vector<8x768xf32> -> vector<8x768xf32>
    %173 = arith.truncf %161 : vector<8x512xf32> to vector<8x512xbf16>
    %cst_63 = arith.constant dense<0.000000e+00> : vector<8x768xf32>
    %174 = tpu.matmul %173, %167, %cst_63 {dimension_numbers = #tpu.dot_dimension_numbers<[1], [0], [0], [1], [0, 0, 1, 1], [], []>} : vector<8x512xbf16>, vector<512x768xbf16>, vector<8x768xf32> -> vector<8x768xf32>
    %175 = arith.addf %172, %174 : vector<8x768xf32>
    %176 = vector.broadcast %168 : vector<1x768xf32> to vector<8x768xf32>
    %177 = arith.addf %175, %176 : vector<8x768xf32>
    %cst_64 = arith.constant dense<0.000000e+00> : vector<8xf32>
    %178 = vector.multi_reduction <add>, %177, %cst_64 [1] : vector<8x768xf32> to vector<8xf32>
    %179 = vector.shape_cast %178 : vector<8xf32> to vector<8x1xf32>
    %cst_65 = arith.constant 7.680000e+02 : f32
    %180 = vector.broadcast %cst_65 : f32 to vector<8x1xf32>
    %181 = arith.divf %179, %180 : vector<8x1xf32>
    %182 = arith.mulf %177, %177 : vector<8x768xf32>
    %cst_66 = arith.constant dense<0.000000e+00> : vector<8xf32>
    %183 = vector.multi_reduction <add>, %182, %cst_66 [1] : vector<8x768xf32> to vector<8xf32>
    %184 = vector.shape_cast %183 : vector<8xf32> to vector<8x1xf32>
    %cst_67 = arith.constant 7.680000e+02 : f32
    %185 = vector.broadcast %cst_67 : f32 to vector<8x1xf32>
    %186 = arith.divf %184, %185 : vector<8x1xf32>
    %187 = arith.mulf %181, %181 : vector<8x1xf32>
    %188 = arith.subf %186, %187 : vector<8x1xf32>
    %189 = vector.broadcast %181 : vector<8x1xf32> to vector<8x768xf32>
    %190 = arith.subf %177, %189 : vector<8x768xf32>
    %cst_68 = arith.constant 9.99999974E-6 : f32
    %191 = vector.broadcast %cst_68 : f32 to vector<8x1xf32>
    %192 = arith.addf %188, %191 : vector<8x1xf32>
    %193 = math.rsqrt %192 : vector<8x1xf32>
    %194 = vector.broadcast %193 : vector<8x1xf32> to vector<8x768xf32>
    %195 = arith.mulf %190, %194 : vector<8x768xf32>
    %196 = vector.broadcast %169 : vector<1x768xf32> to vector<8x768xf32>
    %197 = arith.mulf %195, %196 : vector<8x768xf32>
    %198 = vector.broadcast %170 : vector<1x768xf32> to vector<8x768xf32>
    %199 = arith.addf %197, %198 : vector<8x768xf32>
    %cst_69 = arith.constant 0.000000e+00 : f32
    %200 = vector.broadcast %cst_69 : f32 to vector<8x768xf32>
    %201 = arith.maximumf %199, %200 : vector<8x768xf32>
    %c6_i32_70 = arith.constant 6 : i32
    %202 = tpu.memref_slice %arg32[%c6_i32_70] : memref<14x!tpu.dma_semaphore, #tpu.memory_space<semaphore_mem>> -> memref<1x!tpu.dma_semaphore, #tpu.memory_space<semaphore_mem>>
    %203 = tpu.memref_squeeze %202 : memref<1x!tpu.dma_semaphore, #tpu.memory_space<semaphore_mem>> -> memref<!tpu.dma_semaphore, #tpu.memory_space<semaphore_mem>>
    tpu.wait_dma2 semaphore(%203 : memref<!tpu.dma_semaphore, #tpu.memory_space<semaphore_mem>>) src(%arg9 : memref<768x512xbf16, #tpu.memory_space<any>>) dst(%arg24 : memref<768x512xbf16, #tpu.memory_space<vmem>>)
    %c0_71 = arith.constant 0 : index
    %c0_72 = arith.constant 0 : index
    %204 = vector.load %arg24[%c0_71, %c0_72] : memref<768x512xbf16, #tpu.memory_space<vmem>>, vector<768x512xbf16>
    %c15 = arith.constant 15 : index
    %c0_73 = arith.constant 0 : index
    %205 = vector.load %arg2[%c15, %c0_73] : memref<54x1024xf32, #tpu.memory_space<vmem>>, vector<1x512xf32>
    %c16 = arith.constant 16 : index
    %c0_74 = arith.constant 0 : index
    %206 = vector.load %arg2[%c16, %c0_74] : memref<54x1024xf32, #tpu.memory_space<vmem>>, vector<1x512xf32>
    %c17 = arith.constant 17 : index
    %c0_75 = arith.constant 0 : index
    %207 = vector.load %arg2[%c17, %c0_75] : memref<54x1024xf32, #tpu.memory_space<vmem>>, vector<1x512xf32>
    %208 = arith.truncf %201 : vector<8x768xf32> to vector<8x768xbf16>
    %cst_76 = arith.constant dense<0.000000e+00> : vector<8x512xf32>
    %209 = tpu.matmul %208, %204, %cst_76 {dimension_numbers = #tpu.dot_dimension_numbers<[1], [0], [0], [1], [0, 0, 1, 1], [], []>} : vector<8x768xbf16>, vector<768x512xbf16>, vector<8x512xf32> -> vector<8x512xf32>
    %210 = vector.broadcast %205 : vector<1x512xf32> to vector<8x512xf32>
    %211 = arith.addf %209, %210 : vector<8x512xf32>
    %cst_77 = arith.constant dense<0.000000e+00> : vector<8xf32>
    %212 = vector.multi_reduction <add>, %211, %cst_77 [1] : vector<8x512xf32> to vector<8xf32>
    %213 = vector.shape_cast %212 : vector<8xf32> to vector<8x1xf32>
    %cst_78 = arith.constant 5.120000e+02 : f32
    %214 = vector.broadcast %cst_78 : f32 to vector<8x1xf32>
    %215 = arith.divf %213, %214 : vector<8x1xf32>
    %216 = arith.mulf %211, %211 : vector<8x512xf32>
    %cst_79 = arith.constant dense<0.000000e+00> : vector<8xf32>
    %217 = vector.multi_reduction <add>, %216, %cst_79 [1] : vector<8x512xf32> to vector<8xf32>
    %218 = vector.shape_cast %217 : vector<8xf32> to vector<8x1xf32>
    %cst_80 = arith.constant 5.120000e+02 : f32
    %219 = vector.broadcast %cst_80 : f32 to vector<8x1xf32>
    %220 = arith.divf %218, %219 : vector<8x1xf32>
    %221 = arith.mulf %215, %215 : vector<8x1xf32>
    %222 = arith.subf %220, %221 : vector<8x1xf32>
    %223 = vector.broadcast %215 : vector<8x1xf32> to vector<8x512xf32>
    %224 = arith.subf %211, %223 : vector<8x512xf32>
    %cst_81 = arith.constant 9.99999974E-6 : f32
    %225 = vector.broadcast %cst_81 : f32 to vector<8x1xf32>
    %226 = arith.addf %222, %225 : vector<8x1xf32>
    %227 = math.rsqrt %226 : vector<8x1xf32>
    %228 = vector.broadcast %227 : vector<8x1xf32> to vector<8x512xf32>
    %229 = arith.mulf %224, %228 : vector<8x512xf32>
    %230 = vector.broadcast %206 : vector<1x512xf32> to vector<8x512xf32>
    %231 = arith.mulf %229, %230 : vector<8x512xf32>
    %232 = vector.broadcast %207 : vector<1x512xf32> to vector<8x512xf32>
    %233 = arith.addf %231, %232 : vector<8x512xf32>
    %cst_82 = arith.constant 0.000000e+00 : f32
    %234 = vector.broadcast %cst_82 : f32 to vector<8x512xf32>
    %235 = arith.maximumf %233, %234 : vector<8x512xf32>
    %c7_i32_83 = arith.constant 7 : i32
    %236 = tpu.memref_slice %arg32[%c7_i32_83] : memref<14x!tpu.dma_semaphore, #tpu.memory_space<semaphore_mem>> -> memref<1x!tpu.dma_semaphore, #tpu.memory_space<semaphore_mem>>
    %237 = tpu.memref_squeeze %236 : memref<1x!tpu.dma_semaphore, #tpu.memory_space<semaphore_mem>> -> memref<!tpu.dma_semaphore, #tpu.memory_space<semaphore_mem>>
    tpu.wait_dma2 semaphore(%237 : memref<!tpu.dma_semaphore, #tpu.memory_space<semaphore_mem>>) src(%arg10 : memref<512x256xbf16, #tpu.memory_space<any>>) dst(%arg25 : memref<512x256xbf16, #tpu.memory_space<vmem>>)
    %c0_84 = arith.constant 0 : index
    %c0_85 = arith.constant 0 : index
    %238 = vector.load %arg25[%c0_84, %c0_85] : memref<512x256xbf16, #tpu.memory_space<vmem>>, vector<512x256xbf16>
    %c18 = arith.constant 18 : index
    %c0_86 = arith.constant 0 : index
    %239 = vector.load %arg2[%c18, %c0_86] : memref<54x1024xf32, #tpu.memory_space<vmem>>, vector<1x256xf32>
    %c19 = arith.constant 19 : index
    %c0_87 = arith.constant 0 : index
    %240 = vector.load %arg2[%c19, %c0_87] : memref<54x1024xf32, #tpu.memory_space<vmem>>, vector<1x256xf32>
    %c20 = arith.constant 20 : index
    %c0_88 = arith.constant 0 : index
    %241 = vector.load %arg2[%c20, %c0_88] : memref<54x1024xf32, #tpu.memory_space<vmem>>, vector<1x256xf32>
    %242 = arith.truncf %235 : vector<8x512xf32> to vector<8x512xbf16>
    %cst_89 = arith.constant dense<0.000000e+00> : vector<8x256xf32>
    %243 = tpu.matmul %242, %238, %cst_89 {dimension_numbers = #tpu.dot_dimension_numbers<[1], [0], [0], [1], [0, 0, 1, 1], [], []>} : vector<8x512xbf16>, vector<512x256xbf16>, vector<8x256xf32> -> vector<8x256xf32>
    %244 = vector.broadcast %239 : vector<1x256xf32> to vector<8x256xf32>
    %245 = arith.addf %243, %244 : vector<8x256xf32>
    %cst_90 = arith.constant dense<0.000000e+00> : vector<8xf32>
    %246 = vector.multi_reduction <add>, %245, %cst_90 [1] : vector<8x256xf32> to vector<8xf32>
    %247 = vector.shape_cast %246 : vector<8xf32> to vector<8x1xf32>
    %cst_91 = arith.constant 2.560000e+02 : f32
    %248 = vector.broadcast %cst_91 : f32 to vector<8x1xf32>
    %249 = arith.divf %247, %248 : vector<8x1xf32>
    %250 = arith.mulf %245, %245 : vector<8x256xf32>
    %cst_92 = arith.constant dense<0.000000e+00> : vector<8xf32>
    %251 = vector.multi_reduction <add>, %250, %cst_92 [1] : vector<8x256xf32> to vector<8xf32>
    %252 = vector.shape_cast %251 : vector<8xf32> to vector<8x1xf32>
    %cst_93 = arith.constant 2.560000e+02 : f32
    %253 = vector.broadcast %cst_93 : f32 to vector<8x1xf32>
    %254 = arith.divf %252, %253 : vector<8x1xf32>
    %255 = arith.mulf %249, %249 : vector<8x1xf32>
    %256 = arith.subf %254, %255 : vector<8x1xf32>
    %257 = vector.broadcast %249 : vector<8x1xf32> to vector<8x256xf32>
    %258 = arith.subf %245, %257 : vector<8x256xf32>
    %cst_94 = arith.constant 9.99999974E-6 : f32
    %259 = vector.broadcast %cst_94 : f32 to vector<8x1xf32>
    %260 = arith.addf %256, %259 : vector<8x1xf32>
    %261 = math.rsqrt %260 : vector<8x1xf32>
    %262 = vector.broadcast %261 : vector<8x1xf32> to vector<8x256xf32>
    %263 = arith.mulf %258, %262 : vector<8x256xf32>
    %264 = vector.broadcast %240 : vector<1x256xf32> to vector<8x256xf32>
    %265 = arith.mulf %263, %264 : vector<8x256xf32>
    %266 = vector.broadcast %241 : vector<1x256xf32> to vector<8x256xf32>
    %267 = arith.addf %265, %266 : vector<8x256xf32>
    %cst_95 = arith.constant 0.000000e+00 : f32
    %268 = vector.broadcast %cst_95 : f32 to vector<8x256xf32>
    %269 = arith.maximumf %267, %268 : vector<8x256xf32>
    %c21 = arith.constant 21 : index
    %c0_96 = arith.constant 0 : index
    %270 = vector.load %arg2[%c21, %c0_96] : memref<54x1024xf32, #tpu.memory_space<vmem>>, vector<1x256xf32>
    %c22 = arith.constant 22 : index
    %c0_97 = arith.constant 0 : index
    %271 = vector.load %arg2[%c22, %c0_97] : memref<54x1024xf32, #tpu.memory_space<vmem>>, vector<1x1xf32>
    %272 = vector.broadcast %270 : vector<1x256xf32> to vector<8x256xf32>
    %273 = arith.mulf %269, %272 : vector<8x256xf32>
    %cst_98 = arith.constant dense<0.000000e+00> : vector<8xf32>
    %274 = vector.multi_reduction <add>, %273, %cst_98 [1] : vector<8x256xf32> to vector<8xf32>
    %275 = vector.shape_cast %274 : vector<8xf32> to vector<8x1xf32>
    %276 = vector.broadcast %271 : vector<1x1xf32> to vector<8x1xf32>
    %277 = arith.addf %275, %276 : vector<8x1xf32>
    %cst_99 = arith.constant 0.000000e+00 : f32
    %278 = vector.broadcast %cst_99 : f32 to vector<8x1xf32>
    %279 = arith.subf %278, %277 : vector<8x1xf32>
    %280 = math.exp %279 : vector<8x1xf32>
    %cst_100 = arith.constant 1.000000e+00 : f32
    %281 = vector.broadcast %cst_100 : f32 to vector<8x1xf32>
    %282 = arith.addf %281, %280 : vector<8x1xf32>
    %cst_101 = arith.constant 1.000000e+00 : f32
    %283 = vector.broadcast %cst_101 : f32 to vector<8x1xf32>
    %284 = arith.divf %283, %282 : vector<8x1xf32>
    %cst_102 = arith.constant 1.000000e+00 : f32
    %285 = vector.broadcast %cst_102 : f32 to vector<8x1xf32>
    %286 = arith.subf %285, %284 : vector<8x1xf32>
    %287 = vector.broadcast %284 : vector<8x1xf32> to vector<8x512xf32>
    %288 = arith.mulf %95, %287 : vector<8x512xf32>
    %289 = vector.broadcast %286 : vector<8x1xf32> to vector<8x512xf32>
    %290 = arith.mulf %161, %289 : vector<8x512xf32>
    %291 = arith.addf %288, %290 : vector<8x512xf32>
    %c8_i32_103 = arith.constant 8 : i32
    %292 = tpu.memref_slice %arg32[%c8_i32_103] : memref<14x!tpu.dma_semaphore, #tpu.memory_space<semaphore_mem>> -> memref<1x!tpu.dma_semaphore, #tpu.memory_space<semaphore_mem>>
    %293 = tpu.memref_squeeze %292 : memref<1x!tpu.dma_semaphore, #tpu.memory_space<semaphore_mem>> -> memref<!tpu.dma_semaphore, #tpu.memory_space<semaphore_mem>>
    tpu.wait_dma2 semaphore(%293 : memref<!tpu.dma_semaphore, #tpu.memory_space<semaphore_mem>>) src(%arg11 : memref<512x512xbf16, #tpu.memory_space<any>>) dst(%arg26 : memref<512x512xbf16, #tpu.memory_space<vmem>>)
    %c0_104 = arith.constant 0 : index
    %c0_105 = arith.constant 0 : index
    %294 = vector.load %arg26[%c0_104, %c0_105] : memref<512x512xbf16, #tpu.memory_space<vmem>>, vector<512x512xbf16>
    %c23 = arith.constant 23 : index
    %c0_106 = arith.constant 0 : index
    %295 = vector.load %arg2[%c23, %c0_106] : memref<54x1024xf32, #tpu.memory_space<vmem>>, vector<1x512xf32>
    %c24 = arith.constant 24 : index
    %c0_107 = arith.constant 0 : index
    %296 = vector.load %arg2[%c24, %c0_107] : memref<54x1024xf32, #tpu.memory_space<vmem>>, vector<1x512xf32>
    %c25 = arith.constant 25 : index
    %c0_108 = arith.constant 0 : index
    %297 = vector.load %arg2[%c25, %c0_108] : memref<54x1024xf32, #tpu.memory_space<vmem>>, vector<1x512xf32>
    %298 = arith.truncf %291 : vector<8x512xf32> to vector<8x512xbf16>
    %cst_109 = arith.constant dense<0.000000e+00> : vector<8x512xf32>
    %299 = tpu.matmul %298, %294, %cst_109 {dimension_numbers = #tpu.dot_dimension_numbers<[1], [0], [0], [1], [0, 0, 1, 1], [], []>} : vector<8x512xbf16>, vector<512x512xbf16>, vector<8x512xf32> -> vector<8x512xf32>
    %300 = vector.broadcast %295 : vector<1x512xf32> to vector<8x512xf32>
    %301 = arith.addf %299, %300 : vector<8x512xf32>
    %cst_110 = arith.constant dense<0.000000e+00> : vector<8xf32>
    %302 = vector.multi_reduction <add>, %301, %cst_110 [1] : vector<8x512xf32> to vector<8xf32>
    %303 = vector.shape_cast %302 : vector<8xf32> to vector<8x1xf32>
    %cst_111 = arith.constant 5.120000e+02 : f32
    %304 = vector.broadcast %cst_111 : f32 to vector<8x1xf32>
    %305 = arith.divf %303, %304 : vector<8x1xf32>
    %306 = arith.mulf %301, %301 : vector<8x512xf32>
    %cst_112 = arith.constant dense<0.000000e+00> : vector<8xf32>
    %307 = vector.multi_reduction <add>, %306, %cst_112 [1] : vector<8x512xf32> to vector<8xf32>
    %308 = vector.shape_cast %307 : vector<8xf32> to vector<8x1xf32>
    %cst_113 = arith.constant 5.120000e+02 : f32
    %309 = vector.broadcast %cst_113 : f32 to vector<8x1xf32>
    %310 = arith.divf %308, %309 : vector<8x1xf32>
    %311 = arith.mulf %305, %305 : vector<8x1xf32>
    %312 = arith.subf %310, %311 : vector<8x1xf32>
    %313 = vector.broadcast %305 : vector<8x1xf32> to vector<8x512xf32>
    %314 = arith.subf %301, %313 : vector<8x512xf32>
    %cst_114 = arith.constant 9.99999974E-6 : f32
    %315 = vector.broadcast %cst_114 : f32 to vector<8x1xf32>
    %316 = arith.addf %312, %315 : vector<8x1xf32>
    %317 = math.rsqrt %316 : vector<8x1xf32>
    %318 = vector.broadcast %317 : vector<8x1xf32> to vector<8x512xf32>
    %319 = arith.mulf %314, %318 : vector<8x512xf32>
    %320 = vector.broadcast %296 : vector<1x512xf32> to vector<8x512xf32>
    %321 = arith.mulf %319, %320 : vector<8x512xf32>
    %322 = vector.broadcast %297 : vector<1x512xf32> to vector<8x512xf32>
    %323 = arith.addf %321, %322 : vector<8x512xf32>
    %cst_115 = arith.constant 0.000000e+00 : f32
    %324 = vector.broadcast %cst_115 : f32 to vector<8x512xf32>
    %325 = arith.maximumf %323, %324 : vector<8x512xf32>
    %c9_i32_116 = arith.constant 9 : i32
    %326 = tpu.memref_slice %arg32[%c9_i32_116] : memref<14x!tpu.dma_semaphore, #tpu.memory_space<semaphore_mem>> -> memref<1x!tpu.dma_semaphore, #tpu.memory_space<semaphore_mem>>
    %327 = tpu.memref_squeeze %326 : memref<1x!tpu.dma_semaphore, #tpu.memory_space<semaphore_mem>> -> memref<!tpu.dma_semaphore, #tpu.memory_space<semaphore_mem>>
    tpu.wait_dma2 semaphore(%327 : memref<!tpu.dma_semaphore, #tpu.memory_space<semaphore_mem>>) src(%arg12 : memref<512x384xbf16, #tpu.memory_space<any>>) dst(%arg27 : memref<512x384xbf16, #tpu.memory_space<vmem>>)
    %c0_117 = arith.constant 0 : index
    %c0_118 = arith.constant 0 : index
    %328 = vector.load %arg27[%c0_117, %c0_118] : memref<512x384xbf16, #tpu.memory_space<vmem>>, vector<512x384xbf16>
    %c26 = arith.constant 26 : index
    %c0_119 = arith.constant 0 : index
    %329 = vector.load %arg2[%c26, %c0_119] : memref<54x1024xf32, #tpu.memory_space<vmem>>, vector<1x384xf32>
    %c27 = arith.constant 27 : index
    %c0_120 = arith.constant 0 : index
    %330 = vector.load %arg2[%c27, %c0_120] : memref<54x1024xf32, #tpu.memory_space<vmem>>, vector<1x384xf32>
    %c28 = arith.constant 28 : index
    %c0_121 = arith.constant 0 : index
    %331 = vector.load %arg2[%c28, %c0_121] : memref<54x1024xf32, #tpu.memory_space<vmem>>, vector<1x384xf32>
    %332 = arith.truncf %325 : vector<8x512xf32> to vector<8x512xbf16>
    %cst_122 = arith.constant dense<0.000000e+00> : vector<8x384xf32>
    %333 = tpu.matmul %332, %328, %cst_122 {dimension_numbers = #tpu.dot_dimension_numbers<[1], [0], [0], [1], [0, 0, 1, 1], [], []>} : vector<8x512xbf16>, vector<512x384xbf16>, vector<8x384xf32> -> vector<8x384xf32>
    %334 = vector.broadcast %329 : vector<1x384xf32> to vector<8x384xf32>
    %335 = arith.addf %333, %334 : vector<8x384xf32>
    %cst_123 = arith.constant dense<0.000000e+00> : vector<8xf32>
    %336 = vector.multi_reduction <add>, %335, %cst_123 [1] : vector<8x384xf32> to vector<8xf32>
    %337 = vector.shape_cast %336 : vector<8xf32> to vector<8x1xf32>
    %cst_124 = arith.constant 3.840000e+02 : f32
    %338 = vector.broadcast %cst_124 : f32 to vector<8x1xf32>
    %339 = arith.divf %337, %338 : vector<8x1xf32>
    %340 = arith.mulf %335, %335 : vector<8x384xf32>
    %cst_125 = arith.constant dense<0.000000e+00> : vector<8xf32>
    %341 = vector.multi_reduction <add>, %340, %cst_125 [1] : vector<8x384xf32> to vector<8xf32>
    %342 = vector.shape_cast %341 : vector<8xf32> to vector<8x1xf32>
    %cst_126 = arith.constant 3.840000e+02 : f32
    %343 = vector.broadcast %cst_126 : f32 to vector<8x1xf32>
    %344 = arith.divf %342, %343 : vector<8x1xf32>
    %345 = arith.mulf %339, %339 : vector<8x1xf32>
    %346 = arith.subf %344, %345 : vector<8x1xf32>
    %347 = vector.broadcast %339 : vector<8x1xf32> to vector<8x384xf32>
    %348 = arith.subf %335, %347 : vector<8x384xf32>
    %cst_127 = arith.constant 9.99999974E-6 : f32
    %349 = vector.broadcast %cst_127 : f32 to vector<8x1xf32>
    %350 = arith.addf %346, %349 : vector<8x1xf32>
    %351 = math.rsqrt %350 : vector<8x1xf32>
    %352 = vector.broadcast %351 : vector<8x1xf32> to vector<8x384xf32>
    %353 = arith.mulf %348, %352 : vector<8x384xf32>
    %354 = vector.broadcast %330 : vector<1x384xf32> to vector<8x384xf32>
    %355 = arith.mulf %353, %354 : vector<8x384xf32>
    %356 = vector.broadcast %331 : vector<1x384xf32> to vector<8x384xf32>
    %357 = arith.addf %355, %356 : vector<8x384xf32>
    %cst_128 = arith.constant 0.000000e+00 : f32
    %358 = vector.broadcast %cst_128 : f32 to vector<8x384xf32>
    %359 = arith.maximumf %357, %358 : vector<8x384xf32>
    %c10_i32_129 = arith.constant 10 : i32
    %360 = tpu.memref_slice %arg32[%c10_i32_129] : memref<14x!tpu.dma_semaphore, #tpu.memory_space<semaphore_mem>> -> memref<1x!tpu.dma_semaphore, #tpu.memory_space<semaphore_mem>>
    %361 = tpu.memref_squeeze %360 : memref<1x!tpu.dma_semaphore, #tpu.memory_space<semaphore_mem>> -> memref<!tpu.dma_semaphore, #tpu.memory_space<semaphore_mem>>
    tpu.wait_dma2 semaphore(%361 : memref<!tpu.dma_semaphore, #tpu.memory_space<semaphore_mem>>) src(%arg13 : memref<384x256xbf16, #tpu.memory_space<any>>) dst(%arg28 : memref<384x256xbf16, #tpu.memory_space<vmem>>)
    %c0_130 = arith.constant 0 : index
    %c0_131 = arith.constant 0 : index
    %362 = vector.load %arg28[%c0_130, %c0_131] : memref<384x256xbf16, #tpu.memory_space<vmem>>, vector<384x256xbf16>
    %c29 = arith.constant 29 : index
    %c0_132 = arith.constant 0 : index
    %363 = vector.load %arg2[%c29, %c0_132] : memref<54x1024xf32, #tpu.memory_space<vmem>>, vector<1x256xf32>
    %c30 = arith.constant 30 : index
    %c0_133 = arith.constant 0 : index
    %364 = vector.load %arg2[%c30, %c0_133] : memref<54x1024xf32, #tpu.memory_space<vmem>>, vector<1x256xf32>
    %c31 = arith.constant 31 : index
    %c0_134 = arith.constant 0 : index
    %365 = vector.load %arg2[%c31, %c0_134] : memref<54x1024xf32, #tpu.memory_space<vmem>>, vector<1x256xf32>
    %366 = arith.truncf %359 : vector<8x384xf32> to vector<8x384xbf16>
    %cst_135 = arith.constant dense<0.000000e+00> : vector<8x256xf32>
    %367 = tpu.matmul %366, %362, %cst_135 {dimension_numbers = #tpu.dot_dimension_numbers<[1], [0], [0], [1], [0, 0, 1, 1], [], []>} : vector<8x384xbf16>, vector<384x256xbf16>, vector<8x256xf32> -> vector<8x256xf32>
    %368 = vector.broadcast %363 : vector<1x256xf32> to vector<8x256xf32>
    %369 = arith.addf %367, %368 : vector<8x256xf32>
    %cst_136 = arith.constant dense<0.000000e+00> : vector<8xf32>
    %370 = vector.multi_reduction <add>, %369, %cst_136 [1] : vector<8x256xf32> to vector<8xf32>
    %371 = vector.shape_cast %370 : vector<8xf32> to vector<8x1xf32>
    %cst_137 = arith.constant 2.560000e+02 : f32
    %372 = vector.broadcast %cst_137 : f32 to vector<8x1xf32>
    %373 = arith.divf %371, %372 : vector<8x1xf32>
    %374 = arith.mulf %369, %369 : vector<8x256xf32>
    %cst_138 = arith.constant dense<0.000000e+00> : vector<8xf32>
    %375 = vector.multi_reduction <add>, %374, %cst_138 [1] : vector<8x256xf32> to vector<8xf32>
    %376 = vector.shape_cast %375 : vector<8xf32> to vector<8x1xf32>
    %cst_139 = arith.constant 2.560000e+02 : f32
    %377 = vector.broadcast %cst_139 : f32 to vector<8x1xf32>
    %378 = arith.divf %376, %377 : vector<8x1xf32>
    %379 = arith.mulf %373, %373 : vector<8x1xf32>
    %380 = arith.subf %378, %379 : vector<8x1xf32>
    %381 = vector.broadcast %373 : vector<8x1xf32> to vector<8x256xf32>
    %382 = arith.subf %369, %381 : vector<8x256xf32>
    %cst_140 = arith.constant 9.99999974E-6 : f32
    %383 = vector.broadcast %cst_140 : f32 to vector<8x1xf32>
    %384 = arith.addf %380, %383 : vector<8x1xf32>
    %385 = math.rsqrt %384 : vector<8x1xf32>
    %386 = vector.broadcast %385 : vector<8x1xf32> to vector<8x256xf32>
    %387 = arith.mulf %382, %386 : vector<8x256xf32>
    %388 = vector.broadcast %364 : vector<1x256xf32> to vector<8x256xf32>
    %389 = arith.mulf %387, %388 : vector<8x256xf32>
    %390 = vector.broadcast %365 : vector<1x256xf32> to vector<8x256xf32>
    %391 = arith.addf %389, %390 : vector<8x256xf32>
    %cst_141 = arith.constant 0.000000e+00 : f32
    %392 = vector.broadcast %cst_141 : f32 to vector<8x256xf32>
    %393 = arith.maximumf %391, %392 : vector<8x256xf32>
    %c11_i32_142 = arith.constant 11 : i32
    %394 = tpu.memref_slice %arg32[%c11_i32_142] : memref<14x!tpu.dma_semaphore, #tpu.memory_space<semaphore_mem>> -> memref<1x!tpu.dma_semaphore, #tpu.memory_space<semaphore_mem>>
    %395 = tpu.memref_squeeze %394 : memref<1x!tpu.dma_semaphore, #tpu.memory_space<semaphore_mem>> -> memref<!tpu.dma_semaphore, #tpu.memory_space<semaphore_mem>>
    tpu.wait_dma2 semaphore(%395 : memref<!tpu.dma_semaphore, #tpu.memory_space<semaphore_mem>>) src(%arg14 : memref<256x1024xbf16, #tpu.memory_space<any>>) dst(%arg29 : memref<256x1024xbf16, #tpu.memory_space<vmem>>)
    %c0_143 = arith.constant 0 : index
    %c0_144 = arith.constant 0 : index
    %396 = vector.load %arg29[%c0_143, %c0_144] : memref<256x1024xbf16, #tpu.memory_space<vmem>>, vector<256x1024xbf16>
    %c32 = arith.constant 32 : index
    %c0_145 = arith.constant 0 : index
    %397 = vector.load %arg2[%c32, %c0_145] : memref<54x1024xf32, #tpu.memory_space<vmem>>, vector<1x1024xf32>
    %398 = arith.truncf %393 : vector<8x256xf32> to vector<8x256xbf16>
    %cst_146 = arith.constant dense<0.000000e+00> : vector<8x1024xf32>
    %399 = tpu.matmul %398, %396, %cst_146 {dimension_numbers = #tpu.dot_dimension_numbers<[1], [0], [0], [1], [0, 0, 1, 1], [], []>} : vector<8x256xbf16>, vector<256x1024xbf16>, vector<8x1024xf32> -> vector<8x1024xf32>
    %400 = vector.broadcast %397 : vector<1x1024xf32> to vector<8x1024xf32>
    %401 = arith.addf %399, %400 : vector<8x1024xf32>
    %c12_i32_147 = arith.constant 12 : i32
    %402 = tpu.memref_slice %arg32[%c12_i32_147] : memref<14x!tpu.dma_semaphore, #tpu.memory_space<semaphore_mem>> -> memref<1x!tpu.dma_semaphore, #tpu.memory_space<semaphore_mem>>
    %403 = tpu.memref_squeeze %402 : memref<1x!tpu.dma_semaphore, #tpu.memory_space<semaphore_mem>> -> memref<!tpu.dma_semaphore, #tpu.memory_space<semaphore_mem>>
    tpu.wait_dma2 semaphore(%403 : memref<!tpu.dma_semaphore, #tpu.memory_space<semaphore_mem>>) src(%arg15 : memref<1024x128xbf16, #tpu.memory_space<any>>) dst(%arg30 : memref<1024x128xbf16, #tpu.memory_space<vmem>>)
    %c0_148 = arith.constant 0 : index
    %c0_149 = arith.constant 0 : index
    %404 = vector.load %arg30[%c0_148, %c0_149] : memref<1024x128xbf16, #tpu.memory_space<vmem>>, vector<1024x128xbf16>
    %c33 = arith.constant 33 : index
    %c0_150 = arith.constant 0 : index
    %405 = vector.load %arg2[%c33, %c0_150] : memref<54x1024xf32, #tpu.memory_space<vmem>>, vector<1x256xf32>
    %c34 = arith.constant 34 : index
    %c0_151 = arith.constant 0 : index
    %406 = vector.load %arg2[%c34, %c0_151] : memref<54x1024xf32, #tpu.memory_space<vmem>>, vector<1x256xf32>
    %407 = vector.extract_strided_slice %401 {offsets = [0, 0], sizes = [8, 256], strides = [1, 1]} : vector<8x1024xf32> to vector<8x256xf32>
    %cst_152 = arith.constant dense<0.000000e+00> : vector<8xf32>
    %408 = vector.multi_reduction <add>, %407, %cst_152 [1] : vector<8x256xf32> to vector<8xf32>
    %409 = vector.shape_cast %408 : vector<8xf32> to vector<8x1xf32>
    %cst_153 = arith.constant 2.560000e+02 : f32
    %410 = vector.broadcast %cst_153 : f32 to vector<8x1xf32>
    %411 = arith.divf %409, %410 : vector<8x1xf32>
    %412 = arith.mulf %407, %407 : vector<8x256xf32>
    %cst_154 = arith.constant dense<0.000000e+00> : vector<8xf32>
    %413 = vector.multi_reduction <add>, %412, %cst_154 [1] : vector<8x256xf32> to vector<8xf32>
    %414 = vector.shape_cast %413 : vector<8xf32> to vector<8x1xf32>
    %cst_155 = arith.constant 2.560000e+02 : f32
    %415 = vector.broadcast %cst_155 : f32 to vector<8x1xf32>
    %416 = arith.divf %414, %415 : vector<8x1xf32>
    %417 = arith.mulf %411, %411 : vector<8x1xf32>
    %418 = arith.subf %416, %417 : vector<8x1xf32>
    %419 = vector.broadcast %411 : vector<8x1xf32> to vector<8x256xf32>
    %420 = arith.subf %407, %419 : vector<8x256xf32>
    %cst_156 = arith.constant 9.99999974E-6 : f32
    %421 = vector.broadcast %cst_156 : f32 to vector<8x1xf32>
    %422 = arith.addf %418, %421 : vector<8x1xf32>
    %423 = math.rsqrt %422 : vector<8x1xf32>
    %424 = vector.broadcast %423 : vector<8x1xf32> to vector<8x256xf32>
    %425 = arith.mulf %420, %424 : vector<8x256xf32>
    %426 = vector.broadcast %405 : vector<1x256xf32> to vector<8x256xf32>
    %427 = arith.mulf %425, %426 : vector<8x256xf32>
    %428 = vector.broadcast %406 : vector<1x256xf32> to vector<8x256xf32>
    %429 = arith.addf %427, %428 : vector<8x256xf32>
    %cst_157 = arith.constant 0.000000e+00 : f32
    %430 = vector.broadcast %cst_157 : f32 to vector<8x256xf32>
    %431 = arith.maximumf %429, %430 : vector<8x256xf32>
    %c35 = arith.constant 35 : index
    %c0_158 = arith.constant 0 : index
    %432 = vector.load %arg2[%c35, %c0_158] : memref<54x1024xf32, #tpu.memory_space<vmem>>, vector<1x128xf32>
    %c36 = arith.constant 36 : index
    %c0_159 = arith.constant 0 : index
    %433 = vector.load %arg2[%c36, %c0_159] : memref<54x1024xf32, #tpu.memory_space<vmem>>, vector<1x128xf32>
    %c37 = arith.constant 37 : index
    %c0_160 = arith.constant 0 : index
    %434 = vector.load %arg2[%c37, %c0_160] : memref<54x1024xf32, #tpu.memory_space<vmem>>, vector<1x128xf32>
    %435 = vector.extract_strided_slice %404 {offsets = [0, 0], sizes = [256, 128], strides = [1, 1]} : vector<1024x128xbf16> to vector<256x128xbf16>
    %436 = arith.truncf %431 : vector<8x256xf32> to vector<8x256xbf16>
    %cst_161 = arith.constant dense<0.000000e+00> : vector<8x128xf32>
    %437 = tpu.matmul %436, %435, %cst_161 {dimension_numbers = #tpu.dot_dimension_numbers<[1], [0], [0], [1], [0, 0, 1, 1], [], []>} : vector<8x256xbf16>, vector<256x128xbf16>, vector<8x128xf32> -> vector<8x128xf32>
    %438 = vector.broadcast %432 : vector<1x128xf32> to vector<8x128xf32>
    %439 = arith.addf %437, %438 : vector<8x128xf32>
    %cst_162 = arith.constant dense<0.000000e+00> : vector<8xf32>
    %440 = vector.multi_reduction <add>, %439, %cst_162 [1] : vector<8x128xf32> to vector<8xf32>
    %441 = vector.shape_cast %440 : vector<8xf32> to vector<8x1xf32>
    %cst_163 = arith.constant 1.280000e+02 : f32
    %442 = vector.broadcast %cst_163 : f32 to vector<8x1xf32>
    %443 = arith.divf %441, %442 : vector<8x1xf32>
    %444 = arith.mulf %439, %439 : vector<8x128xf32>
    %cst_164 = arith.constant dense<0.000000e+00> : vector<8xf32>
    %445 = vector.multi_reduction <add>, %444, %cst_164 [1] : vector<8x128xf32> to vector<8xf32>
    %446 = vector.shape_cast %445 : vector<8xf32> to vector<8x1xf32>
    %cst_165 = arith.constant 1.280000e+02 : f32
    %447 = vector.broadcast %cst_165 : f32 to vector<8x1xf32>
    %448 = arith.divf %446, %447 : vector<8x1xf32>
    %449 = arith.mulf %443, %443 : vector<8x1xf32>
    %450 = arith.subf %448, %449 : vector<8x1xf32>
    %451 = vector.broadcast %443 : vector<8x1xf32> to vector<8x128xf32>
    %452 = arith.subf %439, %451 : vector<8x128xf32>
    %cst_166 = arith.constant 9.99999974E-6 : f32
    %453 = vector.broadcast %cst_166 : f32 to vector<8x1xf32>
    %454 = arith.addf %450, %453 : vector<8x1xf32>
    %455 = math.rsqrt %454 : vector<8x1xf32>
    %456 = vector.broadcast %455 : vector<8x1xf32> to vector<8x128xf32>
    %457 = arith.mulf %452, %456 : vector<8x128xf32>
    %458 = vector.broadcast %433 : vector<1x128xf32> to vector<8x128xf32>
    %459 = arith.mulf %457, %458 : vector<8x128xf32>
    %460 = vector.broadcast %434 : vector<1x128xf32> to vector<8x128xf32>
    %461 = arith.addf %459, %460 : vector<8x128xf32>
    %cst_167 = arith.constant 0.000000e+00 : f32
    %462 = vector.broadcast %cst_167 : f32 to vector<8x128xf32>
    %463 = arith.maximumf %461, %462 : vector<8x128xf32>
    %c38 = arith.constant 38 : index
    %c0_168 = arith.constant 0 : index
    %464 = vector.load %arg2[%c38, %c0_168] : memref<54x1024xf32, #tpu.memory_space<vmem>>, vector<1x256xf32>
    %c39 = arith.constant 39 : index
    %c0_169 = arith.constant 0 : index
    %465 = vector.load %arg2[%c39, %c0_169] : memref<54x1024xf32, #tpu.memory_space<vmem>>, vector<1x256xf32>
    %466 = vector.extract_strided_slice %401 {offsets = [0, 256], sizes = [8, 256], strides = [1, 1]} : vector<8x1024xf32> to vector<8x256xf32>
    %cst_170 = arith.constant dense<0.000000e+00> : vector<8xf32>
    %467 = vector.multi_reduction <add>, %466, %cst_170 [1] : vector<8x256xf32> to vector<8xf32>
    %468 = vector.shape_cast %467 : vector<8xf32> to vector<8x1xf32>
    %cst_171 = arith.constant 2.560000e+02 : f32
    %469 = vector.broadcast %cst_171 : f32 to vector<8x1xf32>
    %470 = arith.divf %468, %469 : vector<8x1xf32>
    %471 = arith.mulf %466, %466 : vector<8x256xf32>
    %cst_172 = arith.constant dense<0.000000e+00> : vector<8xf32>
    %472 = vector.multi_reduction <add>, %471, %cst_172 [1] : vector<8x256xf32> to vector<8xf32>
    %473 = vector.shape_cast %472 : vector<8xf32> to vector<8x1xf32>
    %cst_173 = arith.constant 2.560000e+02 : f32
    %474 = vector.broadcast %cst_173 : f32 to vector<8x1xf32>
    %475 = arith.divf %473, %474 : vector<8x1xf32>
    %476 = arith.mulf %470, %470 : vector<8x1xf32>
    %477 = arith.subf %475, %476 : vector<8x1xf32>
    %478 = vector.broadcast %470 : vector<8x1xf32> to vector<8x256xf32>
    %479 = arith.subf %466, %478 : vector<8x256xf32>
    %cst_174 = arith.constant 9.99999974E-6 : f32
    %480 = vector.broadcast %cst_174 : f32 to vector<8x1xf32>
    %481 = arith.addf %477, %480 : vector<8x1xf32>
    %482 = math.rsqrt %481 : vector<8x1xf32>
    %483 = vector.broadcast %482 : vector<8x1xf32> to vector<8x256xf32>
    %484 = arith.mulf %479, %483 : vector<8x256xf32>
    %485 = vector.broadcast %464 : vector<1x256xf32> to vector<8x256xf32>
    %486 = arith.mulf %484, %485 : vector<8x256xf32>
    %487 = vector.broadcast %465 : vector<1x256xf32> to vector<8x256xf32>
    %488 = arith.addf %486, %487 : vector<8x256xf32>
    %cst_175 = arith.constant 0.000000e+00 : f32
    %489 = vector.broadcast %cst_175 : f32 to vector<8x256xf32>
    %490 = arith.maximumf %488, %489 : vector<8x256xf32>
    %c40 = arith.constant 40 : index
    %c0_176 = arith.constant 0 : index
    %491 = vector.load %arg2[%c40, %c0_176] : memref<54x1024xf32, #tpu.memory_space<vmem>>, vector<1x128xf32>
    %c41 = arith.constant 41 : index
    %c0_177 = arith.constant 0 : index
    %492 = vector.load %arg2[%c41, %c0_177] : memref<54x1024xf32, #tpu.memory_space<vmem>>, vector<1x128xf32>
    %c42 = arith.constant 42 : index
    %c0_178 = arith.constant 0 : index
    %493 = vector.load %arg2[%c42, %c0_178] : memref<54x1024xf32, #tpu.memory_space<vmem>>, vector<1x128xf32>
    %494 = vector.extract_strided_slice %404 {offsets = [256, 0], sizes = [256, 128], strides = [1, 1]} : vector<1024x128xbf16> to vector<256x128xbf16>
    %495 = arith.truncf %490 : vector<8x256xf32> to vector<8x256xbf16>
    %cst_179 = arith.constant dense<0.000000e+00> : vector<8x128xf32>
    %496 = tpu.matmul %495, %494, %cst_179 {dimension_numbers = #tpu.dot_dimension_numbers<[1], [0], [0], [1], [0, 0, 1, 1], [], []>} : vector<8x256xbf16>, vector<256x128xbf16>, vector<8x128xf32> -> vector<8x128xf32>
    %497 = vector.broadcast %491 : vector<1x128xf32> to vector<8x128xf32>
    %498 = arith.addf %496, %497 : vector<8x128xf32>
    %cst_180 = arith.constant dense<0.000000e+00> : vector<8xf32>
    %499 = vector.multi_reduction <add>, %498, %cst_180 [1] : vector<8x128xf32> to vector<8xf32>
    %500 = vector.shape_cast %499 : vector<8xf32> to vector<8x1xf32>
    %cst_181 = arith.constant 1.280000e+02 : f32
    %501 = vector.broadcast %cst_181 : f32 to vector<8x1xf32>
    %502 = arith.divf %500, %501 : vector<8x1xf32>
    %503 = arith.mulf %498, %498 : vector<8x128xf32>
    %cst_182 = arith.constant dense<0.000000e+00> : vector<8xf32>
    %504 = vector.multi_reduction <add>, %503, %cst_182 [1] : vector<8x128xf32> to vector<8xf32>
    %505 = vector.shape_cast %504 : vector<8xf32> to vector<8x1xf32>
    %cst_183 = arith.constant 1.280000e+02 : f32
    %506 = vector.broadcast %cst_183 : f32 to vector<8x1xf32>
    %507 = arith.divf %505, %506 : vector<8x1xf32>
    %508 = arith.mulf %502, %502 : vector<8x1xf32>
    %509 = arith.subf %507, %508 : vector<8x1xf32>
    %510 = vector.broadcast %502 : vector<8x1xf32> to vector<8x128xf32>
    %511 = arith.subf %498, %510 : vector<8x128xf32>
    %cst_184 = arith.constant 9.99999974E-6 : f32
    %512 = vector.broadcast %cst_184 : f32 to vector<8x1xf32>
    %513 = arith.addf %509, %512 : vector<8x1xf32>
    %514 = math.rsqrt %513 : vector<8x1xf32>
    %515 = vector.broadcast %514 : vector<8x1xf32> to vector<8x128xf32>
    %516 = arith.mulf %511, %515 : vector<8x128xf32>
    %517 = vector.broadcast %492 : vector<1x128xf32> to vector<8x128xf32>
    %518 = arith.mulf %516, %517 : vector<8x128xf32>
    %519 = vector.broadcast %493 : vector<1x128xf32> to vector<8x128xf32>
    %520 = arith.addf %518, %519 : vector<8x128xf32>
    %cst_185 = arith.constant 0.000000e+00 : f32
    %521 = vector.broadcast %cst_185 : f32 to vector<8x128xf32>
    %522 = arith.maximumf %520, %521 : vector<8x128xf32>
    %c43 = arith.constant 43 : index
    %c0_186 = arith.constant 0 : index
    %523 = vector.load %arg2[%c43, %c0_186] : memref<54x1024xf32, #tpu.memory_space<vmem>>, vector<1x256xf32>
    %c44 = arith.constant 44 : index
    %c0_187 = arith.constant 0 : index
    %524 = vector.load %arg2[%c44, %c0_187] : memref<54x1024xf32, #tpu.memory_space<vmem>>, vector<1x256xf32>
    %525 = vector.extract_strided_slice %401 {offsets = [0, 512], sizes = [8, 256], strides = [1, 1]} : vector<8x1024xf32> to vector<8x256xf32>
    %cst_188 = arith.constant dense<0.000000e+00> : vector<8xf32>
    %526 = vector.multi_reduction <add>, %525, %cst_188 [1] : vector<8x256xf32> to vector<8xf32>
    %527 = vector.shape_cast %526 : vector<8xf32> to vector<8x1xf32>
    %cst_189 = arith.constant 2.560000e+02 : f32
    %528 = vector.broadcast %cst_189 : f32 to vector<8x1xf32>
    %529 = arith.divf %527, %528 : vector<8x1xf32>
    %530 = arith.mulf %525, %525 : vector<8x256xf32>
    %cst_190 = arith.constant dense<0.000000e+00> : vector<8xf32>
    %531 = vector.multi_reduction <add>, %530, %cst_190 [1] : vector<8x256xf32> to vector<8xf32>
    %532 = vector.shape_cast %531 : vector<8xf32> to vector<8x1xf32>
    %cst_191 = arith.constant 2.560000e+02 : f32
    %533 = vector.broadcast %cst_191 : f32 to vector<8x1xf32>
    %534 = arith.divf %532, %533 : vector<8x1xf32>
    %535 = arith.mulf %529, %529 : vector<8x1xf32>
    %536 = arith.subf %534, %535 : vector<8x1xf32>
    %537 = vector.broadcast %529 : vector<8x1xf32> to vector<8x256xf32>
    %538 = arith.subf %525, %537 : vector<8x256xf32>
    %cst_192 = arith.constant 9.99999974E-6 : f32
    %539 = vector.broadcast %cst_192 : f32 to vector<8x1xf32>
    %540 = arith.addf %536, %539 : vector<8x1xf32>
    %541 = math.rsqrt %540 : vector<8x1xf32>
    %542 = vector.broadcast %541 : vector<8x1xf32> to vector<8x256xf32>
    %543 = arith.mulf %538, %542 : vector<8x256xf32>
    %544 = vector.broadcast %523 : vector<1x256xf32> to vector<8x256xf32>
    %545 = arith.mulf %543, %544 : vector<8x256xf32>
    %546 = vector.broadcast %524 : vector<1x256xf32> to vector<8x256xf32>
    %547 = arith.addf %545, %546 : vector<8x256xf32>
    %cst_193 = arith.constant 0.000000e+00 : f32
    %548 = vector.broadcast %cst_193 : f32 to vector<8x256xf32>
    %549 = arith.maximumf %547, %548 : vector<8x256xf32>
    %c45 = arith.constant 45 : index
    %c0_194 = arith.constant 0 : index
    %550 = vector.load %arg2[%c45, %c0_194] : memref<54x1024xf32, #tpu.memory_space<vmem>>, vector<1x128xf32>
    %c46 = arith.constant 46 : index
    %c0_195 = arith.constant 0 : index
    %551 = vector.load %arg2[%c46, %c0_195] : memref<54x1024xf32, #tpu.memory_space<vmem>>, vector<1x128xf32>
    %c47 = arith.constant 47 : index
    %c0_196 = arith.constant 0 : index
    %552 = vector.load %arg2[%c47, %c0_196] : memref<54x1024xf32, #tpu.memory_space<vmem>>, vector<1x128xf32>
    %553 = vector.extract_strided_slice %404 {offsets = [512, 0], sizes = [256, 128], strides = [1, 1]} : vector<1024x128xbf16> to vector<256x128xbf16>
    %554 = arith.truncf %549 : vector<8x256xf32> to vector<8x256xbf16>
    %cst_197 = arith.constant dense<0.000000e+00> : vector<8x128xf32>
    %555 = tpu.matmul %554, %553, %cst_197 {dimension_numbers = #tpu.dot_dimension_numbers<[1], [0], [0], [1], [0, 0, 1, 1], [], []>} : vector<8x256xbf16>, vector<256x128xbf16>, vector<8x128xf32> -> vector<8x128xf32>
    %556 = vector.broadcast %550 : vector<1x128xf32> to vector<8x128xf32>
    %557 = arith.addf %555, %556 : vector<8x128xf32>
    %cst_198 = arith.constant dense<0.000000e+00> : vector<8xf32>
    %558 = vector.multi_reduction <add>, %557, %cst_198 [1] : vector<8x128xf32> to vector<8xf32>
    %559 = vector.shape_cast %558 : vector<8xf32> to vector<8x1xf32>
    %cst_199 = arith.constant 1.280000e+02 : f32
    %560 = vector.broadcast %cst_199 : f32 to vector<8x1xf32>
    %561 = arith.divf %559, %560 : vector<8x1xf32>
    %562 = arith.mulf %557, %557 : vector<8x128xf32>
    %cst_200 = arith.constant dense<0.000000e+00> : vector<8xf32>
    %563 = vector.multi_reduction <add>, %562, %cst_200 [1] : vector<8x128xf32> to vector<8xf32>
    %564 = vector.shape_cast %563 : vector<8xf32> to vector<8x1xf32>
    %cst_201 = arith.constant 1.280000e+02 : f32
    %565 = vector.broadcast %cst_201 : f32 to vector<8x1xf32>
    %566 = arith.divf %564, %565 : vector<8x1xf32>
    %567 = arith.mulf %561, %561 : vector<8x1xf32>
    %568 = arith.subf %566, %567 : vector<8x1xf32>
    %569 = vector.broadcast %561 : vector<8x1xf32> to vector<8x128xf32>
    %570 = arith.subf %557, %569 : vector<8x128xf32>
    %cst_202 = arith.constant 9.99999974E-6 : f32
    %571 = vector.broadcast %cst_202 : f32 to vector<8x1xf32>
    %572 = arith.addf %568, %571 : vector<8x1xf32>
    %573 = math.rsqrt %572 : vector<8x1xf32>
    %574 = vector.broadcast %573 : vector<8x1xf32> to vector<8x128xf32>
    %575 = arith.mulf %570, %574 : vector<8x128xf32>
    %576 = vector.broadcast %551 : vector<1x128xf32> to vector<8x128xf32>
    %577 = arith.mulf %575, %576 : vector<8x128xf32>
    %578 = vector.broadcast %552 : vector<1x128xf32> to vector<8x128xf32>
    %579 = arith.addf %577, %578 : vector<8x128xf32>
    %cst_203 = arith.constant 0.000000e+00 : f32
    %580 = vector.broadcast %cst_203 : f32 to vector<8x128xf32>
    %581 = arith.maximumf %579, %580 : vector<8x128xf32>
    %c48 = arith.constant 48 : index
    %c0_204 = arith.constant 0 : index
    %582 = vector.load %arg2[%c48, %c0_204] : memref<54x1024xf32, #tpu.memory_space<vmem>>, vector<1x256xf32>
    %c49 = arith.constant 49 : index
    %c0_205 = arith.constant 0 : index
    %583 = vector.load %arg2[%c49, %c0_205] : memref<54x1024xf32, #tpu.memory_space<vmem>>, vector<1x256xf32>
    %584 = vector.extract_strided_slice %401 {offsets = [0, 768], sizes = [8, 256], strides = [1, 1]} : vector<8x1024xf32> to vector<8x256xf32>
    %cst_206 = arith.constant dense<0.000000e+00> : vector<8xf32>
    %585 = vector.multi_reduction <add>, %584, %cst_206 [1] : vector<8x256xf32> to vector<8xf32>
    %586 = vector.shape_cast %585 : vector<8xf32> to vector<8x1xf32>
    %cst_207 = arith.constant 2.560000e+02 : f32
    %587 = vector.broadcast %cst_207 : f32 to vector<8x1xf32>
    %588 = arith.divf %586, %587 : vector<8x1xf32>
    %589 = arith.mulf %584, %584 : vector<8x256xf32>
    %cst_208 = arith.constant dense<0.000000e+00> : vector<8xf32>
    %590 = vector.multi_reduction <add>, %589, %cst_208 [1] : vector<8x256xf32> to vector<8xf32>
    %591 = vector.shape_cast %590 : vector<8xf32> to vector<8x1xf32>
    %cst_209 = arith.constant 2.560000e+02 : f32
    %592 = vector.broadcast %cst_209 : f32 to vector<8x1xf32>
    %593 = arith.divf %591, %592 : vector<8x1xf32>
    %594 = arith.mulf %588, %588 : vector<8x1xf32>
    %595 = arith.subf %593, %594 : vector<8x1xf32>
    %596 = vector.broadcast %588 : vector<8x1xf32> to vector<8x256xf32>
    %597 = arith.subf %584, %596 : vector<8x256xf32>
    %cst_210 = arith.constant 9.99999974E-6 : f32
    %598 = vector.broadcast %cst_210 : f32 to vector<8x1xf32>
    %599 = arith.addf %595, %598 : vector<8x1xf32>
    %600 = math.rsqrt %599 : vector<8x1xf32>
    %601 = vector.broadcast %600 : vector<8x1xf32> to vector<8x256xf32>
    %602 = arith.mulf %597, %601 : vector<8x256xf32>
    %603 = vector.broadcast %582 : vector<1x256xf32> to vector<8x256xf32>
    %604 = arith.mulf %602, %603 : vector<8x256xf32>
    %605 = vector.broadcast %583 : vector<1x256xf32> to vector<8x256xf32>
    %606 = arith.addf %604, %605 : vector<8x256xf32>
    %cst_211 = arith.constant 0.000000e+00 : f32
    %607 = vector.broadcast %cst_211 : f32 to vector<8x256xf32>
    %608 = arith.maximumf %606, %607 : vector<8x256xf32>
    %c50 = arith.constant 50 : index
    %c0_212 = arith.constant 0 : index
    %609 = vector.load %arg2[%c50, %c0_212] : memref<54x1024xf32, #tpu.memory_space<vmem>>, vector<1x128xf32>
    %c51 = arith.constant 51 : index
    %c0_213 = arith.constant 0 : index
    %610 = vector.load %arg2[%c51, %c0_213] : memref<54x1024xf32, #tpu.memory_space<vmem>>, vector<1x128xf32>
    %c52 = arith.constant 52 : index
    %c0_214 = arith.constant 0 : index
    %611 = vector.load %arg2[%c52, %c0_214] : memref<54x1024xf32, #tpu.memory_space<vmem>>, vector<1x128xf32>
    %612 = vector.extract_strided_slice %404 {offsets = [768, 0], sizes = [256, 128], strides = [1, 1]} : vector<1024x128xbf16> to vector<256x128xbf16>
    %613 = arith.truncf %608 : vector<8x256xf32> to vector<8x256xbf16>
    %cst_215 = arith.constant dense<0.000000e+00> : vector<8x128xf32>
    %614 = tpu.matmul %613, %612, %cst_215 {dimension_numbers = #tpu.dot_dimension_numbers<[1], [0], [0], [1], [0, 0, 1, 1], [], []>} : vector<8x256xbf16>, vector<256x128xbf16>, vector<8x128xf32> -> vector<8x128xf32>
    %615 = vector.broadcast %609 : vector<1x128xf32> to vector<8x128xf32>
    %616 = arith.addf %614, %615 : vector<8x128xf32>
    %cst_216 = arith.constant dense<0.000000e+00> : vector<8xf32>
    %617 = vector.multi_reduction <add>, %616, %cst_216 [1] : vector<8x128xf32> to vector<8xf32>
    %618 = vector.shape_cast %617 : vector<8xf32> to vector<8x1xf32>
    %cst_217 = arith.constant 1.280000e+02 : f32
    %619 = vector.broadcast %cst_217 : f32 to vector<8x1xf32>
    %620 = arith.divf %618, %619 : vector<8x1xf32>
    %621 = arith.mulf %616, %616 : vector<8x128xf32>
    %cst_218 = arith.constant dense<0.000000e+00> : vector<8xf32>
    %622 = vector.multi_reduction <add>, %621, %cst_218 [1] : vector<8x128xf32> to vector<8xf32>
    %623 = vector.shape_cast %622 : vector<8xf32> to vector<8x1xf32>
    %cst_219 = arith.constant 1.280000e+02 : f32
    %624 = vector.broadcast %cst_219 : f32 to vector<8x1xf32>
    %625 = arith.divf %623, %624 : vector<8x1xf32>
    %626 = arith.mulf %620, %620 : vector<8x1xf32>
    %627 = arith.subf %625, %626 : vector<8x1xf32>
    %628 = vector.broadcast %620 : vector<8x1xf32> to vector<8x128xf32>
    %629 = arith.subf %616, %628 : vector<8x128xf32>
    %cst_220 = arith.constant 9.99999974E-6 : f32
    %630 = vector.broadcast %cst_220 : f32 to vector<8x1xf32>
    %631 = arith.addf %627, %630 : vector<8x1xf32>
    %632 = math.rsqrt %631 : vector<8x1xf32>
    %633 = vector.broadcast %632 : vector<8x1xf32> to vector<8x128xf32>
    %634 = arith.mulf %629, %633 : vector<8x128xf32>
    %635 = vector.broadcast %610 : vector<1x128xf32> to vector<8x128xf32>
    %636 = arith.mulf %634, %635 : vector<8x128xf32>
    %637 = vector.broadcast %611 : vector<1x128xf32> to vector<8x128xf32>
    %638 = arith.addf %636, %637 : vector<8x128xf32>
    %cst_221 = arith.constant 0.000000e+00 : f32
    %639 = vector.broadcast %cst_221 : f32 to vector<8x128xf32>
    %640 = arith.maximumf %638, %639 : vector<8x128xf32>
    %641 = tpu.concatenate %463, %522, %581, %640 in 1 : vector<8x128xf32>, vector<8x128xf32>, vector<8x128xf32>, vector<8x128xf32> -> vector<8x512xf32>
    %c13_i32_222 = arith.constant 13 : i32
    %642 = tpu.memref_slice %arg32[%c13_i32_222] : memref<14x!tpu.dma_semaphore, #tpu.memory_space<semaphore_mem>> -> memref<1x!tpu.dma_semaphore, #tpu.memory_space<semaphore_mem>>
    %643 = tpu.memref_squeeze %642 : memref<1x!tpu.dma_semaphore, #tpu.memory_space<semaphore_mem>> -> memref<!tpu.dma_semaphore, #tpu.memory_space<semaphore_mem>>
    tpu.wait_dma2 semaphore(%643 : memref<!tpu.dma_semaphore, #tpu.memory_space<semaphore_mem>>) src(%arg16 : memref<512x128xbf16, #tpu.memory_space<any>>) dst(%arg31 : memref<512x128xbf16, #tpu.memory_space<vmem>>)
    %c0_223 = arith.constant 0 : index
    %c0_224 = arith.constant 0 : index
    %644 = vector.load %arg31[%c0_223, %c0_224] : memref<512x128xbf16, #tpu.memory_space<vmem>>, vector<512x128xbf16>
    %c53 = arith.constant 53 : index
    %c0_225 = arith.constant 0 : index
    %645 = vector.load %arg2[%c53, %c0_225] : memref<54x1024xf32, #tpu.memory_space<vmem>>, vector<1x14xf32>
    %646 = arith.truncf %641 : vector<8x512xf32> to vector<8x512xbf16>
    %cst_226 = arith.constant dense<0.000000e+00> : vector<8x128xf32>
    %647 = tpu.matmul %646, %644, %cst_226 {dimension_numbers = #tpu.dot_dimension_numbers<[1], [0], [0], [1], [0, 0, 1, 1], [], []>} : vector<8x512xbf16>, vector<512x128xbf16>, vector<8x128xf32> -> vector<8x128xf32>
    %648 = vector.extract_strided_slice %647 {offsets = [0, 0], sizes = [8, 14], strides = [1, 1]} : vector<8x128xf32> to vector<8x14xf32>
    %649 = vector.broadcast %645 : vector<1x14xf32> to vector<8x14xf32>
    %650 = arith.addf %648, %649 : vector<8x14xf32>
    %c0_227 = arith.constant 0 : index
    %c0_228 = arith.constant 0 : index
    %651 = vector.load %arg17[%c0_227, %c0_228] : memref<8x14xf32, #tpu.memory_space<vmem>>, vector<8x14xf32>
    tpu.vector_store %arg17[%c0_227, %c0_228], %650 {strides = array<i32>} : memref<8x14xf32, #tpu.memory_space<vmem>>, vector<8x14xf32>,
    return
  }
}

</mosaic_0001>

<bundles_post_ra>
// kernel: meme_emotion_forward.1
= control target key start
LH: loop header
LB: loop body
LE: loop exit
PB: predicated region body
PF: predicated region fallthrough
CT: control target
= control target key end

     0   :  { %s9486_s0 = inlined_call_operand.hbm [shape: f32[8,768], index: 0, kind: input, shape index: {}]   ;;  %s9487_s1 = inlined_call_operand.hbm [shape: f32[8,768], index: 1, kind: input, shape index: {}]   ;;  %s9488_s2 = inlined_call_operand.hbm [shape: f32[54,1024], index: 2, kind: input, shape index: {}]   ;;  %s9489_s3 = inlined_call_operand.hbm [shape: bf16[768,768], index: 3, kind: input, shape index: {}]   ;;  %s9490_s4 = inlined_call_operand.hbm [shape: bf16[768,512], index: 4, kind: input, shape index: {}]   ;;  %s9491_s5 = inlined_call_operand.hbm [shape: bf16[768,768], index: 5, kind: input, shape index: {}]   ;;  %s9492_s6 = inlined_call_operand.hbm [shape: bf16[768,512], index: 6, kind: input, shape index: {}]   ;;  %s9493_s7 = inlined_call_operand.hbm [shape: bf16[512,768], index: 7, kind: input, shape index: {}]   ;;  %s9494_s8 = inlined_call_operand.hbm [shape: bf16[512,768], index: 8, kind: input, shape index: {}]   ;;  %s9495_s9 = inlined_call_operand.hbm [shape: bf16[768,512], index: 9, kind: input, shape index: {}]   ;;  %s9496_s10 = inlined_call_operand.hbm [shape: bf16[512,256], index: 10, kind: input, shape index: {}]   ;;  %s9497_s11 = inlined_call_operand.hbm [shape: bf16[512,512], index: 11, kind: input, shape index: {}]   ;;  %s9498_s12 = inlined_call_operand.hbm [shape: bf16[512,384], index: 12, kind: input, shape index: {}]   ;;  %s9499_s13 = inlined_call_operand.hbm [shape: bf16[384,256], index: 13, kind: input, shape index: {}]   ;;  %s9500_s14 = inlined_call_operand.hbm [shape: bf16[256,1024], index: 14, kind: input, shape index: {}]   ;;  %s9501_s15 = inlined_call_operand.hbm [shape: bf16[1024,128], index: 15, kind: input, shape index: {}]   ;;  %s9502_s16 = inlined_call_operand.hbm [shape: bf16[512,128], index: 16, kind: input, shape index: {}]   ;;  %s9503_s17 = inlined_call_operand.hbm [shape: f32[8,14], index: 17, kind: output, shape index: {}]  }
   0x1   :  { %9529 = sst [smem:[#allocation230_spill]] %s9486_s0 }
   0x2   :  { %9530 = sst [smem:[#allocation231_spill]] %s9487_s1 }
   0x3   :  { %22 = vsyncpa [#allocation18], 0 }
   0x4   :  { %23 = vsyncpa [#allocation21], 0 }
   0x5   :  { %24 = vsyncpa [#allocation19], 0  ;;  %s7839_s24 = smov [#allocation20]   ;;  %s7840_s26 = smov [#allocation17]  }
   0x6   :  { %s41_s25 = sshll.u32 %s7839_s24, 4  ;;  %s31_s27 = sshll.u32 %s7840_s26, 4  ;;  %s42_s25 = int_to_ptr.vmem [resolvable:$true] %s41_s25  ;;  %s32_s27 = int_to_ptr.vmem [resolvable:$true] %s31_s27 }
   0x7   :  { %s9531_s0 = sld [smem:[#allocation231_spill]] }
   0xd   :  { %s7673_s30 = scalar_lea.hbm %s9531_s0, 768 }
   0xe   :  { %p7674_p0 = scmp.ne.s32.totalorder %s9531_s0, %s7673_s30  ;;  %p7677_p1 = scmp.lt.u32.totalorder %s7673_s30, %s9531_s0 }
  0x10   :  { %p7679_p2 = pnand %p7677_p1, %p7674_p0 }
  0x12   :  { %7682 = shalt.err (!%p7679_p2)
}
  0x13   :  { %s7683_s21 = scalar_lea.vmem %s42_s25, 768  ;;  %p7688_p4 = scmp.lt.s32.totalorder %s42_s25, %s42_s25 }
  0x14   :  { %p7684_p3 = scmp.ne.s32.totalorder %s42_s25, %s7683_s21  ;;  %p7689_p5 = scmp.lt.s32.totalorder %s7683_s21, %s7683_s21 }
  0x16   :  { %p7690_p6 = por %p7689_p5, %p7688_p4 }
  0x18   :  { %p7691_p7 = pnand %p7690_p6, %p7684_p3 }
  0x1a   :  { %7694 = shalt.err (!%p7691_p7)
}
  0x1b   :  { %44 = dma.hbm_to_vmem [thread:$0]  %s9531_s0, 768, %s42_s25, [#allocation21]  }
  0x1c   :  { %s9532_s28 = sld [smem:[#allocation230_spill]] }
  0x22   :  { %s7695_s29 = scalar_lea.hbm %s9532_s28, 768 }
  0x23   :  { %p7696_p8 = scmp.ne.s32.totalorder %s9532_s28, %s7695_s29  ;;  %p7699_p9 = scmp.lt.u32.totalorder %s7695_s29, %s9532_s28 }
  0x25   :  { %p7701_p10 = pnand %p7699_p9, %p7696_p8 }
  0x27   :  { %7704 = shalt.err (!%p7701_p10)
}
  0x28   :  { %s7705_s20 = scalar_lea.vmem %s32_s27, 768  ;;  %p7710_p12 = scmp.lt.s32.totalorder %s32_s27, %s32_s27 }
  0x29   :  { %p7706_p11 = scmp.ne.s32.totalorder %s32_s27, %s7705_s20  ;;  %p7711_p13 = scmp.lt.s32.totalorder %s7705_s20, %s7705_s20 }
  0x2b   :  { %p7712_p0 = por %p7711_p13, %p7710_p12 }
  0x2d   :  { %p7713_p1 = pnand %p7712_p0, %p7706_p11 }
  0x2f   :  { %7716 = shalt.err (!%p7713_p1)
}
  0x30   :  { %34 = dma.hbm_to_vmem [thread:$0]  %s9532_s28, 768, %s32_s27, [#allocation18]  }
  0x31   :  { %s7841_s21 = smov [#allocation22]   ;;  %s7717_s26 = scalar_lea.hbm %s9488_s2, 7168 }
  0x32   :  { %s50_s22 = sshll.u32 %s7841_s21, 4  ;;  %p7718_p2 = scmp.ne.s32.totalorder %s9488_s2, %s7717_s26  ;;  %s51_s22 = int_to_ptr.vmem [resolvable:$true] %s50_s22 }
  0x33   :  { %p7721_p3 = scmp.lt.u32.totalorder %s7717_s26, %s9488_s2 }
  0x35   :  { %p7723_p4 = pnand %p7721_p3, %p7718_p2 }
  0x37   :  { %7726 = shalt.err (!%p7723_p4)
}
  0x38   :  { %s7727_s1 = scalar_lea.vmem %s51_s22, 7168  ;;  %p7732_p6 = scmp.lt.s32.totalorder %s51_s22, %s51_s22 }
  0x39   :  { %p7728_p5 = scmp.ne.s32.totalorder %s51_s22, %s7727_s1  ;;  %p7733_p7 = scmp.lt.s32.totalorder %s7727_s1, %s7727_s1 }
  0x3b   :  { %p7734_p8 = por %p7733_p7, %p7732_p6 }
  0x3d   :  { %p7735_p9 = pnand %p7734_p8, %p7728_p5 }
  0x3f   :  { %7738 = shalt.err (!%p7735_p9)
}
  0x40   :  { %s9506_s27 = smov 1024   ;;  %s7843_s28 = smov 64  }
  0x41   :  { %56 = dma.hbm_to_vmem [thread:$0]  %s9488_s2, 7168, %s51_s22, [#allocation21], %s9506_s27, %s9506_s27, %s7843_s28  }
  0x42   :  { %7805 = dma.done.wait [#allocation18], 768  }
  0x43   :  { %7806 = vsyncadd [#allocation18], 4294966528 }
  0x44   :  { %7807 = dma.done.wait [#allocation21], 7936  }
  0x45   :  { %7808 = vsyncadd [#allocation21], 4294959360  ;;  %s71_s0 = sld [smem:[#allocation0]]   ;;  %s7844_s21 = smov 768  }
  0x46   :  { %83 = sst [smem:[#allocation25]] %s7844_s21  ;;  %s7845_s23 = smov 6  }
  0x47   :  { %85 = sst [smem:[#allocation25 + $0x1]] %s7844_s21  ;;  %s7846_s24 = smov 128  }
  0x48   :  { %87 = sst [smem:[#allocation25 + $0x2]] %s7845_s23  ;;  %s7847_s26 = smov 2  }
  0x49   :  { %89 = sst [smem:[#allocation25 + $0x3]] %s7843_s28  ;;  %s9508_s22 = smov 384  }
  0x4a   :  { %91 = sst [smem:[#allocation25 + $0x4]] %s7846_s24  ;;  %s7849_s18 = smov 4  }
  0x4b   :  { %93 = sst [smem:[#allocation25 + $0x5]] %s7847_s26  ;;  %s7211_s2 = sshll.u32 %s71_s0, 26 }
  0x4c   :  { %95 = sst [smem:[#allocation25 + $0x6]] %s9508_s22  ;;  %s8031_s29 = sadd.s32 134217728, %s7211_s2 }
  0x4d   :  { %97 = sst [smem:[#allocation25 + $0x7]] %s7843_s28  ;;  %s7850_s19 = smov [#allocation2]  }
  0x4e   :  { %99 = sst [smem:[#allocation25 + $0x8]] %s7849_s18  ;;  %s79_s30 = sshll.u32 %s7850_s19, 4  ;;  %s80_s30 = int_to_ptr.vmem [resolvable:$true] %s79_s30 }
  0x4f   :  { %s7851_s1 = smov [#allocation16]   ;;  %s7852_s20 = smov [#allocation24]  }
  0x50   :  { %101 = dma.general %s9489_s3, 36864, %s80_s30, %s7851_s1, %s7852_s20, [#allocation25], %s8031_s29, 0  }
  0x51   :  { %s7853_s0 = smov 512   ;;  %122 = sst [smem:[#allocation27 + $0x2]] %s7849_s18 }
  0x52   :  { %118 = sst [smem:[#allocation27]] %s7853_s0  ;;  %s7854_s2 = smov [#allocation3]  }
  0x53   :  { %120 = sst [smem:[#allocation27 + $0x1]] %s7853_s0  ;;  %s114_s22 = sshll.u32 %s7854_s2, 4  ;;  %s115_s22 = int_to_ptr.vmem [resolvable:$true] %s114_s22 }
  0x54   :  { %124 = sst [smem:[#allocation27 + $0x3]] %s7843_s28  ;;  %s7855_s19 = smov 256  }
  0x55   :  { %126 = sst [smem:[#allocation27 + $0x4]] %s7846_s24  ;;  %s7856_s3 = smov [#allocation16 + $0x1]  }
  0x56   :  { %128 = sst [smem:[#allocation27 + $0x5]] %s7847_s26  ;;  %s7857_s27 = smov [#allocation26]  }
  0x57   :  { %130 = sst [smem:[#allocation27 + $0x6]] %s7855_s19  ;;  %s7858_s20 = smov [#allocation4]  }
  0x58   :  { %132 = sst [smem:[#allocation27 + $0x7]] %s7843_s28  ;;  %s149_s25 = sshll.u32 %s7858_s20, 4  ;;  %s150_s25 = int_to_ptr.vmem [resolvable:$true] %s149_s25 }
  0x59   :  { %134 = sst [smem:[#allocation27 + $0x8]] %s7849_s18  ;;  %s9533_s2 = smov 384  }
  0x5a   :  { %136 = dma.general %s9490_s4, 24576, %s115_s22, %s7856_s3, %s7857_s27, [#allocation27], %s8031_s29, 0  }
  0x5b   :  { %153 = sst [smem:[#allocation29]] %s7844_s21  ;;  %s7859_s4 = smov [#allocation16 + $0x2]  }
  0x5c   :  { %155 = sst [smem:[#allocation29 + $0x1]] %s7844_s21  ;;  %s7860_s22 = smov [#allocation28]  }
  0x5d   :  { %157 = sst [smem:[#allocation29 + $0x2]] %s7845_s23  ;;  %s7861_s30 = smov [#allocation5]  }
  0x5e   :  { %159 = sst [smem:[#allocation29 + $0x3]] %s7843_s28  ;;  %s184_s1 = sshll.u32 %s7861_s30, 4  ;;  %s185_s1 = int_to_ptr.vmem [resolvable:$true] %s184_s1 }
  0x5f   :  { %161 = sst [smem:[#allocation29 + $0x4]] %s7846_s24  ;;  %s7863_s20 = smov [#allocation30]  }
  0x60   :  { %163 = sst [smem:[#allocation29 + $0x5]] %s7847_s26  ;;  %s7866_s27 = smov [#allocation32]  }
  0x61   :  { %165 = sst [smem:[#allocation29 + $0x6]] %s9533_s2  ;;  %s7873_s30 = smov [#allocation9]  }
  0x62   :  { %167 = sst [smem:[#allocation29 + $0x7]] %s7843_s28 }
  0x63   :  { %169 = sst [smem:[#allocation29 + $0x8]] %s7849_s18 }
  0x64   :  { %171 = dma.general %s9491_s5, 36864, %s150_s25, %s7859_s4, %s7860_s22, [#allocation29], %s8031_s29, 0  }
  0x65   :  { %188 = sst [smem:[#allocation31]] %s7853_s0  ;;  %s7862_s5 = smov [#allocation16 + $0x3]  }
  0x66   :  { %190 = sst [smem:[#allocation31 + $0x1]] %s7853_s0  ;;  %s7864_s22 = smov [#allocation6]  }
  0x67   :  { %192 = sst [smem:[#allocation31 + $0x2]] %s7849_s18  ;;  %s219_s3 = sshll.u32 %s7864_s22, 4  ;;  %s220_s3 = int_to_ptr.vmem [resolvable:$true] %s219_s3 }
  0x68   :  { %194 = sst [smem:[#allocation31 + $0x3]] %s7843_s28  ;;  %s7869_s25 = smov [#allocation34]  }
  0x69   :  { %196 = sst [smem:[#allocation31 + $0x4]] %s7846_s24  ;;  %s7878_s4 = smov [#allocation40]  }
  0x6a   :  { %198 = sst [smem:[#allocation31 + $0x5]] %s7847_s26 }
  0x6b   :  { %200 = sst [smem:[#allocation31 + $0x6]] %s7855_s19 }
  0x6c   :  { %202 = sst [smem:[#allocation31 + $0x7]] %s7843_s28 }
  0x6d   :  { %204 = sst [smem:[#allocation31 + $0x8]] %s7849_s18 }
  0x6e   :  { %206 = dma.general %s9492_s6, 24576, %s185_s1, %s7862_s5, %s7863_s20, [#allocation31], %s8031_s29, 0  }
  0x6f   :  { %223 = sst [smem:[#allocation33]] %s7844_s21  ;;  %s7865_s6 = smov [#allocation16 + $0x4]  }
  0x70   :  { %225 = sst [smem:[#allocation33 + $0x1]] %s7844_s21  ;;  %s7867_s5 = smov [#allocation7]  }
  0x71   :  { %227 = sst [smem:[#allocation33 + $0x2]] %s7845_s23  ;;  %s254_s20 = sshll.u32 %s7867_s5, 4  ;;  %s255_s20 = int_to_ptr.vmem [resolvable:$true] %s254_s20 }
  0x72   :  { %229 = sst [smem:[#allocation33 + $0x3]] %s7843_s28  ;;  %s324_s1 = sshll.u32 %s7873_s30, 4  ;;  %s325_s1 = int_to_ptr.vmem [resolvable:$true] %s324_s1 }
  0x73   :  { %231 = sst [smem:[#allocation33 + $0x4]] %s7846_s24  ;;  %s7875_s5 = smov [#allocation38]  }
  0x74   :  { %233 = sst [smem:[#allocation33 + $0x5]] %s7847_s26  ;;  %s7883_s30 = smov [#allocation42]  }
  0x75   :  { %235 = sst [smem:[#allocation33 + $0x6]] %s9533_s2 }
  0x76   :  { %237 = sst [smem:[#allocation33 + $0x7]] %s7843_s28 }
  0x77   :  { %239 = sst [smem:[#allocation33 + $0x8]] %s7849_s18 }
  0x78   :  { %241 = dma.general %s9493_s7, 24576, %s220_s3, %s7865_s6, %s7866_s27, [#allocation33], %s8031_s29, 0  }
  0x79   :  { %258 = sst [smem:[#allocation35]] %s7844_s21  ;;  %s7868_s7 = smov [#allocation16 + $0x5]  }
  0x7a   :  { %260 = sst [smem:[#allocation35 + $0x1]] %s7844_s21  ;;  %s7872_s3 = smov [#allocation36]  }
  0x7b   :  { %262 = sst [smem:[#allocation35 + $0x2]] %s7845_s23  ;;  %s7870_s23 = smov [#allocation8]  }
  0x7c   :  { %264 = sst [smem:[#allocation35 + $0x3]] %s7843_s28  ;;  %s289_s22 = sshll.u32 %s7870_s23, 4  ;;  %s290_s22 = int_to_ptr.vmem [resolvable:$true] %s289_s22 }
  0x7d   :  { %266 = sst [smem:[#allocation35 + $0x4]] %s7846_s24  ;;  %s7880_s6 = smov 3  }
  0x7e   :  { %268 = sst [smem:[#allocation35 + $0x5]] %s7847_s26  ;;  %s7881_s27 = smov 192  }
  0x7f   :  { %270 = sst [smem:[#allocation35 + $0x6]] %s9533_s2  ;;  %s7889_s23 = smov [#allocation14]  }
  0x80   :  { %272 = sst [smem:[#allocation35 + $0x7]] %s7843_s28 }
  0x81   :  { %274 = sst [smem:[#allocation35 + $0x8]] %s7849_s18 }
  0x82   :  { %276 = dma.general %s9494_s8, 24576, %s255_s20, %s7868_s7, %s7869_s25, [#allocation35], %s8031_s29, 0  }
  0x83   :  { %293 = sst [smem:[#allocation37]] %s7853_s0  ;;  %s7871_s8 = smov [#allocation16 + $0x6]  }
  0x84   :  { %295 = sst [smem:[#allocation37 + $0x1]] %s7853_s0  ;;  %s7876_s25 = smov [#allocation10]  }
  0x85   :  { %297 = sst [smem:[#allocation37 + $0x2]] %s7849_s18  ;;  %s359_s21 = sshll.u32 %s7876_s25, 4  ;;  %s360_s21 = int_to_ptr.vmem [resolvable:$true] %s359_s21 }
  0x86   :  { %299 = sst [smem:[#allocation37 + $0x3]] %s7843_s28  ;;  %s7886_s7 = smov [#allocation16 + $0xa]  }
  0x87   :  { %301 = sst [smem:[#allocation37 + $0x4]] %s7846_s24  ;;  %s7887_s25 = smov [#allocation44]  }
  0x88   :  { %303 = sst [smem:[#allocation37 + $0x5]] %s7847_s26 }
  0x89   :  { %305 = sst [smem:[#allocation37 + $0x6]] %s7855_s19 }
  0x8a   :  { %307 = sst [smem:[#allocation37 + $0x7]] %s7843_s28 }
  0x8b   :  { %309 = sst [smem:[#allocation37 + $0x8]] %s7849_s18 }
  0x8c   :  { %311 = dma.general %s9495_s9, 24576, %s290_s22, %s7871_s8, %s7872_s3, [#allocation37], %s8031_s29, 0  }
  0x8d   :  { %328 = sst [smem:[#allocation39]] %s7855_s19  ;;  %s7874_s9 = smov [#allocation16 + $0x7]  }
  0x8e   :  { %330 = sst [smem:[#allocation39 + $0x1]] %s7855_s19  ;;  %s7879_s8 = smov [#allocation11]  }
  0x8f   :  { %332 = sst [smem:[#allocation39 + $0x2]] %s7847_s26  ;;  %s394_s3 = sshll.u32 %s7879_s8, 4  ;;  %s395_s3 = int_to_ptr.vmem [resolvable:$true] %s394_s3 }
  0x90   :  { %334 = sst [smem:[#allocation39 + $0x3]] %s7843_s28  ;;  %s495_s22 = sshll.u32 %s7889_s23, 4  ;;  %s496_s22 = int_to_ptr.vmem [resolvable:$true] %s495_s22 }
  0x91   :  { %336 = sst [smem:[#allocation39 + $0x4]] %s7846_s24  ;;  %s7890_s8 = smov [#allocation15]  }
  0x92   :  { %338 = sst [smem:[#allocation39 + $0x5]] %s7847_s26 }
  0x93   :  { %340 = sst [smem:[#allocation39 + $0x6]] %s7846_s24 }
  0x94   :  { %342 = sst [smem:[#allocation39 + $0x7]] %s7843_s28 }
  0x95   :  { %344 = sst [smem:[#allocation39 + $0x8]] %s7849_s18 }
  0x96   :  { %346 = dma.general %s9496_s10, 8192, %s325_s1, %s7874_s9, %s7875_s5, [#allocation39], %s8031_s29, 0  }
  0x97   :  { %363 = sst [smem:[#allocation41]] %s7853_s0  ;;  %s7877_s10 = smov [#allocation16 + $0x8]  }
  0x98   :  { %365 = sst [smem:[#allocation41 + $0x1]] %s7853_s0  ;;  %s7884_s9 = smov [#allocation12]  }
  0x99   :  { %367 = sst [smem:[#allocation41 + $0x2]] %s7849_s18  ;;  %s429_s5 = sshll.u32 %s7884_s9, 4  ;;  %s430_s5 = int_to_ptr.vmem [resolvable:$true] %s429_s5 }
  0x9a   :  { %369 = sst [smem:[#allocation41 + $0x3]] %s7843_s28 }
  0x9b   :  { %371 = sst [smem:[#allocation41 + $0x4]] %s7846_s24 }
  0x9c   :  { %373 = sst [smem:[#allocation41 + $0x5]] %s7847_s26 }
  0x9d   :  { %375 = sst [smem:[#allocation41 + $0x6]] %s7855_s19 }
  0x9e   :  { %377 = sst [smem:[#allocation41 + $0x7]] %s7843_s28 }
  0x9f   :  { %379 = sst [smem:[#allocation41 + $0x8]] %s7849_s18 }
  0xa0   :  { %381 = dma.general %s9497_s11, 16384, %s360_s21, %s7877_s10, %s7878_s4, [#allocation41], %s8031_s29, 0  }
  0xa1   :  { %398 = sst [smem:[#allocation43]] %s9533_s2  ;;  %s7882_s11 = smov [#allocation16 + $0x9]  }
  0xa2   :  { %400 = sst [smem:[#allocation43 + $0x1]] %s9533_s2  ;;  %s9534_s10 = smov 1024  }
  0xa3   :  { %402 = sst [smem:[#allocation43 + $0x2]] %s7880_s6  ;;  %s7888_s4 = smov 8  }
  0xa4   :  { %404 = sst [smem:[#allocation43 + $0x3]] %s7843_s28  ;;  %s7892_s6 = smov [#allocation46]  }
  0xa5   :  { %406 = sst [smem:[#allocation43 + $0x4]] %s7846_s24 }
  0xa6   :  { %408 = sst [smem:[#allocation43 + $0x5]] %s7847_s26 }
  0xa7   :  { %410 = sst [smem:[#allocation43 + $0x6]] %s7881_s27 }
  0xa8   :  { %412 = sst [smem:[#allocation43 + $0x7]] %s7843_s28 }
  0xa9   :  { %414 = sst [smem:[#allocation43 + $0x8]] %s7849_s18 }
  0xaa   :  { %416 = dma.general %s9498_s12, 12288, %s395_s3, %s7882_s11, %s7883_s30, [#allocation43], %s8031_s29, 0  }
  0xab   :  { %433 = sst [smem:[#allocation45]] %s7855_s19  ;;  %s7885_s12 = smov [#allocation13]  }
  0xac   :  { %435 = sst [smem:[#allocation45 + $0x1]] %s7855_s19  ;;  %s464_s20 = sshll.u32 %s7885_s12, 4  ;;  %s465_s20 = int_to_ptr.vmem [resolvable:$true] %s464_s20 }
  0xad   :  { %437 = sst [smem:[#allocation45 + $0x2]] %s7847_s26  ;;  %s507_s3 = sshll.u32 %s7890_s8, 4  ;;  %s8175_s3 = int_to_ptr.vmem [resolvable:$true] %s507_s3 }
  0xae   :  { %439 = sst [smem:[#allocation45 + $0x3]] %s7843_s28 }
  0xaf   :  { %441 = sst [smem:[#allocation45 + $0x4]] %s7846_s24 }
  0xb0   :  { %443 = sst [smem:[#allocation45 + $0x5]] %s7847_s26 }
  0xb1   :  { %445 = sst [smem:[#allocation45 + $0x6]] %s7846_s24 }
  0xb2   :  { %447 = sst [smem:[#allocation45 + $0x7]] %s7843_s28 }
  0xb3   :  { %449 = sst [smem:[#allocation45 + $0x8]] %s7849_s18 }
  0xb4   :  { %451 = dma.general %s9499_s13, 6144, %s430_s5, %s7886_s7, %s7887_s25, [#allocation45], %s8031_s29, 0  }
  0xb5   :  { %468 = sst [smem:[#allocation47]] %s9534_s10  ;;  %s7891_s13 = smov [#allocation16 + $0xb]  }
  0xb6   :  { %470 = sst [smem:[#allocation47 + $0x1]] %s9534_s10 }
  0xb7   :  { %472 = sst [smem:[#allocation47 + $0x2]] %s7888_s4 }
  0xb8   :  { %474 = sst [smem:[#allocation47 + $0x3]] %s7843_s28 }
  0xb9   :  { %476 = sst [smem:[#allocation47 + $0x4]] %s7846_s24 }
  0xba   :  { %478 = sst [smem:[#allocation47 + $0x5]] %s7847_s26  ;;  %s7739_s26 = scalar_lea.hbm %s9501_s15, 8192 }
  0xbb   :  { %480 = sst [smem:[#allocation47 + $0x6]] %s7853_s0  ;;  %p7740_p10 = scmp.ne.s32.totalorder %s9501_s15, %s7739_s26 }
  0xbc   :  { %482 = sst [smem:[#allocation47 + $0x7]] %s7843_s28  ;;  %p7743_p11 = scmp.lt.u32.totalorder %s7739_s26, %s9501_s15 }
  0xbd   :  { %484 = sst [smem:[#allocation47 + $0x8]] %s7849_s18 }
  0xbe   :  { %486 = dma.general %s9500_s14, 16384, %s465_s20, %s7891_s13, %s7892_s6, [#allocation47], %s8031_s29, 0  }
  0xbf   :  { %p7745_p12 = pnand %p7743_p11, %p7740_p10 }
  0xc1   :  { %7748 = shalt.err (!%p7745_p12)  }
  0xc2   :  { %s7749_s18 = scalar_lea.vmem %s496_s22, 8192  ;;  %p7754_p0 = scmp.lt.s32.totalorder %s496_s22, %s496_s22 }
  0xc3   :  { %p7750_p13 = scmp.ne.s32.totalorder %s496_s22, %s7749_s18  ;;  %p7755_p1 = scmp.lt.s32.totalorder %s7749_s18, %s7749_s18 }
  0xc5   :  { %p7756_p2 = por %p7755_p1, %p7754_p0 }
  0xc7   :  { %p7757_p3 = pnand %p7756_p2, %p7750_p13 }
  0xc9   :  { %7760 = shalt.err (!%p7757_p3)  }
  0xca   :  { %498 = dma.hbm_to_vmem [thread:$0]  %s9501_s15, 8192, %s496_s22, [#allocation16 + $0xc] }
  0xcb   :  { %s7761_s12 = scalar_lea.hbm %s9502_s16, 4096 }
  0xcc   :  { %p7762_p4 = scmp.ne.s32.totalorder %s9502_s16, %s7761_s12  ;;  %p7765_p5 = scmp.lt.u32.totalorder %s7761_s12, %s9502_s16 }
  0xce   :  { %p7767_p6 = pnand %p7765_p5, %p7762_p4 }
  0xd0   :  { %7770 = shalt.err (!%p7767_p6)  }
  0xd1   :  { %s7771_s21 = scalar_lea.vmem %s8175_s3, 4096  ;;  %p7776_p8 = scmp.lt.s32.totalorder %s8175_s3, %s8175_s3 }
  0xd2   :  { %p7772_p7 = scmp.ne.s32.totalorder %s8175_s3, %s7771_s21  ;;  %p7777_p9 = scmp.lt.s32.totalorder %s7771_s21, %s7771_s21 }
  0xd4   :  { %p7778_p10 = por %p7777_p9, %p7776_p8 }
  0xd6   :  { %p7779_p11 = pnand %p7778_p10, %p7772_p7 }
  0xd8   :  { %7782 = shalt.err (!%p7779_p11)  }
  0xd9   :  { %510 = dma.hbm_to_vmem [thread:$0]  %s9502_s16, 4096, %s8175_s3, [#allocation16 + $0xd]  ;;  %v8210_v0 = vld [vmem:[#allocation17] sm:$0xff]  ;;  %v512_v1 = vld [vmem:[#allocation17 + $0x8] sm:$0xff]  ;;  %v8212_v2 = vld [vmem:[#allocation17 + $0x10] sm:$0xff] }
  0xda   :  { %v8214_v3 = vld [vmem:[#allocation17 + $0x18] sm:$0xff]  ;;  %v8216_v4 = vld [vmem:[#allocation17 + $0x20] sm:$0xff]  ;;  %v8218_v5 = vld [vmem:[#allocation17 + $0x28] sm:$0xff] }
  0xdb   :  { %v8220_v6 = vld [vmem:[#allocation20] sm:$0xff]  ;;  %v8222_v7 = vld [vmem:[#allocation20 + $0x8] sm:$0xff]  ;;  %v8224_v8 = vld [vmem:[#allocation20 + $0x10] sm:$0xff] }
  0xdc   :  { %v8226_v9 = vld [vmem:[#allocation20 + $0x18] sm:$0xff]  ;;  %v8228_v10 = vld [vmem:[#allocation20 + $0x20] sm:$0xff]  ;;  %v8230_v11 = vld [vmem:[#allocation20 + $0x28] sm:$0xff] }
  0xdd   :  { %7809 = dma.done.wait [#allocation16], 36864 }
  0xde   :  { %7810 = vsyncadd [#allocation16], 4294930432  ;;  %v8232_v12 = vpack.c.bf16 %v512_v1, %v512_v1  ;;  %v528_v13 = vld [vmem:[#allocation2 + $0x8] sm:$0xff]  ;;  %v527_v14 = vld [vmem:[#allocation2] sm:$0xff] }
  0xdf   :  { %v530_v15 = vld [vmem:[#allocation2 + $0x18] sm:$0xff]  ;;  %863 = vmatprep.subr.bf16.mxu0 %v528_v13  ;;  %v529_v17 = vld [vmem:[#allocation2 + $0x10] sm:$0xff]  ;;  %v536_v18 = vld [vmem:[#allocation2 + $0x48] sm:$0xff] }
  0xe0   :  { %895 = vmatprep.mubr.bf16.mxu0 %v8232_v12  ;;  %1018 = vmatprep.mubr.bf16.mxu1 %v8232_v12  ;;  %v534_v16 = vld [vmem:[#allocation2 + $0x38] sm:$0xff]  ;;  %v533_v19 = vld [vmem:[#allocation2 + $0x30] sm:$0xff]  ;;  %v535_v20 = vld [vmem:[#allocation2 + $0x40] sm:$0xff] }
  0xe1   :  { %986 = vmatprep.subr.bf16.mxu1 %v530_v15  ;;  %864 = vmatpush1.bf16.msra.mxu0 %v527_v14  ;;  %v540_v21 = vld [vmem:[#allocation2 + $0x68] sm:$0xff]  ;;  %v542_v22 = vld [vmem:[#allocation2 + $0x78] sm:$0xff]  ;;  %v539_v23 = vld [vmem:[#allocation2 + $0x60] sm:$0xff] }
  0xe2   :  { %987 = vmatpush1.bf16.msra.mxu1 %v529_v17  ;;  %865 = vmatprep.subr.bf16.mxu0 %v534_v16  ;;  %v541_v24 = vld [vmem:[#allocation2 + $0x70] sm:$0xff]  ;;  %v546_v25 = vld [vmem:[#allocation2 + $0x98] sm:$0xff]  ;;  %v548_v26 = vld [vmem:[#allocation2 + $0xa8] sm:$0xff] }
  0xe3   :  { %988 = vmatprep.subr.bf16.mxu1 %v536_v18  ;;  %v545_v27 = vld [vmem:[#allocation2 + $0x90] sm:$0xff]  ;;  %v547_v28 = vld [vmem:[#allocation2 + $0xa0] sm:$0xff]  ;;  %v552_v29 = vld [vmem:[#allocation2 + $0xc8] sm:$0xff] }
  0xe4   :  { %v554_v30 = vld [vmem:[#allocation2 + $0xd8] sm:$0xff]  ;;  %v551_v31 = vld [vmem:[#allocation2 + $0xc0] sm:$0xff]  ;;  %v553_v32 = vld [vmem:[#allocation2 + $0xd0] sm:$0xff] }
  0xe5   :  { %866 = vmatpush1.bf16.msra.mxu0 %v533_v19  ;;  %v558_v33 = vld [vmem:[#allocation2 + $0xf8] sm:$0xff]  ;;  %v560_v34 = vld [vmem:[#allocation2 + $0x108] sm:$0xff]  ;;  %v557_v35 = vld [vmem:[#allocation2 + $0xf0] sm:$0xff] }
  0xe6   :  { %989 = vmatpush1.bf16.msra.mxu1 %v535_v20  ;;  %867 = vmatprep.subr.bf16.mxu0 %v540_v21  ;;  %v559_v36 = vld [vmem:[#allocation2 + $0x100] sm:$0xff]  ;;  %v564_v37 = vld [vmem:[#allocation2 + $0x128] sm:$0xff]  ;;  %v566_v38 = vld [vmem:[#allocation2 + $0x138] sm:$0xff] }
  0xe7   :  { %990 = vmatprep.subr.bf16.mxu1 %v542_v22  ;;  %v563_v39 = vld [vmem:[#allocation2 + $0x120] sm:$0xff]  ;;  %v565_v40 = vld [vmem:[#allocation2 + $0x130] sm:$0xff]  ;;  %v570_v41 = vld [vmem:[#allocation2 + $0x158] sm:$0xff] }
  0xe8   :  { %v572_v42 = vld [vmem:[#allocation2 + $0x168] sm:$0xff]  ;;  %v569_v43 = vld [vmem:[#allocation2 + $0x150] sm:$0xff]  ;;  %v571_v44 = vld [vmem:[#allocation2 + $0x160] sm:$0xff] }
  0xe9   :  { %868 = vmatpush1.bf16.msra.mxu0 %v539_v23  ;;  %v576_v45 = vld [vmem:[#allocation2 + $0x188] sm:$0xff]  ;;  %v578_v46 = vld [vmem:[#allocation2 + $0x198] sm:$0xff]  ;;  %v575_v47 = vld [vmem:[#allocation2 + $0x180] sm:$0xff] }
  0xea   :  { %991 = vmatpush1.bf16.msra.mxu1 %v541_v24  ;;  %869 = vmatprep.subr.bf16.mxu0 %v546_v25  ;;  %v577_v48 = vld [vmem:[#allocation2 + $0x190] sm:$0xff]  ;;  %v582_v49 = vld [vmem:[#allocation2 + $0x1b8] sm:$0xff]  ;;  %v584_v50 = vld [vmem:[#allocation2 + $0x1c8] sm:$0xff] }
  0xeb   :  { %992 = vmatprep.subr.bf16.mxu1 %v548_v26  ;;  %v581_v51 = vld [vmem:[#allocation2 + $0x1b0] sm:$0xff]  ;;  %v583_v52 = vld [vmem:[#allocation2 + $0x1c0] sm:$0xff]  ;;  %v588_v53 = vld [vmem:[#allocation2 + $0x1e8] sm:$0xff] }
  0xec   :  { %v590_v54 = vld [vmem:[#allocation2 + $0x1f8] sm:$0xff]  ;;  %v587_v55 = vld [vmem:[#allocation2 + $0x1e0] sm:$0xff]  ;;  %v589_v56 = vld [vmem:[#allocation2 + $0x1f0] sm:$0xff] }
  0xed   :  { %870 = vmatpush1.bf16.msra.mxu0 %v545_v27  ;;  %v594_v57 = vld [vmem:[#allocation2 + $0x218] sm:$0xff]  ;;  %v596_v58 = vld [vmem:[#allocation2 + $0x228] sm:$0xff]  ;;  %v593_v59 = vld [vmem:[#allocation2 + $0x210] sm:$0xff]  ;;  %v8238_v27 = vpack.c.bf16 %v8210_v0, %v8210_v0 }
  0xee   :  { %993 = vmatpush1.bf16.msra.mxu1 %v547_v28  ;;  %871 = vmatprep.subr.bf16.mxu0 %v552_v29  ;;  %v595_v60 = vld [vmem:[#allocation2 + $0x220] sm:$0xff]  ;;  %v600_v61 = vld [vmem:[#allocation2 + $0x248] sm:$0xff]  ;;  %v602_v62 = vld [vmem:[#allocation2 + $0x258] sm:$0xff] }
  0xef   :  { %994 = vmatprep.subr.bf16.mxu1 %v554_v30  ;;  %v599_v63 = vld [vmem:[#allocation2 + $0x240] sm:$0xff]  ;;  %v601_v1 = vld [vmem:[#allocation2 + $0x250] sm:$0xff]  ;;  %v606_v13 = vld [vmem:[#allocation2 + $0x278] sm:$0xff] }
  0xf0   :  { %v608_v14 = vld [vmem:[#allocation2 + $0x288] sm:$0xff]  ;;  %v605_v15 = vld [vmem:[#allocation2 + $0x270] sm:$0xff]  ;;  %v607_v16 = vld [vmem:[#allocation2 + $0x280] sm:$0xff] }
  0xf1   :  { %872 = vmatpush1.bf16.msra.mxu0 %v551_v31  ;;  %v612_v17 = vld [vmem:[#allocation2 + $0x2a8] sm:$0xff]  ;;  %v614_v18 = vld [vmem:[#allocation2 + $0x2b8] sm:$0xff]  ;;  %v611_v19 = vld [vmem:[#allocation2 + $0x2a0] sm:$0xff] }
  0xf2   :  { %995 = vmatpush1.bf16.msra.mxu1 %v553_v32  ;;  %873 = vmatprep.subr.bf16.mxu0 %v558_v33  ;;  %v613_v20 = vld [vmem:[#allocation2 + $0x2b0] sm:$0xff]  ;;  %v618_v21 = vld [vmem:[#allocation2 + $0x2d8] sm:$0xff]  ;;  %v620_v22 = vld [vmem:[#allocation2 + $0x2e8] sm:$0xff]  ;;  %v8242_v32 = vpack.c.bf16 %v8214_v3, %v8214_v3 }
  0xf3   :  { %996 = vmatprep.subr.bf16.mxu1 %v560_v34  ;;  %v617_v23 = vld [vmem:[#allocation2 + $0x2d0] sm:$0xff]  ;;  %v619_v24 = vld [vmem:[#allocation2 + $0x2e0] sm:$0xff]  ;;  %v624_v25 = vld [vmem:[#allocation2 + $0x308] sm:$0xff] }
  0xf4   :  { %v626_v26 = vld [vmem:[#allocation2 + $0x318] sm:$0xff]  ;;  %v623_v28 = vld [vmem:[#allocation2 + $0x300] sm:$0xff]  ;;  %v625_v29 = vld [vmem:[#allocation2 + $0x310] sm:$0xff] }
  0xf5   :  { %874 = vmatpush1.bf16.msra.mxu0 %v557_v35  ;;  %v630_v30 = vld [vmem:[#allocation2 + $0x338] sm:$0xff]  ;;  %v632_v31 = vld [vmem:[#allocation2 + $0x348] sm:$0xff]  ;;  %v629_v0 = vld [vmem:[#allocation2 + $0x330] sm:$0xff] }
  0xf6   :  { %997 = vmatpush1.bf16.msra.mxu1 %v559_v36  ;;  %875 = vmatprep.subr.bf16.mxu0 %v564_v37  ;;  %v631_v33 = vld [vmem:[#allocation2 + $0x340] sm:$0xff]  ;;  %v636_v34 = vld [vmem:[#allocation2 + $0x368] sm:$0xff]  ;;  %v638_v35 = vld [vmem:[#allocation2 + $0x378] sm:$0xff] }
  0xf7   :  { %998 = vmatprep.subr.bf16.mxu1 %v566_v38  ;;  %v635_v3 = vld [vmem:[#allocation2 + $0x360] sm:$0xff]  ;;  %v637_v36 = vld [vmem:[#allocation2 + $0x370] sm:$0xff]  ;;  %v642_v37 = vld [vmem:[#allocation2 + $0x398] sm:$0xff] }
  0xf8   :  { %v644_v38 = vld [vmem:[#allocation2 + $0x3a8] sm:$0xff] }
  0xf9   :  { %876 = vmatpush1.bf16.msra.mxu0 %v563_v39  ;;  %v641_v39 = vld [vmem:[#allocation2 + $0x390] sm:$0xff] }
  0xfa   :  { %999 = vmatpush1.bf16.msra.mxu1 %v565_v40  ;;  %877 = vmatprep.subr.bf16.mxu0 %v570_v41  ;;  %v643_v40 = vld [vmem:[#allocation2 + $0x3a0] sm:$0xff]  ;;  %v648_v41 = vld [vmem:[#allocation2 + $0x3c8] sm:$0xff] }
  0xfb   :  { %1000 = vmatprep.subr.bf16.mxu1 %v572_v42  ;;  %v650_v42 = vld [vmem:[#allocation2 + $0x3d8] sm:$0xff] }
  0xfd   :  { %878 = vmatpush1.bf16.msra.mxu0 %v569_v43  ;;  %v647_v43 = vld [vmem:[#allocation2 + $0x3c0] sm:$0xff] }
  0xfe   :  { %1001 = vmatpush1.bf16.msra.mxu1 %v571_v44  ;;  %879 = vmatprep.subr.bf16.mxu0 %v576_v45  ;;  %v649_v44 = vld [vmem:[#allocation2 + $0x3d0] sm:$0xff]  ;;  %v654_v45 = vld [vmem:[#allocation2 + $0x3f8] sm:$0xff] }
  0xff   :  { %1002 = vmatprep.subr.bf16.mxu1 %v578_v46  ;;  %v656_v46 = vld [vmem:[#allocation2 + $0x408] sm:$0xff] }
 0x101   :  { %880 = vmatpush1.bf16.msra.mxu0 %v575_v47  ;;  %v653_v47 = vld [vmem:[#allocation2 + $0x3f0] sm:$0xff] }
 0x102   :  { %1003 = vmatpush1.bf16.msra.mxu1 %v577_v48  ;;  %881 = vmatprep.subr.bf16.mxu0 %v582_v49  ;;  %v655_v48 = vld [vmem:[#allocation2 + $0x400] sm:$0xff]  ;;  %v660_v49 = vld [vmem:[#allocation2 + $0x428] sm:$0xff] }
 0x103   :  { %1004 = vmatprep.subr.bf16.mxu1 %v584_v50  ;;  %v662_v50 = vld [vmem:[#allocation2 + $0x438] sm:$0xff] }
 0x105   :  { %882 = vmatpush1.bf16.msra.mxu0 %v581_v51  ;;  %v659_v51 = vld [vmem:[#allocation2 + $0x420] sm:$0xff] }
 0x106   :  { %1005 = vmatpush1.bf16.msra.mxu1 %v583_v52  ;;  %883 = vmatprep.subr.bf16.mxu0 %v588_v53  ;;  %v661_v52 = vld [vmem:[#allocation2 + $0x430] sm:$0xff]  ;;  %v666_v53 = vld [vmem:[#allocation2 + $0x458] sm:$0xff] }
 0x107   :  { %1006 = vmatprep.subr.bf16.mxu1 %v590_v54  ;;  %v668_v54 = vld [vmem:[#allocation2 + $0x468] sm:$0xff] }
 0x109   :  { %884 = vmatpush1.bf16.msra.mxu0 %v587_v55  ;;  %v665_v55 = vld [vmem:[#allocation2 + $0x450] sm:$0xff] }
 0x10a   :  { %1007 = vmatpush1.bf16.msra.mxu1 %v589_v56  ;;  %885 = vmatprep.subr.bf16.mxu0 %v594_v57  ;;  %v667_v56 = vld [vmem:[#allocation2 + $0x460] sm:$0xff]  ;;  %v672_v57 = vld [vmem:[#allocation2 + $0x488] sm:$0xff] }
 0x10b   :  { %1008 = vmatprep.subr.bf16.mxu1 %v596_v58  ;;  %v674_v58 = vld [vmem:[#allocation2 + $0x498] sm:$0xff] }
 0x10d   :  { %886 = vmatpush1.bf16.msra.mxu0 %v593_v59  ;;  %v671_v59 = vld [vmem:[#allocation2 + $0x480] sm:$0xff] }
 0x10e   :  { %1009 = vmatpush1.bf16.msra.mxu1 %v595_v60  ;;  %887 = vmatprep.subr.bf16.mxu0 %v600_v61  ;;  %v673_v60 = vld [vmem:[#allocation2 + $0x490] sm:$0xff]  ;;  %v678_v61 = vld [vmem:[#allocation2 + $0x4b8] sm:$0xff] }
 0x10f   :  { %1010 = vmatprep.subr.bf16.mxu1 %v602_v62  ;;  %v680_v62 = vld [vmem:[#allocation2 + $0x4c8] sm:$0xff] }
 0x111   :  { %888 = vmatpush1.bf16.msra.mxu0 %v599_v63  ;;  %v677_v63 = vld [vmem:[#allocation2 + $0x4b0] sm:$0xff] }
 0x112   :  { %1011 = vmatpush1.bf16.msra.mxu1 %v601_v1  ;;  %889 = vmatprep.subr.bf16.mxu0 %v606_v13  ;;  %v679_v1 = vld [vmem:[#allocation2 + $0x4c0] sm:$0xff]  ;;  %v684_v13 = vld [vmem:[#allocation2 + $0x4e8] sm:$0xff] }
 0x113   :  { %1012 = vmatprep.subr.bf16.mxu1 %v608_v14  ;;  %v686_v14 = vld [vmem:[#allocation2 + $0x4f8] sm:$0xff] }
 0x115   :  { %890 = vmatpush1.bf16.msra.mxu0 %v605_v15  ;;  %v683_v15 = vld [vmem:[#allocation2 + $0x4e0] sm:$0xff] }
 0x116   :  { %1013 = vmatpush1.bf16.msra.mxu1 %v607_v16  ;;  %891 = vmatprep.subr.bf16.mxu0 %v612_v17  ;;  %v685_v16 = vld [vmem:[#allocation2 + $0x4f0] sm:$0xff]  ;;  %v690_v17 = vld [vmem:[#allocation2 + $0x518] sm:$0xff] }
 0x117   :  { %1014 = vmatprep.subr.bf16.mxu1 %v614_v18  ;;  %v692_v18 = vld [vmem:[#allocation2 + $0x528] sm:$0xff] }
 0x119   :  { %892 = vmatpush1.bf16.msra.mxu0 %v611_v19  ;;  %v689_v19 = vld [vmem:[#allocation2 + $0x510] sm:$0xff] }
 0x11a   :  { %1015 = vmatpush1.bf16.msra.mxu1 %v613_v20  ;;  %893 = vmatprep.subr.bf16.mxu0 %v618_v21  ;;  %v691_v20 = vld [vmem:[#allocation2 + $0x520] sm:$0xff]  ;;  %v696_v21 = vld [vmem:[#allocation2 + $0x548] sm:$0xff] }
 0x11b   :  { %1016 = vmatprep.subr.bf16.mxu1 %v620_v22  ;;  %v698_v22 = vld [vmem:[#allocation2 + $0x558] sm:$0xff] }
 0x11d   :  { %894 = vmatpush1.bf16.msra.mxu0 %v617_v23  ;;  %v695_v23 = vld [vmem:[#allocation2 + $0x540] sm:$0xff] }
 0x11e   :  { %1017 = vmatpush1.bf16.msra.mxu1 %v619_v24  ;;  %904 = vmatprep.subr.bf16.mxu0 %v624_v25  ;;  %v697_v24 = vld [vmem:[#allocation2 + $0x550] sm:$0xff]  ;;  %v702_v25 = vld [vmem:[#allocation2 + $0x578] sm:$0xff] }
 0x11f   :  { %1027 = vmatprep.subr.bf16.mxu1 %v626_v26  ;;  %v704_v26 = vld [vmem:[#allocation2 + $0x588] sm:$0xff] }
 0x120   :  { %896 = vmatmul.mubr.bf16.vlgmr.msra.gmra.mrb[0].mxu0 %v8238_v27 }
 0x121   :  { %1019 = vmatmul.mubr.bf16.vlgmr.msra.gmra.mrb[0].mxu1 %v8238_v27  ;;  %905 = vmatpush1.bf16.msra.mxu0 %v623_v28  ;;  %v701_v28 = vld [vmem:[#allocation2 + $0x570] sm:$0xff] }
 0x122   :  { %1028 = vmatpush1.bf16.msra.mxu1 %v625_v29  ;;  %906 = vmatprep.subr.bf16.mxu0 %v630_v30  ;;  %v703_v29 = vld [vmem:[#allocation2 + $0x580] sm:$0xff]  ;;  %v708_v30 = vld [vmem:[#allocation2 + $0x5a8] sm:$0xff] }
 0x123   :  { %1029 = vmatprep.subr.bf16.mxu1 %v632_v31  ;;  %936 = vmatprep.mubr.bf16.mxu0 %v8242_v32  ;;  %v710_v31 = vld [vmem:[#allocation2 + $0x5b8] sm:$0xff] }
 0x124   :  { %1059 = vmatprep.mubr.bf16.mxu1 %v8242_v32 }
 0x125   :  { %907 = vmatpush1.bf16.msra.mxu0 %v629_v0  ;;  %v707_v0 = vld [vmem:[#allocation2 + $0x5a0] sm:$0xff] }
 0x126   :  { %1030 = vmatpush1.bf16.msra.mxu1 %v631_v33  ;;  %908 = vmatprep.subr.bf16.mxu0 %v636_v34  ;;  %v709_v33 = vld [vmem:[#allocation2 + $0x5b0] sm:$0xff]  ;;  %v714_v34 = vld [vmem:[#allocation2 + $0x5d8] sm:$0xff] }
 0x127   :  { %1031 = vmatprep.subr.bf16.mxu1 %v638_v35  ;;  %v716_v35 = vld [vmem:[#allocation2 + $0x5e8] sm:$0xff] }
 0x129   :  { %909 = vmatpush1.bf16.msra.mxu0 %v635_v3  ;;  %v713_v3 = vld [vmem:[#allocation2 + $0x5d0] sm:$0xff] }
 0x12a   :  { %1032 = vmatpush1.bf16.msra.mxu1 %v637_v36  ;;  %910 = vmatprep.subr.bf16.mxu0 %v642_v37  ;;  %v715_v36 = vld [vmem:[#allocation2 + $0x5e0] sm:$0xff]  ;;  %v720_v37 = vld [vmem:[#allocation2 + $0x608] sm:$0xff] }
 0x12b   :  { %1033 = vmatprep.subr.bf16.mxu1 %v644_v38  ;;  %v722_v38 = vld [vmem:[#allocation2 + $0x618] sm:$0xff] }
 0x12d   :  { %911 = vmatpush1.bf16.msra.mxu0 %v641_v39  ;;  %v8250_v39 = vpack.c.bf16 %v8212_v2, %v8212_v2  ;;  %v725_v2 = vld [vmem:[#allocation2 + $0x630] sm:$0xff] }
 0x12e   :  { %1034 = vmatpush1.bf16.msra.mxu1 %v643_v40  ;;  %912 = vmatprep.subr.bf16.mxu0 %v648_v41  ;;  %v719_v40 = vld [vmem:[#allocation2 + $0x600] sm:$0xff]  ;;  %v721_v41 = vld [vmem:[#allocation2 + $0x610] sm:$0xff] }
 0x12f   :  { %1035 = vmatprep.subr.bf16.mxu1 %v650_v42  ;;  %v726_v42 = vld [vmem:[#allocation2 + $0x638] sm:$0xff] }
 0x131   :  { %913 = vmatpush1.bf16.msra.mxu0 %v647_v43  ;;  %v728_v43 = vld [vmem:[#allocation2 + $0x648] sm:$0xff] }
 0x132   :  { %1036 = vmatpush1.bf16.msra.mxu1 %v649_v44  ;;  %914 = vmatprep.subr.bf16.mxu0 %v654_v45  ;;  %v8254_v44 = vpack.c.bf16 %v8218_v5, %v8218_v5  ;;  %v727_v45 = vld [vmem:[#allocation2 + $0x640] sm:$0xff] }
 0x133   :  { %1037 = vmatprep.subr.bf16.mxu1 %v656_v46  ;;  %v732_v46 = vld [vmem:[#allocation2 + $0x668] sm:$0xff]  ;;  %v731_v5 = vld [vmem:[#allocation2 + $0x660] sm:$0xff] }
 0x135   :  { %915 = vmatpush1.bf16.msra.mxu0 %v653_v47  ;;  %v734_v47 = vld [vmem:[#allocation2 + $0x678] sm:$0xff] }
 0x136   :  { %1038 = vmatpush1.bf16.msra.mxu1 %v655_v48  ;;  %916 = vmatprep.subr.bf16.mxu0 %v660_v49  ;;  %v733_v48 = vld [vmem:[#allocation2 + $0x670] sm:$0xff]  ;;  %v738_v49 = vld [vmem:[#allocation2 + $0x698] sm:$0xff] }
 0x137   :  { %1039 = vmatprep.subr.bf16.mxu1 %v662_v50  ;;  %v740_v50 = vld [vmem:[#allocation2 + $0x6a8] sm:$0xff] }
 0x139   :  { %917 = vmatpush1.bf16.msra.mxu0 %v659_v51  ;;  %v737_v51 = vld [vmem:[#allocation2 + $0x690] sm:$0xff] }
 0x13a   :  { %1040 = vmatpush1.bf16.msra.mxu1 %v661_v52  ;;  %918 = vmatprep.subr.bf16.mxu0 %v666_v53  ;;  %v739_v52 = vld [vmem:[#allocation2 + $0x6a0] sm:$0xff]  ;;  %v744_v53 = vld [vmem:[#allocation2 + $0x6c8] sm:$0xff] }
 0x13b   :  { %1041 = vmatprep.subr.bf16.mxu1 %v668_v54  ;;  %v746_v54 = vld [vmem:[#allocation2 + $0x6d8] sm:$0xff] }
 0x13d   :  { %919 = vmatpush1.bf16.msra.mxu0 %v665_v55  ;;  %v743_v55 = vld [vmem:[#allocation2 + $0x6c0] sm:$0xff] }
 0x13e   :  { %1042 = vmatpush1.bf16.msra.mxu1 %v667_v56  ;;  %920 = vmatprep.subr.bf16.mxu0 %v672_v57  ;;  %v745_v56 = vld [vmem:[#allocation2 + $0x6d0] sm:$0xff]  ;;  %v750_v57 = vld [vmem:[#allocation2 + $0x6f8] sm:$0xff] }
 0x13f   :  { %1043 = vmatprep.subr.bf16.mxu1 %v674_v58  ;;  %v752_v58 = vld [vmem:[#allocation2 + $0x708] sm:$0xff] }
 0x141   :  { %921 = vmatpush1.bf16.msra.mxu0 %v671_v59  ;;  %v749_v59 = vld [vmem:[#allocation2 + $0x6f0] sm:$0xff] }
 0x142   :  { %1044 = vmatpush1.bf16.msra.mxu1 %v673_v60  ;;  %922 = vmatprep.subr.bf16.mxu0 %v678_v61  ;;  %v751_v60 = vld [vmem:[#allocation2 + $0x700] sm:$0xff]  ;;  %v756_v61 = vld [vmem:[#allocation2 + $0x728] sm:$0xff] }
 0x143   :  { %1045 = vmatprep.subr.bf16.mxu1 %v680_v62  ;;  %v758_v62 = vld [vmem:[#allocation2 + $0x738] sm:$0xff] }
 0x145   :  { %923 = vmatpush1.bf16.msra.mxu0 %v677_v63  ;;  %v755_v63 = vld [vmem:[#allocation2 + $0x720] sm:$0xff] }
 0x146   :  { %1046 = vmatpush1.bf16.msra.mxu1 %v679_v1  ;;  %924 = vmatprep.subr.bf16.mxu0 %v684_v13  ;;  %v757_v1 = vld [vmem:[#allocation2 + $0x730] sm:$0xff]  ;;  %v762_v13 = vld [vmem:[#allocation2 + $0x758] sm:$0xff] }
 0x147   :  { %1047 = vmatprep.subr.bf16.mxu1 %v686_v14  ;;  %v764_v14 = vld [vmem:[#allocation2 + $0x768] sm:$0xff] }
 0x149   :  { %925 = vmatpush1.bf16.msra.mxu0 %v683_v15  ;;  %v761_v15 = vld [vmem:[#allocation2 + $0x750] sm:$0xff] }
 0x14a   :  { %1048 = vmatpush1.bf16.msra.mxu1 %v685_v16  ;;  %926 = vmatprep.subr.bf16.mxu0 %v690_v17  ;;  %v763_v16 = vld [vmem:[#allocation2 + $0x760] sm:$0xff]  ;;  %v768_v17 = vld [vmem:[#allocation2 + $0x788] sm:$0xff] }
 0x14b   :  { %1049 = vmatprep.subr.bf16.mxu1 %v692_v18  ;;  %v770_v18 = vld [vmem:[#allocation2 + $0x798] sm:$0xff] }
 0x14d   :  { %927 = vmatpush1.bf16.msra.mxu0 %v689_v19  ;;  %v767_v19 = vld [vmem:[#allocation2 + $0x780] sm:$0xff] }
 0x14e   :  { %1050 = vmatpush1.bf16.msra.mxu1 %v691_v20  ;;  %928 = vmatprep.subr.bf16.mxu0 %v696_v21  ;;  %v769_v20 = vld [vmem:[#allocation2 + $0x790] sm:$0xff]  ;;  %v774_v21 = vld [vmem:[#allocation2 + $0x7b8] sm:$0xff] }
 0x14f   :  { %1051 = vmatprep.subr.bf16.mxu1 %v698_v22  ;;  %v776_v22 = vld [vmem:[#allocation2 + $0x7c8] sm:$0xff] }
 0x151   :  { %929 = vmatpush1.bf16.msra.mxu0 %v695_v23  ;;  %v773_v23 = vld [vmem:[#allocation2 + $0x7b0] sm:$0xff] }
 0x152   :  { %1052 = vmatpush1.bf16.msra.mxu1 %v697_v24  ;;  %930 = vmatprep.subr.bf16.mxu0 %v702_v25  ;;  %v775_v24 = vld [vmem:[#allocation2 + $0x7c0] sm:$0xff]  ;;  %v780_v25 = vld [vmem:[#allocation2 + $0x7e8] sm:$0xff] }
 0x153   :  { %1053 = vmatprep.subr.bf16.mxu1 %v704_v26  ;;  %v782_v26 = vld [vmem:[#allocation2 + $0x7f8] sm:$0xff] }
 0x155   :  { %931 = vmatpush1.bf16.msra.mxu0 %v701_v28  ;;  %v779_v28 = vld [vmem:[#allocation2 + $0x7e0] sm:$0xff] }
 0x156   :  { %1054 = vmatpush1.bf16.msra.mxu1 %v703_v29  ;;  %932 = vmatprep.subr.bf16.mxu0 %v708_v30  ;;  %v781_v29 = vld [vmem:[#allocation2 + $0x7f0] sm:$0xff]  ;;  %v786_v30 = vld [vmem:[#allocation2 + $0x818] sm:$0xff] }
 0x157   :  { %1055 = vmatprep.subr.bf16.mxu1 %v710_v31  ;;  %v788_v31 = vld [vmem:[#allocation2 + $0x828] sm:$0xff] }
 0x159   :  { %933 = vmatpush1.bf16.msra.mxu0 %v707_v0  ;;  %v785_v0 = vld [vmem:[#allocation2 + $0x810] sm:$0xff] }
 0x15a   :  { %1056 = vmatpush1.bf16.msra.mxu1 %v709_v33  ;;  %934 = vmatprep.subr.bf16.mxu0 %v714_v34  ;;  %v787_v33 = vld [vmem:[#allocation2 + $0x820] sm:$0xff]  ;;  %v792_v34 = vld [vmem:[#allocation2 + $0x848] sm:$0xff] }
 0x15b   :  { %1057 = vmatprep.subr.bf16.mxu1 %v716_v35  ;;  %v794_v35 = vld [vmem:[#allocation2 + $0x858] sm:$0xff] }
 0x15d   :  { %935 = vmatpush1.bf16.msra.mxu0 %v713_v3  ;;  %v791_v3 = vld [vmem:[#allocation2 + $0x840] sm:$0xff] }
 0x15e   :  { %1058 = vmatpush1.bf16.msra.mxu1 %v715_v36  ;;  %945 = vmatprep.subr.bf16.mxu0 %v720_v37  ;;  %v793_v36 = vld [vmem:[#allocation2 + $0x850] sm:$0xff]  ;;  %v798_v37 = vld [vmem:[#allocation2 + $0x878] sm:$0xff] }
 0x15f   :  { %1068 = vmatprep.subr.bf16.mxu1 %v722_v38  ;;  %v800_v38 = vld [vmem:[#allocation2 + $0x888] sm:$0xff] }
 0x160   :  { %937 = vmatmul.mubr.bf16.vlgmr.msra.gmra.mrb[0].mxu0 %v8250_v39 }
 0x161   :  { %1060 = vmatmul.mubr.bf16.vlgmr.msra.gmra.mrb[0].mxu1 %v8250_v39  ;;  %946 = vmatpush1.bf16.msra.mxu0 %v719_v40  ;;  %v797_v40 = vld [vmem:[#allocation2 + $0x870] sm:$0xff] }
 0x162   :  { %1069 = vmatpush1.bf16.msra.mxu1 %v721_v41  ;;  %947 = vmatprep.subr.bf16.mxu0 %v726_v42  ;;  %v799_v41 = vld [vmem:[#allocation2 + $0x880] sm:$0xff]  ;;  %v804_v42 = vld [vmem:[#allocation2 + $0x8a8] sm:$0xff] }
 0x163   :  { %1070 = vmatprep.subr.bf16.mxu1 %v728_v43  ;;  %977 = vmatprep.mubr.bf16.mxu0 %v8254_v44  ;;  %v806_v43 = vld [vmem:[#allocation2 + $0x8b8] sm:$0xff] }
 0x164   :  { %1100 = vmatprep.mubr.bf16.mxu1 %v8254_v44 }
 0x165   :  { %948 = vmatpush1.bf16.msra.mxu0 %v725_v2  ;;  %v803_v2 = vld [vmem:[#allocation2 + $0x8a0] sm:$0xff] }
 0x166   :  { %1071 = vmatpush1.bf16.msra.mxu1 %v727_v45  ;;  %949 = vmatprep.subr.bf16.mxu0 %v732_v46  ;;  %v805_v45 = vld [vmem:[#allocation2 + $0x8b0] sm:$0xff]  ;;  %v810_v46 = vld [vmem:[#allocation2 + $0x8d8] sm:$0xff] }
 0x167   :  { %1072 = vmatprep.subr.bf16.mxu1 %v734_v47  ;;  %v812_v47 = vld [vmem:[#allocation2 + $0x8e8] sm:$0xff] }
 0x169   :  { %950 = vmatpush1.bf16.msra.mxu0 %v731_v5  ;;  %v809_v5 = vld [vmem:[#allocation2 + $0x8d0] sm:$0xff] }
 0x16a   :  { %1073 = vmatpush1.bf16.msra.mxu1 %v733_v48  ;;  %951 = vmatprep.subr.bf16.mxu0 %v738_v49  ;;  %v811_v48 = vld [vmem:[#allocation2 + $0x8e0] sm:$0xff]  ;;  %v532_v49 = vld [vmem:[#allocation2 + $0x28] sm:$0xff] }
 0x16b   :  { %1074 = vmatprep.subr.bf16.mxu1 %v740_v50  ;;  %v8262_v50 = vpack.c.bf16 %v8216_v4, %v8216_v4  ;;  %v550_v4 = vld [vmem:[#allocation2 + $0xb8] sm:$0xff] }
 0x16d   :  { %952 = vmatpush1.bf16.msra.mxu0 %v737_v51  ;;  %v531_v51 = vld [vmem:[#allocation2 + $0x20] sm:$0xff] }
 0x16e   :  { %1075 = vmatpush1.bf16.msra.mxu1 %v739_v52  ;;  %953 = vmatprep.subr.bf16.mxu0 %v744_v53  ;;  %v538_v52 = vld [vmem:[#allocation2 + $0x58] sm:$0xff]  ;;  %v537_v53 = vld [vmem:[#allocation2 + $0x50] sm:$0xff] }
 0x16f   :  { %1076 = vmatprep.subr.bf16.mxu1 %v746_v54  ;;  %v544_v54 = vld [vmem:[#allocation2 + $0x88] sm:$0xff] }
 0x171   :  { %954 = vmatpush1.bf16.msra.mxu0 %v743_v55  ;;  %v543_v55 = vld [vmem:[#allocation2 + $0x80] sm:$0xff] }
 0x172   :  { %1077 = vmatpush1.bf16.msra.mxu1 %v745_v56  ;;  %955 = vmatprep.subr.bf16.mxu0 %v750_v57  ;;  %v549_v56 = vld [vmem:[#allocation2 + $0xb0] sm:$0xff]  ;;  %v556_v57 = vld [vmem:[#allocation2 + $0xe8] sm:$0xff] }
 0x173   :  { %1078 = vmatprep.subr.bf16.mxu1 %v752_v58  ;;  %v555_v58 = vld [vmem:[#allocation2 + $0xe0] sm:$0xff] }
 0x175   :  { %956 = vmatpush1.bf16.msra.mxu0 %v749_v59  ;;  %v562_v59 = vld [vmem:[#allocation2 + $0x118] sm:$0xff] }
 0x176   :  { %1079 = vmatpush1.bf16.msra.mxu1 %v751_v60  ;;  %957 = vmatprep.subr.bf16.mxu0 %v756_v61  ;;  %v561_v60 = vld [vmem:[#allocation2 + $0x110] sm:$0xff]  ;;  %v568_v61 = vld [vmem:[#allocation2 + $0x148] sm:$0xff] }
 0x177   :  { %1080 = vmatprep.subr.bf16.mxu1 %v758_v62  ;;  %v574_v62 = vld [vmem:[#allocation2 + $0x178] sm:$0xff] }
 0x179   :  { %958 = vmatpush1.bf16.msra.mxu0 %v755_v63  ;;  %v573_v63 = vld [vmem:[#allocation2 + $0x170] sm:$0xff] }
 0x17a   :  { %1081 = vmatpush1.bf16.msra.mxu1 %v757_v1  ;;  %959 = vmatprep.subr.bf16.mxu0 %v762_v13  ;;  %v580_v1 = vld [vmem:[#allocation2 + $0x1a8] sm:$0xff]  ;;  %v579_v13 = vld [vmem:[#allocation2 + $0x1a0] sm:$0xff] }
 0x17b   :  { %1082 = vmatprep.subr.bf16.mxu1 %v764_v14  ;;  %v586_v14 = vld [vmem:[#allocation2 + $0x1d8] sm:$0xff] }
 0x17d   :  { %960 = vmatpush1.bf16.msra.mxu0 %v761_v15  ;;  %v585_v15 = vld [vmem:[#allocation2 + $0x1d0] sm:$0xff] }
 0x17e   :  { %1083 = vmatpush1.bf16.msra.mxu1 %v763_v16  ;;  %961 = vmatprep.subr.bf16.mxu0 %v768_v17  ;;  %v592_v16 = vld [vmem:[#allocation2 + $0x208] sm:$0xff]  ;;  %v591_v17 = vld [vmem:[#allocation2 + $0x200] sm:$0xff] }
 0x17f   :  { %1084 = vmatprep.subr.bf16.mxu1 %v770_v18  ;;  %v598_v18 = vld [vmem:[#allocation2 + $0x238] sm:$0xff] }
 0x181   :  { %962 = vmatpush1.bf16.msra.mxu0 %v767_v19  ;;  %v597_v19 = vld [vmem:[#allocation2 + $0x230] sm:$0xff] }
 0x182   :  { %1085 = vmatpush1.bf16.msra.mxu1 %v769_v20  ;;  %963 = vmatprep.subr.bf16.mxu0 %v774_v21  ;;  %v604_v20 = vld [vmem:[#allocation2 + $0x268] sm:$0xff]  ;;  %v603_v21 = vld [vmem:[#allocation2 + $0x260] sm:$0xff] }
 0x183   :  { %1086 = vmatprep.subr.bf16.mxu1 %v776_v22  ;;  %v610_v22 = vld [vmem:[#allocation2 + $0x298] sm:$0xff] }
 0x185   :  { %964 = vmatpush1.bf16.msra.mxu0 %v773_v23  ;;  %v609_v23 = vld [vmem:[#allocation2 + $0x290] sm:$0xff] }
 0x186   :  { %1087 = vmatpush1.bf16.msra.mxu1 %v775_v24  ;;  %965 = vmatprep.subr.bf16.mxu0 %v780_v25  ;;  %v616_v24 = vld [vmem:[#allocation2 + $0x2c8] sm:$0xff]  ;;  %v615_v25 = vld [vmem:[#allocation2 + $0x2c0] sm:$0xff] }
 0x187   :  { %1088 = vmatprep.subr.bf16.mxu1 %v782_v26  ;;  %v622_v26 = vld [vmem:[#allocation2 + $0x2f8] sm:$0xff] }
 0x189   :  { %966 = vmatpush1.bf16.msra.mxu0 %v779_v28  ;;  %v621_v28 = vld [vmem:[#allocation2 + $0x2f0] sm:$0xff] }
 0x18a   :  { %1089 = vmatpush1.bf16.msra.mxu1 %v781_v29  ;;  %967 = vmatprep.subr.bf16.mxu0 %v786_v30  ;;  %v628_v29 = vld [vmem:[#allocation2 + $0x328] sm:$0xff]  ;;  %v627_v30 = vld [vmem:[#allocation2 + $0x320] sm:$0xff] }
 0x18b   :  { %1090 = vmatprep.subr.bf16.mxu1 %v788_v31  ;;  %v634_v31 = vld [vmem:[#allocation2 + $0x358] sm:$0xff] }
 0x18d   :  { %968 = vmatpush1.bf16.msra.mxu0 %v785_v0  ;;  %v633_v0 = vld [vmem:[#allocation2 + $0x350] sm:$0xff] }
 0x18e   :  { %1091 = vmatpush1.bf16.msra.mxu1 %v787_v33  ;;  %969 = vmatprep.subr.bf16.mxu0 %v792_v34  ;;  %v640_v33 = vld [vmem:[#allocation2 + $0x388] sm:$0xff]  ;;  %v639_v34 = vld [vmem:[#allocation2 + $0x380] sm:$0xff] }
 0x18f   :  { %1092 = vmatprep.subr.bf16.mxu1 %v794_v35  ;;  %v646_v35 = vld [vmem:[#allocation2 + $0x3b8] sm:$0xff] }
 0x191   :  { %970 = vmatpush1.bf16.msra.mxu0 %v791_v3  ;;  %v645_v3 = vld [vmem:[#allocation2 + $0x3b0] sm:$0xff] }
 0x192   :  { %1093 = vmatpush1.bf16.msra.mxu1 %v793_v36  ;;  %971 = vmatprep.subr.bf16.mxu0 %v798_v37  ;;  %v652_v36 = vld [vmem:[#allocation2 + $0x3e8] sm:$0xff]  ;;  %v651_v37 = vld [vmem:[#allocation2 + $0x3e0] sm:$0xff] }
 0x193   :  { %1094 = vmatprep.subr.bf16.mxu1 %v800_v38  ;;  %v658_v38 = vld [vmem:[#allocation2 + $0x418] sm:$0xff] }
 0x195   :  { %972 = vmatpush1.bf16.msra.mxu0 %v797_v40  ;;  %v664_v40 = vld [vmem:[#allocation2 + $0x448] sm:$0xff] }
 0x196   :  { %1095 = vmatpush1.bf16.msra.mxu1 %v799_v41  ;;  %973 = vmatprep.subr.bf16.mxu0 %v804_v42  ;;  %v670_v41 = vld [vmem:[#allocation2 + $0x478] sm:$0xff]  ;;  %v669_v42 = vld [vmem:[#allocation2 + $0x470] sm:$0xff] }
 0x197   :  { %1096 = vmatprep.subr.bf16.mxu1 %v806_v43  ;;  %v676_v43 = vld [vmem:[#allocation2 + $0x4a8] sm:$0xff] }
 0x199   :  { %974 = vmatpush1.bf16.msra.mxu0 %v803_v2  ;;  %v675_v2 = vld [vmem:[#allocation2 + $0x4a0] sm:$0xff] }
 0x19a   :  { %1097 = vmatpush1.bf16.msra.mxu1 %v805_v45  ;;  %975 = vmatprep.subr.bf16.mxu0 %v810_v46  ;;  %v682_v45 = vld [vmem:[#allocation2 + $0x4d8] sm:$0xff]  ;;  %v681_v46 = vld [vmem:[#allocation2 + $0x4d0] sm:$0xff] }
 0x19b   :  { %1098 = vmatprep.subr.bf16.mxu1 %v812_v47  ;;  %v688_v47 = vld [vmem:[#allocation2 + $0x508] sm:$0xff] }
 0x19d   :  { %976 = vmatpush1.bf16.msra.mxu0 %v809_v5  ;;  %v687_v5 = vld [vmem:[#allocation2 + $0x500] sm:$0xff] }
 0x19e   :  { %1099 = vmatpush1.bf16.msra.mxu1 %v811_v48  ;;  %1109 = vmatprep.subr.bf16.mxu0 %v532_v49  ;;  %v694_v48 = vld [vmem:[#allocation2 + $0x538] sm:$0xff]  ;;  %v693_v49 = vld [vmem:[#allocation2 + $0x530] sm:$0xff] }
 0x1a0   :  { %978 = vmatmul.mubr.bf16.vlgmr.msra.gmra.mrb[0].mxu0 %v8262_v50 }
 0x1a1   :  { %1101 = vmatmul.mubr.bf16.vlgmr.msra.gmra.mrb[0].mxu1 %v8262_v50  ;;  %1110 = vmatpush1.bf16.msra.mxu0 %v531_v51  ;;  %v700_v51 = vld [vmem:[#allocation2 + $0x568] sm:$0xff] }
 0x1a2   :  { %1141 = vmatprep.mubr.bf16.mxu0 %v8232_v12  ;;  %1111 = vmatprep.subr.bf16.mxu0 %v538_v52  ;;  %v567_v12 = vld [vmem:[#allocation2 + $0x140] sm:$0xff] }
 0x1a3   :  { %v699_v52 = vld [vmem:[#allocation2 + $0x560] sm:$0xff] }
 0x1a5   :  { %1112 = vmatpush1.bf16.msra.mxu0 %v537_v53  ;;  %v706_v53 = vld [vmem:[#allocation2 + $0x598] sm:$0xff] }
 0x1a6   :  { %1113 = vmatprep.subr.bf16.mxu0 %v544_v54  ;;  %v705_v54 = vld [vmem:[#allocation2 + $0x590] sm:$0xff] }
 0x1a9   :  { %1114 = vmatpush1.bf16.msra.mxu0 %v543_v55  ;;  %v712_v55 = vld [vmem:[#allocation2 + $0x5c8] sm:$0xff] }
 0x1aa   :  { %1115 = vmatprep.subr.bf16.mxu0 %v550_v4  ;;  %v711_v4 = vld [vmem:[#allocation2 + $0x5c0] sm:$0xff] }
 0x1ad   :  { %1116 = vmatpush1.bf16.msra.mxu0 %v549_v56  ;;  %v718_v56 = vld [vmem:[#allocation2 + $0x5f8] sm:$0xff] }
 0x1ae   :  { %1117 = vmatprep.subr.bf16.mxu0 %v556_v57  ;;  %v717_v57 = vld [vmem:[#allocation2 + $0x5f0] sm:$0xff] }
 0x1b1   :  { %1118 = vmatpush1.bf16.msra.mxu0 %v555_v58  ;;  %v724_v58 = vld [vmem:[#allocation2 + $0x628] sm:$0xff] }
 0x1b2   :  { %1119 = vmatprep.subr.bf16.mxu0 %v562_v59  ;;  %v723_v59 = vld [vmem:[#allocation2 + $0x620] sm:$0xff] }
 0x1b5   :  { %1120 = vmatpush1.bf16.msra.mxu0 %v561_v60  ;;  %v730_v60 = vld [vmem:[#allocation2 + $0x658] sm:$0xff] }
 0x1b6   :  { %1121 = vmatprep.subr.bf16.mxu0 %v568_v61  ;;  %v729_v61 = vld [vmem:[#allocation2 + $0x650] sm:$0xff] }
 0x1b9   :  { %1122 = vmatpush1.bf16.msra.mxu0 %v567_v12  ;;  %v736_v12 = vld [vmem:[#allocation2 + $0x688] sm:$0xff] }
 0x1ba   :  { %1123 = vmatprep.subr.bf16.mxu0 %v574_v62  ;;  %v735_v62 = vld [vmem:[#allocation2 + $0x680] sm:$0xff] }
 0x1bd   :  { %1124 = vmatpush1.bf16.msra.mxu0 %v573_v63  ;;  %v742_v63 = vld [vmem:[#allocation2 + $0x6b8] sm:$0xff] }
 0x1be   :  { %1125 = vmatprep.subr.bf16.mxu0 %v580_v1  ;;  %v741_v1 = vld [vmem:[#allocation2 + $0x6b0] sm:$0xff] }
 0x1c1   :  { %1126 = vmatpush1.bf16.msra.mxu0 %v579_v13  ;;  %v748_v13 = vld [vmem:[#allocation2 + $0x6e8] sm:$0xff] }
 0x1c2   :  { %1127 = vmatprep.subr.bf16.mxu0 %v586_v14  ;;  %v747_v14 = vld [vmem:[#allocation2 + $0x6e0] sm:$0xff] }
 0x1c5   :  { %1128 = vmatpush1.bf16.msra.mxu0 %v585_v15  ;;  %v754_v15 = vld [vmem:[#allocation2 + $0x718] sm:$0xff] }
 0x1c6   :  { %1129 = vmatprep.subr.bf16.mxu0 %v592_v16  ;;  %v760_v16 = vld [vmem:[#allocation2 + $0x748] sm:$0xff] }
 0x1c9   :  { %1130 = vmatpush1.bf16.msra.mxu0 %v591_v17  ;;  %v766_v17 = vld [vmem:[#allocation2 + $0x778] sm:$0xff] }
 0x1ca   :  { %1131 = vmatprep.subr.bf16.mxu0 %v598_v18  ;;  %v765_v18 = vld [vmem:[#allocation2 + $0x770] sm:$0xff] }
 0x1cd   :  { %1132 = vmatpush1.bf16.msra.mxu0 %v597_v19  ;;  %v772_v19 = vld [vmem:[#allocation2 + $0x7a8] sm:$0xff] }
 0x1ce   :  { %1133 = vmatprep.subr.bf16.mxu0 %v604_v20  ;;  %v771_v20 = vld [vmem:[#allocation2 + $0x7a0] sm:$0xff] }
 0x1d1   :  { %1134 = vmatpush1.bf16.msra.mxu0 %v603_v21  ;;  %v778_v21 = vld [vmem:[#allocation2 + $0x7d8] sm:$0xff] }
 0x1d2   :  { %1135 = vmatprep.subr.bf16.mxu0 %v610_v22  ;;  %v777_v22 = vld [vmem:[#allocation2 + $0x7d0] sm:$0xff] }
 0x1d5   :  { %1136 = vmatpush1.bf16.msra.mxu0 %v609_v23  ;;  %v784_v23 = vld [vmem:[#allocation2 + $0x808] sm:$0xff] }
 0x1d6   :  { %1137 = vmatprep.subr.bf16.mxu0 %v616_v24  ;;  %v783_v24 = vld [vmem:[#allocation2 + $0x800] sm:$0xff] }
 0x1d9   :  { %1138 = vmatpush1.bf16.msra.mxu0 %v615_v25  ;;  %v790_v25 = vld [vmem:[#allocation2 + $0x838] sm:$0xff] }
 0x1da   :  { %1139 = vmatprep.subr.bf16.mxu0 %v622_v26  ;;  %v789_v26 = vld [vmem:[#allocation2 + $0x830] sm:$0xff] }
 0x1dd   :  { %1140 = vmatpush1.bf16.msra.mxu0 %v621_v28  ;;  %v796_v28 = vld [vmem:[#allocation2 + $0x868] sm:$0xff] }
 0x1de   :  { %1150 = vmatprep.subr.bf16.mxu0 %v628_v29  ;;  %v795_v29 = vld [vmem:[#allocation2 + $0x860] sm:$0xff] }
 0x1e0   :  { %1142 = vmatmul.mubr.bf16.vlgmr.msra.gmra.mrb[4].mxu0 %v8238_v27  ;;  %v657_v27 = vld [vmem:[#allocation2 + $0x410] sm:$0xff] }
 0x1e1   :  { %1151 = vmatpush1.bf16.msra.mxu0 %v627_v30  ;;  %1182 = vmatprep.mubr.bf16.mxu0 %v8242_v32  ;;  %v663_v32 = vld [vmem:[#allocation2 + $0x440] sm:$0xff]  ;;  %v802_v30 = vld [vmem:[#allocation2 + $0x898] sm:$0xff] }
 0x1e2   :  { %1152 = vmatprep.subr.bf16.mxu0 %v634_v31  ;;  %v801_v31 = vld [vmem:[#allocation2 + $0x890] sm:$0xff] }
 0x1e5   :  { %1153 = vmatpush1.bf16.msra.mxu0 %v633_v0  ;;  %v808_v0 = vld [vmem:[#allocation2 + $0x8c8] sm:$0xff] }
 0x1e6   :  { %1154 = vmatprep.subr.bf16.mxu0 %v640_v33  ;;  %v807_v33 = vld [vmem:[#allocation2 + $0x8c0] sm:$0xff] }
 0x1e9   :  { %1155 = vmatpush1.bf16.msra.mxu0 %v639_v34  ;;  %v814_v34 = vld [vmem:[#allocation2 + $0x8f8] sm:$0xff] }
 0x1ea   :  { %1156 = vmatprep.subr.bf16.mxu0 %v646_v35  ;;  %v813_v35 = vld [vmem:[#allocation2 + $0x8f0] sm:$0xff] }
 0x1ed   :  { %1157 = vmatpush1.bf16.msra.mxu0 %v645_v3 }
 0x1ee   :  { %1158 = vmatprep.subr.bf16.mxu0 %v652_v36 }
 0x1f1   :  { %1159 = vmatpush1.bf16.msra.mxu0 %v651_v37 }
 0x1f2   :  { %1160 = vmatprep.subr.bf16.mxu0 %v658_v38 }
 0x1f5   :  { %1161 = vmatpush1.bf16.msra.mxu0 %v657_v27 }
 0x1f6   :  { %1162 = vmatprep.subr.bf16.mxu0 %v664_v40 }
 0x1f9   :  { %1163 = vmatpush1.bf16.msra.mxu0 %v663_v32 }
 0x1fa   :  { %1164 = vmatprep.subr.bf16.mxu0 %v670_v41 }
 0x1fd   :  { %1165 = vmatpush1.bf16.msra.mxu0 %v669_v42  ;;  %v833_v42 = vlaneseq }
 0x1fe   :  { %1166 = vmatprep.subr.bf16.mxu0 %v676_v43 }
 0x1ff   :  { %v8272_v43 = vshrl.u32 %v833_v42, 7 }
 0x201   :  { %1167 = vmatpush1.bf16.msra.mxu0 %v675_v2  ;;  %9535 = vst [vmem:[#allocation71_spill] sm:$0xff] %v8272_v43  ;;  %v815_v2 = vld [vmem:[#allocation22] ss:$8 sm:$0xf] }
 0x202   :  { %1168 = vmatprep.subr.bf16.mxu0 %v682_v45  ;;  %v816_v45 = vld [vmem:[#allocation22] ss:$8 sm:$0x30] }
 0x205   :  { %1169 = vmatpush1.bf16.msra.mxu0 %v681_v46  ;;  %v817_v46 = vor.u32 %v816_v45, %v815_v2 }
 0x206   :  { %1170 = vmatprep.subr.bf16.mxu0 %v688_v47  ;;  %v8275_v47 = vsub.s32 0, %v8272_v43 }
 0x208   :  { %9536 = vst [vmem:[#allocation72_spill] sm:$0xff] %v8275_v47 }
 0x209   :  { %1171 = vmatpush1.bf16.msra.mxu0 %v687_v5  ;;  %v8278_v5 = vsub.s32 1, %v8272_v43 }
 0x20a   :  { %1172 = vmatprep.subr.bf16.mxu0 %v694_v48 }
 0x20b   :  { %9537 = vst [vmem:[#allocation73_spill] sm:$0xff] %v8278_v5  ;;  %v840_v48 = vrot.slane %v817_v46, %v8278_v5 }
 0x20d   :  { %1173 = vmatpush1.bf16.msra.mxu0 %v693_v49  ;;  %v8283_v49 = vsub.s32 2, %v8272_v43 }
 0x20e   :  { %1174 = vmatprep.subr.bf16.mxu0 %v700_v51 }
 0x20f   :  { %9538 = vst [vmem:[#allocation74_spill] sm:$0xff] %v8283_v49 }
 0x211   :  { %1175 = vmatpush1.bf16.msra.mxu0 %v699_v52 }
 0x212   :  { %1176 = vmatprep.subr.bf16.mxu0 %v706_v53  ;;  %v844_v53 = vrot.slane %v817_v46, %v8283_v49 }
 0x215   :  { %1177 = vmatpush1.bf16.msra.mxu0 %v705_v54  ;;  %v8291_v54 = vsub.s32 3, %v8272_v43 }
 0x216   :  { %1178 = vmatprep.subr.bf16.mxu0 %v712_v55 }
 0x217   :  { %9539 = vst [vmem:[#allocation75_spill] sm:$0xff] %v8291_v54 }
 0x219   :  { %1179 = vmatpush1.bf16.msra.mxu0 %v711_v4 }
 0x21a   :  { %1180 = vmatprep.subr.bf16.mxu0 %v718_v56 }
 0x21d   :  { %1181 = vmatpush1.bf16.msra.mxu0 %v717_v57  ;;  %v848_v57 = vrot.slane %v817_v46, %v8291_v54 }
 0x21e   :  { %1191 = vmatprep.subr.bf16.mxu0 %v724_v58 }
 0x220   :  { %1183 = vmatmul.mubr.bf16.vlgmr.msra.gmra.mrb[4].mxu0 %v8250_v39  ;;  %v753_v39 = vld [vmem:[#allocation2 + $0x710] sm:$0xff] }
 0x221   :  { %1192 = vmatpush1.bf16.msra.mxu0 %v723_v59  ;;  %1223 = vmatprep.mubr.bf16.mxu0 %v8254_v44  ;;  %v759_v44 = vld [vmem:[#allocation2 + $0x740] sm:$0xff]  ;;  %v8303_v59 = vsub.s32 4, %v8272_v43 }
 0x222   :  { %1193 = vmatprep.subr.bf16.mxu0 %v730_v60  ;;  %v8306_v60 = vsub.s32 5, %v8272_v43 }
 0x223   :  { %9540 = vst [vmem:[#allocation76_spill] sm:$0xff] %v8303_v59 }
 0x224   :  { %9541 = vst [vmem:[#allocation77_spill] sm:$0xff] %v8306_v60 }
 0x225   :  { %1194 = vmatpush1.bf16.msra.mxu0 %v729_v61 }
 0x226   :  { %1195 = vmatprep.subr.bf16.mxu0 %v736_v12 }
 0x229   :  { %1196 = vmatpush1.bf16.msra.mxu0 %v735_v62 }
 0x22a   :  { %1197 = vmatprep.subr.bf16.mxu0 %v742_v63 }
 0x22d   :  { %1198 = vmatpush1.bf16.msra.mxu0 %v741_v1  ;;  %v852_v1 = vrot.slane %v817_v46, %v8303_v59 }
 0x22e   :  { %1199 = vmatprep.subr.bf16.mxu0 %v748_v13  ;;  %v856_v13 = vrot.slane %v817_v46, %v8306_v60 }
 0x231   :  { %1200 = vmatpush1.bf16.msra.mxu0 %v747_v14 }
 0x232   :  { %1201 = vmatprep.subr.bf16.mxu0 %v754_v15 }
 0x235   :  { %1202 = vmatpush1.bf16.msra.mxu0 %v753_v39 }
 0x236   :  { %1203 = vmatprep.subr.bf16.mxu0 %v760_v16 }
 0x239   :  { %1204 = vmatpush1.bf16.msra.mxu0 %v759_v44 }
 0x23a   :  { %1205 = vmatprep.subr.bf16.mxu0 %v766_v17 }
 0x23d   :  { %1206 = vmatpush1.bf16.msra.mxu0 %v765_v18 }
 0x23e   :  { %1207 = vmatprep.subr.bf16.mxu0 %v772_v19 }
 0x241   :  { %1208 = vmatpush1.bf16.msra.mxu0 %v771_v20 }
 0x242   :  { %1209 = vmatprep.subr.bf16.mxu0 %v778_v21 }
 0x245   :  { %1210 = vmatpush1.bf16.msra.mxu0 %v777_v22 }
 0x246   :  { %1211 = vmatprep.subr.bf16.mxu0 %v784_v23 }
 0x249   :  { %1212 = vmatpush1.bf16.msra.mxu0 %v783_v24 }
 0x24a   :  { %1213 = vmatprep.subr.bf16.mxu0 %v790_v25 }
 0x24d   :  { %1214 = vmatpush1.bf16.msra.mxu0 %v789_v26 }
 0x24e   :  { %1215 = vmatprep.subr.bf16.mxu0 %v796_v28 }
 0x251   :  { %1216 = vmatpush1.bf16.msra.mxu0 %v795_v29 }
 0x252   :  { %1217 = vmatprep.subr.bf16.mxu0 %v802_v30 }
 0x255   :  { %1218 = vmatpush1.bf16.msra.mxu0 %v801_v31 }
 0x256   :  { %1219 = vmatprep.subr.bf16.mxu0 %v808_v0 }
 0x259   :  { %1220 = vmatpush1.bf16.msra.mxu0 %v807_v33 }
 0x25a   :  { %1221 = vmatprep.subr.bf16.mxu0 %v814_v34 }
 0x25d   :  { %1222 = vmatpush1.bf16.msra.mxu0 %v813_v35 }
 0x260   :  { %1224 = vmatmul.mubr.bf16.vlgmr.msra.gmra.mrb[4].mxu0 %v8262_v50  ;;  %v836_v50 = vrot.slane %v817_v46, %v8275_v47 }
 0x273   :  { %v979_v3 = vpop.f32.mrb[0].mxu0 }
 0x274   :  { %v1102_v36 = vpop.f32.mrb[0].mxu1  ;;  %v981_v37 = vpop.f32.mrb[1].mxu0  ;;  %v8285_v51 = vadd.f32 %v979_v3, %v836_v50  ;;  %v819_v3 = vld [vmem:[#allocation22 + $0x1] ss:$8 sm:$0xf] }
 0x275   :  { %v1104_v38 = vpop.f32.mrb[1].mxu1  ;;  %v983_v27 = vpop.f32.mrb[2].mxu0  ;;  %v8287_v52 = vadd.f32 %v981_v37, %v840_v48  ;;  %v8297_v56 = vadd.f32 %v1102_v36, %v844_v53  ;;  %v820_v36 = vld [vmem:[#allocation22 + $0x1] ss:$8 sm:$0x30] }
 0x276   :  { %v1106_v40 = vpop.f32.mrb[2].mxu1  ;;  %v984_v32 = vpop.f32.mrb[3].mxu0  ;;  %v1241_v55 = vmul.f32 %v8285_v51, %v8285_v51  ;;  %v7428_v62 = vadd.f32 %v1104_v38, %v848_v57  ;;  %v823_v37 = vld [vmem:[#allocation22 + $0x2] ss:$8 sm:$0xf]  ;;  %v821_v27 = vor.u32 %v820_v36, %v819_v3 }
 0x277   :  { %v1107_v41 = vpop.f32.mrb[3].mxu1  ;;  %v1242_v4 = vmul.f32 %v8287_v52, %v8287_v52  ;;  %v1232_v58 = vadd.f32 %v8287_v52, %v8285_v51  ;;  %v1243_v12 = vmul.f32 %v8297_v56, %v8297_v56  ;;  %v824_v38 = vld [vmem:[#allocation22 + $0x2] ss:$8 sm:$0x30] }
 0x278   :  { %v1244_v15 = vmul.f32 %v7428_v62, %v7428_v62  ;;  %v825_v40 = vor.u32 %v824_v38, %v823_v37  ;;  %v1275_v32 = vrot.slane %v821_v27, %v8275_v47  ;;  %v1279_v42 = vrot.slane %v821_v27, %v8278_v5 }
 0x279   :  { %v1247_v61 = vadd.f32 %v1242_v4, %v1241_v55  ;;  %v1233_v63 = vadd.f32 %v8297_v56, %v1232_v58  ;;  %v1283_v45 = vrot.slane %v821_v27, %v8283_v49  ;;  %v1287_v50 = vrot.slane %v821_v27, %v8291_v54 }
 0x27a   :  { %v1312_v41 = vrot.slane %v825_v40, %v8275_v47  ;;  %v1316_v2 = vrot.slane %v825_v40, %v8278_v5  ;;  %v1320_v46 = vrot.slane %v825_v40, %v8283_v49  ;;  %v1324_v48 = vrot.slane %v825_v40, %v8291_v54 }
 0x27b   :  { %v1248_v14 = vadd.f32 %v1247_v61, %v1243_v12  ;;  %v1234_v17 = vadd.f32 %v7428_v62, %v1233_v63  ;;  %v1291_v61 = vrot.slane %v821_v27, %v8303_v59  ;;  %v1295_v12 = vrot.slane %v821_v27, %v8306_v60 }
 0x27d   :  { %v1249_v23 = vadd.f32 %v1248_v14, %v1244_v15 }
 0x333   :  { %v1225_v39 = vpop.f32.mrb[4].mxu0 }
 0x334   :  { %v7429_v16 = vadd.f32 %v1225_v39, %v852_v1  ;;  %v1227_v44 = vpop.f32.mrb[5].mxu0 }
 0x335   :  { %v7430_v18 = vadd.f32 %v1227_v44, %v856_v13  ;;  %v1229_v19 = vpop.f32.mrb[6].mxu0  ;;  %v1328_v44 = vrot.slane %v825_v40, %v8303_v59 }
 0x336   :  { %v1245_v20 = vmul.f32 %v7429_v16, %v7429_v16  ;;  %v1230_v21 = vpop.f32.mrb[7].mxu0  ;;  %v1235_v22 = vadd.f32 %v7429_v16, %v1234_v17 }
 0x337   :  { %v1246_v25 = vmul.f32 %v7430_v18, %v7430_v18 }
 0x338   :  { %v1236_v24 = vadd.f32 %v7430_v18, %v1235_v22  ;;  %v1250_v26 = vadd.f32 %v1249_v23, %v1245_v20 }
 0x33a   :  { %1237 = vadd.xlane.f32.xlu0 %v1236_v24  ;;  %v1251_v28 = vadd.f32 %v1250_v26, %v1246_v25 }
 0x33e   :  { %1252 = vadd.xlane.f32.xlu0 %v1251_v28 }
 0x3c7   :  { %v1238_v29 = vpop.xlane.xlu0 %1237 }
 0x3c8   :  { %v1240_v30 = vmul.f32 0.0013020834, %v1238_v29 }
 0x3ca   :  { %v1255_v0 = vmul.f32 %v1240_v30, %v1240_v30  ;;  %v1257_v53 = vsub.f32 %v8285_v51, %v1240_v30  ;;  %v1258_v55 = vsub.f32 %v8287_v52, %v1240_v30  ;;  %v1259_v4 = vsub.f32 %v8297_v56, %v1240_v30 }
 0x3cb   :  { %v1253_v31 = vpop.xlane.xlu0 %1252  ;;  %v1260_v57 = vsub.f32 %v7428_v62, %v1240_v30  ;;  %v1261_v63 = vsub.f32 %v7429_v16, %v1240_v30  ;;  %v1262_v1 = vsub.f32 %v7430_v18, %v1240_v30  ;;  %v1332_v51 = vrot.slane %v825_v40, %v8306_v60 }
 0x3cc   :  { %v1254_v33 = vmul.f32 0.0013020834, %v1253_v31 }
 0x3ce   :  { %v1256_v34 = vsub.f32 %v1254_v33, %v1255_v0 }
 0x3d0   :  { %v1263_v35 = vadd.f32 1e-05, %v1256_v34 }
 0x3d2   :  { %7631 = vrsqrt.f32 %v1263_v35 }
 0x3dc   :  { %v7632_v58 = vpop.eup %7631 }
 0x3dd   :  { %v1265_v13 = vmul.f32 %v7632_v58, %v1257_v53  ;;  %v1266_v14 = vmul.f32 %v7632_v58, %v1258_v55  ;;  %v1267_v15 = vmul.f32 %v7632_v58, %v1259_v4  ;;  %v1268_v39 = vmul.f32 %v7632_v58, %v1260_v57 }
 0x3de   :  { %v1269_v17 = vmul.f32 %v7632_v58, %v1261_v63  ;;  %v1270_v52 = vmul.f32 %v7632_v58, %v1262_v1 }
 0x3df   :  { %v1302_v19 = vmul.f32 %v1275_v32, %v1265_v13  ;;  %v1303_v56 = vmul.f32 %v1279_v42, %v1266_v14  ;;  %v1304_v62 = vmul.f32 %v1283_v45, %v1267_v15  ;;  %v1305_v20 = vmul.f32 %v1287_v50, %v1268_v39 }
 0x3e0   :  { %v1306_v21 = vmul.f32 %v1291_v61, %v1269_v17  ;;  %v1307_v22 = vmul.f32 %v1295_v12, %v1270_v52 }
 0x3e1   :  { %v8328_v23 = vadd.f32 %v1312_v41, %v1302_v19  ;;  %v1340_v16 = vadd.f32 %v1316_v2, %v1303_v56  ;;  %v8330_v18 = vadd.f32 %v1320_v46, %v1304_v62  ;;  %v8332_v24 = vadd.f32 %v1324_v48, %v1305_v20 }
 0x3e2   :  { %v8334_v25 = vadd.f32 %v1328_v44, %v1306_v21  ;;  %v8336_v26 = vadd.f32 %v1332_v51, %v1307_v22 }
 0x3e3   :  { %v1345_v28 = vmax.f32 %v8328_v23, 0.0  ;;  %v1346_v29 = vmax.f32 %v1340_v16, 0.0  ;;  %v1347_v30 = vmax.f32 %v8330_v18, 0.0  ;;  %v1348_v31 = vmax.f32 %v8332_v24, 0.0 }
 0x3e4   :  { %v1349_v0 = vmax.f32 %v8334_v25, 0.0  ;;  %v1350_v33 = vmax.f32 %v8336_v26, 0.0 }
 0x3e5   :  { %7811 = dma.done.wait [#allocation16 + $0x1], 24576 }
 0x3e6   :  { %7812 = vsyncadd [#allocation16 + $0x1], 4294942720  ;;  %v1553_v34 = vpack.c.bf16 %v1346_v29, %v1346_v29  ;;  %v1355_v35 = vld [vmem:[#allocation3 + $0x8] sm:$0xff]  ;;  %v1357_v3 = vld [vmem:[#allocation3 + $0x18] sm:$0xff] }
 0x3e7   :  { %v1354_v36 = vld [vmem:[#allocation3] sm:$0xff]  ;;  %1579 = vmatprep.subr.bf16.mxu1 %v1355_v35  ;;  %1702 = vmatprep.subr.bf16.mxu0 %v1357_v3  ;;  %v1356_v37 = vld [vmem:[#allocation3 + $0x10] sm:$0xff]  ;;  %v1359_v38 = vld [vmem:[#allocation3 + $0x28] sm:$0xff] }
 0x3e8   :  { %1611 = vmatprep.mubr.bf16.mxu1 %v1553_v34  ;;  %1734 = vmatprep.mubr.bf16.mxu0 %v1553_v34  ;;  %v1361_v27 = vld [vmem:[#allocation3 + $0x38] sm:$0xff]  ;;  %v1358_v40 = vld [vmem:[#allocation3 + $0x20] sm:$0xff]  ;;  %v1360_v32 = vld [vmem:[#allocation3 + $0x30] sm:$0xff] }
 0x3e9   :  { %1580 = vmatpush1.bf16.msra.mxu1 %v1354_v36  ;;  %1703 = vmatpush1.bf16.msra.mxu0 %v1356_v37  ;;  %v1363_v41 = vld [vmem:[#allocation3 + $0x48] sm:$0xff]  ;;  %v1365_v42 = vld [vmem:[#allocation3 + $0x58] sm:$0xff]  ;;  %v1362_v2 = vld [vmem:[#allocation3 + $0x40] sm:$0xff] }
 0x3ea   :  { %1581 = vmatprep.subr.bf16.mxu1 %v1359_v38  ;;  %1704 = vmatprep.subr.bf16.mxu0 %v1361_v27  ;;  %v1364_v45 = vld [vmem:[#allocation3 + $0x50] sm:$0xff]  ;;  %v1367_v46 = vld [vmem:[#allocation3 + $0x68] sm:$0xff]  ;;  %v1369_v50 = vld [vmem:[#allocation3 + $0x78] sm:$0xff] }
 0x3eb   :  { %v1366_v48 = vld [vmem:[#allocation3 + $0x60] sm:$0xff]  ;;  %v1368_v53 = vld [vmem:[#allocation3 + $0x70] sm:$0xff]  ;;  %v1371_v55 = vld [vmem:[#allocation3 + $0x88] sm:$0xff] }
 0x3ec   :  { %v1373_v4 = vld [vmem:[#allocation3 + $0x98] sm:$0xff]  ;;  %v1370_v57 = vld [vmem:[#allocation3 + $0x80] sm:$0xff]  ;;  %v1372_v58 = vld [vmem:[#allocation3 + $0x90] sm:$0xff] }
 0x3ed   :  { %1582 = vmatpush1.bf16.msra.mxu1 %v1358_v40  ;;  %1705 = vmatpush1.bf16.msra.mxu0 %v1360_v32  ;;  %v1375_v61 = vld [vmem:[#allocation3 + $0xa8] sm:$0xff]  ;;  %v1377_v12 = vld [vmem:[#allocation3 + $0xb8] sm:$0xff]  ;;  %v1374_v63 = vld [vmem:[#allocation3 + $0xa0] sm:$0xff] }
 0x3ee   :  { %1583 = vmatprep.subr.bf16.mxu1 %v1363_v41  ;;  %1706 = vmatprep.subr.bf16.mxu0 %v1365_v42  ;;  %v1376_v1 = vld [vmem:[#allocation3 + $0xb0] sm:$0xff]  ;;  %v1379_v13 = vld [vmem:[#allocation3 + $0xc8] sm:$0xff]  ;;  %v1381_v14 = vld [vmem:[#allocation3 + $0xd8] sm:$0xff] }
 0x3ef   :  { %v1378_v15 = vld [vmem:[#allocation3 + $0xc0] sm:$0xff]  ;;  %v1380_v39 = vld [vmem:[#allocation3 + $0xd0] sm:$0xff]  ;;  %v1383_v44 = vld [vmem:[#allocation3 + $0xe8] sm:$0xff] }
 0x3f0   :  { %v1385_v51 = vld [vmem:[#allocation3 + $0xf8] sm:$0xff]  ;;  %v1382_v17 = vld [vmem:[#allocation3 + $0xe0] sm:$0xff]  ;;  %v1384_v52 = vld [vmem:[#allocation3 + $0xf0] sm:$0xff] }
 0x3f1   :  { %1584 = vmatpush1.bf16.msra.mxu1 %v1362_v2  ;;  %1707 = vmatpush1.bf16.msra.mxu0 %v1364_v45  ;;  %v1387_v19 = vld [vmem:[#allocation3 + $0x108] sm:$0xff]  ;;  %v1389_v56 = vld [vmem:[#allocation3 + $0x118] sm:$0xff]  ;;  %v1386_v62 = vld [vmem:[#allocation3 + $0x100] sm:$0xff] }
 0x3f2   :  { %1585 = vmatprep.subr.bf16.mxu1 %v1367_v46  ;;  %1708 = vmatprep.subr.bf16.mxu0 %v1369_v50  ;;  %v1388_v20 = vld [vmem:[#allocation3 + $0x110] sm:$0xff]  ;;  %v1391_v21 = vld [vmem:[#allocation3 + $0x128] sm:$0xff]  ;;  %v1393_v22 = vld [vmem:[#allocation3 + $0x138] sm:$0xff] }
 0x3f3   :  { %v1390_v16 = vld [vmem:[#allocation3 + $0x120] sm:$0xff]  ;;  %v1392_v29 = vld [vmem:[#allocation3 + $0x130] sm:$0xff]  ;;  %v1395_v34 = vld [vmem:[#allocation3 + $0x148] sm:$0xff] }
 0x3f4   :  { %v1397_v35 = vld [vmem:[#allocation3 + $0x158] sm:$0xff]  ;;  %v1394_v3 = vld [vmem:[#allocation3 + $0x140] sm:$0xff]  ;;  %v1396_v36 = vld [vmem:[#allocation3 + $0x150] sm:$0xff] }
 0x3f5   :  { %1586 = vmatpush1.bf16.msra.mxu1 %v1366_v48  ;;  %1709 = vmatpush1.bf16.msra.mxu0 %v1368_v53  ;;  %v1399_v37 = vld [vmem:[#allocation3 + $0x168] sm:$0xff]  ;;  %v1401_v38 = vld [vmem:[#allocation3 + $0x178] sm:$0xff]  ;;  %v1398_v27 = vld [vmem:[#allocation3 + $0x160] sm:$0xff] }
 0x3f6   :  { %1587 = vmatprep.subr.bf16.mxu1 %v1371_v55  ;;  %1710 = vmatprep.subr.bf16.mxu0 %v1373_v4  ;;  %v1400_v40 = vld [vmem:[#allocation3 + $0x170] sm:$0xff]  ;;  %v1403_v32 = vld [vmem:[#allocation3 + $0x188] sm:$0xff]  ;;  %v1405_v41 = vld [vmem:[#allocation3 + $0x198] sm:$0xff] }
 0x3f7   :  { %v1402_v42 = vld [vmem:[#allocation3 + $0x180] sm:$0xff]  ;;  %v1404_v2 = vld [vmem:[#allocation3 + $0x190] sm:$0xff]  ;;  %v1407_v45 = vld [vmem:[#allocation3 + $0x1a8] sm:$0xff] }
 0x3f8   :  { %v1409_v46 = vld [vmem:[#allocation3 + $0x1b8] sm:$0xff]  ;;  %v1406_v50 = vld [vmem:[#allocation3 + $0x1a0] sm:$0xff]  ;;  %v1408_v48 = vld [vmem:[#allocation3 + $0x1b0] sm:$0xff] }
 0x3f9   :  { %1588 = vmatpush1.bf16.msra.mxu1 %v1370_v57  ;;  %1711 = vmatpush1.bf16.msra.mxu0 %v1372_v58  ;;  %v1411_v53 = vld [vmem:[#allocation3 + $0x1c8] sm:$0xff]  ;;  %v1413_v55 = vld [vmem:[#allocation3 + $0x1d8] sm:$0xff]  ;;  %v1410_v4 = vld [vmem:[#allocation3 + $0x1c0] sm:$0xff] }
 0x3fa   :  { %1589 = vmatprep.subr.bf16.mxu1 %v1375_v61  ;;  %1712 = vmatprep.subr.bf16.mxu0 %v1377_v12  ;;  %v1412_v57 = vld [vmem:[#allocation3 + $0x1d0] sm:$0xff]  ;;  %v1415_v58 = vld [vmem:[#allocation3 + $0x1e8] sm:$0xff]  ;;  %v1417_v61 = vld [vmem:[#allocation3 + $0x1f8] sm:$0xff] }
 0x3fb   :  { %v1414_v12 = vld [vmem:[#allocation3 + $0x1e0] sm:$0xff]  ;;  %v1428_v24 = vld [vmem:[#allocation3 + $0x250] sm:$0xff] }
 0x3fc   :  { %v1422_v23 = vld [vmem:[#allocation3 + $0x220] sm:$0xff]  ;;  %v1492_v26 = vld [vmem:[#allocation3 + $0x450] sm:$0xff] }
 0x3fd   :  { %1590 = vmatpush1.bf16.msra.mxu1 %v1374_v63  ;;  %1713 = vmatpush1.bf16.msra.mxu0 %v1376_v1  ;;  %v1416_v63 = vld [vmem:[#allocation3 + $0x1f0] sm:$0xff]  ;;  %v1419_v1 = vld [vmem:[#allocation3 + $0x208] sm:$0xff]  ;;  %v1486_v18 = vld [vmem:[#allocation3 + $0x420] sm:$0xff] }
 0x3fe   :  { %1591 = vmatprep.subr.bf16.mxu1 %v1379_v13  ;;  %1714 = vmatprep.subr.bf16.mxu0 %v1381_v14  ;;  %v1421_v13 = vld [vmem:[#allocation3 + $0x218] sm:$0xff]  ;;  %v1552_v14 = vpack.c.bf16 %v1345_v28, %v1345_v28  ;;  %v1424_v28 = vld [vmem:[#allocation3 + $0x230] sm:$0xff] }
 0x401   :  { %1592 = vmatpush1.bf16.msra.mxu1 %v1378_v15  ;;  %1715 = vmatpush1.bf16.msra.mxu0 %v1380_v39  ;;  %v1418_v15 = vld [vmem:[#allocation3 + $0x200] sm:$0xff]  ;;  %v1420_v39 = vld [vmem:[#allocation3 + $0x210] sm:$0xff] }
 0x402   :  { %1593 = vmatprep.subr.bf16.mxu1 %v1383_v44  ;;  %1716 = vmatprep.subr.bf16.mxu0 %v1385_v51  ;;  %v1423_v44 = vld [vmem:[#allocation3 + $0x228] sm:$0xff]  ;;  %v1425_v51 = vld [vmem:[#allocation3 + $0x238] sm:$0xff] }
 0x405   :  { %1594 = vmatpush1.bf16.msra.mxu1 %v1382_v17  ;;  %1717 = vmatpush1.bf16.msra.mxu0 %v1384_v52  ;;  %v1555_v17 = vpack.c.bf16 %v1348_v31, %v1348_v31  ;;  %v1427_v52 = vld [vmem:[#allocation3 + $0x248] sm:$0xff]  ;;  %v1433_v31 = vld [vmem:[#allocation3 + $0x278] sm:$0xff] }
 0x406   :  { %1595 = vmatprep.subr.bf16.mxu1 %v1387_v19  ;;  %1718 = vmatprep.subr.bf16.mxu0 %v1389_v56  ;;  %v1429_v19 = vld [vmem:[#allocation3 + $0x258] sm:$0xff]  ;;  %v1426_v56 = vld [vmem:[#allocation3 + $0x240] sm:$0xff] }
 0x409   :  { %1596 = vmatpush1.bf16.msra.mxu1 %v1386_v62  ;;  %1719 = vmatpush1.bf16.msra.mxu0 %v1388_v20  ;;  %v1431_v62 = vld [vmem:[#allocation3 + $0x268] sm:$0xff]  ;;  %v1430_v20 = vld [vmem:[#allocation3 + $0x260] sm:$0xff] }
 0x40a   :  { %1597 = vmatprep.subr.bf16.mxu1 %v1391_v21  ;;  %1720 = vmatprep.subr.bf16.mxu0 %v1393_v22  ;;  %v1432_v21 = vld [vmem:[#allocation3 + $0x270] sm:$0xff]  ;;  %v1435_v22 = vld [vmem:[#allocation3 + $0x288] sm:$0xff] }
 0x40d   :  { %1598 = vmatpush1.bf16.msra.mxu1 %v1390_v16  ;;  %1721 = vmatpush1.bf16.msra.mxu0 %v1392_v29  ;;  %v1437_v16 = vld [vmem:[#allocation3 + $0x298] sm:$0xff]  ;;  %v1434_v29 = vld [vmem:[#allocation3 + $0x280] sm:$0xff] }
 0x40e   :  { %1599 = vmatprep.subr.bf16.mxu1 %v1395_v34  ;;  %1722 = vmatprep.subr.bf16.mxu0 %v1397_v35  ;;  %v1436_v34 = vld [vmem:[#allocation3 + $0x290] sm:$0xff]  ;;  %v1439_v35 = vld [vmem:[#allocation3 + $0x2a8] sm:$0xff] }
 0x411   :  { %1600 = vmatpush1.bf16.msra.mxu1 %v1394_v3  ;;  %1723 = vmatpush1.bf16.msra.mxu0 %v1396_v36  ;;  %v1441_v3 = vld [vmem:[#allocation3 + $0x2b8] sm:$0xff]  ;;  %v1438_v36 = vld [vmem:[#allocation3 + $0x2a0] sm:$0xff] }
 0x412   :  { %1601 = vmatprep.subr.bf16.mxu1 %v1399_v37  ;;  %1724 = vmatprep.subr.bf16.mxu0 %v1401_v38  ;;  %v1440_v37 = vld [vmem:[#allocation3 + $0x2b0] sm:$0xff]  ;;  %v1443_v38 = vld [vmem:[#allocation3 + $0x2c8] sm:$0xff] }
 0x415   :  { %1602 = vmatpush1.bf16.msra.mxu1 %v1398_v27  ;;  %1725 = vmatpush1.bf16.msra.mxu0 %v1400_v40  ;;  %v1445_v27 = vld [vmem:[#allocation3 + $0x2d8] sm:$0xff]  ;;  %v1442_v40 = vld [vmem:[#allocation3 + $0x2c0] sm:$0xff] }
 0x416   :  { %1603 = vmatprep.subr.bf16.mxu1 %v1403_v32  ;;  %1726 = vmatprep.subr.bf16.mxu0 %v1405_v41  ;;  %v1444_v32 = vld [vmem:[#allocation3 + $0x2d0] sm:$0xff]  ;;  %v1447_v41 = vld [vmem:[#allocation3 + $0x2e8] sm:$0xff] }
 0x419   :  { %1604 = vmatpush1.bf16.msra.mxu1 %v1402_v42  ;;  %1727 = vmatpush1.bf16.msra.mxu0 %v1404_v2  ;;  %v1449_v42 = vld [vmem:[#allocation3 + $0x2f8] sm:$0xff]  ;;  %v1446_v2 = vld [vmem:[#allocation3 + $0x2e0] sm:$0xff] }
 0x41a   :  { %1605 = vmatprep.subr.bf16.mxu1 %v1407_v45  ;;  %1728 = vmatprep.subr.bf16.mxu0 %v1409_v46  ;;  %v1448_v45 = vld [vmem:[#allocation3 + $0x2f0] sm:$0xff]  ;;  %v1451_v46 = vld [vmem:[#allocation3 + $0x308] sm:$0xff] }
 0x41d   :  { %1606 = vmatpush1.bf16.msra.mxu1 %v1406_v50  ;;  %1729 = vmatpush1.bf16.msra.mxu0 %v1408_v48  ;;  %v1453_v50 = vld [vmem:[#allocation3 + $0x318] sm:$0xff]  ;;  %v1450_v48 = vld [vmem:[#allocation3 + $0x300] sm:$0xff] }
 0x41e   :  { %1607 = vmatprep.subr.bf16.mxu1 %v1411_v53  ;;  %1730 = vmatprep.subr.bf16.mxu0 %v1413_v55  ;;  %v1452_v53 = vld [vmem:[#allocation3 + $0x310] sm:$0xff]  ;;  %v1455_v55 = vld [vmem:[#allocation3 + $0x328] sm:$0xff] }
 0x421   :  { %1608 = vmatpush1.bf16.msra.mxu1 %v1410_v4  ;;  %1731 = vmatpush1.bf16.msra.mxu0 %v1412_v57  ;;  %v1457_v4 = vld [vmem:[#allocation3 + $0x338] sm:$0xff]  ;;  %v1454_v57 = vld [vmem:[#allocation3 + $0x320] sm:$0xff] }
 0x422   :  { %1609 = vmatprep.subr.bf16.mxu1 %v1415_v58  ;;  %1732 = vmatprep.subr.bf16.mxu0 %v1417_v61  ;;  %v1456_v58 = vld [vmem:[#allocation3 + $0x330] sm:$0xff]  ;;  %v1459_v61 = vld [vmem:[#allocation3 + $0x348] sm:$0xff] }
 0x425   :  { %1610 = vmatpush1.bf16.msra.mxu1 %v1414_v12  ;;  %1733 = vmatpush1.bf16.msra.mxu0 %v1416_v63  ;;  %v1461_v12 = vld [vmem:[#allocation3 + $0x358] sm:$0xff]  ;;  %v1458_v63 = vld [vmem:[#allocation3 + $0x340] sm:$0xff] }
 0x426   :  { %1620 = vmatprep.subr.bf16.mxu1 %v1419_v1  ;;  %1743 = vmatprep.subr.bf16.mxu0 %v1421_v13  ;;  %v1460_v1 = vld [vmem:[#allocation3 + $0x350] sm:$0xff]  ;;  %v1463_v13 = vld [vmem:[#allocation3 + $0x368] sm:$0xff] }
 0x428   :  { %1612 = vmatmul.mubr.bf16.vlgmr.msra.gmra.mrb[4].mxu1 %v1552_v14  ;;  %1735 = vmatmul.mubr.bf16.vlgmr.msra.gmra.mrb[8].mxu0 %v1552_v14  ;;  %v1465_v14 = vld [vmem:[#allocation3 + $0x378] sm:$0xff] }
 0x429   :  { %1621 = vmatpush1.bf16.msra.mxu1 %v1418_v15  ;;  %1744 = vmatpush1.bf16.msra.mxu0 %v1420_v39  ;;  %v1462_v15 = vld [vmem:[#allocation3 + $0x360] sm:$0xff]  ;;  %v1464_v39 = vld [vmem:[#allocation3 + $0x370] sm:$0xff] }
 0x42a   :  { %1622 = vmatprep.subr.bf16.mxu1 %v1423_v44  ;;  %1745 = vmatprep.subr.bf16.mxu0 %v1425_v51  ;;  %v1467_v44 = vld [vmem:[#allocation3 + $0x388] sm:$0xff]  ;;  %v1469_v51 = vld [vmem:[#allocation3 + $0x398] sm:$0xff] }
 0x42b   :  { %1652 = vmatprep.mubr.bf16.mxu1 %v1555_v17  ;;  %1775 = vmatprep.mubr.bf16.mxu0 %v1555_v17  ;;  %v1466_v17 = vld [vmem:[#allocation3 + $0x380] sm:$0xff] }
 0x42d   :  { %1623 = vmatpush1.bf16.msra.mxu1 %v1422_v23  ;;  %1746 = vmatpush1.bf16.msra.mxu0 %v1424_v28  ;;  %v1468_v23 = vld [vmem:[#allocation3 + $0x390] sm:$0xff]  ;;  %v1471_v28 = vld [vmem:[#allocation3 + $0x3a8] sm:$0xff] }
 0x42e   :  { %1624 = vmatprep.subr.bf16.mxu1 %v1427_v52  ;;  %1747 = vmatprep.subr.bf16.mxu0 %v1429_v19  ;;  %v1473_v52 = vld [vmem:[#allocation3 + $0x3b8] sm:$0xff]  ;;  %v1470_v19 = vld [vmem:[#allocation3 + $0x3a0] sm:$0xff] }
 0x431   :  { %1625 = vmatpush1.bf16.msra.mxu1 %v1426_v56  ;;  %1748 = vmatpush1.bf16.msra.mxu0 %v1428_v24  ;;  %v1472_v56 = vld [vmem:[#allocation3 + $0x3b0] sm:$0xff]  ;;  %v1475_v24 = vld [vmem:[#allocation3 + $0x3c8] sm:$0xff] }
 0x432   :  { %1626 = vmatprep.subr.bf16.mxu1 %v1431_v62  ;;  %1749 = vmatprep.subr.bf16.mxu0 %v1433_v31  ;;  %v1477_v62 = vld [vmem:[#allocation3 + $0x3d8] sm:$0xff]  ;;  %v1474_v31 = vld [vmem:[#allocation3 + $0x3c0] sm:$0xff] }
 0x435   :  { %1627 = vmatpush1.bf16.msra.mxu1 %v1430_v20  ;;  %1750 = vmatpush1.bf16.msra.mxu0 %v1432_v21  ;;  %v1476_v20 = vld [vmem:[#allocation3 + $0x3d0] sm:$0xff]  ;;  %v1479_v21 = vld [vmem:[#allocation3 + $0x3e8] sm:$0xff] }
 0x436   :  { %1628 = vmatprep.subr.bf16.mxu1 %v1435_v22  ;;  %1751 = vmatprep.subr.bf16.mxu0 %v1437_v16  ;;  %v1481_v22 = vld [vmem:[#allocation3 + $0x3f8] sm:$0xff]  ;;  %v1478_v16 = vld [vmem:[#allocation3 + $0x3e0] sm:$0xff] }
 0x439   :  { %1629 = vmatpush1.bf16.msra.mxu1 %v1434_v29  ;;  %1752 = vmatpush1.bf16.msra.mxu0 %v1436_v34  ;;  %v1480_v29 = vld [vmem:[#allocation3 + $0x3f0] sm:$0xff]  ;;  %v1483_v34 = vld [vmem:[#allocation3 + $0x408] sm:$0xff] }
 0x43a   :  { %1630 = vmatprep.subr.bf16.mxu1 %v1439_v35  ;;  %1753 = vmatprep.subr.bf16.mxu0 %v1441_v3  ;;  %v1485_v35 = vld [vmem:[#allocation3 + $0x418] sm:$0xff]  ;;  %v1554_v3 = vpack.c.bf16 %v1347_v30, %v1347_v30  ;;  %v1488_v30 = vld [vmem:[#allocation3 + $0x430] sm:$0xff] }
 0x43d   :  { %1631 = vmatpush1.bf16.msra.mxu1 %v1438_v36  ;;  %1754 = vmatpush1.bf16.msra.mxu0 %v1440_v37  ;;  %v1482_v36 = vld [vmem:[#allocation3 + $0x400] sm:$0xff]  ;;  %v1484_v37 = vld [vmem:[#allocation3 + $0x410] sm:$0xff] }
 0x43e   :  { %1632 = vmatprep.subr.bf16.mxu1 %v1443_v38  ;;  %1755 = vmatprep.subr.bf16.mxu0 %v1445_v27  ;;  %v1487_v38 = vld [vmem:[#allocation3 + $0x428] sm:$0xff]  ;;  %v1489_v27 = vld [vmem:[#allocation3 + $0x438] sm:$0xff] }
 0x441   :  { %1633 = vmatpush1.bf16.msra.mxu1 %v1442_v40  ;;  %1756 = vmatpush1.bf16.msra.mxu0 %v1444_v32  ;;  %v1557_v40 = vpack.c.bf16 %v1350_v33, %v1350_v33  ;;  %v1491_v32 = vld [vmem:[#allocation3 + $0x448] sm:$0xff]  ;;  %v1497_v33 = vld [vmem:[#allocation3 + $0x478] sm:$0xff] }
 0x442   :  { %1634 = vmatprep.subr.bf16.mxu1 %v1447_v41  ;;  %1757 = vmatprep.subr.bf16.mxu0 %v1449_v42  ;;  %v1493_v41 = vld [vmem:[#allocation3 + $0x458] sm:$0xff]  ;;  %v1490_v42 = vld [vmem:[#allocation3 + $0x440] sm:$0xff] }
 0x445   :  { %1635 = vmatpush1.bf16.msra.mxu1 %v1446_v2  ;;  %1758 = vmatpush1.bf16.msra.mxu0 %v1448_v45  ;;  %v1495_v2 = vld [vmem:[#allocation3 + $0x468] sm:$0xff]  ;;  %v1494_v45 = vld [vmem:[#allocation3 + $0x460] sm:$0xff] }
 0x446   :  { %1636 = vmatprep.subr.bf16.mxu1 %v1451_v46  ;;  %1759 = vmatprep.subr.bf16.mxu0 %v1453_v50  ;;  %v1496_v46 = vld [vmem:[#allocation3 + $0x470] sm:$0xff]  ;;  %v1499_v50 = vld [vmem:[#allocation3 + $0x488] sm:$0xff] }
 0x449   :  { %1637 = vmatpush1.bf16.msra.mxu1 %v1450_v48  ;;  %1760 = vmatpush1.bf16.msra.mxu0 %v1452_v53  ;;  %v1501_v48 = vld [vmem:[#allocation3 + $0x498] sm:$0xff]  ;;  %v1498_v53 = vld [vmem:[#allocation3 + $0x480] sm:$0xff] }
 0x44a   :  { %1638 = vmatprep.subr.bf16.mxu1 %v1455_v55  ;;  %1761 = vmatprep.subr.bf16.mxu0 %v1457_v4  ;;  %v1500_v55 = vld [vmem:[#allocation3 + $0x490] sm:$0xff]  ;;  %v1503_v4 = vld [vmem:[#allocation3 + $0x4a8] sm:$0xff] }
 0x44d   :  { %1639 = vmatpush1.bf16.msra.mxu1 %v1454_v57  ;;  %1762 = vmatpush1.bf16.msra.mxu0 %v1456_v58  ;;  %v1505_v57 = vld [vmem:[#allocation3 + $0x4b8] sm:$0xff]  ;;  %v1502_v58 = vld [vmem:[#allocation3 + $0x4a0] sm:$0xff] }
 0x44e   :  { %1640 = vmatprep.subr.bf16.mxu1 %v1459_v61  ;;  %1763 = vmatprep.subr.bf16.mxu0 %v1461_v12  ;;  %v1504_v61 = vld [vmem:[#allocation3 + $0x4b0] sm:$0xff]  ;;  %v1507_v12 = vld [vmem:[#allocation3 + $0x4c8] sm:$0xff] }
 0x451   :  { %1641 = vmatpush1.bf16.msra.mxu1 %v1458_v63  ;;  %1764 = vmatpush1.bf16.msra.mxu0 %v1460_v1  ;;  %v1509_v63 = vld [vmem:[#allocation3 + $0x4d8] sm:$0xff]  ;;  %v1506_v1 = vld [vmem:[#allocation3 + $0x4c0] sm:$0xff] }
 0x452   :  { %1642 = vmatprep.subr.bf16.mxu1 %v1463_v13  ;;  %1765 = vmatprep.subr.bf16.mxu0 %v1465_v14  ;;  %v1508_v13 = vld [vmem:[#allocation3 + $0x4d0] sm:$0xff]  ;;  %v1511_v14 = vld [vmem:[#allocation3 + $0x4e8] sm:$0xff] }
 0x455   :  { %1643 = vmatpush1.bf16.msra.mxu1 %v1462_v15  ;;  %1766 = vmatpush1.bf16.msra.mxu0 %v1464_v39  ;;  %v1513_v15 = vld [vmem:[#allocation3 + $0x4f8] sm:$0xff]  ;;  %v1510_v39 = vld [vmem:[#allocation3 + $0x4e0] sm:$0xff] }
 0x456   :  { %1644 = vmatprep.subr.bf16.mxu1 %v1467_v44  ;;  %1767 = vmatprep.subr.bf16.mxu0 %v1469_v51  ;;  %v1512_v44 = vld [vmem:[#allocation3 + $0x4f0] sm:$0xff]  ;;  %v1515_v51 = vld [vmem:[#allocation3 + $0x508] sm:$0xff] }
 0x459   :  { %1645 = vmatpush1.bf16.msra.mxu1 %v1466_v17  ;;  %1768 = vmatpush1.bf16.msra.mxu0 %v1468_v23  ;;  %v1517_v17 = vld [vmem:[#allocation3 + $0x518] sm:$0xff]  ;;  %v1514_v23 = vld [vmem:[#allocation3 + $0x500] sm:$0xff] }
 0x45a   :  { %1646 = vmatprep.subr.bf16.mxu1 %v1471_v28  ;;  %1769 = vmatprep.subr.bf16.mxu0 %v1473_v52  ;;  %v1516_v28 = vld [vmem:[#allocation3 + $0x510] sm:$0xff]  ;;  %v1519_v52 = vld [vmem:[#allocation3 + $0x528] sm:$0xff] }
 0x45d   :  { %1647 = vmatpush1.bf16.msra.mxu1 %v1470_v19  ;;  %1770 = vmatpush1.bf16.msra.mxu0 %v1472_v56  ;;  %v1521_v19 = vld [vmem:[#allocation3 + $0x538] sm:$0xff]  ;;  %v1518_v56 = vld [vmem:[#allocation3 + $0x520] sm:$0xff] }
 0x45e   :  { %1648 = vmatprep.subr.bf16.mxu1 %v1475_v24  ;;  %1771 = vmatprep.subr.bf16.mxu0 %v1477_v62  ;;  %v1520_v24 = vld [vmem:[#allocation3 + $0x530] sm:$0xff]  ;;  %v1523_v62 = vld [vmem:[#allocation3 + $0x548] sm:$0xff] }
 0x461   :  { %1649 = vmatpush1.bf16.msra.mxu1 %v1474_v31  ;;  %1772 = vmatpush1.bf16.msra.mxu0 %v1476_v20  ;;  %v1525_v31 = vld [vmem:[#allocation3 + $0x558] sm:$0xff]  ;;  %v1522_v20 = vld [vmem:[#allocation3 + $0x540] sm:$0xff] }
 0x462   :  { %1650 = vmatprep.subr.bf16.mxu1 %v1479_v21  ;;  %1773 = vmatprep.subr.bf16.mxu0 %v1481_v22  ;;  %v1524_v21 = vld [vmem:[#allocation3 + $0x550] sm:$0xff]  ;;  %v1527_v22 = vld [vmem:[#allocation3 + $0x568] sm:$0xff] }
 0x465   :  { %1651 = vmatpush1.bf16.msra.mxu1 %v1478_v16  ;;  %1774 = vmatpush1.bf16.msra.mxu0 %v1480_v29  ;;  %v1529_v16 = vld [vmem:[#allocation3 + $0x578] sm:$0xff]  ;;  %v1526_v29 = vld [vmem:[#allocation3 + $0x560] sm:$0xff] }
 0x466   :  { %1661 = vmatprep.subr.bf16.mxu1 %v1483_v34  ;;  %1784 = vmatprep.subr.bf16.mxu0 %v1485_v35  ;;  %v1528_v34 = vld [vmem:[#allocation3 + $0x570] sm:$0xff]  ;;  %v1531_v35 = vld [vmem:[#allocation3 + $0x588] sm:$0xff] }
 0x468   :  { %1653 = vmatmul.mubr.bf16.vlgmr.msra.gmra.mrb[4].mxu1 %v1554_v3  ;;  %1776 = vmatmul.mubr.bf16.vlgmr.msra.gmra.mrb[8].mxu0 %v1554_v3  ;;  %v1533_v3 = vld [vmem:[#allocation3 + $0x598] sm:$0xff] }
 0x469   :  { %1662 = vmatpush1.bf16.msra.mxu1 %v1482_v36  ;;  %1785 = vmatpush1.bf16.msra.mxu0 %v1484_v37  ;;  %v1530_v36 = vld [vmem:[#allocation3 + $0x580] sm:$0xff]  ;;  %v1532_v37 = vld [vmem:[#allocation3 + $0x590] sm:$0xff] }
 0x46a   :  { %1663 = vmatprep.subr.bf16.mxu1 %v1487_v38  ;;  %1786 = vmatprep.subr.bf16.mxu0 %v1489_v27  ;;  %v1535_v38 = vld [vmem:[#allocation3 + $0x5a8] sm:$0xff]  ;;  %v1537_v27 = vld [vmem:[#allocation3 + $0x5b8] sm:$0xff] }
 0x46b   :  { %1693 = vmatprep.mubr.bf16.mxu1 %v1557_v40  ;;  %1816 = vmatprep.mubr.bf16.mxu0 %v1557_v40  ;;  %v1534_v40 = vld [vmem:[#allocation3 + $0x5a0] sm:$0xff] }
 0x46d   :  { %1664 = vmatpush1.bf16.msra.mxu1 %v1486_v18  ;;  %1787 = vmatpush1.bf16.msra.mxu0 %v1488_v30  ;;  %v1536_v18 = vld [vmem:[#allocation3 + $0x5b0] sm:$0xff]  ;;  %v1539_v30 = vld [vmem:[#allocation3 + $0x5c8] sm:$0xff] }
 0x46e   :  { %1665 = vmatprep.subr.bf16.mxu1 %v1491_v32  ;;  %1788 = vmatprep.subr.bf16.mxu0 %v1493_v41  ;;  %v1541_v32 = vld [vmem:[#allocation3 + $0x5d8] sm:$0xff]  ;;  %v1538_v41 = vld [vmem:[#allocation3 + $0x5c0] sm:$0xff] }
 0x471   :  { %1666 = vmatpush1.bf16.msra.mxu1 %v1490_v42  ;;  %1789 = vmatpush1.bf16.msra.mxu0 %v1492_v26  ;;  %v1540_v42 = vld [vmem:[#allocation3 + $0x5d0] sm:$0xff]  ;;  %v1543_v26 = vld [vmem:[#allocation3 + $0x5e8] sm:$0xff] }
 0x472   :  { %1667 = vmatprep.subr.bf16.mxu1 %v1495_v2  ;;  %1790 = vmatprep.subr.bf16.mxu0 %v1497_v33  ;;  %v1545_v2 = vld [vmem:[#allocation3 + $0x5f8] sm:$0xff]  ;;  %v1542_v33 = vld [vmem:[#allocation3 + $0x5e0] sm:$0xff] }
 0x475   :  { %1668 = vmatpush1.bf16.msra.mxu1 %v1494_v45  ;;  %1791 = vmatpush1.bf16.msra.mxu0 %v1496_v46  ;;  %v1544_v45 = vld [vmem:[#allocation3 + $0x5f0] sm:$0xff]  ;;  %v1556_v46 = vpack.c.bf16 %v1349_v0, %v1349_v0 }
 0x476   :  { %1669 = vmatprep.subr.bf16.mxu1 %v1499_v50  ;;  %1792 = vmatprep.subr.bf16.mxu0 %v1501_v48  ;;  %v1547_v50 = vld [vmem:[#allocation22 + $0x3] ss:$8 sm:$0xf] }
 0x477   :  { %v1562_v48 = vrot.slane %v1547_v50, %v8275_v47  ;;  %v1574_v0 = vrot.slane %v1547_v50, %v8291_v54 }
 0x479   :  { %1670 = vmatpush1.bf16.msra.mxu1 %v1498_v53  ;;  %1793 = vmatpush1.bf16.msra.mxu0 %v1500_v55  ;;  %v1570_v53 = vrot.slane %v1547_v50, %v8283_v49  ;;  %v1566_v55 = vrot.slane %v1547_v50, %v8278_v5 }
 0x47a   :  { %1671 = vmatprep.subr.bf16.mxu1 %v1503_v4  ;;  %1794 = vmatprep.subr.bf16.mxu0 %v1505_v57 }
 0x47d   :  { %1672 = vmatpush1.bf16.msra.mxu1 %v1502_v58  ;;  %1795 = vmatpush1.bf16.msra.mxu0 %v1504_v61 }
 0x47e   :  { %1673 = vmatprep.subr.bf16.mxu1 %v1507_v12  ;;  %1796 = vmatprep.subr.bf16.mxu0 %v1509_v63 }
 0x481   :  { %1674 = vmatpush1.bf16.msra.mxu1 %v1506_v1  ;;  %1797 = vmatpush1.bf16.msra.mxu0 %v1508_v13 }
 0x482   :  { %1675 = vmatprep.subr.bf16.mxu1 %v1511_v14  ;;  %1798 = vmatprep.subr.bf16.mxu0 %v1513_v15 }
 0x485   :  { %1676 = vmatpush1.bf16.msra.mxu1 %v1510_v39  ;;  %1799 = vmatpush1.bf16.msra.mxu0 %v1512_v44 }
 0x486   :  { %1677 = vmatprep.subr.bf16.mxu1 %v1515_v51  ;;  %1800 = vmatprep.subr.bf16.mxu0 %v1517_v17 }
 0x489   :  { %1678 = vmatpush1.bf16.msra.mxu1 %v1514_v23  ;;  %1801 = vmatpush1.bf16.msra.mxu0 %v1516_v28 }
 0x48a   :  { %1679 = vmatprep.subr.bf16.mxu1 %v1519_v52  ;;  %1802 = vmatprep.subr.bf16.mxu0 %v1521_v19 }
 0x48d   :  { %1680 = vmatpush1.bf16.msra.mxu1 %v1518_v56  ;;  %1803 = vmatpush1.bf16.msra.mxu0 %v1520_v24 }
 0x48e   :  { %1681 = vmatprep.subr.bf16.mxu1 %v1523_v62  ;;  %1804 = vmatprep.subr.bf16.mxu0 %v1525_v31 }
 0x491   :  { %1682 = vmatpush1.bf16.msra.mxu1 %v1522_v20  ;;  %1805 = vmatpush1.bf16.msra.mxu0 %v1524_v21 }
 0x492   :  { %1683 = vmatprep.subr.bf16.mxu1 %v1527_v22  ;;  %1806 = vmatprep.subr.bf16.mxu0 %v1529_v16 }
 0x495   :  { %1684 = vmatpush1.bf16.msra.mxu1 %v1526_v29  ;;  %1807 = vmatpush1.bf16.msra.mxu0 %v1528_v34 }
 0x496   :  { %1685 = vmatprep.subr.bf16.mxu1 %v1531_v35  ;;  %1808 = vmatprep.subr.bf16.mxu0 %v1533_v3  ;;  %v1549_v35 = vld [vmem:[#allocation22 + $0x4] ss:$8 sm:$0xf]  ;;  %v1551_v3 = vld [vmem:[#allocation22 + $0x5] ss:$8 sm:$0xf] }
 0x499   :  { %1686 = vmatpush1.bf16.msra.mxu1 %v1530_v36  ;;  %1809 = vmatpush1.bf16.msra.mxu0 %v1532_v37  ;;  %v1858_v36 = vrot.slane %v1549_v35, %v8275_v47  ;;  %v1862_v37 = vrot.slane %v1549_v35, %v8278_v5 }
 0x49a   :  { %1687 = vmatprep.subr.bf16.mxu1 %v1535_v38  ;;  %1810 = vmatprep.subr.bf16.mxu0 %v1537_v27  ;;  %v1866_v38 = vrot.slane %v1549_v35, %v8283_v49  ;;  %v1870_v27 = vrot.slane %v1549_v35, %v8291_v54 }
 0x49d   :  { %1688 = vmatpush1.bf16.msra.mxu1 %v1534_v40  ;;  %1811 = vmatpush1.bf16.msra.mxu0 %v1536_v18 }
 0x49e   :  { %1689 = vmatprep.subr.bf16.mxu1 %v1539_v30  ;;  %1812 = vmatprep.subr.bf16.mxu0 %v1541_v32 }
 0x4a1   :  { %1690 = vmatpush1.bf16.msra.mxu1 %v1538_v41  ;;  %1813 = vmatpush1.bf16.msra.mxu0 %v1540_v42  ;;  %v1883_v42 = vrot.slane %v1551_v3, %v8275_v47 }
 0x4a2   :  { %1691 = vmatprep.subr.bf16.mxu1 %v1543_v26  ;;  %1814 = vmatprep.subr.bf16.mxu0 %v1545_v2  ;;  %v1887_v26 = vrot.slane %v1551_v3, %v8278_v5  ;;  %v1891_v2 = vrot.slane %v1551_v3, %v8283_v49 }
 0x4a5   :  { %1692 = vmatpush1.bf16.msra.mxu1 %v1542_v33  ;;  %1815 = vmatpush1.bf16.msra.mxu0 %v1544_v45  ;;  %v1895_v33 = vrot.slane %v1551_v3, %v8291_v54 }
 0x4a8   :  { %1694 = vmatmul.mubr.bf16.vlgmr.msra.gmra.mrb[4].mxu1 %v1556_v46  ;;  %1817 = vmatmul.mubr.bf16.vlgmr.msra.gmra.mrb[8].mxu0 %v1556_v46 }
 0x57b   :  { %v1695_v4 = vpop.f32.mrb[4].mxu1  ;;  %v1818_v57 = vpop.f32.mrb[8].mxu0 }
 0x57c   :  { %v7431_v58 = vadd.f32 %v1695_v4, %v1562_v48  ;;  %v1697_v61 = vpop.f32.mrb[5].mxu1  ;;  %v1820_v12 = vpop.f32.mrb[9].mxu0  ;;  %v7433_v63 = vadd.f32 %v1818_v57, %v1570_v53 }
 0x57d   :  { %v7432_v25 = vadd.f32 %v1697_v61, %v1566_v55  ;;  %v1699_v1 = vpop.f32.mrb[6].mxu1  ;;  %v1822_v13 = vpop.f32.mrb[10].mxu0  ;;  %v7434_v23 = vadd.f32 %v1820_v12, %v1574_v0 }
 0x57e   :  { %v1832_v14 = vmul.f32 %v7431_v58, %v7431_v58  ;;  %v1700_v15 = vpop.f32.mrb[7].mxu1  ;;  %v1823_v39 = vpop.f32.mrb[11].mxu0  ;;  %v1834_v17 = vmul.f32 %v7433_v63, %v7433_v63 }
 0x57f   :  { %v1833_v44 = vmul.f32 %v7432_v25, %v7432_v25  ;;  %v1825_v51 = vadd.f32 %v7432_v25, %v7431_v58  ;;  %v1835_v24 = vmul.f32 %v7434_v23, %v7434_v23 }
 0x581   :  { %v1826_v28 = vadd.f32 %v7433_v63, %v1825_v51  ;;  %v1836_v52 = vadd.f32 %v1833_v44, %v1832_v14 }
 0x583   :  { %v1827_v19 = vadd.f32 %v7434_v23, %v1826_v28  ;;  %v1837_v56 = vadd.f32 %v1836_v52, %v1834_v17 }
 0x585   :  { %1828 = vadd.xlane.f32.xlu0 %v1827_v19  ;;  %v1838_v62 = vadd.f32 %v1837_v56, %v1835_v24 }
 0x589   :  { %1839 = vadd.xlane.f32.xlu0 %v1838_v62 }
 0x612   :  { %v1829_v31 = vpop.xlane.xlu0 %1828 }
 0x613   :  { %v1831_v20 = vmul.f32 0.001953125, %v1829_v31 }
 0x615   :  { %v1842_v22 = vmul.f32 %v1831_v20, %v1831_v20  ;;  %v1844_v40 = vsub.f32 %v7431_v58, %v1831_v20  ;;  %v1845_v18 = vsub.f32 %v7432_v25, %v1831_v20  ;;  %v1846_v30 = vsub.f32 %v7433_v63, %v1831_v20 }
 0x616   :  { %v1840_v21 = vpop.xlane.xlu0 %1839  ;;  %v1847_v32 = vsub.f32 %v7434_v23, %v1831_v20 }
 0x617   :  { %v1841_v16 = vmul.f32 0.001953125, %v1840_v21 }
 0x619   :  { %v1843_v29 = vsub.f32 %v1841_v16, %v1842_v22 }
 0x61b   :  { %v1848_v34 = vadd.f32 1e-05, %v1843_v29 }
 0x61d   :  { %7633 = vrsqrt.f32 %v1848_v34 }
 0x627   :  { %v7634_v41 = vpop.eup %7633 }
 0x628   :  { %v1850_v45 = vmul.f32 %v7634_v41, %v1844_v40  ;;  %v1851_v46 = vmul.f32 %v7634_v41, %v1845_v18  ;;  %v1852_v50 = vmul.f32 %v7634_v41, %v1846_v30  ;;  %v1853_v48 = vmul.f32 %v7634_v41, %v1847_v32 }
 0x62a   :  { %v1875_v53 = vmul.f32 %v1858_v36, %v1850_v45  ;;  %v1876_v55 = vmul.f32 %v1862_v37, %v1851_v46  ;;  %v1877_v4 = vmul.f32 %v1866_v38, %v1852_v50  ;;  %v1878_v57 = vmul.f32 %v1870_v27, %v1853_v48 }
 0x62c   :  { %v8370_v58 = vadd.f32 %v1883_v42, %v1875_v53  ;;  %v8372_v61 = vadd.f32 %v1887_v26, %v1876_v55  ;;  %v8374_v12 = vadd.f32 %v1891_v2, %v1877_v4  ;;  %v8376_v63 = vadd.f32 %v1895_v33, %v1878_v57 }
 0x62e   :  { %9542 = vst [vmem:[#allocation78_spill] sm:$0xff] %v8370_v58  ;;  %9543 = vst [vmem:[#allocation79_spill] sm:$0xff] %v8374_v12 }
 0x62f   :  { %7813 = dma.done.wait [#allocation16 + $0x2], 36864 }
 0x630   :  { %7814 = vsyncadd [#allocation16 + $0x2], 4294930432  ;;  %v8380_v25 = vpack.c.bf16 %v8222_v7, %v8222_v7  ;;  %v1907_v0 = vld [vmem:[#allocation4 + $0x8] sm:$0xff]  ;;  %v1906_v1 = vld [vmem:[#allocation4] sm:$0xff] }
 0x631   :  { %v1909_v13 = vld [vmem:[#allocation4 + $0x18] sm:$0xff]  ;;  %2243 = vmatprep.subr.bf16.mxu1 %v1907_v0  ;;  %v1908_v15 = vld [vmem:[#allocation4 + $0x10] sm:$0xff]  ;;  %v1915_v39 = vld [vmem:[#allocation4 + $0x48] sm:$0xff] }
 0x632   :  { %2275 = vmatprep.mubr.bf16.mxu1 %v8380_v25  ;;  %2398 = vmatprep.mubr.bf16.mxu0 %v8380_v25  ;;  %v1913_v14 = vld [vmem:[#allocation4 + $0x38] sm:$0xff]  ;;  %v1912_v44 = vld [vmem:[#allocation4 + $0x30] sm:$0xff]  ;;  %v1914_v51 = vld [vmem:[#allocation4 + $0x40] sm:$0xff] }
 0x633   :  { %2366 = vmatprep.subr.bf16.mxu0 %v1909_v13  ;;  %2244 = vmatpush1.bf16.msra.mxu1 %v1906_v1  ;;  %v1919_v7 = vld [vmem:[#allocation4 + $0x68] sm:$0xff]  ;;  %v1921_v17 = vld [vmem:[#allocation4 + $0x78] sm:$0xff]  ;;  %v1918_v23 = vld [vmem:[#allocation4 + $0x60] sm:$0xff] }
 0x634   :  { %2367 = vmatpush1.bf16.msra.mxu0 %v1908_v15  ;;  %2245 = vmatprep.subr.bf16.mxu1 %v1913_v14  ;;  %v1920_v28 = vld [vmem:[#allocation4 + $0x70] sm:$0xff]  ;;  %v1925_v52 = vld [vmem:[#allocation4 + $0x98] sm:$0xff]  ;;  %v1927_v19 = vld [vmem:[#allocation4 + $0xa8] sm:$0xff] }
 0x635   :  { %2368 = vmatprep.subr.bf16.mxu0 %v1915_v39  ;;  %v1924_v56 = vld [vmem:[#allocation4 + $0x90] sm:$0xff]  ;;  %v1926_v24 = vld [vmem:[#allocation4 + $0xa0] sm:$0xff]  ;;  %v1931_v62 = vld [vmem:[#allocation4 + $0xc8] sm:$0xff] }
 0x636   :  { %v1933_v31 = vld [vmem:[#allocation4 + $0xd8] sm:$0xff]  ;;  %v1930_v20 = vld [vmem:[#allocation4 + $0xc0] sm:$0xff]  ;;  %v1932_v21 = vld [vmem:[#allocation4 + $0xd0] sm:$0xff] }
 0x637   :  { %2246 = vmatpush1.bf16.msra.mxu1 %v1912_v44  ;;  %v1937_v22 = vld [vmem:[#allocation4 + $0xf8] sm:$0xff]  ;;  %v1939_v16 = vld [vmem:[#allocation4 + $0x108] sm:$0xff]  ;;  %v1936_v29 = vld [vmem:[#allocation4 + $0xf0] sm:$0xff] }
 0x638   :  { %2369 = vmatpush1.bf16.msra.mxu0 %v1914_v51  ;;  %2247 = vmatprep.subr.bf16.mxu1 %v1919_v7  ;;  %v1938_v34 = vld [vmem:[#allocation4 + $0x100] sm:$0xff]  ;;  %v1943_v35 = vld [vmem:[#allocation4 + $0x128] sm:$0xff]  ;;  %v1945_v3 = vld [vmem:[#allocation4 + $0x138] sm:$0xff] }
 0x639   :  { %2370 = vmatprep.subr.bf16.mxu0 %v1921_v17  ;;  %v1942_v36 = vld [vmem:[#allocation4 + $0x120] sm:$0xff]  ;;  %v1944_v37 = vld [vmem:[#allocation4 + $0x130] sm:$0xff]  ;;  %v1949_v38 = vld [vmem:[#allocation4 + $0x158] sm:$0xff] }
 0x63a   :  { %v1951_v27 = vld [vmem:[#allocation4 + $0x168] sm:$0xff]  ;;  %v1948_v40 = vld [vmem:[#allocation4 + $0x150] sm:$0xff]  ;;  %v1950_v18 = vld [vmem:[#allocation4 + $0x160] sm:$0xff] }
 0x63b   :  { %2248 = vmatpush1.bf16.msra.mxu1 %v1918_v23  ;;  %v1955_v30 = vld [vmem:[#allocation4 + $0x188] sm:$0xff]  ;;  %v1957_v32 = vld [vmem:[#allocation4 + $0x198] sm:$0xff]  ;;  %v1954_v41 = vld [vmem:[#allocation4 + $0x180] sm:$0xff] }
 0x63c   :  { %2371 = vmatpush1.bf16.msra.mxu0 %v1920_v28  ;;  %2249 = vmatprep.subr.bf16.mxu1 %v1925_v52  ;;  %v1956_v42 = vld [vmem:[#allocation4 + $0x190] sm:$0xff]  ;;  %v1961_v26 = vld [vmem:[#allocation4 + $0x1b8] sm:$0xff]  ;;  %v1963_v2 = vld [vmem:[#allocation4 + $0x1c8] sm:$0xff] }
 0x63d   :  { %2372 = vmatprep.subr.bf16.mxu0 %v1927_v19  ;;  %v1960_v33 = vld [vmem:[#allocation4 + $0x1b0] sm:$0xff]  ;;  %v1962_v45 = vld [vmem:[#allocation4 + $0x1c0] sm:$0xff]  ;;  %v1967_v46 = vld [vmem:[#allocation4 + $0x1e8] sm:$0xff] }
 0x63e   :  { %v1969_v50 = vld [vmem:[#allocation4 + $0x1f8] sm:$0xff]  ;;  %v1966_v48 = vld [vmem:[#allocation4 + $0x1e0] sm:$0xff]  ;;  %v1968_v53 = vld [vmem:[#allocation4 + $0x1f0] sm:$0xff] }
 0x63f   :  { %2250 = vmatpush1.bf16.msra.mxu1 %v1924_v56  ;;  %v1973_v55 = vld [vmem:[#allocation4 + $0x218] sm:$0xff]  ;;  %v1975_v4 = vld [vmem:[#allocation4 + $0x228] sm:$0xff]  ;;  %v1972_v57 = vld [vmem:[#allocation4 + $0x210] sm:$0xff] }
 0x640   :  { %2373 = vmatpush1.bf16.msra.mxu0 %v1926_v24  ;;  %2251 = vmatprep.subr.bf16.mxu1 %v1931_v62  ;;  %v1974_v0 = vld [vmem:[#allocation4 + $0x220] sm:$0xff]  ;;  %v1979_v1 = vld [vmem:[#allocation4 + $0x248] sm:$0xff]  ;;  %v1981_v13 = vld [vmem:[#allocation4 + $0x258] sm:$0xff] }
 0x641   :  { %2374 = vmatprep.subr.bf16.mxu0 %v1933_v31  ;;  %v1978_v14 = vld [vmem:[#allocation4 + $0x240] sm:$0xff]  ;;  %v1980_v15 = vld [vmem:[#allocation4 + $0x250] sm:$0xff]  ;;  %v1985_v39 = vld [vmem:[#allocation4 + $0x278] sm:$0xff] }
 0x642   :  { %v1987_v44 = vld [vmem:[#allocation4 + $0x288] sm:$0xff]  ;;  %v1984_v51 = vld [vmem:[#allocation4 + $0x270] sm:$0xff]  ;;  %v1986_v7 = vld [vmem:[#allocation4 + $0x280] sm:$0xff] }
 0x643   :  { %2252 = vmatpush1.bf16.msra.mxu1 %v1930_v20  ;;  %v1991_v17 = vld [vmem:[#allocation4 + $0x2a8] sm:$0xff]  ;;  %v1993_v23 = vld [vmem:[#allocation4 + $0x2b8] sm:$0xff]  ;;  %v1990_v28 = vld [vmem:[#allocation4 + $0x2a0] sm:$0xff] }
 0x644   :  { %2375 = vmatpush1.bf16.msra.mxu0 %v1932_v21  ;;  %2253 = vmatprep.subr.bf16.mxu1 %v1937_v22  ;;  %v1992_v52 = vld [vmem:[#allocation4 + $0x2b0] sm:$0xff]  ;;  %v1997_v19 = vld [vmem:[#allocation4 + $0x2d8] sm:$0xff]  ;;  %v1999_v56 = vld [vmem:[#allocation4 + $0x2e8] sm:$0xff]  ;;  %v8386_v21 = vpack.c.bf16 %v8220_v6, %v8220_v6 }
 0x645   :  { %2376 = vmatprep.subr.bf16.mxu0 %v1939_v16  ;;  %v1996_v24 = vld [vmem:[#allocation4 + $0x2d0] sm:$0xff]  ;;  %v1998_v62 = vld [vmem:[#allocation4 + $0x2e0] sm:$0xff]  ;;  %v2003_v31 = vld [vmem:[#allocation4 + $0x308] sm:$0xff] }
 0x646   :  { %v2005_v20 = vld [vmem:[#allocation4 + $0x318] sm:$0xff]  ;;  %v2002_v22 = vld [vmem:[#allocation4 + $0x300] sm:$0xff]  ;;  %v2004_v16 = vld [vmem:[#allocation4 + $0x310] sm:$0xff] }
 0x647   :  { %2254 = vmatpush1.bf16.msra.mxu1 %v1936_v29  ;;  %v2009_v29 = vld [vmem:[#allocation4 + $0x338] sm:$0xff]  ;;  %v2008_v6 = vld [vmem:[#allocation4 + $0x330] sm:$0xff] }
 0x648   :  { %2377 = vmatpush1.bf16.msra.mxu0 %v1938_v34  ;;  %2255 = vmatprep.subr.bf16.mxu1 %v1943_v35  ;;  %v2011_v34 = vld [vmem:[#allocation4 + $0x348] sm:$0xff]  ;;  %v8390_v35 = vpack.c.bf16 %v8226_v9, %v8226_v9  ;;  %v2014_v9 = vld [vmem:[#allocation4 + $0x360] sm:$0xff] }
 0x649   :  { %2378 = vmatprep.subr.bf16.mxu0 %v1945_v3  ;;  %v2010_v3 = vld [vmem:[#allocation4 + $0x340] sm:$0xff] }
 0x64b   :  { %2256 = vmatpush1.bf16.msra.mxu1 %v1942_v36  ;;  %v2015_v36 = vld [vmem:[#allocation4 + $0x368] sm:$0xff] }
 0x64c   :  { %2379 = vmatpush1.bf16.msra.mxu0 %v1944_v37  ;;  %2257 = vmatprep.subr.bf16.mxu1 %v1949_v38  ;;  %v2017_v37 = vld [vmem:[#allocation4 + $0x378] sm:$0xff]  ;;  %v2016_v38 = vld [vmem:[#allocation4 + $0x370] sm:$0xff] }
 0x64d   :  { %2380 = vmatprep.subr.bf16.mxu0 %v1951_v27  ;;  %v2021_v27 = vld [vmem:[#allocation4 + $0x398] sm:$0xff] }
 0x64f   :  { %2258 = vmatpush1.bf16.msra.mxu1 %v1948_v40  ;;  %v2023_v40 = vld [vmem:[#allocation4 + $0x3a8] sm:$0xff] }
 0x650   :  { %2381 = vmatpush1.bf16.msra.mxu0 %v1950_v18  ;;  %2259 = vmatprep.subr.bf16.mxu1 %v1955_v30  ;;  %v2020_v18 = vld [vmem:[#allocation4 + $0x390] sm:$0xff]  ;;  %v2022_v30 = vld [vmem:[#allocation4 + $0x3a0] sm:$0xff] }
 0x651   :  { %2382 = vmatprep.subr.bf16.mxu0 %v1957_v32  ;;  %v2027_v32 = vld [vmem:[#allocation4 + $0x3c8] sm:$0xff] }
 0x653   :  { %2260 = vmatpush1.bf16.msra.mxu1 %v1954_v41  ;;  %v2029_v41 = vld [vmem:[#allocation4 + $0x3d8] sm:$0xff] }
 0x654   :  { %2383 = vmatpush1.bf16.msra.mxu0 %v1956_v42  ;;  %2261 = vmatprep.subr.bf16.mxu1 %v1961_v26  ;;  %v2026_v42 = vld [vmem:[#allocation4 + $0x3c0] sm:$0xff]  ;;  %v2028_v26 = vld [vmem:[#allocation4 + $0x3d0] sm:$0xff] }
 0x655   :  { %2384 = vmatprep.subr.bf16.mxu0 %v1963_v2  ;;  %v2033_v2 = vld [vmem:[#allocation4 + $0x3f8] sm:$0xff] }
 0x657   :  { %2262 = vmatpush1.bf16.msra.mxu1 %v1960_v33  ;;  %v2035_v33 = vld [vmem:[#allocation4 + $0x408] sm:$0xff] }
 0x658   :  { %2385 = vmatpush1.bf16.msra.mxu0 %v1962_v45  ;;  %2263 = vmatprep.subr.bf16.mxu1 %v1967_v46  ;;  %v2032_v45 = vld [vmem:[#allocation4 + $0x3f0] sm:$0xff]  ;;  %v2034_v46 = vld [vmem:[#allocation4 + $0x400] sm:$0xff] }
 0x659   :  { %2386 = vmatprep.subr.bf16.mxu0 %v1969_v50  ;;  %v2039_v50 = vld [vmem:[#allocation4 + $0x428] sm:$0xff] }
 0x65b   :  { %2264 = vmatpush1.bf16.msra.mxu1 %v1966_v48  ;;  %v2041_v48 = vld [vmem:[#allocation4 + $0x438] sm:$0xff] }
 0x65c   :  { %2387 = vmatpush1.bf16.msra.mxu0 %v1968_v53  ;;  %2265 = vmatprep.subr.bf16.mxu1 %v1973_v55  ;;  %v2038_v53 = vld [vmem:[#allocation4 + $0x420] sm:$0xff]  ;;  %v2040_v55 = vld [vmem:[#allocation4 + $0x430] sm:$0xff] }
 0x65d   :  { %2388 = vmatprep.subr.bf16.mxu0 %v1975_v4  ;;  %v2045_v4 = vld [vmem:[#allocation4 + $0x458] sm:$0xff] }
 0x65f   :  { %2266 = vmatpush1.bf16.msra.mxu1 %v1972_v57  ;;  %v2047_v57 = vld [vmem:[#allocation4 + $0x468] sm:$0xff] }
 0x660   :  { %2389 = vmatpush1.bf16.msra.mxu0 %v1974_v0  ;;  %2267 = vmatprep.subr.bf16.mxu1 %v1979_v1  ;;  %v2044_v0 = vld [vmem:[#allocation4 + $0x450] sm:$0xff]  ;;  %v2046_v1 = vld [vmem:[#allocation4 + $0x460] sm:$0xff] }
 0x661   :  { %2390 = vmatprep.subr.bf16.mxu0 %v1981_v13  ;;  %v2051_v13 = vld [vmem:[#allocation4 + $0x488] sm:$0xff] }
 0x663   :  { %2268 = vmatpush1.bf16.msra.mxu1 %v1978_v14  ;;  %v2053_v14 = vld [vmem:[#allocation4 + $0x498] sm:$0xff] }
 0x664   :  { %2391 = vmatpush1.bf16.msra.mxu0 %v1980_v15  ;;  %2269 = vmatprep.subr.bf16.mxu1 %v1985_v39  ;;  %v2050_v15 = vld [vmem:[#allocation4 + $0x480] sm:$0xff]  ;;  %v2052_v39 = vld [vmem:[#allocation4 + $0x490] sm:$0xff] }
 0x665   :  { %2392 = vmatprep.subr.bf16.mxu0 %v1987_v44  ;;  %v2057_v44 = vld [vmem:[#allocation4 + $0x4b8] sm:$0xff] }
 0x667   :  { %2270 = vmatpush1.bf16.msra.mxu1 %v1984_v51  ;;  %v2059_v51 = vld [vmem:[#allocation4 + $0x4c8] sm:$0xff] }
 0x668   :  { %2393 = vmatpush1.bf16.msra.mxu0 %v1986_v7  ;;  %2271 = vmatprep.subr.bf16.mxu1 %v1991_v17  ;;  %v2056_v7 = vld [vmem:[#allocation4 + $0x4b0] sm:$0xff]  ;;  %v2058_v17 = vld [vmem:[#allocation4 + $0x4c0] sm:$0xff] }
 0x669   :  { %2394 = vmatprep.subr.bf16.mxu0 %v1993_v23  ;;  %v2063_v23 = vld [vmem:[#allocation4 + $0x4e8] sm:$0xff] }
 0x66b   :  { %2272 = vmatpush1.bf16.msra.mxu1 %v1990_v28  ;;  %v2065_v28 = vld [vmem:[#allocation4 + $0x4f8] sm:$0xff] }
 0x66c   :  { %2395 = vmatpush1.bf16.msra.mxu0 %v1992_v52  ;;  %2273 = vmatprep.subr.bf16.mxu1 %v1997_v19  ;;  %v2062_v52 = vld [vmem:[#allocation4 + $0x4e0] sm:$0xff]  ;;  %v2064_v19 = vld [vmem:[#allocation4 + $0x4f0] sm:$0xff] }
 0x66d   :  { %2396 = vmatprep.subr.bf16.mxu0 %v1999_v56  ;;  %v2069_v56 = vld [vmem:[#allocation4 + $0x518] sm:$0xff] }
 0x66f   :  { %2274 = vmatpush1.bf16.msra.mxu1 %v1996_v24  ;;  %v2071_v24 = vld [vmem:[#allocation4 + $0x528] sm:$0xff] }
 0x670   :  { %2397 = vmatpush1.bf16.msra.mxu0 %v1998_v62  ;;  %2284 = vmatprep.subr.bf16.mxu1 %v2003_v31  ;;  %v2068_v62 = vld [vmem:[#allocation4 + $0x510] sm:$0xff]  ;;  %v2070_v31 = vld [vmem:[#allocation4 + $0x520] sm:$0xff] }
 0x671   :  { %2407 = vmatprep.subr.bf16.mxu0 %v2005_v20  ;;  %v2075_v20 = vld [vmem:[#allocation4 + $0x548] sm:$0xff] }
 0x672   :  { %2276 = vmatmul.mubr.bf16.vlgmr.msra.gmra.mrb[8].mxu1 %v8386_v21 }
 0x673   :  { %2399 = vmatmul.mubr.bf16.vlgmr.msra.gmra.mrb[12].mxu0 %v8386_v21  ;;  %2285 = vmatpush1.bf16.msra.mxu1 %v2002_v22  ;;  %v2077_v22 = vld [vmem:[#allocation4 + $0x558] sm:$0xff] }
 0x674   :  { %2408 = vmatpush1.bf16.msra.mxu0 %v2004_v16  ;;  %2286 = vmatprep.subr.bf16.mxu1 %v2009_v29  ;;  %v2074_v16 = vld [vmem:[#allocation4 + $0x540] sm:$0xff]  ;;  %v2076_v29 = vld [vmem:[#allocation4 + $0x550] sm:$0xff] }
 0x675   :  { %2409 = vmatprep.subr.bf16.mxu0 %v2011_v34  ;;  %2316 = vmatprep.mubr.bf16.mxu1 %v8390_v35  ;;  %v2081_v34 = vld [vmem:[#allocation4 + $0x578] sm:$0xff] }
 0x676   :  { %2439 = vmatprep.mubr.bf16.mxu0 %v8390_v35 }
 0x677   :  { %2287 = vmatpush1.bf16.msra.mxu1 %v2008_v6  ;;  %v2083_v6 = vld [vmem:[#allocation4 + $0x588] sm:$0xff] }
 0x678   :  { %2410 = vmatpush1.bf16.msra.mxu0 %v2010_v3  ;;  %2288 = vmatprep.subr.bf16.mxu1 %v2015_v36  ;;  %v2080_v3 = vld [vmem:[#allocation4 + $0x570] sm:$0xff]  ;;  %v2082_v36 = vld [vmem:[#allocation4 + $0x580] sm:$0xff] }
 0x679   :  { %2411 = vmatprep.subr.bf16.mxu0 %v2017_v37  ;;  %v2087_v37 = vld [vmem:[#allocation4 + $0x5a8] sm:$0xff] }
 0x67b   :  { %2289 = vmatpush1.bf16.msra.mxu1 %v2014_v9  ;;  %v2089_v9 = vld [vmem:[#allocation4 + $0x5b8] sm:$0xff] }
 0x67c   :  { %2412 = vmatpush1.bf16.msra.mxu0 %v2016_v38  ;;  %2290 = vmatprep.subr.bf16.mxu1 %v2021_v27  ;;  %v2086_v38 = vld [vmem:[#allocation4 + $0x5a0] sm:$0xff]  ;;  %v2088_v27 = vld [vmem:[#allocation4 + $0x5b0] sm:$0xff] }
 0x67d   :  { %2413 = vmatprep.subr.bf16.mxu0 %v2023_v40  ;;  %v2093_v40 = vld [vmem:[#allocation4 + $0x5d8] sm:$0xff] }
 0x67f   :  { %2291 = vmatpush1.bf16.msra.mxu1 %v2020_v18  ;;  %v2095_v18 = vld [vmem:[#allocation4 + $0x5e8] sm:$0xff] }
 0x680   :  { %2414 = vmatpush1.bf16.msra.mxu0 %v2022_v30  ;;  %2292 = vmatprep.subr.bf16.mxu1 %v2027_v32  ;;  %v2092_v30 = vld [vmem:[#allocation4 + $0x5d0] sm:$0xff]  ;;  %v2094_v32 = vld [vmem:[#allocation4 + $0x5e0] sm:$0xff] }
 0x681   :  { %2415 = vmatprep.subr.bf16.mxu0 %v2029_v41  ;;  %v2099_v41 = vld [vmem:[#allocation4 + $0x608] sm:$0xff] }
 0x683   :  { %2293 = vmatpush1.bf16.msra.mxu1 %v2026_v42  ;;  %v2101_v42 = vld [vmem:[#allocation4 + $0x618] sm:$0xff] }
 0x684   :  { %2416 = vmatpush1.bf16.msra.mxu0 %v2028_v26  ;;  %2294 = vmatprep.subr.bf16.mxu1 %v2033_v2  ;;  %v8398_v26 = vpack.c.bf16 %v8224_v8, %v8224_v8  ;;  %v2098_v2 = vld [vmem:[#allocation4 + $0x600] sm:$0xff]  ;;  %v2104_v8 = vld [vmem:[#allocation4 + $0x630] sm:$0xff] }
 0x685   :  { %2417 = vmatprep.subr.bf16.mxu0 %v2035_v33  ;;  %v2100_v33 = vld [vmem:[#allocation4 + $0x610] sm:$0xff] }
 0x687   :  { %2295 = vmatpush1.bf16.msra.mxu1 %v2032_v45  ;;  %v2105_v45 = vld [vmem:[#allocation4 + $0x638] sm:$0xff] }
 0x688   :  { %2418 = vmatpush1.bf16.msra.mxu0 %v2034_v46  ;;  %2296 = vmatprep.subr.bf16.mxu1 %v2039_v50  ;;  %v2107_v46 = vld [vmem:[#allocation4 + $0x648] sm:$0xff]  ;;  %v8402_v50 = vpack.c.bf16 %v8230_v11, %v8230_v11  ;;  %v2110_v11 = vld [vmem:[#allocation4 + $0x660] sm:$0xff] }
 0x689   :  { %2419 = vmatprep.subr.bf16.mxu0 %v2041_v48  ;;  %v2106_v48 = vld [vmem:[#allocation4 + $0x640] sm:$0xff] }
 0x68b   :  { %2297 = vmatpush1.bf16.msra.mxu1 %v2038_v53  ;;  %v2111_v53 = vld [vmem:[#allocation4 + $0x668] sm:$0xff] }
 0x68c   :  { %2420 = vmatpush1.bf16.msra.mxu0 %v2040_v55  ;;  %2298 = vmatprep.subr.bf16.mxu1 %v2045_v4  ;;  %v2113_v55 = vld [vmem:[#allocation4 + $0x678] sm:$0xff]  ;;  %v2112_v4 = vld [vmem:[#allocation4 + $0x670] sm:$0xff] }
 0x68d   :  { %2421 = vmatprep.subr.bf16.mxu0 %v2047_v57  ;;  %v2117_v57 = vld [vmem:[#allocation4 + $0x698] sm:$0xff] }
 0x68f   :  { %2299 = vmatpush1.bf16.msra.mxu1 %v2044_v0  ;;  %v2119_v0 = vld [vmem:[#allocation4 + $0x6a8] sm:$0xff] }
 0x690   :  { %2422 = vmatpush1.bf16.msra.mxu0 %v2046_v1  ;;  %2300 = vmatprep.subr.bf16.mxu1 %v2051_v13  ;;  %v2116_v1 = vld [vmem:[#allocation4 + $0x690] sm:$0xff]  ;;  %v2118_v13 = vld [vmem:[#allocation4 + $0x6a0] sm:$0xff] }
 0x691   :  { %2423 = vmatprep.subr.bf16.mxu0 %v2053_v14  ;;  %v2123_v14 = vld [vmem:[#allocation4 + $0x6c8] sm:$0xff] }
 0x693   :  { %2301 = vmatpush1.bf16.msra.mxu1 %v2050_v15  ;;  %v2125_v15 = vld [vmem:[#allocation4 + $0x6d8] sm:$0xff] }
 0x694   :  { %2424 = vmatpush1.bf16.msra.mxu0 %v2052_v39  ;;  %2302 = vmatprep.subr.bf16.mxu1 %v2057_v44  ;;  %v2122_v39 = vld [vmem:[#allocation4 + $0x6c0] sm:$0xff]  ;;  %v2124_v44 = vld [vmem:[#allocation4 + $0x6d0] sm:$0xff] }
 0x695   :  { %2425 = vmatprep.subr.bf16.mxu0 %v2059_v51  ;;  %v2129_v51 = vld [vmem:[#allocation4 + $0x6f8] sm:$0xff] }
 0x697   :  { %2303 = vmatpush1.bf16.msra.mxu1 %v2056_v7  ;;  %v2131_v7 = vld [vmem:[#allocation4 + $0x708] sm:$0xff] }
 0x698   :  { %2426 = vmatpush1.bf16.msra.mxu0 %v2058_v17  ;;  %2304 = vmatprep.subr.bf16.mxu1 %v2063_v23  ;;  %v2128_v17 = vld [vmem:[#allocation4 + $0x6f0] sm:$0xff]  ;;  %v2130_v23 = vld [vmem:[#allocation4 + $0x700] sm:$0xff] }
 0x699   :  { %2427 = vmatprep.subr.bf16.mxu0 %v2065_v28  ;;  %v2135_v28 = vld [vmem:[#allocation4 + $0x728] sm:$0xff] }
 0x69b   :  { %2305 = vmatpush1.bf16.msra.mxu1 %v2062_v52  ;;  %v2137_v52 = vld [vmem:[#allocation4 + $0x738] sm:$0xff] }
 0x69c   :  { %2428 = vmatpush1.bf16.msra.mxu0 %v2064_v19  ;;  %2306 = vmatprep.subr.bf16.mxu1 %v2069_v56  ;;  %v2134_v19 = vld [vmem:[#allocation4 + $0x720] sm:$0xff]  ;;  %v2136_v56 = vld [vmem:[#allocation4 + $0x730] sm:$0xff] }
 0x69d   :  { %2429 = vmatprep.subr.bf16.mxu0 %v2071_v24  ;;  %v2141_v24 = vld [vmem:[#allocation4 + $0x758] sm:$0xff] }
 0x69f   :  { %2307 = vmatpush1.bf16.msra.mxu1 %v2068_v62  ;;  %v2143_v62 = vld [vmem:[#allocation4 + $0x768] sm:$0xff] }
 0x6a0   :  { %2430 = vmatpush1.bf16.msra.mxu0 %v2070_v31  ;;  %2308 = vmatprep.subr.bf16.mxu1 %v2075_v20  ;;  %v2140_v31 = vld [vmem:[#allocation4 + $0x750] sm:$0xff]  ;;  %v2142_v20 = vld [vmem:[#allocation4 + $0x760] sm:$0xff] }
 0x6a1   :  { %2431 = vmatprep.subr.bf16.mxu0 %v2077_v22  ;;  %v2147_v22 = vld [vmem:[#allocation4 + $0x788] sm:$0xff] }
 0x6a3   :  { %2309 = vmatpush1.bf16.msra.mxu1 %v2074_v16  ;;  %v2149_v16 = vld [vmem:[#allocation4 + $0x798] sm:$0xff] }
 0x6a4   :  { %2432 = vmatpush1.bf16.msra.mxu0 %v2076_v29  ;;  %2310 = vmatprep.subr.bf16.mxu1 %v2081_v34  ;;  %v2146_v29 = vld [vmem:[#allocation4 + $0x780] sm:$0xff]  ;;  %v2148_v34 = vld [vmem:[#allocation4 + $0x790] sm:$0xff] }
 0x6a5   :  { %2433 = vmatprep.subr.bf16.mxu0 %v2083_v6  ;;  %v2153_v6 = vld [vmem:[#allocation4 + $0x7b8] sm:$0xff] }
 0x6a7   :  { %2311 = vmatpush1.bf16.msra.mxu1 %v2080_v3  ;;  %v2155_v3 = vld [vmem:[#allocation4 + $0x7c8] sm:$0xff] }
 0x6a8   :  { %2434 = vmatpush1.bf16.msra.mxu0 %v2082_v36  ;;  %2312 = vmatprep.subr.bf16.mxu1 %v2087_v37  ;;  %v2152_v36 = vld [vmem:[#allocation4 + $0x7b0] sm:$0xff]  ;;  %v2154_v37 = vld [vmem:[#allocation4 + $0x7c0] sm:$0xff] }
 0x6a9   :  { %2435 = vmatprep.subr.bf16.mxu0 %v2089_v9  ;;  %v2159_v9 = vld [vmem:[#allocation4 + $0x7e8] sm:$0xff] }
 0x6ab   :  { %2313 = vmatpush1.bf16.msra.mxu1 %v2086_v38  ;;  %v2161_v38 = vld [vmem:[#allocation4 + $0x7f8] sm:$0xff] }
 0x6ac   :  { %2436 = vmatpush1.bf16.msra.mxu0 %v2088_v27  ;;  %2314 = vmatprep.subr.bf16.mxu1 %v2093_v40  ;;  %v2158_v27 = vld [vmem:[#allocation4 + $0x7e0] sm:$0xff]  ;;  %v2160_v40 = vld [vmem:[#allocation4 + $0x7f0] sm:$0xff] }
 0x6ad   :  { %2437 = vmatprep.subr.bf16.mxu0 %v2095_v18  ;;  %v2165_v18 = vld [vmem:[#allocation4 + $0x818] sm:$0xff] }
 0x6af   :  { %2315 = vmatpush1.bf16.msra.mxu1 %v2092_v30  ;;  %v2167_v30 = vld [vmem:[#allocation4 + $0x828] sm:$0xff] }
 0x6b0   :  { %2438 = vmatpush1.bf16.msra.mxu0 %v2094_v32  ;;  %2325 = vmatprep.subr.bf16.mxu1 %v2099_v41  ;;  %v2164_v32 = vld [vmem:[#allocation4 + $0x810] sm:$0xff]  ;;  %v2166_v41 = vld [vmem:[#allocation4 + $0x820] sm:$0xff] }
 0x6b1   :  { %2448 = vmatprep.subr.bf16.mxu0 %v2101_v42  ;;  %v2171_v42 = vld [vmem:[#allocation4 + $0x848] sm:$0xff] }
 0x6b2   :  { %2317 = vmatmul.mubr.bf16.vlgmr.msra.gmra.mrb[8].mxu1 %v8398_v26 }
 0x6b3   :  { %2440 = vmatmul.mubr.bf16.vlgmr.msra.gmra.mrb[12].mxu0 %v8398_v26  ;;  %2326 = vmatpush1.bf16.msra.mxu1 %v2098_v2  ;;  %v2173_v2 = vld [vmem:[#allocation4 + $0x858] sm:$0xff] }
 0x6b4   :  { %2449 = vmatpush1.bf16.msra.mxu0 %v2100_v33  ;;  %2327 = vmatprep.subr.bf16.mxu1 %v2105_v45  ;;  %v2170_v33 = vld [vmem:[#allocation4 + $0x840] sm:$0xff]  ;;  %v2172_v45 = vld [vmem:[#allocation4 + $0x850] sm:$0xff] }
 0x6b5   :  { %2450 = vmatprep.subr.bf16.mxu0 %v2107_v46  ;;  %2357 = vmatprep.mubr.bf16.mxu1 %v8402_v50  ;;  %v2177_v46 = vld [vmem:[#allocation4 + $0x878] sm:$0xff] }
 0x6b6   :  { %2480 = vmatprep.mubr.bf16.mxu0 %v8402_v50 }
 0x6b7   :  { %2328 = vmatpush1.bf16.msra.mxu1 %v2104_v8  ;;  %v2179_v8 = vld [vmem:[#allocation4 + $0x888] sm:$0xff] }
 0x6b8   :  { %2451 = vmatpush1.bf16.msra.mxu0 %v2106_v48  ;;  %2329 = vmatprep.subr.bf16.mxu1 %v2111_v53  ;;  %v2176_v48 = vld [vmem:[#allocation4 + $0x870] sm:$0xff]  ;;  %v2178_v53 = vld [vmem:[#allocation4 + $0x880] sm:$0xff] }
 0x6b9   :  { %2452 = vmatprep.subr.bf16.mxu0 %v2113_v55  ;;  %v2183_v55 = vld [vmem:[#allocation4 + $0x8a8] sm:$0xff] }
 0x6bb   :  { %2330 = vmatpush1.bf16.msra.mxu1 %v2110_v11  ;;  %v2185_v11 = vld [vmem:[#allocation4 + $0x8b8] sm:$0xff] }
 0x6bc   :  { %2453 = vmatpush1.bf16.msra.mxu0 %v2112_v4  ;;  %2331 = vmatprep.subr.bf16.mxu1 %v2117_v57  ;;  %v2182_v4 = vld [vmem:[#allocation4 + $0x8a0] sm:$0xff]  ;;  %v2184_v57 = vld [vmem:[#allocation4 + $0x8b0] sm:$0xff] }
 0x6bd   :  { %2454 = vmatprep.subr.bf16.mxu0 %v2119_v0  ;;  %v2189_v0 = vld [vmem:[#allocation4 + $0x8d8] sm:$0xff] }
 0x6bf   :  { %2332 = vmatpush1.bf16.msra.mxu1 %v2116_v1  ;;  %v2191_v1 = vld [vmem:[#allocation4 + $0x8e8] sm:$0xff] }
 0x6c0   :  { %2455 = vmatpush1.bf16.msra.mxu0 %v2118_v13  ;;  %2333 = vmatprep.subr.bf16.mxu1 %v2123_v14  ;;  %v2188_v13 = vld [vmem:[#allocation4 + $0x8d0] sm:$0xff]  ;;  %v2190_v14 = vld [vmem:[#allocation4 + $0x8e0] sm:$0xff] }
 0x6c1   :  { %2456 = vmatprep.subr.bf16.mxu0 %v2125_v15  ;;  %v1911_v15 = vld [vmem:[#allocation4 + $0x28] sm:$0xff] }
 0x6c3   :  { %2334 = vmatpush1.bf16.msra.mxu1 %v2122_v39  ;;  %v8410_v39 = vpack.c.bf16 %v8228_v10, %v8228_v10  ;;  %v1929_v10 = vld [vmem:[#allocation4 + $0xb8] sm:$0xff] }
 0x6c4   :  { %2457 = vmatpush1.bf16.msra.mxu0 %v2124_v44  ;;  %2335 = vmatprep.subr.bf16.mxu1 %v2129_v51  ;;  %v1910_v44 = vld [vmem:[#allocation4 + $0x20] sm:$0xff]  ;;  %v1917_v51 = vld [vmem:[#allocation4 + $0x58] sm:$0xff] }
 0x6c5   :  { %2458 = vmatprep.subr.bf16.mxu0 %v2131_v7  ;;  %v1916_v7 = vld [vmem:[#allocation4 + $0x50] sm:$0xff] }
 0x6c7   :  { %2336 = vmatpush1.bf16.msra.mxu1 %v2128_v17  ;;  %v1923_v17 = vld [vmem:[#allocation4 + $0x88] sm:$0xff] }
 0x6c8   :  { %2459 = vmatpush1.bf16.msra.mxu0 %v2130_v23  ;;  %2337 = vmatprep.subr.bf16.mxu1 %v2135_v28  ;;  %v1922_v23 = vld [vmem:[#allocation4 + $0x80] sm:$0xff]  ;;  %v1928_v28 = vld [vmem:[#allocation4 + $0xb0] sm:$0xff] }
 0x6c9   :  { %2460 = vmatprep.subr.bf16.mxu0 %v2137_v52  ;;  %v1935_v52 = vld [vmem:[#allocation4 + $0xe8] sm:$0xff] }
 0x6cb   :  { %2338 = vmatpush1.bf16.msra.mxu1 %v2134_v19  ;;  %v1934_v19 = vld [vmem:[#allocation4 + $0xe0] sm:$0xff] }
 0x6cc   :  { %2461 = vmatpush1.bf16.msra.mxu0 %v2136_v56  ;;  %2339 = vmatprep.subr.bf16.mxu1 %v2141_v24  ;;  %v1941_v56 = vld [vmem:[#allocation4 + $0x118] sm:$0xff]  ;;  %v1940_v24 = vld [vmem:[#allocation4 + $0x110] sm:$0xff] }
 0x6cd   :  { %2462 = vmatprep.subr.bf16.mxu0 %v2143_v62  ;;  %v1947_v62 = vld [vmem:[#allocation4 + $0x148] sm:$0xff] }
 0x6cf   :  { %2340 = vmatpush1.bf16.msra.mxu1 %v2140_v31  ;;  %v1953_v31 = vld [vmem:[#allocation4 + $0x178] sm:$0xff] }
 0x6d0   :  { %2463 = vmatpush1.bf16.msra.mxu0 %v2142_v20  ;;  %2341 = vmatprep.subr.bf16.mxu1 %v2147_v22  ;;  %v1952_v20 = vld [vmem:[#allocation4 + $0x170] sm:$0xff]  ;;  %v1959_v22 = vld [vmem:[#allocation4 + $0x1a8] sm:$0xff] }
 0x6d1   :  { %2464 = vmatprep.subr.bf16.mxu0 %v2149_v16  ;;  %v1958_v16 = vld [vmem:[#allocation4 + $0x1a0] sm:$0xff] }
 0x6d3   :  { %2342 = vmatpush1.bf16.msra.mxu1 %v2146_v29  ;;  %v1965_v29 = vld [vmem:[#allocation4 + $0x1d8] sm:$0xff] }
 0x6d4   :  { %2465 = vmatpush1.bf16.msra.mxu0 %v2148_v34  ;;  %2343 = vmatprep.subr.bf16.mxu1 %v2153_v6  ;;  %v1964_v34 = vld [vmem:[#allocation4 + $0x1d0] sm:$0xff]  ;;  %v1971_v6 = vld [vmem:[#allocation4 + $0x208] sm:$0xff] }
 0x6d5   :  { %2466 = vmatprep.subr.bf16.mxu0 %v2155_v3  ;;  %v1970_v3 = vld [vmem:[#allocation4 + $0x200] sm:$0xff] }
 0x6d7   :  { %2344 = vmatpush1.bf16.msra.mxu1 %v2152_v36  ;;  %v1977_v36 = vld [vmem:[#allocation4 + $0x238] sm:$0xff] }
 0x6d8   :  { %2467 = vmatpush1.bf16.msra.mxu0 %v2154_v37  ;;  %2345 = vmatprep.subr.bf16.mxu1 %v2159_v9  ;;  %v1976_v37 = vld [vmem:[#allocation4 + $0x230] sm:$0xff]  ;;  %v1983_v9 = vld [vmem:[#allocation4 + $0x268] sm:$0xff] }
 0x6d9   :  { %2468 = vmatprep.subr.bf16.mxu0 %v2161_v38  ;;  %v1982_v38 = vld [vmem:[#allocation4 + $0x260] sm:$0xff] }
 0x6db   :  { %2346 = vmatpush1.bf16.msra.mxu1 %v2158_v27  ;;  %v1989_v27 = vld [vmem:[#allocation4 + $0x298] sm:$0xff] }
 0x6dc   :  { %2469 = vmatpush1.bf16.msra.mxu0 %v2160_v40  ;;  %2347 = vmatprep.subr.bf16.mxu1 %v2165_v18  ;;  %v1988_v40 = vld [vmem:[#allocation4 + $0x290] sm:$0xff]  ;;  %v1995_v18 = vld [vmem:[#allocation4 + $0x2c8] sm:$0xff] }
 0x6dd   :  { %2470 = vmatprep.subr.bf16.mxu0 %v2167_v30  ;;  %v1994_v30 = vld [vmem:[#allocation4 + $0x2c0] sm:$0xff] }
 0x6df   :  { %2348 = vmatpush1.bf16.msra.mxu1 %v2164_v32  ;;  %v2001_v32 = vld [vmem:[#allocation4 + $0x2f8] sm:$0xff] }
 0x6e0   :  { %2471 = vmatpush1.bf16.msra.mxu0 %v2166_v41  ;;  %2349 = vmatprep.subr.bf16.mxu1 %v2171_v42  ;;  %v2000_v41 = vld [vmem:[#allocation4 + $0x2f0] sm:$0xff]  ;;  %v2007_v42 = vld [vmem:[#allocation4 + $0x328] sm:$0xff] }
 0x6e1   :  { %2472 = vmatprep.subr.bf16.mxu0 %v2173_v2  ;;  %v2006_v2 = vld [vmem:[#allocation4 + $0x320] sm:$0xff] }
 0x6e3   :  { %2350 = vmatpush1.bf16.msra.mxu1 %v2170_v33  ;;  %v2013_v33 = vld [vmem:[#allocation4 + $0x358] sm:$0xff] }
 0x6e4   :  { %2473 = vmatpush1.bf16.msra.mxu0 %v2172_v45  ;;  %2351 = vmatprep.subr.bf16.mxu1 %v2177_v46  ;;  %v2012_v45 = vld [vmem:[#allocation4 + $0x350] sm:$0xff]  ;;  %v2019_v46 = vld [vmem:[#allocation4 + $0x388] sm:$0xff] }
 0x6e5   :  { %2474 = vmatprep.subr.bf16.mxu0 %v2179_v8  ;;  %v2018_v8 = vld [vmem:[#allocation4 + $0x380] sm:$0xff] }
 0x6e7   :  { %2352 = vmatpush1.bf16.msra.mxu1 %v2176_v48  ;;  %v2025_v48 = vld [vmem:[#allocation4 + $0x3b8] sm:$0xff] }
 0x6e8   :  { %2475 = vmatpush1.bf16.msra.mxu0 %v2178_v53  ;;  %2353 = vmatprep.subr.bf16.mxu1 %v2183_v55  ;;  %v2024_v53 = vld [vmem:[#allocation4 + $0x3b0] sm:$0xff]  ;;  %v2031_v55 = vld [vmem:[#allocation4 + $0x3e8] sm:$0xff] }
 0x6e9   :  { %2476 = vmatprep.subr.bf16.mxu0 %v2185_v11  ;;  %v2030_v11 = vld [vmem:[#allocation4 + $0x3e0] sm:$0xff] }
 0x6eb   :  { %2354 = vmatpush1.bf16.msra.mxu1 %v2182_v4  ;;  %v2037_v4 = vld [vmem:[#allocation4 + $0x418] sm:$0xff] }
 0x6ec   :  { %2477 = vmatpush1.bf16.msra.mxu0 %v2184_v57  ;;  %2355 = vmatprep.subr.bf16.mxu1 %v2189_v0  ;;  %v2043_v57 = vld [vmem:[#allocation4 + $0x448] sm:$0xff]  ;;  %v2049_v0 = vld [vmem:[#allocation4 + $0x478] sm:$0xff] }
 0x6ed   :  { %2478 = vmatprep.subr.bf16.mxu0 %v2191_v1  ;;  %v2048_v1 = vld [vmem:[#allocation4 + $0x470] sm:$0xff] }
 0x6ef   :  { %2356 = vmatpush1.bf16.msra.mxu1 %v2188_v13  ;;  %v2055_v13 = vld [vmem:[#allocation4 + $0x4a8] sm:$0xff] }
 0x6f0   :  { %2479 = vmatpush1.bf16.msra.mxu0 %v2190_v14  ;;  %2489 = vmatprep.subr.bf16.mxu1 %v1911_v15  ;;  %v2054_v14 = vld [vmem:[#allocation4 + $0x4a0] sm:$0xff]  ;;  %v2061_v15 = vld [vmem:[#allocation4 + $0x4d8] sm:$0xff] }
 0x6f2   :  { %2358 = vmatmul.mubr.bf16.vlgmr.msra.gmra.mrb[8].mxu1 %v8410_v39 }
 0x6f3   :  { %2481 = vmatmul.mubr.bf16.vlgmr.msra.gmra.mrb[12].mxu0 %v8410_v39  ;;  %2490 = vmatpush1.bf16.msra.mxu1 %v1910_v44  ;;  %v2060_v44 = vld [vmem:[#allocation4 + $0x4d0] sm:$0xff] }
 0x6f4   :  { %2521 = vmatprep.mubr.bf16.mxu1 %v8380_v25  ;;  %2491 = vmatprep.subr.bf16.mxu1 %v1917_v51  ;;  %v1946_v25 = vld [vmem:[#allocation4 + $0x140] sm:$0xff]  ;;  %v2067_v51 = vld [vmem:[#allocation4 + $0x508] sm:$0xff] }
 0x6f7   :  { %2492 = vmatpush1.bf16.msra.mxu1 %v1916_v7  ;;  %v2066_v7 = vld [vmem:[#allocation4 + $0x500] sm:$0xff] }
 0x6f8   :  { %2493 = vmatprep.subr.bf16.mxu1 %v1923_v17  ;;  %v2073_v17 = vld [vmem:[#allocation4 + $0x538] sm:$0xff] }
 0x6fb   :  { %2494 = vmatpush1.bf16.msra.mxu1 %v1922_v23  ;;  %v2072_v23 = vld [vmem:[#allocation4 + $0x530] sm:$0xff] }
 0x6fc   :  { %2495 = vmatprep.subr.bf16.mxu1 %v1929_v10  ;;  %v2079_v10 = vld [vmem:[#allocation4 + $0x568] sm:$0xff] }
 0x6ff   :  { %2496 = vmatpush1.bf16.msra.mxu1 %v1928_v28  ;;  %v2078_v28 = vld [vmem:[#allocation4 + $0x560] sm:$0xff] }
 0x700   :  { %2497 = vmatprep.subr.bf16.mxu1 %v1935_v52  ;;  %v2085_v52 = vld [vmem:[#allocation4 + $0x598] sm:$0xff] }
 0x703   :  { %2498 = vmatpush1.bf16.msra.mxu1 %v1934_v19  ;;  %v2084_v19 = vld [vmem:[#allocation4 + $0x590] sm:$0xff] }
 0x704   :  { %2499 = vmatprep.subr.bf16.mxu1 %v1941_v56  ;;  %v2091_v56 = vld [vmem:[#allocation4 + $0x5c8] sm:$0xff] }
 0x707   :  { %2500 = vmatpush1.bf16.msra.mxu1 %v1940_v24  ;;  %v2090_v24 = vld [vmem:[#allocation4 + $0x5c0] sm:$0xff] }
 0x708   :  { %2501 = vmatprep.subr.bf16.mxu1 %v1947_v62  ;;  %v2097_v62 = vld [vmem:[#allocation4 + $0x5f8] sm:$0xff] }
 0x70b   :  { %2502 = vmatpush1.bf16.msra.mxu1 %v1946_v25  ;;  %v2096_v25 = vld [vmem:[#allocation4 + $0x5f0] sm:$0xff] }
 0x70c   :  { %2503 = vmatprep.subr.bf16.mxu1 %v1953_v31  ;;  %v2103_v31 = vld [vmem:[#allocation4 + $0x628] sm:$0xff] }
 0x70f   :  { %2504 = vmatpush1.bf16.msra.mxu1 %v1952_v20  ;;  %v2102_v20 = vld [vmem:[#allocation4 + $0x620] sm:$0xff] }
 0x710   :  { %2505 = vmatprep.subr.bf16.mxu1 %v1959_v22  ;;  %v2109_v22 = vld [vmem:[#allocation4 + $0x658] sm:$0xff] }
 0x713   :  { %2506 = vmatpush1.bf16.msra.mxu1 %v1958_v16  ;;  %v2108_v16 = vld [vmem:[#allocation4 + $0x650] sm:$0xff] }
 0x714   :  { %2507 = vmatprep.subr.bf16.mxu1 %v1965_v29  ;;  %v2115_v29 = vld [vmem:[#allocation4 + $0x688] sm:$0xff] }
 0x717   :  { %2508 = vmatpush1.bf16.msra.mxu1 %v1964_v34  ;;  %v2114_v34 = vld [vmem:[#allocation4 + $0x680] sm:$0xff] }
 0x718   :  { %2509 = vmatprep.subr.bf16.mxu1 %v1971_v6  ;;  %v2121_v6 = vld [vmem:[#allocation4 + $0x6b8] sm:$0xff] }
 0x71b   :  { %2510 = vmatpush1.bf16.msra.mxu1 %v1970_v3  ;;  %v2120_v3 = vld [vmem:[#allocation4 + $0x6b0] sm:$0xff] }
 0x71c   :  { %2511 = vmatprep.subr.bf16.mxu1 %v1977_v36  ;;  %v2127_v36 = vld [vmem:[#allocation4 + $0x6e8] sm:$0xff] }
 0x71f   :  { %2512 = vmatpush1.bf16.msra.mxu1 %v1976_v37  ;;  %v2126_v37 = vld [vmem:[#allocation4 + $0x6e0] sm:$0xff] }
 0x720   :  { %2513 = vmatprep.subr.bf16.mxu1 %v1983_v9  ;;  %v2133_v9 = vld [vmem:[#allocation4 + $0x718] sm:$0xff] }
 0x723   :  { %2514 = vmatpush1.bf16.msra.mxu1 %v1982_v38  ;;  %v2139_v38 = vld [vmem:[#allocation4 + $0x748] sm:$0xff] }
 0x724   :  { %2515 = vmatprep.subr.bf16.mxu1 %v1989_v27  ;;  %v2145_v27 = vld [vmem:[#allocation4 + $0x778] sm:$0xff] }
 0x727   :  { %2516 = vmatpush1.bf16.msra.mxu1 %v1988_v40  ;;  %v2144_v40 = vld [vmem:[#allocation4 + $0x770] sm:$0xff] }
 0x728   :  { %2517 = vmatprep.subr.bf16.mxu1 %v1995_v18  ;;  %v2151_v18 = vld [vmem:[#allocation4 + $0x7a8] sm:$0xff] }
 0x72b   :  { %2518 = vmatpush1.bf16.msra.mxu1 %v1994_v30  ;;  %v2150_v30 = vld [vmem:[#allocation4 + $0x7a0] sm:$0xff] }
 0x72c   :  { %2519 = vmatprep.subr.bf16.mxu1 %v2001_v32  ;;  %v2157_v32 = vld [vmem:[#allocation4 + $0x7d8] sm:$0xff] }
 0x72f   :  { %2520 = vmatpush1.bf16.msra.mxu1 %v2000_v41  ;;  %v2156_v41 = vld [vmem:[#allocation4 + $0x7d0] sm:$0xff] }
 0x730   :  { %2530 = vmatprep.subr.bf16.mxu1 %v2007_v42  ;;  %v2163_v42 = vld [vmem:[#allocation4 + $0x808] sm:$0xff] }
 0x732   :  { %2522 = vmatmul.mubr.bf16.vlgmr.msra.gmra.mrb[12].mxu1 %v8386_v21  ;;  %v2036_v21 = vld [vmem:[#allocation4 + $0x410] sm:$0xff] }
 0x733   :  { %2531 = vmatpush1.bf16.msra.mxu1 %v2006_v2  ;;  %2562 = vmatprep.mubr.bf16.mxu1 %v8390_v35  ;;  %v2042_v35 = vld [vmem:[#allocation4 + $0x440] sm:$0xff] }
 0x734   :  { %2532 = vmatprep.subr.bf16.mxu1 %v2013_v33  ;;  %v2162_v2 = vld [vmem:[#allocation4 + $0x800] sm:$0xff]  ;;  %v2169_v33 = vld [vmem:[#allocation4 + $0x838] sm:$0xff] }
 0x737   :  { %2533 = vmatpush1.bf16.msra.mxu1 %v2012_v45  ;;  %v2168_v45 = vld [vmem:[#allocation4 + $0x830] sm:$0xff] }
 0x738   :  { %2534 = vmatprep.subr.bf16.mxu1 %v2019_v46  ;;  %v2175_v46 = vld [vmem:[#allocation4 + $0x868] sm:$0xff] }
 0x73b   :  { %2535 = vmatpush1.bf16.msra.mxu1 %v2018_v8  ;;  %v2174_v8 = vld [vmem:[#allocation4 + $0x860] sm:$0xff] }
 0x73c   :  { %2536 = vmatprep.subr.bf16.mxu1 %v2025_v48  ;;  %v2181_v48 = vld [vmem:[#allocation4 + $0x898] sm:$0xff] }
 0x73f   :  { %2537 = vmatpush1.bf16.msra.mxu1 %v2024_v53  ;;  %v2180_v53 = vld [vmem:[#allocation4 + $0x890] sm:$0xff] }
 0x740   :  { %2538 = vmatprep.subr.bf16.mxu1 %v2031_v55  ;;  %v2187_v55 = vld [vmem:[#allocation4 + $0x8c8] sm:$0xff] }
 0x743   :  { %2539 = vmatpush1.bf16.msra.mxu1 %v2030_v11  ;;  %v2186_v11 = vld [vmem:[#allocation4 + $0x8c0] sm:$0xff] }
 0x744   :  { %2540 = vmatprep.subr.bf16.mxu1 %v2037_v4  ;;  %v2193_v4 = vld [vmem:[#allocation4 + $0x8f8] sm:$0xff] }
 0x747   :  { %2541 = vmatpush1.bf16.msra.mxu1 %v2036_v21  ;;  %v2192_v21 = vld [vmem:[#allocation4 + $0x8f0] sm:$0xff] }
 0x748   :  { %2542 = vmatprep.subr.bf16.mxu1 %v2043_v57 }
 0x74b   :  { %2543 = vmatpush1.bf16.msra.mxu1 %v2042_v35 }
 0x74c   :  { %2544 = vmatprep.subr.bf16.mxu1 %v2049_v0 }
 0x74f   :  { %2545 = vmatpush1.bf16.msra.mxu1 %v2048_v1 }
 0x750   :  { %2546 = vmatprep.subr.bf16.mxu1 %v2055_v13 }
 0x753   :  { %2547 = vmatpush1.bf16.msra.mxu1 %v2054_v14 }
 0x754   :  { %2548 = vmatprep.subr.bf16.mxu1 %v2061_v15 }
 0x757   :  { %2549 = vmatpush1.bf16.msra.mxu1 %v2060_v44 }
 0x758   :  { %2550 = vmatprep.subr.bf16.mxu1 %v2067_v51  ;;  %v2195_v51 = vld [vmem:[#allocation22 + $0x6] ss:$8 sm:$0xf] }
 0x75b   :  { %2551 = vmatpush1.bf16.msra.mxu1 %v2066_v7  ;;  %v2196_v7 = vld [vmem:[#allocation22 + $0x6] ss:$8 sm:$0x30] }
 0x75c   :  { %2552 = vmatprep.subr.bf16.mxu1 %v2073_v17  ;;  %v2197_v17 = vor.u32 %v2196_v7, %v2195_v51 }
 0x75f   :  { %2553 = vmatpush1.bf16.msra.mxu1 %v2072_v23  ;;  %v2216_v23 = vrot.slane %v2197_v17, %v8275_v47 }
 0x760   :  { %2554 = vmatprep.subr.bf16.mxu1 %v2079_v10  ;;  %v2220_v10 = vrot.slane %v2197_v17, %v8278_v5 }
 0x763   :  { %2555 = vmatpush1.bf16.msra.mxu1 %v2078_v28 }
 0x764   :  { %2556 = vmatprep.subr.bf16.mxu1 %v2085_v52 }
 0x767   :  { %2557 = vmatpush1.bf16.msra.mxu1 %v2084_v19 }
 0x768   :  { %2558 = vmatprep.subr.bf16.mxu1 %v2091_v56 }
 0x76b   :  { %2559 = vmatpush1.bf16.msra.mxu1 %v2090_v24 }
 0x76c   :  { %2560 = vmatprep.subr.bf16.mxu1 %v2097_v62  ;;  %v2228_v62 = vrot.slane %v2197_v17, %v8291_v54 }
 0x76f   :  { %2561 = vmatpush1.bf16.msra.mxu1 %v2096_v25 }
 0x770   :  { %2571 = vmatprep.subr.bf16.mxu1 %v2103_v31 }
 0x772   :  { %2563 = vmatmul.mubr.bf16.vlgmr.msra.gmra.mrb[12].mxu1 %v8398_v26  ;;  %v2132_v26 = vld [vmem:[#allocation4 + $0x710] sm:$0xff] }
 0x773   :  { %2572 = vmatpush1.bf16.msra.mxu1 %v2102_v20  ;;  %2603 = vmatprep.mubr.bf16.mxu1 %v8402_v50  ;;  %v2138_v50 = vld [vmem:[#allocation4 + $0x740] sm:$0xff] }
 0x774   :  { %2573 = vmatprep.subr.bf16.mxu1 %v2109_v22 }
 0x777   :  { %2574 = vmatpush1.bf16.msra.mxu1 %v2108_v16 }
 0x778   :  { %2575 = vmatprep.subr.bf16.mxu1 %v2115_v29  ;;  %v2232_v29 = vrot.slane %v2197_v17, %v8303_v59 }
 0x77b   :  { %2576 = vmatpush1.bf16.msra.mxu1 %v2114_v34  ;;  %v2236_v34 = vrot.slane %v2197_v17, %v8306_v60 }
 0x77c   :  { %2577 = vmatprep.subr.bf16.mxu1 %v2121_v6 }
 0x77f   :  { %2578 = vmatpush1.bf16.msra.mxu1 %v2120_v3 }
 0x780   :  { %2579 = vmatprep.subr.bf16.mxu1 %v2127_v36 }
 0x783   :  { %2580 = vmatpush1.bf16.msra.mxu1 %v2126_v37 }
 0x784   :  { %2581 = vmatprep.subr.bf16.mxu1 %v2133_v9 }
 0x787   :  { %2582 = vmatpush1.bf16.msra.mxu1 %v2132_v26 }
 0x788   :  { %2583 = vmatprep.subr.bf16.mxu1 %v2139_v38 }
 0x78b   :  { %2584 = vmatpush1.bf16.msra.mxu1 %v2138_v50 }
 0x78c   :  { %2585 = vmatprep.subr.bf16.mxu1 %v2145_v27 }
 0x78f   :  { %2586 = vmatpush1.bf16.msra.mxu1 %v2144_v40 }
 0x790   :  { %2587 = vmatprep.subr.bf16.mxu1 %v2151_v18 }
 0x793   :  { %2588 = vmatpush1.bf16.msra.mxu1 %v2150_v30 }
 0x794   :  { %2589 = vmatprep.subr.bf16.mxu1 %v2157_v32 }
 0x797   :  { %2590 = vmatpush1.bf16.msra.mxu1 %v2156_v41 }
 0x798   :  { %2591 = vmatprep.subr.bf16.mxu1 %v2163_v42 }
 0x79b   :  { %2592 = vmatpush1.bf16.msra.mxu1 %v2162_v2 }
 0x79c   :  { %2593 = vmatprep.subr.bf16.mxu1 %v2169_v33 }
 0x79f   :  { %2594 = vmatpush1.bf16.msra.mxu1 %v2168_v45 }
 0x7a0   :  { %2595 = vmatprep.subr.bf16.mxu1 %v2175_v46 }
 0x7a3   :  { %2596 = vmatpush1.bf16.msra.mxu1 %v2174_v8 }
 0x7a4   :  { %2597 = vmatprep.subr.bf16.mxu1 %v2181_v48 }
 0x7a7   :  { %2598 = vmatpush1.bf16.msra.mxu1 %v2180_v53 }
 0x7a8   :  { %2599 = vmatprep.subr.bf16.mxu1 %v2187_v55 }
 0x7ab   :  { %2600 = vmatpush1.bf16.msra.mxu1 %v2186_v11  ;;  %v2199_v11 = vld [vmem:[#allocation22 + $0x7] ss:$8 sm:$0xf] }
 0x7ac   :  { %2601 = vmatprep.subr.bf16.mxu1 %v2193_v4  ;;  %v2200_v4 = vld [vmem:[#allocation22 + $0x7] ss:$8 sm:$0x30] }
 0x7af   :  { %2602 = vmatpush1.bf16.msra.mxu1 %v2192_v21  ;;  %v2203_v21 = vld [vmem:[#allocation22 + $0x40] ss:$8 sm:$0xf] }
 0x7b2   :  { %2604 = vmatmul.mubr.bf16.vlgmr.msra.gmra.mrb[12].mxu1 %v8410_v39  ;;  %v2224_v39 = vrot.slane %v2197_v17, %v8283_v49 }
 0x7c5   :  { %v2359_v57 = vpop.f32.mrb[8].mxu1 }
 0x7c6   :  { %v2482_v35 = vpop.f32.mrb[12].mxu0  ;;  %v2361_v0 = vpop.f32.mrb[9].mxu1  ;;  %v8422_v28 = vadd.f32 %v2359_v57, %v2216_v23  ;;  %v2204_v57 = vld [vmem:[#allocation22 + $0x40] ss:$8 sm:$0x30] }
 0x7c7   :  { %v2484_v1 = vpop.f32.mrb[13].mxu0  ;;  %v2363_v13 = vpop.f32.mrb[10].mxu1  ;;  %v8424_v52 = vadd.f32 %v2361_v0, %v2220_v10  ;;  %v7437_v24 = vadd.f32 %v2482_v35, %v2224_v39  ;;  %v2201_v35 = vor.u32 %v2200_v4, %v2199_v11  ;;  %v2205_v0 = vor.u32 %v2204_v57, %v2203_v21 }
 0x7c8   :  { %v2486_v14 = vpop.f32.mrb[14].mxu0  ;;  %v2364_v15 = vpop.f32.mrb[11].mxu1  ;;  %v2620_v19 = vmul.f32 %v8422_v28, %v8422_v28  ;;  %v7438_v22 = vadd.f32 %v2484_v1, %v2228_v62 }
 0x7c9   :  { %v2487_v44 = vpop.f32.mrb[15].mxu0  ;;  %v2621_v56 = vmul.f32 %v8424_v52, %v8424_v52  ;;  %v2612_v25 = vadd.f32 %v8424_v52, %v8422_v28  ;;  %v2622_v20 = vmul.f32 %v7437_v24, %v7437_v24  ;;  %v2654_v1 = vrot.slane %v2201_v35, %v8275_v47 }
 0x7ca   :  { %v2623_v3 = vmul.f32 %v7438_v22, %v7438_v22  ;;  %v2658_v13 = vrot.slane %v2201_v35, %v8278_v5  ;;  %v2662_v14 = vrot.slane %v2201_v35, %v8283_v49  ;;  %v2666_v15 = vrot.slane %v2201_v35, %v8291_v54 }
 0x7cb   :  { %v2626_v31 = vadd.f32 %v2621_v56, %v2620_v19  ;;  %v2613_v16 = vadd.f32 %v7437_v24, %v2612_v25  ;;  %v2670_v44 = vrot.slane %v2201_v35, %v8303_v59  ;;  %v2674_v51 = vrot.slane %v2201_v35, %v8306_v60 }
 0x7cc   :  { %v2691_v7 = vrot.slane %v2205_v0, %v8275_v47  ;;  %v2695_v17 = vrot.slane %v2205_v0, %v8278_v5 }
 0x7cd   :  { %v2627_v6 = vadd.f32 %v2626_v31, %v2622_v20  ;;  %v2614_v26 = vadd.f32 %v7438_v22, %v2613_v16  ;;  %v2699_v31 = vrot.slane %v2205_v0, %v8283_v49  ;;  %v2703_v20 = vrot.slane %v2205_v0, %v8291_v54 }
 0x7cf   :  { %v2628_v30 = vadd.f32 %v2627_v6, %v2623_v3  ;;  %v2707_v3 = vrot.slane %v2205_v0, %v8303_v59 }
 0x885   :  { %v2605_v36 = vpop.f32.mrb[12].mxu1 }
 0x886   :  { %v7439_v37 = vadd.f32 %v2605_v36, %v2232_v29  ;;  %v2607_v9 = vpop.f32.mrb[13].mxu1  ;;  %v2711_v36 = vrot.slane %v2205_v0, %v8306_v60 }
 0x887   :  { %v7440_v38 = vadd.f32 %v2607_v9, %v2236_v34  ;;  %v2609_v50 = vpop.f32.mrb[14].mxu1 }
 0x888   :  { %v2624_v27 = vmul.f32 %v7439_v37, %v7439_v37  ;;  %v2610_v40 = vpop.f32.mrb[15].mxu1  ;;  %v2615_v18 = vadd.f32 %v7439_v37, %v2614_v26 }
 0x889   :  { %v2625_v41 = vmul.f32 %v7440_v38, %v7440_v38 }
 0x88a   :  { %v2616_v32 = vadd.f32 %v7440_v38, %v2615_v18  ;;  %v2629_v42 = vadd.f32 %v2628_v30, %v2624_v27 }
 0x88c   :  { %2617 = vadd.xlane.f32.xlu0 %v2616_v32  ;;  %v2630_v2 = vadd.f32 %v2629_v42, %v2625_v41 }
 0x890   :  { %2631 = vadd.xlane.f32.xlu0 %v2630_v2 }
 0x919   :  { %v2618_v33 = vpop.xlane.xlu0 %2617 }
 0x91a   :  { %v2619_v45 = vmul.f32 0.0013020834, %v2618_v33 }
 0x91c   :  { %v2634_v8 = vmul.f32 %v2619_v45, %v2619_v45  ;;  %v2636_v23 = vsub.f32 %v8422_v28, %v2619_v45  ;;  %v2637_v10 = vsub.f32 %v8424_v52, %v2619_v45  ;;  %v2638_v39 = vsub.f32 %v7437_v24, %v2619_v45 }
 0x91d   :  { %v2632_v46 = vpop.xlane.xlu0 %2631  ;;  %v2639_v19 = vsub.f32 %v7438_v22, %v2619_v45  ;;  %v2640_v62 = vsub.f32 %v7439_v37, %v2619_v45  ;;  %v2641_v25 = vsub.f32 %v7440_v38, %v2619_v45 }
 0x91e   :  { %v2633_v48 = vmul.f32 0.0013020834, %v2632_v46 }
 0x920   :  { %v2635_v53 = vsub.f32 %v2633_v48, %v2634_v8 }
 0x922   :  { %v2642_v55 = vadd.f32 1e-05, %v2635_v53 }
 0x924   :  { %7635 = vrsqrt.f32 %v2642_v55 }
 0x92e   :  { %v7636_v56 = vpop.eup %7635 }
 0x92f   :  { %v2644_v16 = vmul.f32 %v7636_v56, %v2636_v23  ;;  %v2645_v29 = vmul.f32 %v7636_v56, %v2637_v10  ;;  %v2646_v34 = vmul.f32 %v7636_v56, %v2638_v39  ;;  %v2647_v6 = vmul.f32 %v7636_v56, %v2639_v19 }
 0x930   :  { %v2648_v28 = vmul.f32 %v7636_v56, %v2640_v62  ;;  %v2649_v9 = vmul.f32 %v7636_v56, %v2641_v25 }
 0x931   :  { %v2681_v52 = vmul.f32 %v2654_v1, %v2644_v16  ;;  %v2682_v24 = vmul.f32 %v2658_v13, %v2645_v29  ;;  %v2683_v22 = vmul.f32 %v2662_v14, %v2646_v34  ;;  %v2684_v26 = vmul.f32 %v2666_v15, %v2647_v6 }
 0x932   :  { %v2685_v37 = vmul.f32 %v2670_v44, %v2648_v28  ;;  %v2686_v38 = vmul.f32 %v2674_v51, %v2649_v9 }
 0x933   :  { %v8450_v50 = vadd.f32 %v2691_v7, %v2681_v52  ;;  %v2719_v27 = vadd.f32 %v2695_v17, %v2682_v24  ;;  %v8452_v40 = vadd.f32 %v2699_v31, %v2683_v22  ;;  %v8454_v18 = vadd.f32 %v2703_v20, %v2684_v26 }
 0x934   :  { %v8456_v30 = vadd.f32 %v2707_v3, %v2685_v37  ;;  %v8458_v32 = vadd.f32 %v2711_v36, %v2686_v38 }
 0x935   :  { %v2724_v41 = vmax.f32 %v8450_v50, 0.0  ;;  %v2725_v42 = vmax.f32 %v2719_v27, 0.0  ;;  %v2726_v2 = vmax.f32 %v8452_v40, 0.0  ;;  %v2727_v33 = vmax.f32 %v8454_v18, 0.0 }
 0x936   :  { %v2728_v45 = vmax.f32 %v8456_v30, 0.0  ;;  %v2729_v46 = vmax.f32 %v8458_v32, 0.0 }
 0x937   :  { %7815 = dma.done.wait [#allocation16 + $0x3], 24576 }
 0x938   :  { %7816 = vsyncadd [#allocation16 + $0x3], 4294942720  ;;  %v2931_v8 = vpack.c.bf16 %v2725_v42, %v2725_v42  ;;  %v2733_v48 = vld [vmem:[#allocation5 + $0x8] sm:$0xff]  ;;  %v2735_v53 = vld [vmem:[#allocation5 + $0x18] sm:$0xff] }
 0x939   :  { %v2732_v55 = vld [vmem:[#allocation5] sm:$0xff]  ;;  %2957 = vmatprep.subr.bf16.mxu0 %v2733_v48  ;;  %3080 = vmatprep.subr.bf16.mxu1 %v2735_v53  ;;  %v2734_v11 = vld [vmem:[#allocation5 + $0x10] sm:$0xff]  ;;  %v2737_v4 = vld [vmem:[#allocation5 + $0x28] sm:$0xff] }
 0x93a   :  { %2989 = vmatprep.mubr.bf16.mxu0 %v2931_v8  ;;  %3112 = vmatprep.mubr.bf16.mxu1 %v2931_v8  ;;  %v2739_v21 = vld [vmem:[#allocation5 + $0x38] sm:$0xff]  ;;  %v2736_v57 = vld [vmem:[#allocation5 + $0x20] sm:$0xff]  ;;  %v2738_v35 = vld [vmem:[#allocation5 + $0x30] sm:$0xff] }
 0x93b   :  { %2958 = vmatpush1.bf16.msra.mxu0 %v2732_v55  ;;  %3081 = vmatpush1.bf16.msra.mxu1 %v2734_v11  ;;  %v2741_v0 = vld [vmem:[#allocation5 + $0x48] sm:$0xff]  ;;  %v2743_v1 = vld [vmem:[#allocation5 + $0x58] sm:$0xff]  ;;  %v2740_v13 = vld [vmem:[#allocation5 + $0x40] sm:$0xff] }
 0x93c   :  { %2959 = vmatprep.subr.bf16.mxu0 %v2737_v4  ;;  %3082 = vmatprep.subr.bf16.mxu1 %v2739_v21  ;;  %v2742_v14 = vld [vmem:[#allocation5 + $0x50] sm:$0xff]  ;;  %v2745_v15 = vld [vmem:[#allocation5 + $0x68] sm:$0xff]  ;;  %v2747_v44 = vld [vmem:[#allocation5 + $0x78] sm:$0xff] }
 0x93d   :  { %v2744_v51 = vld [vmem:[#allocation5 + $0x60] sm:$0xff]  ;;  %v2746_v7 = vld [vmem:[#allocation5 + $0x70] sm:$0xff]  ;;  %v2749_v17 = vld [vmem:[#allocation5 + $0x88] sm:$0xff] }
 0x93e   :  { %v2751_v23 = vld [vmem:[#allocation5 + $0x98] sm:$0xff]  ;;  %v2748_v10 = vld [vmem:[#allocation5 + $0x80] sm:$0xff]  ;;  %v2750_v39 = vld [vmem:[#allocation5 + $0x90] sm:$0xff] }
 0x93f   :  { %2960 = vmatpush1.bf16.msra.mxu0 %v2736_v57  ;;  %3083 = vmatpush1.bf16.msra.mxu1 %v2738_v35  ;;  %v2753_v19 = vld [vmem:[#allocation5 + $0xa8] sm:$0xff]  ;;  %v2755_v56 = vld [vmem:[#allocation5 + $0xb8] sm:$0xff]  ;;  %v2752_v62 = vld [vmem:[#allocation5 + $0xa0] sm:$0xff] }
 0x940   :  { %2961 = vmatprep.subr.bf16.mxu0 %v2741_v0  ;;  %3084 = vmatprep.subr.bf16.mxu1 %v2743_v1  ;;  %v2754_v25 = vld [vmem:[#allocation5 + $0xb0] sm:$0xff]  ;;  %v2757_v31 = vld [vmem:[#allocation5 + $0xc8] sm:$0xff]  ;;  %v2759_v20 = vld [vmem:[#allocation5 + $0xd8] sm:$0xff] }
 0x941   :  { %v2756_v16 = vld [vmem:[#allocation5 + $0xc0] sm:$0xff]  ;;  %v2758_v29 = vld [vmem:[#allocation5 + $0xd0] sm:$0xff]  ;;  %v2761_v34 = vld [vmem:[#allocation5 + $0xe8] sm:$0xff] }
 0x942   :  { %v2763_v6 = vld [vmem:[#allocation5 + $0xf8] sm:$0xff]  ;;  %v2760_v3 = vld [vmem:[#allocation5 + $0xe0] sm:$0xff]  ;;  %v2762_v36 = vld [vmem:[#allocation5 + $0xf0] sm:$0xff] }
 0x943   :  { %2962 = vmatpush1.bf16.msra.mxu0 %v2740_v13  ;;  %3085 = vmatpush1.bf16.msra.mxu1 %v2742_v14  ;;  %v2765_v28 = vld [vmem:[#allocation5 + $0x108] sm:$0xff]  ;;  %v2767_v9 = vld [vmem:[#allocation5 + $0x118] sm:$0xff]  ;;  %v2764_v52 = vld [vmem:[#allocation5 + $0x100] sm:$0xff] }
 0x944   :  { %2963 = vmatprep.subr.bf16.mxu0 %v2745_v15  ;;  %3086 = vmatprep.subr.bf16.mxu1 %v2747_v44  ;;  %v2766_v24 = vld [vmem:[#allocation5 + $0x110] sm:$0xff]  ;;  %v2769_v22 = vld [vmem:[#allocation5 + $0x128] sm:$0xff]  ;;  %v2771_v26 = vld [vmem:[#allocation5 + $0x138] sm:$0xff] }
 0x945   :  { %v2768_v37 = vld [vmem:[#allocation5 + $0x120] sm:$0xff]  ;;  %v2770_v38 = vld [vmem:[#allocation5 + $0x130] sm:$0xff]  ;;  %v2773_v27 = vld [vmem:[#allocation5 + $0x148] sm:$0xff] }
 0x946   :  { %v2775_v42 = vld [vmem:[#allocation5 + $0x158] sm:$0xff]  ;;  %v2772_v8 = vld [vmem:[#allocation5 + $0x140] sm:$0xff]  ;;  %v2774_v48 = vld [vmem:[#allocation5 + $0x150] sm:$0xff] }
 0x947   :  { %2964 = vmatpush1.bf16.msra.mxu0 %v2744_v51  ;;  %3087 = vmatpush1.bf16.msra.mxu1 %v2746_v7  ;;  %v2777_v53 = vld [vmem:[#allocation5 + $0x168] sm:$0xff]  ;;  %v2779_v55 = vld [vmem:[#allocation5 + $0x178] sm:$0xff]  ;;  %v2776_v11 = vld [vmem:[#allocation5 + $0x160] sm:$0xff] }
 0x948   :  { %2965 = vmatprep.subr.bf16.mxu0 %v2749_v17  ;;  %3088 = vmatprep.subr.bf16.mxu1 %v2751_v23  ;;  %v2778_v4 = vld [vmem:[#allocation5 + $0x170] sm:$0xff]  ;;  %v2781_v21 = vld [vmem:[#allocation5 + $0x188] sm:$0xff]  ;;  %v2783_v57 = vld [vmem:[#allocation5 + $0x198] sm:$0xff] }
 0x949   :  { %v2780_v35 = vld [vmem:[#allocation5 + $0x180] sm:$0xff]  ;;  %v2782_v0 = vld [vmem:[#allocation5 + $0x190] sm:$0xff]  ;;  %v2785_v1 = vld [vmem:[#allocation5 + $0x1a8] sm:$0xff] }
 0x94a   :  { %v2787_v13 = vld [vmem:[#allocation5 + $0x1b8] sm:$0xff]  ;;  %v2784_v14 = vld [vmem:[#allocation5 + $0x1a0] sm:$0xff]  ;;  %v2786_v15 = vld [vmem:[#allocation5 + $0x1b0] sm:$0xff] }
 0x94b   :  { %2966 = vmatpush1.bf16.msra.mxu0 %v2748_v10  ;;  %3089 = vmatpush1.bf16.msra.mxu1 %v2750_v39  ;;  %v2789_v44 = vld [vmem:[#allocation5 + $0x1c8] sm:$0xff]  ;;  %v2791_v51 = vld [vmem:[#allocation5 + $0x1d8] sm:$0xff]  ;;  %v2788_v7 = vld [vmem:[#allocation5 + $0x1c0] sm:$0xff] }
 0x94c   :  { %2967 = vmatprep.subr.bf16.mxu0 %v2753_v19  ;;  %3090 = vmatprep.subr.bf16.mxu1 %v2755_v56  ;;  %v2790_v17 = vld [vmem:[#allocation5 + $0x1d0] sm:$0xff]  ;;  %v2793_v23 = vld [vmem:[#allocation5 + $0x1e8] sm:$0xff]  ;;  %v2795_v10 = vld [vmem:[#allocation5 + $0x1f8] sm:$0xff] }
 0x94d   :  { %v2792_v39 = vld [vmem:[#allocation5 + $0x1e0] sm:$0xff]  ;;  %v2794_v19 = vld [vmem:[#allocation5 + $0x1f0] sm:$0xff]  ;;  %v2797_v56 = vld [vmem:[#allocation5 + $0x208] sm:$0xff] }
 0x94e   :  { %v2800_v50 = vld [vmem:[#allocation5 + $0x220] sm:$0xff]  ;;  %v2806_v18 = vld [vmem:[#allocation5 + $0x250] sm:$0xff] }
 0x94f   :  { %2968 = vmatpush1.bf16.msra.mxu0 %v2752_v62  ;;  %3091 = vmatpush1.bf16.msra.mxu1 %v2754_v25  ;;  %v2799_v62 = vld [vmem:[#allocation5 + $0x218] sm:$0xff]  ;;  %v2930_v25 = vpack.c.bf16 %v2724_v41, %v2724_v41  ;;  %v2802_v41 = vld [vmem:[#allocation5 + $0x230] sm:$0xff]  ;;  %v2864_v40 = vld [vmem:[#allocation5 + $0x420] sm:$0xff] }
 0x950   :  { %2969 = vmatprep.subr.bf16.mxu0 %v2757_v31  ;;  %3092 = vmatprep.subr.bf16.mxu1 %v2759_v20  ;;  %v2796_v31 = vld [vmem:[#allocation5 + $0x200] sm:$0xff]  ;;  %v2798_v20 = vld [vmem:[#allocation5 + $0x210] sm:$0xff] }
 0x951   :  { %v2870_v32 = vld [vmem:[#allocation5 + $0x450] sm:$0xff] }
 0x953   :  { %2970 = vmatpush1.bf16.msra.mxu0 %v2756_v16  ;;  %3093 = vmatpush1.bf16.msra.mxu1 %v2758_v29  ;;  %v2801_v16 = vld [vmem:[#allocation5 + $0x228] sm:$0xff]  ;;  %v2803_v29 = vld [vmem:[#allocation5 + $0x238] sm:$0xff] }
 0x954   :  { %2971 = vmatprep.subr.bf16.mxu0 %v2761_v34  ;;  %3094 = vmatprep.subr.bf16.mxu1 %v2763_v6  ;;  %v2933_v34 = vpack.c.bf16 %v2727_v33, %v2727_v33  ;;  %v2805_v6 = vld [vmem:[#allocation5 + $0x248] sm:$0xff]  ;;  %v2811_v33 = vld [vmem:[#allocation5 + $0x278] sm:$0xff] }
 0x957   :  { %2972 = vmatpush1.bf16.msra.mxu0 %v2760_v3  ;;  %3095 = vmatpush1.bf16.msra.mxu1 %v2762_v36  ;;  %v2807_v3 = vld [vmem:[#allocation5 + $0x258] sm:$0xff]  ;;  %v2804_v36 = vld [vmem:[#allocation5 + $0x240] sm:$0xff] }
 0x958   :  { %2973 = vmatprep.subr.bf16.mxu0 %v2765_v28  ;;  %3096 = vmatprep.subr.bf16.mxu1 %v2767_v9  ;;  %v2809_v28 = vld [vmem:[#allocation5 + $0x268] sm:$0xff]  ;;  %v2808_v9 = vld [vmem:[#allocation5 + $0x260] sm:$0xff] }
 0x95b   :  { %2974 = vmatpush1.bf16.msra.mxu0 %v2764_v52  ;;  %3097 = vmatpush1.bf16.msra.mxu1 %v2766_v24  ;;  %v2810_v52 = vld [vmem:[#allocation5 + $0x270] sm:$0xff]  ;;  %v2813_v24 = vld [vmem:[#allocation5 + $0x288] sm:$0xff] }
 0x95c   :  { %2975 = vmatprep.subr.bf16.mxu0 %v2769_v22  ;;  %3098 = vmatprep.subr.bf16.mxu1 %v2771_v26  ;;  %v2815_v22 = vld [vmem:[#allocation5 + $0x298] sm:$0xff]  ;;  %v2812_v26 = vld [vmem:[#allocation5 + $0x280] sm:$0xff] }
 0x95f   :  { %2976 = vmatpush1.bf16.msra.mxu0 %v2768_v37  ;;  %3099 = vmatpush1.bf16.msra.mxu1 %v2770_v38  ;;  %v2814_v37 = vld [vmem:[#allocation5 + $0x290] sm:$0xff]  ;;  %v2817_v38 = vld [vmem:[#allocation5 + $0x2a8] sm:$0xff] }
 0x960   :  { %2977 = vmatprep.subr.bf16.mxu0 %v2773_v27  ;;  %3100 = vmatprep.subr.bf16.mxu1 %v2775_v42  ;;  %v2819_v27 = vld [vmem:[#allocation5 + $0x2b8] sm:$0xff]  ;;  %v2816_v42 = vld [vmem:[#allocation5 + $0x2a0] sm:$0xff] }
 0x963   :  { %2978 = vmatpush1.bf16.msra.mxu0 %v2772_v8  ;;  %3101 = vmatpush1.bf16.msra.mxu1 %v2774_v48  ;;  %v2818_v8 = vld [vmem:[#allocation5 + $0x2b0] sm:$0xff]  ;;  %v2821_v48 = vld [vmem:[#allocation5 + $0x2c8] sm:$0xff] }
 0x964   :  { %2979 = vmatprep.subr.bf16.mxu0 %v2777_v53  ;;  %3102 = vmatprep.subr.bf16.mxu1 %v2779_v55  ;;  %v2823_v53 = vld [vmem:[#allocation5 + $0x2d8] sm:$0xff]  ;;  %v2820_v55 = vld [vmem:[#allocation5 + $0x2c0] sm:$0xff] }
 0x967   :  { %2980 = vmatpush1.bf16.msra.mxu0 %v2776_v11  ;;  %3103 = vmatpush1.bf16.msra.mxu1 %v2778_v4  ;;  %v2822_v11 = vld [vmem:[#allocation5 + $0x2d0] sm:$0xff]  ;;  %v2825_v4 = vld [vmem:[#allocation5 + $0x2e8] sm:$0xff] }
 0x968   :  { %2981 = vmatprep.subr.bf16.mxu0 %v2781_v21  ;;  %3104 = vmatprep.subr.bf16.mxu1 %v2783_v57  ;;  %v2827_v21 = vld [vmem:[#allocation5 + $0x2f8] sm:$0xff]  ;;  %v2824_v57 = vld [vmem:[#allocation5 + $0x2e0] sm:$0xff] }
 0x96b   :  { %2982 = vmatpush1.bf16.msra.mxu0 %v2780_v35  ;;  %3105 = vmatpush1.bf16.msra.mxu1 %v2782_v0  ;;  %v2826_v35 = vld [vmem:[#allocation5 + $0x2f0] sm:$0xff]  ;;  %v2829_v0 = vld [vmem:[#allocation5 + $0x308] sm:$0xff] }
 0x96c   :  { %2983 = vmatprep.subr.bf16.mxu0 %v2785_v1  ;;  %3106 = vmatprep.subr.bf16.mxu1 %v2787_v13  ;;  %v2831_v1 = vld [vmem:[#allocation5 + $0x318] sm:$0xff]  ;;  %v2828_v13 = vld [vmem:[#allocation5 + $0x300] sm:$0xff] }
 0x96f   :  { %2984 = vmatpush1.bf16.msra.mxu0 %v2784_v14  ;;  %3107 = vmatpush1.bf16.msra.mxu1 %v2786_v15  ;;  %v2830_v14 = vld [vmem:[#allocation5 + $0x310] sm:$0xff]  ;;  %v2833_v15 = vld [vmem:[#allocation5 + $0x328] sm:$0xff] }
 0x970   :  { %2985 = vmatprep.subr.bf16.mxu0 %v2789_v44  ;;  %3108 = vmatprep.subr.bf16.mxu1 %v2791_v51  ;;  %v2835_v44 = vld [vmem:[#allocation5 + $0x338] sm:$0xff]  ;;  %v2832_v51 = vld [vmem:[#allocation5 + $0x320] sm:$0xff] }
 0x973   :  { %2986 = vmatpush1.bf16.msra.mxu0 %v2788_v7  ;;  %3109 = vmatpush1.bf16.msra.mxu1 %v2790_v17  ;;  %v2834_v7 = vld [vmem:[#allocation5 + $0x330] sm:$0xff]  ;;  %v2837_v17 = vld [vmem:[#allocation5 + $0x348] sm:$0xff] }
 0x974   :  { %2987 = vmatprep.subr.bf16.mxu0 %v2793_v23  ;;  %3110 = vmatprep.subr.bf16.mxu1 %v2795_v10  ;;  %v2839_v23 = vld [vmem:[#allocation5 + $0x358] sm:$0xff]  ;;  %v2836_v10 = vld [vmem:[#allocation5 + $0x340] sm:$0xff] }
 0x977   :  { %2988 = vmatpush1.bf16.msra.mxu0 %v2792_v39  ;;  %3111 = vmatpush1.bf16.msra.mxu1 %v2794_v19  ;;  %v2838_v39 = vld [vmem:[#allocation5 + $0x350] sm:$0xff]  ;;  %v2841_v19 = vld [vmem:[#allocation5 + $0x368] sm:$0xff] }
 0x978   :  { %2998 = vmatprep.subr.bf16.mxu0 %v2797_v56  ;;  %3121 = vmatprep.subr.bf16.mxu1 %v2799_v62  ;;  %v2843_v56 = vld [vmem:[#allocation5 + $0x378] sm:$0xff]  ;;  %v2840_v62 = vld [vmem:[#allocation5 + $0x360] sm:$0xff] }
 0x97a   :  { %2990 = vmatmul.mubr.bf16.vlgmr.msra.gmra.mrb[16].mxu0 %v2930_v25  ;;  %3113 = vmatmul.mubr.bf16.vlgmr.msra.gmra.mrb[16].mxu1 %v2930_v25  ;;  %v2842_v25 = vld [vmem:[#allocation5 + $0x370] sm:$0xff] }
 0x97b   :  { %2999 = vmatpush1.bf16.msra.mxu0 %v2796_v31  ;;  %3122 = vmatpush1.bf16.msra.mxu1 %v2798_v20  ;;  %v2845_v31 = vld [vmem:[#allocation5 + $0x388] sm:$0xff]  ;;  %v2847_v20 = vld [vmem:[#allocation5 + $0x398] sm:$0xff] }
 0x97c   :  { %3000 = vmatprep.subr.bf16.mxu0 %v2801_v16  ;;  %3123 = vmatprep.subr.bf16.mxu1 %v2803_v29  ;;  %v2844_v16 = vld [vmem:[#allocation5 + $0x380] sm:$0xff]  ;;  %v2846_v29 = vld [vmem:[#allocation5 + $0x390] sm:$0xff] }
 0x97d   :  { %3030 = vmatprep.mubr.bf16.mxu0 %v2933_v34  ;;  %3153 = vmatprep.mubr.bf16.mxu1 %v2933_v34  ;;  %v2849_v34 = vld [vmem:[#allocation5 + $0x3a8] sm:$0xff] }
 0x97f   :  { %3001 = vmatpush1.bf16.msra.mxu0 %v2800_v50  ;;  %3124 = vmatpush1.bf16.msra.mxu1 %v2802_v41  ;;  %v2851_v50 = vld [vmem:[#allocation5 + $0x3b8] sm:$0xff]  ;;  %v2848_v41 = vld [vmem:[#allocation5 + $0x3a0] sm:$0xff] }
 0x980   :  { %3002 = vmatprep.subr.bf16.mxu0 %v2805_v6  ;;  %3125 = vmatprep.subr.bf16.mxu1 %v2807_v3  ;;  %v2850_v6 = vld [vmem:[#allocation5 + $0x3b0] sm:$0xff]  ;;  %v2853_v3 = vld [vmem:[#allocation5 + $0x3c8] sm:$0xff] }
 0x983   :  { %3003 = vmatpush1.bf16.msra.mxu0 %v2804_v36  ;;  %3126 = vmatpush1.bf16.msra.mxu1 %v2806_v18  ;;  %v2855_v36 = vld [vmem:[#allocation5 + $0x3d8] sm:$0xff]  ;;  %v2852_v18 = vld [vmem:[#allocation5 + $0x3c0] sm:$0xff] }
 0x984   :  { %3004 = vmatprep.subr.bf16.mxu0 %v2809_v28  ;;  %3127 = vmatprep.subr.bf16.mxu1 %v2811_v33  ;;  %v2854_v28 = vld [vmem:[#allocation5 + $0x3d0] sm:$0xff]  ;;  %v2857_v33 = vld [vmem:[#allocation5 + $0x3e8] sm:$0xff] }
 0x987   :  { %3005 = vmatpush1.bf16.msra.mxu0 %v2808_v9  ;;  %3128 = vmatpush1.bf16.msra.mxu1 %v2810_v52  ;;  %v2859_v9 = vld [vmem:[#allocation5 + $0x3f8] sm:$0xff]  ;;  %v2856_v52 = vld [vmem:[#allocation5 + $0x3e0] sm:$0xff] }
 0x988   :  { %3006 = vmatprep.subr.bf16.mxu0 %v2813_v24  ;;  %3129 = vmatprep.subr.bf16.mxu1 %v2815_v22  ;;  %v2858_v24 = vld [vmem:[#allocation5 + $0x3f0] sm:$0xff]  ;;  %v2861_v22 = vld [vmem:[#allocation5 + $0x408] sm:$0xff] }
 0x98b   :  { %3007 = vmatpush1.bf16.msra.mxu0 %v2812_v26  ;;  %3130 = vmatpush1.bf16.msra.mxu1 %v2814_v37  ;;  %v2863_v26 = vld [vmem:[#allocation5 + $0x418] sm:$0xff]  ;;  %v2932_v37 = vpack.c.bf16 %v2726_v2, %v2726_v2  ;;  %v2866_v2 = vld [vmem:[#allocation5 + $0x430] sm:$0xff] }
 0x98c   :  { %3008 = vmatprep.subr.bf16.mxu0 %v2817_v38  ;;  %3131 = vmatprep.subr.bf16.mxu1 %v2819_v27  ;;  %v2860_v38 = vld [vmem:[#allocation5 + $0x400] sm:$0xff]  ;;  %v2862_v27 = vld [vmem:[#allocation5 + $0x410] sm:$0xff] }
 0x98f   :  { %3009 = vmatpush1.bf16.msra.mxu0 %v2816_v42  ;;  %3132 = vmatpush1.bf16.msra.mxu1 %v2818_v8  ;;  %v2865_v42 = vld [vmem:[#allocation5 + $0x428] sm:$0xff]  ;;  %v2867_v8 = vld [vmem:[#allocation5 + $0x438] sm:$0xff] }
 0x990   :  { %3010 = vmatprep.subr.bf16.mxu0 %v2821_v48  ;;  %3133 = vmatprep.subr.bf16.mxu1 %v2823_v53  ;;  %v2935_v48 = vpack.c.bf16 %v2729_v46, %v2729_v46  ;;  %v2869_v53 = vld [vmem:[#allocation5 + $0x448] sm:$0xff]  ;;  %v2875_v46 = vld [vmem:[#allocation5 + $0x478] sm:$0xff] }
 0x993   :  { %3011 = vmatpush1.bf16.msra.mxu0 %v2820_v55  ;;  %3134 = vmatpush1.bf16.msra.mxu1 %v2822_v11  ;;  %v2871_v55 = vld [vmem:[#allocation5 + $0x458] sm:$0xff]  ;;  %v2868_v11 = vld [vmem:[#allocation5 + $0x440] sm:$0xff] }
 0x994   :  { %3012 = vmatprep.subr.bf16.mxu0 %v2825_v4  ;;  %3135 = vmatprep.subr.bf16.mxu1 %v2827_v21  ;;  %v2873_v4 = vld [vmem:[#allocation5 + $0x468] sm:$0xff]  ;;  %v2872_v21 = vld [vmem:[#allocation5 + $0x460] sm:$0xff] }
 0x997   :  { %3013 = vmatpush1.bf16.msra.mxu0 %v2824_v57  ;;  %3136 = vmatpush1.bf16.msra.mxu1 %v2826_v35  ;;  %v2874_v57 = vld [vmem:[#allocation5 + $0x470] sm:$0xff]  ;;  %v2877_v35 = vld [vmem:[#allocation5 + $0x488] sm:$0xff] }
 0x998   :  { %3014 = vmatprep.subr.bf16.mxu0 %v2829_v0  ;;  %3137 = vmatprep.subr.bf16.mxu1 %v2831_v1  ;;  %v2879_v0 = vld [vmem:[#allocation5 + $0x498] sm:$0xff]  ;;  %v2876_v1 = vld [vmem:[#allocation5 + $0x480] sm:$0xff] }
 0x99b   :  { %3015 = vmatpush1.bf16.msra.mxu0 %v2828_v13  ;;  %3138 = vmatpush1.bf16.msra.mxu1 %v2830_v14  ;;  %v2878_v13 = vld [vmem:[#allocation5 + $0x490] sm:$0xff]  ;;  %v2881_v14 = vld [vmem:[#allocation5 + $0x4a8] sm:$0xff] }
 0x99c   :  { %3016 = vmatprep.subr.bf16.mxu0 %v2833_v15  ;;  %3139 = vmatprep.subr.bf16.mxu1 %v2835_v44  ;;  %v2883_v15 = vld [vmem:[#allocation5 + $0x4b8] sm:$0xff]  ;;  %v2880_v44 = vld [vmem:[#allocation5 + $0x4a0] sm:$0xff] }
 0x99f   :  { %3017 = vmatpush1.bf16.msra.mxu0 %v2832_v51  ;;  %3140 = vmatpush1.bf16.msra.mxu1 %v2834_v7  ;;  %v2882_v51 = vld [vmem:[#allocation5 + $0x4b0] sm:$0xff]  ;;  %v2885_v7 = vld [vmem:[#allocation5 + $0x4c8] sm:$0xff] }
 0x9a0   :  { %3018 = vmatprep.subr.bf16.mxu0 %v2837_v17  ;;  %3141 = vmatprep.subr.bf16.mxu1 %v2839_v23  ;;  %v2887_v17 = vld [vmem:[#allocation5 + $0x4d8] sm:$0xff]  ;;  %v2884_v23 = vld [vmem:[#allocation5 + $0x4c0] sm:$0xff] }
 0x9a3   :  { %3019 = vmatpush1.bf16.msra.mxu0 %v2836_v10  ;;  %3142 = vmatpush1.bf16.msra.mxu1 %v2838_v39  ;;  %v2886_v10 = vld [vmem:[#allocation5 + $0x4d0] sm:$0xff]  ;;  %v2889_v39 = vld [vmem:[#allocation5 + $0x4e8] sm:$0xff] }
 0x9a4   :  { %3020 = vmatprep.subr.bf16.mxu0 %v2841_v19  ;;  %3143 = vmatprep.subr.bf16.mxu1 %v2843_v56  ;;  %v2891_v19 = vld [vmem:[#allocation5 + $0x4f8] sm:$0xff]  ;;  %v2888_v56 = vld [vmem:[#allocation5 + $0x4e0] sm:$0xff] }
 0x9a7   :  { %3021 = vmatpush1.bf16.msra.mxu0 %v2840_v62  ;;  %3144 = vmatpush1.bf16.msra.mxu1 %v2842_v25  ;;  %v2890_v62 = vld [vmem:[#allocation5 + $0x4f0] sm:$0xff]  ;;  %v2893_v25 = vld [vmem:[#allocation5 + $0x508] sm:$0xff] }
 0x9a8   :  { %3022 = vmatprep.subr.bf16.mxu0 %v2845_v31  ;;  %3145 = vmatprep.subr.bf16.mxu1 %v2847_v20  ;;  %v2895_v31 = vld [vmem:[#allocation5 + $0x518] sm:$0xff]  ;;  %v2892_v20 = vld [vmem:[#allocation5 + $0x500] sm:$0xff] }
 0x9ab   :  { %3023 = vmatpush1.bf16.msra.mxu0 %v2844_v16  ;;  %3146 = vmatpush1.bf16.msra.mxu1 %v2846_v29  ;;  %v2894_v16 = vld [vmem:[#allocation5 + $0x510] sm:$0xff]  ;;  %v2897_v29 = vld [vmem:[#allocation5 + $0x528] sm:$0xff] }
 0x9ac   :  { %3024 = vmatprep.subr.bf16.mxu0 %v2849_v34  ;;  %3147 = vmatprep.subr.bf16.mxu1 %v2851_v50  ;;  %v2899_v34 = vld [vmem:[#allocation5 + $0x538] sm:$0xff]  ;;  %v2896_v50 = vld [vmem:[#allocation5 + $0x520] sm:$0xff] }
 0x9af   :  { %3025 = vmatpush1.bf16.msra.mxu0 %v2848_v41  ;;  %3148 = vmatpush1.bf16.msra.mxu1 %v2850_v6  ;;  %v2898_v41 = vld [vmem:[#allocation5 + $0x530] sm:$0xff]  ;;  %v2901_v6 = vld [vmem:[#allocation5 + $0x548] sm:$0xff] }
 0x9b0   :  { %3026 = vmatprep.subr.bf16.mxu0 %v2853_v3  ;;  %3149 = vmatprep.subr.bf16.mxu1 %v2855_v36  ;;  %v2903_v3 = vld [vmem:[#allocation5 + $0x558] sm:$0xff]  ;;  %v2900_v36 = vld [vmem:[#allocation5 + $0x540] sm:$0xff] }
 0x9b3   :  { %3027 = vmatpush1.bf16.msra.mxu0 %v2852_v18  ;;  %3150 = vmatpush1.bf16.msra.mxu1 %v2854_v28  ;;  %v2902_v18 = vld [vmem:[#allocation5 + $0x550] sm:$0xff]  ;;  %v2905_v28 = vld [vmem:[#allocation5 + $0x568] sm:$0xff] }
 0x9b4   :  { %3028 = vmatprep.subr.bf16.mxu0 %v2857_v33  ;;  %3151 = vmatprep.subr.bf16.mxu1 %v2859_v9  ;;  %v2907_v33 = vld [vmem:[#allocation5 + $0x578] sm:$0xff]  ;;  %v2904_v9 = vld [vmem:[#allocation5 + $0x560] sm:$0xff] }
 0x9b7   :  { %3029 = vmatpush1.bf16.msra.mxu0 %v2856_v52  ;;  %3152 = vmatpush1.bf16.msra.mxu1 %v2858_v24  ;;  %v2906_v52 = vld [vmem:[#allocation5 + $0x570] sm:$0xff]  ;;  %v2909_v24 = vld [vmem:[#allocation5 + $0x588] sm:$0xff] }
 0x9b8   :  { %3039 = vmatprep.subr.bf16.mxu0 %v2861_v22  ;;  %3162 = vmatprep.subr.bf16.mxu1 %v2863_v26  ;;  %v2911_v22 = vld [vmem:[#allocation5 + $0x598] sm:$0xff]  ;;  %v2908_v26 = vld [vmem:[#allocation5 + $0x580] sm:$0xff] }
 0x9ba   :  { %3031 = vmatmul.mubr.bf16.vlgmr.msra.gmra.mrb[16].mxu0 %v2932_v37  ;;  %3154 = vmatmul.mubr.bf16.vlgmr.msra.gmra.mrb[16].mxu1 %v2932_v37  ;;  %v2910_v37 = vld [vmem:[#allocation5 + $0x590] sm:$0xff] }
 0x9bb   :  { %3040 = vmatpush1.bf16.msra.mxu0 %v2860_v38  ;;  %3163 = vmatpush1.bf16.msra.mxu1 %v2862_v27  ;;  %v2913_v38 = vld [vmem:[#allocation5 + $0x5a8] sm:$0xff]  ;;  %v2915_v27 = vld [vmem:[#allocation5 + $0x5b8] sm:$0xff] }
 0x9bc   :  { %3041 = vmatprep.subr.bf16.mxu0 %v2865_v42  ;;  %3164 = vmatprep.subr.bf16.mxu1 %v2867_v8  ;;  %v2912_v42 = vld [vmem:[#allocation5 + $0x5a0] sm:$0xff]  ;;  %v2914_v8 = vld [vmem:[#allocation5 + $0x5b0] sm:$0xff] }
 0x9bd   :  { %3071 = vmatprep.mubr.bf16.mxu0 %v2935_v48  ;;  %3194 = vmatprep.mubr.bf16.mxu1 %v2935_v48  ;;  %v2917_v48 = vld [vmem:[#allocation5 + $0x5c8] sm:$0xff] }
 0x9bf   :  { %3042 = vmatpush1.bf16.msra.mxu0 %v2864_v40  ;;  %3165 = vmatpush1.bf16.msra.mxu1 %v2866_v2  ;;  %v2919_v40 = vld [vmem:[#allocation5 + $0x5d8] sm:$0xff]  ;;  %v2916_v2 = vld [vmem:[#allocation5 + $0x5c0] sm:$0xff] }
 0x9c0   :  { %3043 = vmatprep.subr.bf16.mxu0 %v2869_v53  ;;  %3166 = vmatprep.subr.bf16.mxu1 %v2871_v55  ;;  %v2918_v53 = vld [vmem:[#allocation5 + $0x5d0] sm:$0xff]  ;;  %v2921_v55 = vld [vmem:[#allocation5 + $0x5e8] sm:$0xff] }
 0x9c3   :  { %3044 = vmatpush1.bf16.msra.mxu0 %v2868_v11  ;;  %3167 = vmatpush1.bf16.msra.mxu1 %v2870_v32  ;;  %v2923_v11 = vld [vmem:[#allocation5 + $0x5f8] sm:$0xff]  ;;  %v2920_v32 = vld [vmem:[#allocation5 + $0x5e0] sm:$0xff] }
 0x9c4   :  { %3045 = vmatprep.subr.bf16.mxu0 %v2873_v4  ;;  %3168 = vmatprep.subr.bf16.mxu1 %v2875_v46  ;;  %v2922_v4 = vld [vmem:[#allocation5 + $0x5f0] sm:$0xff]  ;;  %v2934_v46 = vpack.c.bf16 %v2728_v45, %v2728_v45 }
 0x9c7   :  { %3046 = vmatpush1.bf16.msra.mxu0 %v2872_v21  ;;  %3169 = vmatpush1.bf16.msra.mxu1 %v2874_v57  ;;  %v2925_v21 = vld [vmem:[#allocation22 + $0x41] ss:$8 sm:$0xf] }
 0x9c8   :  { %3047 = vmatprep.subr.bf16.mxu0 %v2877_v35  ;;  %3170 = vmatprep.subr.bf16.mxu1 %v2879_v0  ;;  %v2940_v57 = vrot.slane %v2925_v21, %v8275_v47  ;;  %v2948_v35 = vrot.slane %v2925_v21, %v8283_v49  ;;  %v2944_v0 = vrot.slane %v2925_v21, %v8278_v5 }
 0x9c9   :  { %v2952_v45 = vrot.slane %v2925_v21, %v8291_v54 }
 0x9cb   :  { %3048 = vmatpush1.bf16.msra.mxu0 %v2876_v1  ;;  %3171 = vmatpush1.bf16.msra.mxu1 %v2878_v13 }
 0x9cc   :  { %3049 = vmatprep.subr.bf16.mxu0 %v2881_v14  ;;  %3172 = vmatprep.subr.bf16.mxu1 %v2883_v15 }
 0x9cf   :  { %3050 = vmatpush1.bf16.msra.mxu0 %v2880_v44  ;;  %3173 = vmatpush1.bf16.msra.mxu1 %v2882_v51 }
 0x9d0   :  { %3051 = vmatprep.subr.bf16.mxu0 %v2885_v7  ;;  %3174 = vmatprep.subr.bf16.mxu1 %v2887_v17 }
 0x9d3   :  { %3052 = vmatpush1.bf16.msra.mxu0 %v2884_v23  ;;  %3175 = vmatpush1.bf16.msra.mxu1 %v2886_v10 }
 0x9d4   :  { %3053 = vmatprep.subr.bf16.mxu0 %v2889_v39  ;;  %3176 = vmatprep.subr.bf16.mxu1 %v2891_v19 }
 0x9d7   :  { %3054 = vmatpush1.bf16.msra.mxu0 %v2888_v56  ;;  %3177 = vmatpush1.bf16.msra.mxu1 %v2890_v62 }
 0x9d8   :  { %3055 = vmatprep.subr.bf16.mxu0 %v2893_v25  ;;  %3178 = vmatprep.subr.bf16.mxu1 %v2895_v31 }
 0x9db   :  { %3056 = vmatpush1.bf16.msra.mxu0 %v2892_v20  ;;  %3179 = vmatpush1.bf16.msra.mxu1 %v2894_v16 }
 0x9dc   :  { %3057 = vmatprep.subr.bf16.mxu0 %v2897_v29  ;;  %3180 = vmatprep.subr.bf16.mxu1 %v2899_v34 }
 0x9df   :  { %3058 = vmatpush1.bf16.msra.mxu0 %v2896_v50  ;;  %3181 = vmatpush1.bf16.msra.mxu1 %v2898_v41 }
 0x9e0   :  { %3059 = vmatprep.subr.bf16.mxu0 %v2901_v6  ;;  %3182 = vmatprep.subr.bf16.mxu1 %v2903_v3 }
 0x9e3   :  { %3060 = vmatpush1.bf16.msra.mxu0 %v2900_v36  ;;  %3183 = vmatpush1.bf16.msra.mxu1 %v2902_v18 }
 0x9e4   :  { %3061 = vmatprep.subr.bf16.mxu0 %v2905_v28  ;;  %3184 = vmatprep.subr.bf16.mxu1 %v2907_v33 }
 0x9e7   :  { %3062 = vmatpush1.bf16.msra.mxu0 %v2904_v9  ;;  %3185 = vmatpush1.bf16.msra.mxu1 %v2906_v52  ;;  %v2927_v9 = vld [vmem:[#allocation22 + $0x42] ss:$8 sm:$0xf]  ;;  %v2929_v52 = vld [vmem:[#allocation22 + $0x43] ss:$8 sm:$0xf] }
 0x9e8   :  { %3063 = vmatprep.subr.bf16.mxu0 %v2909_v24  ;;  %3186 = vmatprep.subr.bf16.mxu1 %v2911_v22  ;;  %v3235_v24 = vrot.slane %v2927_v9, %v8275_v47  ;;  %v3239_v22 = vrot.slane %v2927_v9, %v8278_v5 }
 0x9eb   :  { %3064 = vmatpush1.bf16.msra.mxu0 %v2908_v26  ;;  %3187 = vmatpush1.bf16.msra.mxu1 %v2910_v37  ;;  %v3243_v26 = vrot.slane %v2927_v9, %v8283_v49  ;;  %v3247_v37 = vrot.slane %v2927_v9, %v8291_v54 }
 0x9ec   :  { %3065 = vmatprep.subr.bf16.mxu0 %v2913_v38  ;;  %3188 = vmatprep.subr.bf16.mxu1 %v2915_v27 }
 0x9ef   :  { %3066 = vmatpush1.bf16.msra.mxu0 %v2912_v42  ;;  %3189 = vmatpush1.bf16.msra.mxu1 %v2914_v8 }
 0x9f0   :  { %3067 = vmatprep.subr.bf16.mxu0 %v2917_v48  ;;  %3190 = vmatprep.subr.bf16.mxu1 %v2919_v40  ;;  %v3260_v40 = vrot.slane %v2929_v52, %v8275_v47 }
 0x9f3   :  { %3068 = vmatpush1.bf16.msra.mxu0 %v2916_v2  ;;  %3191 = vmatpush1.bf16.msra.mxu1 %v2918_v53  ;;  %v3264_v2 = vrot.slane %v2929_v52, %v8278_v5  ;;  %v3268_v53 = vrot.slane %v2929_v52, %v8283_v49 }
 0x9f4   :  { %3069 = vmatprep.subr.bf16.mxu0 %v2921_v55  ;;  %3192 = vmatprep.subr.bf16.mxu1 %v2923_v11  ;;  %v3272_v55 = vrot.slane %v2929_v52, %v8291_v54 }
 0x9f7   :  { %3070 = vmatpush1.bf16.msra.mxu0 %v2920_v32  ;;  %3193 = vmatpush1.bf16.msra.mxu1 %v2922_v4 }
 0x9fa   :  { %3072 = vmatmul.mubr.bf16.vlgmr.msra.gmra.mrb[16].mxu0 %v2934_v46  ;;  %3195 = vmatmul.mubr.bf16.vlgmr.msra.gmra.mrb[16].mxu1 %v2934_v46 }
 0xacd   :  { %v3073_v1 = vpop.f32.mrb[16].mxu0  ;;  %v3196_v13 = vpop.f32.mrb[16].mxu1 }
 0xace   :  { %v7441_v14 = vadd.f32 %v3073_v1, %v2940_v57  ;;  %v3075_v15 = vpop.f32.mrb[17].mxu0  ;;  %v3198_v44 = vpop.f32.mrb[17].mxu1  ;;  %v7443_v51 = vadd.f32 %v3196_v13, %v2948_v35 }
 0xacf   :  { %v7442_v30 = vadd.f32 %v3075_v15, %v2944_v0  ;;  %v3077_v7 = vpop.f32.mrb[18].mxu0  ;;  %v3200_v17 = vpop.f32.mrb[18].mxu1  ;;  %v7444_v25 = vadd.f32 %v3198_v44, %v2952_v45 }
 0xad0   :  { %v3209_v23 = vmul.f32 %v7441_v14, %v7441_v14  ;;  %v3078_v10 = vpop.f32.mrb[19].mxu0  ;;  %v3201_v39 = vpop.f32.mrb[19].mxu1  ;;  %v3211_v62 = vmul.f32 %v7443_v51, %v7443_v51 }
 0xad1   :  { %v3210_v19 = vmul.f32 %v7442_v30, %v7442_v30  ;;  %v3203_v56 = vadd.f32 %v7442_v30, %v7441_v14  ;;  %v3212_v34 = vmul.f32 %v7444_v25, %v7444_v25 }
 0xad3   :  { %v3204_v31 = vadd.f32 %v7443_v51, %v3203_v56  ;;  %v3213_v20 = vadd.f32 %v3210_v19, %v3209_v23 }
 0xad5   :  { %v3205_v16 = vadd.f32 %v7444_v25, %v3204_v31  ;;  %v3214_v29 = vadd.f32 %v3213_v20, %v3211_v62 }
 0xad7   :  { %3206 = vadd.xlane.f32.xlu0 %v3205_v16  ;;  %v3215_v50 = vadd.f32 %v3214_v29, %v3212_v34 }
 0xadb   :  { %3216 = vadd.xlane.f32.xlu0 %v3215_v50 }
 0xb64   :  { %v3207_v41 = vpop.xlane.xlu0 %3206 }
 0xb65   :  { %v3208_v6 = vmul.f32 0.001953125, %v3207_v41 }
 0xb67   :  { %v3219_v36 = vmul.f32 %v3208_v6, %v3208_v6  ;;  %v3221_v38 = vsub.f32 %v7441_v14, %v3208_v6  ;;  %v3222_v27 = vsub.f32 %v7442_v30, %v3208_v6  ;;  %v3223_v42 = vsub.f32 %v7443_v51, %v3208_v6 }
 0xb68   :  { %v3217_v3 = vpop.xlane.xlu0 %3216  ;;  %v3224_v8 = vsub.f32 %v7444_v25, %v3208_v6 }
 0xb69   :  { %v3218_v18 = vmul.f32 0.001953125, %v3217_v3 }
 0xb6b   :  { %v3220_v28 = vsub.f32 %v3218_v18, %v3219_v36 }
 0xb6d   :  { %v3225_v33 = vadd.f32 1e-05, %v3220_v28 }
 0xb6f   :  { %7637 = vrsqrt.f32 %v3225_v33 }
 0xb79   :  { %v7638_v48 = vpop.eup %7637 }
 0xb7a   :  { %v3227_v11 = vmul.f32 %v7638_v48, %v3221_v38  ;;  %v3228_v32 = vmul.f32 %v7638_v48, %v3222_v27  ;;  %v3229_v4 = vmul.f32 %v7638_v48, %v3223_v42  ;;  %v3230_v46 = vmul.f32 %v7638_v48, %v3224_v8 }
 0xb7c   :  { %v3252_v21 = vmul.f32 %v3235_v24, %v3227_v11  ;;  %v3253_v57 = vmul.f32 %v3239_v22, %v3228_v32  ;;  %v3254_v35 = vmul.f32 %v3243_v26, %v3229_v4  ;;  %v3255_v0 = vmul.f32 %v3247_v37, %v3230_v46 }
 0xb7e   :  { %v8492_v1 = vadd.f32 %v3260_v40, %v3252_v21  ;;  %v8494_v13 = vadd.f32 %v3264_v2, %v3253_v57  ;;  %v8496_v14 = vadd.f32 %v3268_v53, %v3254_v35  ;;  %v8498_v15 = vadd.f32 %v3272_v55, %v3255_v0 }
 0xb80   :  { %9544 = vst [vmem:[#allocation80_spill] sm:$0xff] %v8494_v13  ;;  %9545 = vst [vmem:[#allocation81_spill] sm:$0xff] %v8496_v14 }
 0xb81   :  { %9546 = vst [vmem:[#allocation82_spill] sm:$0xff] %v8498_v15 }
 0xb82   :  { %7817 = dma.done.wait [#allocation16 + $0x4], 24576 }
 0xb83   :  { %7818 = vsyncadd [#allocation16 + $0x4], 4294942720  ;;  %v8500_v44 = vld [vmem:[#allocation6] sm:$0xff]  ;;  %v8502_v51 = vld [vmem:[#allocation6 + $0x8] sm:$0xff] }
 0xb84   :  { %v8504_v30 = vld [vmem:[#allocation6 + $0x10] sm:$0xff]  ;;  %v8506_v45 = vld [vmem:[#allocation6 + $0x18] sm:$0xff]  ;;  %v8508_v7 = vld [vmem:[#allocation6 + $0x20] sm:$0xff] }
 0xb85   :  { %9547 = vst [vmem:[#allocation83_spill] sm:$0xff] %v8504_v30  ;;  %9548 = vst [vmem:[#allocation84_spill] sm:$0xff] %v8506_v45  ;;  %v8510_v17 = vld [vmem:[#allocation6 + $0x28] sm:$0xff]  ;;  %v8512_v23 = vld [vmem:[#allocation6 + $0x30] sm:$0xff] }
 0xb86   :  { %9549 = vst [vmem:[#allocation85_spill] sm:$0xff] %v8508_v7  ;;  %9550 = vst [vmem:[#allocation86_spill] sm:$0xff] %v8510_v17  ;;  %v8514_v10 = vld [vmem:[#allocation6 + $0x38] sm:$0xff]  ;;  %v8516_v39 = vld [vmem:[#allocation6 + $0x40] sm:$0xff] }
 0xb87   :  { %9551 = vst [vmem:[#allocation87_spill] sm:$0xff] %v8516_v39  ;;  %v8518_v19 = vld [vmem:[#allocation6 + $0x48] sm:$0xff]  ;;  %v8520_v56 = vld [vmem:[#allocation6 + $0x50] sm:$0xff]  ;;  %v8522_v62 = vld [vmem:[#allocation6 + $0x58] sm:$0xff] }
 0xb88   :  { %9552 = vst [vmem:[#allocation88_spill] sm:$0xff] %v8518_v19  ;;  %9553 = vst [vmem:[#allocation89_spill] sm:$0xff] %v8520_v56  ;;  %v8524_v25 = vld [vmem:[#allocation6 + $0x60] sm:$0xff]  ;;  %v8526_v31 = vld [vmem:[#allocation6 + $0x68] sm:$0xff] }
 0xb89   :  { %9554 = vst [vmem:[#allocation90_spill] sm:$0xff] %v8522_v62  ;;  %v8528_v20 = vld [vmem:[#allocation6 + $0x70] sm:$0xff]  ;;  %v8530_v16 = vld [vmem:[#allocation6 + $0x78] sm:$0xff]  ;;  %v8532_v29 = vld [vmem:[#allocation6 + $0x80] sm:$0xff] }
 0xb8a   :  { %9555 = vst [vmem:[#allocation91_spill] sm:$0xff] %v8528_v20  ;;  %9556 = vst [vmem:[#allocation92_spill] sm:$0xff] %v8530_v16  ;;  %v8534_v34 = vld [vmem:[#allocation6 + $0x88] sm:$0xff]  ;;  %v8536_v50 = vld [vmem:[#allocation6 + $0x90] sm:$0xff] }
 0xb8b   :  { %9557 = vst [vmem:[#allocation93_spill] sm:$0xff] %v8532_v29  ;;  %9558 = vst [vmem:[#allocation94_spill] sm:$0xff] %v8534_v34  ;;  %v8538_v41 = vld [vmem:[#allocation6 + $0x98] sm:$0xff]  ;;  %v8540_v6 = vld [vmem:[#allocation6 + $0xa0] sm:$0xff] }
 0xb8c   :  { %9559 = vst [vmem:[#allocation95_spill] sm:$0xff] %v8540_v6  ;;  %v8542_v3 = vld [vmem:[#allocation6 + $0xa8] sm:$0xff]  ;;  %v8544_v36 = vld [vmem:[#allocation6 + $0xb0] sm:$0xff]  ;;  %v8546_v18 = vld [vmem:[#allocation6 + $0xb8] sm:$0xff] }
 0xb8d   :  { %9560 = vst [vmem:[#allocation96_spill] sm:$0xff] %v8542_v3  ;;  %9561 = vst [vmem:[#allocation97_spill] sm:$0xff] %v8544_v36  ;;  %v8548_v28 = vld [vmem:[#allocation6 + $0xc0] sm:$0xff]  ;;  %v8550_v33 = vld [vmem:[#allocation6 + $0xc8] sm:$0xff] }
 0xb8e   :  { %9562 = vst [vmem:[#allocation98_spill] sm:$0xff] %v8546_v18  ;;  %v8552_v9 = vld [vmem:[#allocation6 + $0xd0] sm:$0xff]  ;;  %v8554_v52 = vld [vmem:[#allocation6 + $0xd8] sm:$0xff]  ;;  %v8556_v24 = vld [vmem:[#allocation6 + $0xe0] sm:$0xff] }
 0xb8f   :  { %9563 = vst [vmem:[#allocation99_spill] sm:$0xff] %v8552_v9  ;;  %9564 = vst [vmem:[#allocation100_spill] sm:$0xff] %v8554_v52  ;;  %v8558_v22 = vld [vmem:[#allocation6 + $0xe8] sm:$0xff]  ;;  %v8560_v26 = vld [vmem:[#allocation6 + $0xf0] sm:$0xff] }
 0xb90   :  { %9565 = vst [vmem:[#allocation101_spill] sm:$0xff] %v8556_v24  ;;  %9566 = vst [vmem:[#allocation102_spill] sm:$0xff] %v8558_v22  ;;  %v8562_v37 = vld [vmem:[#allocation6 + $0xf8] sm:$0xff]  ;;  %v8564_v38 = vld [vmem:[#allocation6 + $0x100] sm:$0xff] }
 0xb91   :  { %9567 = vst [vmem:[#allocation103_spill] sm:$0xff] %v8564_v38  ;;  %v8566_v27 = vld [vmem:[#allocation6 + $0x108] sm:$0xff]  ;;  %v8568_v42 = vld [vmem:[#allocation6 + $0x110] sm:$0xff]  ;;  %v8570_v8 = vld [vmem:[#allocation6 + $0x118] sm:$0xff] }
 0xb92   :  { %9568 = vst [vmem:[#allocation104_spill] sm:$0xff] %v8566_v27  ;;  %9569 = vst [vmem:[#allocation105_spill] sm:$0xff] %v8568_v42  ;;  %v8572_v48 = vld [vmem:[#allocation6 + $0x120] sm:$0xff]  ;;  %v8574_v40 = vld [vmem:[#allocation6 + $0x128] sm:$0xff] }
 0xb93   :  { %9570 = vst [vmem:[#allocation106_spill] sm:$0xff] %v8570_v8  ;;  %v8576_v2 = vld [vmem:[#allocation6 + $0x130] sm:$0xff]  ;;  %v8578_v53 = vld [vmem:[#allocation6 + $0x138] sm:$0xff]  ;;  %v8580_v55 = vld [vmem:[#allocation6 + $0x140] sm:$0xff] }
 0xb94   :  { %9571 = vst [vmem:[#allocation107_spill] sm:$0xff] %v8576_v2  ;;  %9572 = vst [vmem:[#allocation108_spill] sm:$0xff] %v8578_v53  ;;  %v8582_v11 = vld [vmem:[#allocation6 + $0x148] sm:$0xff]  ;;  %v8584_v32 = vld [vmem:[#allocation6 + $0x150] sm:$0xff] }
 0xb95   :  { %9573 = vst [vmem:[#allocation109_spill] sm:$0xff] %v8580_v55  ;;  %9574 = vst [vmem:[#allocation110_spill] sm:$0xff] %v8582_v11  ;;  %v8586_v4 = vld [vmem:[#allocation6 + $0x158] sm:$0xff]  ;;  %v8588_v46 = vld [vmem:[#allocation6 + $0x160] sm:$0xff] }
 0xb96   :  { %9575 = vst [vmem:[#allocation111_spill] sm:$0xff] %v8588_v46  ;;  %v8590_v21 = vld [vmem:[#allocation6 + $0x168] sm:$0xff]  ;;  %v8592_v57 = vld [vmem:[#allocation6 + $0x170] sm:$0xff]  ;;  %v8594_v35 = vld [vmem:[#allocation6 + $0x178] sm:$0xff] }
 0xb97   :  { %9576 = vst [vmem:[#allocation112_spill] sm:$0xff] %v8590_v21  ;;  %9577 = vst [vmem:[#allocation113_spill] sm:$0xff] %v8592_v57  ;;  %v8596_v0 = vld [vmem:[#allocation6 + $0x180] sm:$0xff]  ;;  %v8598_v43 = vld [vmem:[#allocation6 + $0x188] sm:$0xff] }
 0xb98   :  { %9578 = vst [vmem:[#allocation114_spill] sm:$0xff] %v8594_v35  ;;  %v8600_v60 = vld [vmem:[#allocation6 + $0x190] sm:$0xff]  ;;  %v8602_v59 = vld [vmem:[#allocation6 + $0x198] sm:$0xff]  ;;  %v8604_v54 = vld [vmem:[#allocation6 + $0x1a0] sm:$0xff] }
 0xb99   :  { %9579 = vst [vmem:[#allocation115_spill] sm:$0xff] %v8600_v60  ;;  %9580 = vst [vmem:[#allocation116_spill] sm:$0xff] %v8602_v59  ;;  %v8606_v49 = vld [vmem:[#allocation6 + $0x1a8] sm:$0xff]  ;;  %v8608_v5 = vld [vmem:[#allocation6 + $0x1b0] sm:$0xff] }
 0xb9a   :  { %9581 = vst [vmem:[#allocation117_spill] sm:$0xff] %v8604_v54  ;;  %9582 = vst [vmem:[#allocation118_spill] sm:$0xff] %v8606_v49  ;;  %v8610_v47 = vld [vmem:[#allocation6 + $0x1b8] sm:$0xff]  ;;  %v8612_v55 = vld [vmem:[#allocation6 + $0x1c0] sm:$0xff] }
 0xb9b   :  { %9583 = vst [vmem:[#allocation119_spill] sm:$0xff] %v8612_v55  ;;  %v8614_v57 = vld [vmem:[#allocation6 + $0x1c8] sm:$0xff]  ;;  %v8616_v35 = vld [vmem:[#allocation6 + $0x1d0] sm:$0xff]  ;;  %v8618_v11 = vld [vmem:[#allocation6 + $0x1d8] sm:$0xff] }
 0xb9c   :  { %9584 = vst [vmem:[#allocation120_spill] sm:$0xff] %v8614_v57  ;;  %9585 = vst [vmem:[#allocation121_spill] sm:$0xff] %v8616_v35  ;;  %v8620_v42 = vld [vmem:[#allocation6 + $0x1e0] sm:$0xff]  ;;  %v8622_v8 = vld [vmem:[#allocation6 + $0x1e8] sm:$0xff] }
 0xb9d   :  { %9586 = vst [vmem:[#allocation122_spill] sm:$0xff] %v8618_v11  ;;  %v8624_v24 = vld [vmem:[#allocation6 + $0x1f0] sm:$0xff]  ;;  %v8626_v54 = vld [vmem:[#allocation6 + $0x1f8] sm:$0xff]  ;;  %v8628_v49 = vld [vmem:[#allocation6 + $0x200] sm:$0xff] }
 0xb9e   :  { %9587 = vst [vmem:[#allocation123_spill] sm:$0xff] %v8624_v24  ;;  %9588 = vst [vmem:[#allocation124_spill] sm:$0xff] %v8626_v54  ;;  %v8630_v22 = vld [vmem:[#allocation6 + $0x208] sm:$0xff]  ;;  %v8632_v36 = vld [vmem:[#allocation6 + $0x210] sm:$0xff] }
 0xb9f   :  { %9589 = vst [vmem:[#allocation125_spill] sm:$0xff] %v8628_v49  ;;  %9590 = vst [vmem:[#allocation126_spill] sm:$0xff] %v8630_v22  ;;  %v8634_v18 = vld [vmem:[#allocation6 + $0x218] sm:$0xff]  ;;  %v8636_v29 = vld [vmem:[#allocation6 + $0x220] sm:$0xff] }
 0xba0   :  { %9591 = vst [vmem:[#allocation127_spill] sm:$0xff] %v8632_v36  ;;  %9592 = vst [vmem:[#allocation128_spill] sm:$0xff] %v8636_v29  ;;  %v8638_v35 = vld [vmem:[#allocation6 + $0x228] sm:$0xff]  ;;  %v8640_v11 = vld [vmem:[#allocation6 + $0x230] sm:$0xff] }
 0xba1   :  { %9593 = vst [vmem:[#allocation129_spill] sm:$0xff] %v8638_v35  ;;  %9594 = vst [vmem:[#allocation130_spill] sm:$0xff] %v8640_v11  ;;  %v8642_v34 = vld [vmem:[#allocation6 + $0x238] sm:$0xff]  ;;  %v8644_v56 = vld [vmem:[#allocation6 + $0x240] sm:$0xff] }
 0xba2   :  { %9595 = vst [vmem:[#allocation131_spill] sm:$0xff] %v8642_v34  ;;  %9596 = vst [vmem:[#allocation132_spill] sm:$0xff] %v8644_v56  ;;  %v8646_v62 = vld [vmem:[#allocation6 + $0x248] sm:$0xff]  ;;  %v8648_v7 = vld [vmem:[#allocation6 + $0x250] sm:$0xff] }
 0xba3   :  { %9597 = vst [vmem:[#allocation133_spill] sm:$0xff] %v8646_v62  ;;  %9598 = vst [vmem:[#allocation134_spill] sm:$0xff] %v8648_v7  ;;  %v8650_v49 = vld [vmem:[#allocation6 + $0x258] sm:$0xff]  ;;  %v8652_v22 = vld [vmem:[#allocation6 + $0x260] sm:$0xff] }
 0xba4   :  { %9599 = vst [vmem:[#allocation135_spill] sm:$0xff] %v8650_v49  ;;  %9600 = vst [vmem:[#allocation136_spill] sm:$0xff] %v8652_v22  ;;  %v8654_v17 = vld [vmem:[#allocation6 + $0x268] sm:$0xff]  ;;  %v8656_v24 = vld [vmem:[#allocation6 + $0x270] sm:$0xff] }
 0xba5   :  { %9601 = vst [vmem:[#allocation137_spill] sm:$0xff] %v8654_v17  ;;  %9602 = vst [vmem:[#allocation138_spill] sm:$0xff] %v8656_v24  ;;  %v8658_v29 = vld [vmem:[#allocation6 + $0x278] sm:$0xff]  ;;  %v8660_v35 = vld [vmem:[#allocation6 + $0x280] sm:$0xff] }
 0xba6   :  { %9603 = vst [vmem:[#allocation139_spill] sm:$0xff] %v8658_v29  ;;  %9604 = vst [vmem:[#allocation140_spill] sm:$0xff] %v8660_v35  ;;  %v8662_v11 = vld [vmem:[#allocation6 + $0x288] sm:$0xff]  ;;  %v8664_v34 = vld [vmem:[#allocation6 + $0x290] sm:$0xff] }
 0xba7   :  { %9605 = vst [vmem:[#allocation141_spill] sm:$0xff] %v8662_v11  ;;  %9606 = vst [vmem:[#allocation142_spill] sm:$0xff] %v8664_v34  ;;  %v8666_v54 = vld [vmem:[#allocation6 + $0x298] sm:$0xff]  ;;  %v8668_v55 = vld [vmem:[#allocation6 + $0x2a0] sm:$0xff] }
 0xba8   :  { %9607 = vst [vmem:[#allocation143_spill] sm:$0xff] %v8666_v54  ;;  %9608 = vst [vmem:[#allocation144_spill] sm:$0xff] %v8668_v55  ;;  %v8670_v7 = vld [vmem:[#allocation6 + $0x2a8] sm:$0xff]  ;;  %v8672_v49 = vld [vmem:[#allocation6 + $0x2b0] sm:$0xff] }
 0xba9   :  { %9609 = vst [vmem:[#allocation145_spill] sm:$0xff] %v8670_v7  ;;  %9610 = vst [vmem:[#allocation146_spill] sm:$0xff] %v8672_v49  ;;  %v8674_v22 = vld [vmem:[#allocation6 + $0x2b8] sm:$0xff]  ;;  %v8676_v17 = vld [vmem:[#allocation6 + $0x2c0] sm:$0xff] }
 0xbaa   :  { %9611 = vst [vmem:[#allocation147_spill] sm:$0xff] %v8674_v22  ;;  %9612 = vst [vmem:[#allocation148_spill] sm:$0xff] %v8676_v17  ;;  %v8678_v57 = vld [vmem:[#allocation6 + $0x2c8] sm:$0xff]  ;;  %v8680_v60 = vld [vmem:[#allocation6 + $0x2d0] sm:$0xff] }
 0xbab   :  { %9613 = vst [vmem:[#allocation149_spill] sm:$0xff] %v8678_v57  ;;  %9614 = vst [vmem:[#allocation150_spill] sm:$0xff] %v8680_v60  ;;  %v8682_v35 = vld [vmem:[#allocation6 + $0x2d8] sm:$0xff]  ;;  %v8684_v11 = vld [vmem:[#allocation6 + $0x2e0] sm:$0xff] }
 0xbac   :  { %9615 = vst [vmem:[#allocation151_spill] sm:$0xff] %v8682_v35  ;;  %9616 = vst [vmem:[#allocation152_spill] sm:$0xff] %v8684_v11  ;;  %v8686_v34 = vld [vmem:[#allocation6 + $0x2e8] sm:$0xff]  ;;  %v8688_v54 = vld [vmem:[#allocation6 + $0x2f0] sm:$0xff] }
 0xbad   :  { %9617 = vst [vmem:[#allocation153_spill] sm:$0xff] %v8686_v34  ;;  %9618 = vst [vmem:[#allocation154_spill] sm:$0xff] %v8688_v54  ;;  %v8690_v59 = vld [vmem:[#allocation6 + $0x2f8] sm:$0xff]  ;;  %v8692_v46 = vld [vmem:[#allocation6 + $0x300] sm:$0xff] }
 0xbae   :  { %9619 = vst [vmem:[#allocation155_spill] sm:$0xff] %v8690_v59  ;;  %v8694_v49 = vld [vmem:[#allocation6 + $0x308] sm:$0xff]  ;;  %v8696_v22 = vld [vmem:[#allocation6 + $0x310] sm:$0xff]  ;;  %v8698_v17 = vld [vmem:[#allocation6 + $0x318] sm:$0xff] }
 0xbaf   :  { %9620 = vst [vmem:[#allocation156_spill] sm:$0xff] %v8696_v22  ;;  %9621 = vst [vmem:[#allocation157_spill] sm:$0xff] %v8698_v17  ;;  %v8700_v57 = vld [vmem:[#allocation6 + $0x320] sm:$0xff]  ;;  %v8702_v21 = vld [vmem:[#allocation6 + $0x328] sm:$0xff] }
 0xbb0   :  { %9622 = vst [vmem:[#allocation158_spill] sm:$0xff] %v8700_v57  ;;  %9623 = vst [vmem:[#allocation159_spill] sm:$0xff] %v8702_v21  ;;  %v8704_v2 = vld [vmem:[#allocation6 + $0x330] sm:$0xff]  ;;  %v8706_v11 = vld [vmem:[#allocation6 + $0x338] sm:$0xff] }
 0xbb1   :  { %v8708_v34 = vld [vmem:[#allocation6 + $0x340] sm:$0xff]  ;;  %v8710_v54 = vld [vmem:[#allocation6 + $0x348] sm:$0xff]  ;;  %v8712_v59 = vld [vmem:[#allocation6 + $0x350] sm:$0xff] }
 0xbb2   :  { %9624 = vst [vmem:[#allocation160_spill] sm:$0xff] %v8708_v34  ;;  %9625 = vst [vmem:[#allocation161_spill] sm:$0xff] %v8710_v54  ;;  %v8714_v53 = vld [vmem:[#allocation6 + $0x358] sm:$0xff]  ;;  %v8716_v38 = vld [vmem:[#allocation6 + $0x360] sm:$0xff] }
 0xbb3   :  { %9626 = vst [vmem:[#allocation162_spill] sm:$0xff] %v8712_v59  ;;  %9627 = vst [vmem:[#allocation163_spill] sm:$0xff] %v8714_v53  ;;  %v8718_v27 = vld [vmem:[#allocation6 + $0x368] sm:$0xff]  ;;  %v8720_v9 = vld [vmem:[#allocation6 + $0x370] sm:$0xff] }
 0xbb4   :  { %9628 = vst [vmem:[#allocation164_spill] sm:$0xff] %v8720_v9  ;;  %v8722_v57 = vld [vmem:[#allocation6 + $0x378] sm:$0xff]  ;;  %v8724_v21 = vld [vmem:[#allocation6 + $0x380] sm:$0xff]  ;;  %v8726_v52 = vld [vmem:[#allocation6 + $0x388] sm:$0xff] }
 0xbb5   :  { %9629 = vst [vmem:[#allocation165_spill] sm:$0xff] %v8722_v57  ;;  %9630 = vst [vmem:[#allocation166_spill] sm:$0xff] %v8724_v21  ;;  %v8728_v6 = vld [vmem:[#allocation6 + $0x390] sm:$0xff]  ;;  %v8730_v3 = vld [vmem:[#allocation6 + $0x398] sm:$0xff] }
 0xbb6   :  { %9631 = vst [vmem:[#allocation167_spill] sm:$0xff] %v8726_v52  ;;  %v8732_v20 = vld [vmem:[#allocation6 + $0x3a0] sm:$0xff]  ;;  %v8734_v59 = vld [vmem:[#allocation6 + $0x3a8] sm:$0xff]  ;;  %v8736_v53 = vld [vmem:[#allocation6 + $0x3b0] sm:$0xff] }
 0xbb7   :  { %9632 = vst [vmem:[#allocation168_spill] sm:$0xff] %v8732_v20  ;;  %9633 = vst [vmem:[#allocation169_spill] sm:$0xff] %v8734_v59  ;;  %v8738_v16 = vld [vmem:[#allocation6 + $0x3b8] sm:$0xff]  ;;  %v8740_v34 = vld [vmem:[#allocation6 + $0x3c0] sm:$0xff] }
 0xbb8   :  { %9634 = vst [vmem:[#allocation170_spill] sm:$0xff] %v8736_v53  ;;  %9635 = vst [vmem:[#allocation171_spill] sm:$0xff] %v8738_v16  ;;  %v8742_v9 = vld [vmem:[#allocation6 + $0x3c8] sm:$0xff]  ;;  %v8744_v57 = vld [vmem:[#allocation6 + $0x3d0] sm:$0xff] }
 0xbb9   :  { %9636 = vst [vmem:[#allocation172_spill] sm:$0xff] %v8744_v57  ;;  %v8746_v21 = vld [vmem:[#allocation6 + $0x3d8] sm:$0xff]  ;;  %v8748_v52 = vld [vmem:[#allocation6 + $0x3e0] sm:$0xff]  ;;  %v8750_v39 = vld [vmem:[#allocation6 + $0x3e8] sm:$0xff] }
 0xbba   :  { %9637 = vst [vmem:[#allocation173_spill] sm:$0xff] %v8746_v21  ;;  %9638 = vst [vmem:[#allocation174_spill] sm:$0xff] %v8748_v52  ;;  %v8752_v54 = vld [vmem:[#allocation6 + $0x3f0] sm:$0xff]  ;;  %v8754_v20 = vld [vmem:[#allocation6 + $0x3f8] sm:$0xff] }
 0xbbb   :  { %9639 = vst [vmem:[#allocation175_spill] sm:$0xff] %v8750_v39  ;;  %v8756_v59 = vld [vmem:[#allocation6 + $0x400] sm:$0xff]  ;;  %v8758_v53 = vld [vmem:[#allocation6 + $0x408] sm:$0xff]  ;;  %v8760_v16 = vld [vmem:[#allocation6 + $0x410] sm:$0xff] }
 0xbbc   :  { %9640 = vst [vmem:[#allocation176_spill] sm:$0xff] %v8756_v59  ;;  %9641 = vst [vmem:[#allocation177_spill] sm:$0xff] %v8758_v53  ;;  %v8762_v19 = vld [vmem:[#allocation6 + $0x418] sm:$0xff]  ;;  %v8764_v22 = vld [vmem:[#allocation6 + $0x420] sm:$0xff] }
 0xbbd   :  { %9642 = vst [vmem:[#allocation178_spill] sm:$0xff] %v8760_v16  ;;  %9643 = vst [vmem:[#allocation179_spill] sm:$0xff] %v8762_v19  ;;  %v8766_v57 = vld [vmem:[#allocation6 + $0x428] sm:$0xff]  ;;  %v8768_v21 = vld [vmem:[#allocation6 + $0x430] sm:$0xff] }
 0xbbe   :  { %9644 = vst [vmem:[#allocation180_spill] sm:$0xff] %v8768_v21  ;;  %v8770_v52 = vld [vmem:[#allocation6 + $0x438] sm:$0xff]  ;;  %v8772_v39 = vld [vmem:[#allocation6 + $0x440] sm:$0xff]  ;;  %v8774_v30 = vld [vmem:[#allocation6 + $0x448] sm:$0xff] }
 0xbbf   :  { %9645 = vst [vmem:[#allocation181_spill] sm:$0xff] %v8770_v52  ;;  %9646 = vst [vmem:[#allocation182_spill] sm:$0xff] %v8772_v39  ;;  %v8776_v17 = vld [vmem:[#allocation6 + $0x450] sm:$0xff]  ;;  %v8778_v59 = vld [vmem:[#allocation6 + $0x458] sm:$0xff] }
 0xbc0   :  { %9647 = vst [vmem:[#allocation183_spill] sm:$0xff] %v8774_v30  ;;  %v8780_v53 = vld [vmem:[#allocation6 + $0x460] sm:$0xff]  ;;  %v8782_v16 = vld [vmem:[#allocation6 + $0x468] sm:$0xff]  ;;  %v8784_v19 = vld [vmem:[#allocation6 + $0x470] sm:$0xff] }
 0xbc1   :  { %9648 = vst [vmem:[#allocation184_spill] sm:$0xff] %v8780_v53  ;;  %9649 = vst [vmem:[#allocation185_spill] sm:$0xff] %v8782_v16  ;;  %v8786_v45 = vld [vmem:[#allocation6 + $0x478] sm:$0xff]  ;;  %v8788_v60 = vld [vmem:[#allocation6 + $0x480] sm:$0xff] }
 0xbc2   :  { %9650 = vst [vmem:[#allocation186_spill] sm:$0xff] %v8784_v19  ;;  %9651 = vst [vmem:[#allocation187_spill] sm:$0xff] %v8786_v45  ;;  %v8790_v21 = vld [vmem:[#allocation6 + $0x488] sm:$0xff]  ;;  %v8792_v52 = vld [vmem:[#allocation6 + $0x490] sm:$0xff] }
 0xbc3   :  { %9652 = vst [vmem:[#allocation188_spill] sm:$0xff] %v8792_v52  ;;  %v8794_v39 = vld [vmem:[#allocation6 + $0x498] sm:$0xff]  ;;  %v8796_v30 = vld [vmem:[#allocation6 + $0x4a0] sm:$0xff]  ;;  %v8798_v12 = vld [vmem:[#allocation6 + $0x4a8] sm:$0xff] }
 0xbc4   :  { %9653 = vst [vmem:[#allocation189_spill] sm:$0xff] %v8794_v39  ;;  %9654 = vst [vmem:[#allocation190_spill] sm:$0xff] %v8796_v30  ;;  %v8800_v58 = vld [vmem:[#allocation6 + $0x4b0] sm:$0xff]  ;;  %v8802_v53 = vld [vmem:[#allocation6 + $0x4b8] sm:$0xff] }
 0xbc5   :  { %9655 = vst [vmem:[#allocation191_spill] sm:$0xff] %v8798_v12  ;;  %v8804_v16 = vld [vmem:[#allocation6 + $0x4c0] sm:$0xff]  ;;  %v8806_v19 = vld [vmem:[#allocation6 + $0x4c8] sm:$0xff]  ;;  %v8808_v45 = vld [vmem:[#allocation6 + $0x4d0] sm:$0xff] }
 0xbc6   :  { %9656 = vst [vmem:[#allocation192_spill] sm:$0xff] %v8804_v16  ;;  %9657 = vst [vmem:[#allocation193_spill] sm:$0xff] %v8806_v19  ;;  %v8810_v35 = vld [vmem:[#allocation6 + $0x4d8] sm:$0xff]  ;;  %v8812_v55 = vld [vmem:[#allocation6 + $0x4e0] sm:$0xff] }
 0xbc7   :  { %9658 = vst [vmem:[#allocation194_spill] sm:$0xff] %v8808_v45  ;;  %9659 = vst [vmem:[#allocation195_spill] sm:$0xff] %v8810_v35  ;;  %v8814_v52 = vld [vmem:[#allocation6 + $0x4e8] sm:$0xff]  ;;  %v8816_v39 = vld [vmem:[#allocation6 + $0x4f0] sm:$0xff] }
 0xbc8   :  { %9660 = vst [vmem:[#allocation196_spill] sm:$0xff] %v8816_v39  ;;  %v8818_v30 = vld [vmem:[#allocation6 + $0x4f8] sm:$0xff]  ;;  %v8820_v12 = vld [vmem:[#allocation6 + $0x500] sm:$0xff]  ;;  %v8822_v7 = vld [vmem:[#allocation6 + $0x508] sm:$0xff] }
 0xbc9   :  { %9661 = vst [vmem:[#allocation197_spill] sm:$0xff] %v8818_v30  ;;  %9662 = vst [vmem:[#allocation198_spill] sm:$0xff] %v8820_v12  ;;  %v8824_v24 = vld [vmem:[#allocation6 + $0x510] sm:$0xff]  ;;  %v8826_v16 = vld [vmem:[#allocation6 + $0x518] sm:$0xff] }
 0xbca   :  { %9663 = vst [vmem:[#allocation199_spill] sm:$0xff] %v8822_v7  ;;  %9664 = vst [vmem:[#allocation200_spill] sm:$0xff] %v8824_v24  ;;  %v8828_v19 = vld [vmem:[#allocation6 + $0x520] sm:$0xff]  ;;  %v8830_v45 = vld [vmem:[#allocation6 + $0x528] sm:$0xff] }
 0xbcb   :  { %9665 = vst [vmem:[#allocation201_spill] sm:$0xff] %v8826_v16  ;;  %9666 = vst [vmem:[#allocation202_spill] sm:$0xff] %v8828_v19  ;;  %v8832_v35 = vld [vmem:[#allocation6 + $0x530] sm:$0xff]  ;;  %v8834_v29 = vld [vmem:[#allocation6 + $0x538] sm:$0xff] }
 0xbcc   :  { %9667 = vst [vmem:[#allocation203_spill] sm:$0xff] %v8830_v45  ;;  %9668 = vst [vmem:[#allocation204_spill] sm:$0xff] %v8832_v35  ;;  %v8836_v56 = vld [vmem:[#allocation6 + $0x540] sm:$0xff]  ;;  %v8838_v39 = vld [vmem:[#allocation6 + $0x548] sm:$0xff] }
 0xbcd   :  { %9669 = vst [vmem:[#allocation205_spill] sm:$0xff] %v8834_v29  ;;  %9670 = vst [vmem:[#allocation206_spill] sm:$0xff] %v8836_v56  ;;  %v8840_v30 = vld [vmem:[#allocation6 + $0x550] sm:$0xff]  ;;  %v8842_v12 = vld [vmem:[#allocation6 + $0x558] sm:$0xff] }
 0xbce   :  { %9671 = vst [vmem:[#allocation207_spill] sm:$0xff] %v8838_v39  ;;  %9672 = vst [vmem:[#allocation208_spill] sm:$0xff] %v8840_v30  ;;  %v8844_v7 = vld [vmem:[#allocation6 + $0x560] sm:$0xff]  ;;  %v8846_v62 = vld [vmem:[#allocation6 + $0x568] sm:$0xff] }
 0xbcf   :  { %9673 = vst [vmem:[#allocation209_spill] sm:$0xff] %v8842_v12  ;;  %9674 = vst [vmem:[#allocation210_spill] sm:$0xff] %v8844_v7  ;;  %v8848_v24 = vld [vmem:[#allocation6 + $0x570] sm:$0xff]  ;;  %v8850_v19 = vld [vmem:[#allocation6 + $0x578] sm:$0xff] }
 0xbd0   :  { %9675 = vst [vmem:[#allocation211_spill] sm:$0xff] %v8846_v62  ;;  %9676 = vst [vmem:[#allocation212_spill] sm:$0xff] %v8848_v24  ;;  %v8852_v45 = vld [vmem:[#allocation6 + $0x580] sm:$0xff]  ;;  %v8854_v35 = vld [vmem:[#allocation6 + $0x588] sm:$0xff] }
 0xbd1   :  { %9677 = vst [vmem:[#allocation213_spill] sm:$0xff] %v8850_v19  ;;  %9678 = vst [vmem:[#allocation214_spill] sm:$0xff] %v8852_v45  ;;  %v8856_v29 = vld [vmem:[#allocation6 + $0x590] sm:$0xff]  ;;  %v8858_v56 = vld [vmem:[#allocation6 + $0x598] sm:$0xff] }
 0xbd2   :  { %9679 = vst [vmem:[#allocation215_spill] sm:$0xff] %v8854_v35  ;;  %9680 = vst [vmem:[#allocation216_spill] sm:$0xff] %v8856_v29  ;;  %v8860_v39 = vld [vmem:[#allocation6 + $0x5a0] sm:$0xff]  ;;  %v8862_v30 = vld [vmem:[#allocation6 + $0x5a8] sm:$0xff] }
 0xbd3   :  { %9681 = vst [vmem:[#allocation217_spill] sm:$0xff] %v8858_v56  ;;  %9682 = vst [vmem:[#allocation218_spill] sm:$0xff] %v8860_v39  ;;  %v8864_v12 = vld [vmem:[#allocation6 + $0x5b0] sm:$0xff]  ;;  %v8866_v7 = vld [vmem:[#allocation6 + $0x5b8] sm:$0xff] }
 0xbd4   :  { %9683 = vst [vmem:[#allocation219_spill] sm:$0xff] %v8862_v30  ;;  %9684 = vst [vmem:[#allocation220_spill] sm:$0xff] %v8864_v12  ;;  %v8868_v62 = vld [vmem:[#allocation6 + $0x5c0] sm:$0xff]  ;;  %v8870_v24 = vld [vmem:[#allocation6 + $0x5c8] sm:$0xff] }
 0xbd5   :  { %9685 = vst [vmem:[#allocation221_spill] sm:$0xff] %v8866_v7  ;;  %9686 = vst [vmem:[#allocation222_spill] sm:$0xff] %v8868_v62  ;;  %v8872_v19 = vld [vmem:[#allocation6 + $0x5d0] sm:$0xff]  ;;  %v8874_v45 = vld [vmem:[#allocation6 + $0x5d8] sm:$0xff] }
 0xbd6   :  { %9687 = vst [vmem:[#allocation223_spill] sm:$0xff] %v8870_v24  ;;  %9688 = vst [vmem:[#allocation224_spill] sm:$0xff] %v8872_v19  ;;  %v8876_v35 = vld [vmem:[#allocation6 + $0x5e0] sm:$0xff]  ;;  %v8878_v29 = vld [vmem:[#allocation6 + $0x5e8] sm:$0xff] }
 0xbd7   :  { %9689 = vst [vmem:[#allocation225_spill] sm:$0xff] %v8874_v45  ;;  %9690 = vst [vmem:[#allocation226_spill] sm:$0xff] %v8876_v35  ;;  %v8880_v56 = vld [vmem:[#allocation6 + $0x5f0] sm:$0xff]  ;;  %v8882_v39 = vld [vmem:[#allocation6 + $0x5f8] sm:$0xff] }
 0xbd8   :  { %9691 = vst [vmem:[#allocation227_spill] sm:$0xff] %v8878_v29  ;;  %9692 = vst [vmem:[#allocation228_spill] sm:$0xff] %v8880_v56 }
 0xbd9   :  { %9693 = vst [vmem:[#allocation229_spill] sm:$0xff] %v8882_v39 }
 0xbda   :  { %7819 = dma.done.wait [#allocation16 + $0x5], 24576 }
 0xbdb   :  { %7820 = vsyncadd [#allocation16 + $0x5], 4294942720  ;;  %v8886_v12 = vpack.c.bf16 %v8494_v13, %v8494_v13  ;;  %v8890_v62 = vpack.c.bf16 %v8498_v15, %v8498_v15  ;;  %v3480_v24 = vld [vmem:[#allocation7 + $0x8] sm:$0xff]  ;;  %v3479_v29 = vld [vmem:[#allocation7] sm:$0xff] }
 0xbdc   :  { %v3576_v35 = vld [vmem:[#allocation7 + $0x308] sm:$0xff]  ;;  %3691 = vmatprep.subr.bf16.mxu0 %v3480_v24  ;;  %v3575_v56 = vld [vmem:[#allocation7 + $0x300] sm:$0xff]  ;;  %v3486_v39 = vld [vmem:[#allocation7 + $0x38] sm:$0xff] }
 0xbdd   :  { %3723 = vmatprep.mubr.bf16.mxu0 %v8886_v12  ;;  %3764 = vmatprep.mubr.bf16.mxu1 %v8890_v62  ;;  %v3582_v7 = vld [vmem:[#allocation7 + $0x338] sm:$0xff]  ;;  %v3485_v13 = vld [vmem:[#allocation7 + $0x30] sm:$0xff]  ;;  %v3492_v15 = vld [vmem:[#allocation7 + $0x68] sm:$0xff] }
 0xbde   :  { %3732 = vmatprep.subr.bf16.mxu1 %v3576_v35  ;;  %3692 = vmatpush1.bf16.msra.mxu0 %v3479_v29  ;;  %v3581_v19 = vld [vmem:[#allocation7 + $0x330] sm:$0xff]  ;;  %v3588_v45 = vld [vmem:[#allocation7 + $0x368] sm:$0xff]  ;;  %v3491_v30 = vld [vmem:[#allocation7 + $0x60] sm:$0xff] }
 0xbdf   :  { %3733 = vmatpush1.bf16.msra.mxu1 %v3575_v56  ;;  %3693 = vmatprep.subr.bf16.mxu0 %v3486_v39  ;;  %v3587_v36 = vld [vmem:[#allocation7 + $0x360] sm:$0xff]  ;;  %v3498_v16 = vld [vmem:[#allocation7 + $0x98] sm:$0xff]  ;;  %v3497_v29 = vld [vmem:[#allocation7 + $0x90] sm:$0xff] }
 0xbe0   :  { %3734 = vmatprep.subr.bf16.mxu1 %v3582_v7  ;;  %v3594_v24 = vld [vmem:[#allocation7 + $0x398] sm:$0xff]  ;;  %v3593_v56 = vld [vmem:[#allocation7 + $0x390] sm:$0xff]  ;;  %v3504_v39 = vld [vmem:[#allocation7 + $0xc8] sm:$0xff] }
 0xbe1   :  { %v3600_v7 = vld [vmem:[#allocation7 + $0x3c8] sm:$0xff] }
 0xbe2   :  { %3694 = vmatpush1.bf16.msra.mxu0 %v3485_v13  ;;  %v3503_v13 = vld [vmem:[#allocation7 + $0xc0] sm:$0xff]  ;;  %v3612_v35 = vld [vmem:[#allocation7 + $0x428] sm:$0xff] }
 0xbe3   :  { %3735 = vmatpush1.bf16.msra.mxu1 %v3581_v19  ;;  %3695 = vmatprep.subr.bf16.mxu0 %v3492_v15  ;;  %v3599_v19 = vld [vmem:[#allocation7 + $0x3c0] sm:$0xff]  ;;  %v3510_v15 = vld [vmem:[#allocation7 + $0xf8] sm:$0xff] }
 0xbe4   :  { %3736 = vmatprep.subr.bf16.mxu1 %v3588_v45  ;;  %v3606_v45 = vld [vmem:[#allocation7 + $0x3f8] sm:$0xff] }
 0xbe6   :  { %3696 = vmatpush1.bf16.msra.mxu0 %v3491_v30  ;;  %v3509_v30 = vld [vmem:[#allocation7 + $0xf0] sm:$0xff] }
 0xbe7   :  { %3737 = vmatpush1.bf16.msra.mxu1 %v3587_v36  ;;  %3697 = vmatprep.subr.bf16.mxu0 %v3498_v16  ;;  %v3605_v36 = vld [vmem:[#allocation7 + $0x3f0] sm:$0xff]  ;;  %v3516_v16 = vld [vmem:[#allocation7 + $0x128] sm:$0xff] }
 0xbe8   :  { %3738 = vmatprep.subr.bf16.mxu1 %v3594_v24  ;;  %v3515_v24 = vld [vmem:[#allocation7 + $0x120] sm:$0xff] }
 0xbea   :  { %3698 = vmatpush1.bf16.msra.mxu0 %v3497_v29  ;;  %v3611_v29 = vld [vmem:[#allocation7 + $0x420] sm:$0xff] }
 0xbeb   :  { %3739 = vmatpush1.bf16.msra.mxu1 %v3593_v56  ;;  %3699 = vmatprep.subr.bf16.mxu0 %v3504_v39  ;;  %v3522_v56 = vld [vmem:[#allocation7 + $0x158] sm:$0xff] }
 0xbec   :  { %3740 = vmatprep.subr.bf16.mxu1 %v3600_v7  ;;  %v3618_v39 = vld [vmem:[#allocation7 + $0x458] sm:$0xff]  ;;  %v3521_v7 = vld [vmem:[#allocation7 + $0x150] sm:$0xff] }
 0xbee   :  { %3700 = vmatpush1.bf16.msra.mxu0 %v3503_v13  ;;  %v3617_v13 = vld [vmem:[#allocation7 + $0x450] sm:$0xff] }
 0xbef   :  { %3741 = vmatpush1.bf16.msra.mxu1 %v3599_v19  ;;  %3701 = vmatprep.subr.bf16.mxu0 %v3510_v15  ;;  %v3528_v19 = vld [vmem:[#allocation7 + $0x188] sm:$0xff] }
 0xbf0   :  { %3742 = vmatprep.subr.bf16.mxu1 %v3606_v45  ;;  %v3624_v15 = vld [vmem:[#allocation7 + $0x488] sm:$0xff]  ;;  %v3527_v45 = vld [vmem:[#allocation7 + $0x180] sm:$0xff] }
 0xbf2   :  { %3702 = vmatpush1.bf16.msra.mxu0 %v3509_v30  ;;  %v3623_v30 = vld [vmem:[#allocation7 + $0x480] sm:$0xff] }
 0xbf3   :  { %3743 = vmatpush1.bf16.msra.mxu1 %v3605_v36  ;;  %3703 = vmatprep.subr.bf16.mxu0 %v3516_v16  ;;  %v3534_v36 = vld [vmem:[#allocation7 + $0x1b8] sm:$0xff] }
 0xbf4   :  { %3744 = vmatprep.subr.bf16.mxu1 %v3612_v35  ;;  %v3630_v16 = vld [vmem:[#allocation7 + $0x4b8] sm:$0xff]  ;;  %v3533_v35 = vld [vmem:[#allocation7 + $0x1b0] sm:$0xff] }
 0xbf6   :  { %3704 = vmatpush1.bf16.msra.mxu0 %v3515_v24  ;;  %v3629_v24 = vld [vmem:[#allocation7 + $0x4b0] sm:$0xff] }
 0xbf7   :  { %3745 = vmatpush1.bf16.msra.mxu1 %v3611_v29  ;;  %3705 = vmatprep.subr.bf16.mxu0 %v3522_v56  ;;  %v3540_v29 = vld [vmem:[#allocation7 + $0x1e8] sm:$0xff] }
 0xbf8   :  { %3746 = vmatprep.subr.bf16.mxu1 %v3618_v39  ;;  %v3636_v56 = vld [vmem:[#allocation7 + $0x4e8] sm:$0xff]  ;;  %v3539_v39 = vld [vmem:[#allocation7 + $0x1e0] sm:$0xff] }
 0xbfa   :  { %3706 = vmatpush1.bf16.msra.mxu0 %v3521_v7  ;;  %v3635_v7 = vld [vmem:[#allocation7 + $0x4e0] sm:$0xff] }
 0xbfb   :  { %3747 = vmatpush1.bf16.msra.mxu1 %v3617_v13  ;;  %3707 = vmatprep.subr.bf16.mxu0 %v3528_v19  ;;  %v3546_v13 = vld [vmem:[#allocation7 + $0x218] sm:$0xff] }
 0xbfc   :  { %3748 = vmatprep.subr.bf16.mxu1 %v3624_v15  ;;  %v3642_v19 = vld [vmem:[#allocation7 + $0x518] sm:$0xff]  ;;  %v3545_v15 = vld [vmem:[#allocation7 + $0x210] sm:$0xff] }
 0xbfe   :  { %3708 = vmatpush1.bf16.msra.mxu0 %v3527_v45  ;;  %v3641_v45 = vld [vmem:[#allocation7 + $0x510] sm:$0xff] }
 0xbff   :  { %3749 = vmatpush1.bf16.msra.mxu1 %v3623_v30  ;;  %3709 = vmatprep.subr.bf16.mxu0 %v3534_v36  ;;  %v3552_v30 = vld [vmem:[#allocation7 + $0x248] sm:$0xff] }
 0xc00   :  { %3750 = vmatprep.subr.bf16.mxu1 %v3630_v16  ;;  %v3648_v36 = vld [vmem:[#allocation7 + $0x548] sm:$0xff]  ;;  %v3551_v16 = vld [vmem:[#allocation7 + $0x240] sm:$0xff] }
 0xc02   :  { %3710 = vmatpush1.bf16.msra.mxu0 %v3533_v35  ;;  %v3647_v35 = vld [vmem:[#allocation7 + $0x540] sm:$0xff] }
 0xc03   :  { %3751 = vmatpush1.bf16.msra.mxu1 %v3629_v24  ;;  %3711 = vmatprep.subr.bf16.mxu0 %v3540_v29  ;;  %v3558_v24 = vld [vmem:[#allocation7 + $0x278] sm:$0xff] }
 0xc04   :  { %3752 = vmatprep.subr.bf16.mxu1 %v3636_v56  ;;  %v3654_v29 = vld [vmem:[#allocation7 + $0x578] sm:$0xff]  ;;  %v3557_v56 = vld [vmem:[#allocation7 + $0x270] sm:$0xff] }
 0xc06   :  { %3712 = vmatpush1.bf16.msra.mxu0 %v3539_v39  ;;  %v3653_v39 = vld [vmem:[#allocation7 + $0x570] sm:$0xff] }
 0xc07   :  { %3753 = vmatpush1.bf16.msra.mxu1 %v3635_v7  ;;  %3713 = vmatprep.subr.bf16.mxu0 %v3546_v13  ;;  %v3564_v7 = vld [vmem:[#allocation7 + $0x2a8] sm:$0xff] }
 0xc08   :  { %3754 = vmatprep.subr.bf16.mxu1 %v3642_v19  ;;  %v3660_v13 = vld [vmem:[#allocation7 + $0x5a8] sm:$0xff]  ;;  %v3563_v19 = vld [vmem:[#allocation7 + $0x2a0] sm:$0xff] }
 0xc0a   :  { %3714 = vmatpush1.bf16.msra.mxu0 %v3545_v15  ;;  %v3659_v15 = vld [vmem:[#allocation7 + $0x5a0] sm:$0xff] }
 0xc0b   :  { %3755 = vmatpush1.bf16.msra.mxu1 %v3641_v45  ;;  %3715 = vmatprep.subr.bf16.mxu0 %v3552_v30  ;;  %v3570_v45 = vld [vmem:[#allocation7 + $0x2d8] sm:$0xff] }
 0xc0c   :  { %3756 = vmatprep.subr.bf16.mxu1 %v3648_v36  ;;  %v3666_v30 = vld [vmem:[#allocation7 + $0x5d8] sm:$0xff]  ;;  %v3569_v36 = vld [vmem:[#allocation7 + $0x2d0] sm:$0xff] }
 0xc0e   :  { %3716 = vmatpush1.bf16.msra.mxu0 %v3551_v16  ;;  %v3665_v16 = vld [vmem:[#allocation7 + $0x5d0] sm:$0xff] }
 0xc0f   :  { %3757 = vmatpush1.bf16.msra.mxu1 %v3647_v35  ;;  %3717 = vmatprep.subr.bf16.mxu0 %v3558_v24  ;;  %v3482_v35 = vld [vmem:[#allocation7 + $0x18] sm:$0xff] }
 0xc10   :  { %3758 = vmatprep.subr.bf16.mxu1 %v3654_v29  ;;  %v3578_v24 = vld [vmem:[#allocation7 + $0x318] sm:$0xff]  ;;  %v8896_v29 = vpack.c.bf16 %v8492_v1, %v8492_v1 }
 0xc12   :  { %3718 = vmatpush1.bf16.msra.mxu0 %v3557_v56  ;;  %v8900_v56 = vpack.c.bf16 %v8496_v14, %v8496_v14  ;;  %v3590_v14 = vld [vmem:[#allocation7 + $0x378] sm:$0xff] }
 0xc13   :  { %3759 = vmatpush1.bf16.msra.mxu1 %v3653_v39  ;;  %3719 = vmatprep.subr.bf16.mxu0 %v3564_v7  ;;  %v3481_v39 = vld [vmem:[#allocation7 + $0x10] sm:$0xff] }
 0xc14   :  { %3760 = vmatprep.subr.bf16.mxu1 %v3660_v13  ;;  %v3577_v7 = vld [vmem:[#allocation7 + $0x310] sm:$0xff]  ;;  %v3488_v13 = vld [vmem:[#allocation7 + $0x48] sm:$0xff] }
 0xc16   :  { %3720 = vmatpush1.bf16.msra.mxu0 %v3563_v19  ;;  %v3584_v19 = vld [vmem:[#allocation7 + $0x348] sm:$0xff] }
 0xc17   :  { %3761 = vmatpush1.bf16.msra.mxu1 %v3659_v15  ;;  %3721 = vmatprep.subr.bf16.mxu0 %v3570_v45  ;;  %v3487_v15 = vld [vmem:[#allocation7 + $0x40] sm:$0xff] }
 0xc18   :  { %3762 = vmatprep.subr.bf16.mxu1 %v3666_v30  ;;  %v3583_v45 = vld [vmem:[#allocation7 + $0x340] sm:$0xff]  ;;  %v3494_v30 = vld [vmem:[#allocation7 + $0x78] sm:$0xff] }
 0xc1a   :  { %3722 = vmatpush1.bf16.msra.mxu0 %v3569_v36  ;;  %v3493_v36 = vld [vmem:[#allocation7 + $0x70] sm:$0xff] }
 0xc1b   :  { %3763 = vmatpush1.bf16.msra.mxu1 %v3665_v16  ;;  %3773 = vmatprep.subr.bf16.mxu0 %v3482_v35  ;;  %v3589_v16 = vld [vmem:[#allocation7 + $0x370] sm:$0xff]  ;;  %v3500_v35 = vld [vmem:[#allocation7 + $0xa8] sm:$0xff] }
 0xc1c   :  { %3814 = vmatprep.subr.bf16.mxu1 %v3578_v24  ;;  %v3596_v24 = vld [vmem:[#allocation7 + $0x3a8] sm:$0xff] }
 0xc1d   :  { %3724 = vmatmul.mubr.bf16.vlgmr.msra.gmra.mrb[20].mxu0 %v8896_v29 }
 0xc1e   :  { %3765 = vmatmul.mubr.bf16.vlgmr.msra.gmra.mrb[20].mxu1 %v8900_v56  ;;  %3774 = vmatpush1.bf16.msra.mxu0 %v3481_v39  ;;  %v3499_v39 = vld [vmem:[#allocation7 + $0xa0] sm:$0xff] }
 0xc1f   :  { %3815 = vmatpush1.bf16.msra.mxu1 %v3577_v7  ;;  %3775 = vmatprep.subr.bf16.mxu0 %v3488_v13  ;;  %v3595_v7 = vld [vmem:[#allocation7 + $0x3a0] sm:$0xff]  ;;  %v3506_v13 = vld [vmem:[#allocation7 + $0xd8] sm:$0xff] }
 0xc20   :  { %3816 = vmatprep.subr.bf16.mxu1 %v3584_v19  ;;  %3805 = vmatprep.mubr.bf16.mxu0 %v8886_v12  ;;  %v3602_v19 = vld [vmem:[#allocation7 + $0x3d8] sm:$0xff] }
 0xc21   :  { %3846 = vmatprep.mubr.bf16.mxu1 %v8890_v62 }
 0xc22   :  { %3776 = vmatpush1.bf16.msra.mxu0 %v3487_v15  ;;  %v3505_v15 = vld [vmem:[#allocation7 + $0xd0] sm:$0xff] }
 0xc23   :  { %3817 = vmatpush1.bf16.msra.mxu1 %v3583_v45  ;;  %3777 = vmatprep.subr.bf16.mxu0 %v3494_v30  ;;  %v3601_v45 = vld [vmem:[#allocation7 + $0x3d0] sm:$0xff]  ;;  %v3512_v30 = vld [vmem:[#allocation7 + $0x108] sm:$0xff] }
 0xc24   :  { %3818 = vmatprep.subr.bf16.mxu1 %v3590_v14  ;;  %v3608_v14 = vld [vmem:[#allocation7 + $0x408] sm:$0xff] }
 0xc26   :  { %3778 = vmatpush1.bf16.msra.mxu0 %v3493_v36  ;;  %v3511_v36 = vld [vmem:[#allocation7 + $0x100] sm:$0xff] }
 0xc27   :  { %3819 = vmatpush1.bf16.msra.mxu1 %v3589_v16  ;;  %3779 = vmatprep.subr.bf16.mxu0 %v3500_v35  ;;  %v3607_v16 = vld [vmem:[#allocation7 + $0x400] sm:$0xff]  ;;  %v3518_v35 = vld [vmem:[#allocation7 + $0x138] sm:$0xff] }
 0xc28   :  { %3820 = vmatprep.subr.bf16.mxu1 %v3596_v24  ;;  %v3614_v24 = vld [vmem:[#allocation7 + $0x438] sm:$0xff] }
 0xc2a   :  { %3780 = vmatpush1.bf16.msra.mxu0 %v3499_v39  ;;  %v3517_v39 = vld [vmem:[#allocation7 + $0x130] sm:$0xff] }
 0xc2b   :  { %3821 = vmatpush1.bf16.msra.mxu1 %v3595_v7  ;;  %3781 = vmatprep.subr.bf16.mxu0 %v3506_v13  ;;  %v3613_v7 = vld [vmem:[#allocation7 + $0x430] sm:$0xff]  ;;  %v3524_v13 = vld [vmem:[#allocation7 + $0x168] sm:$0xff] }
 0xc2c   :  { %3822 = vmatprep.subr.bf16.mxu1 %v3602_v19  ;;  %v3620_v19 = vld [vmem:[#allocation7 + $0x468] sm:$0xff] }
 0xc2e   :  { %3782 = vmatpush1.bf16.msra.mxu0 %v3505_v15  ;;  %v3523_v15 = vld [vmem:[#allocation7 + $0x160] sm:$0xff] }
 0xc2f   :  { %3823 = vmatpush1.bf16.msra.mxu1 %v3601_v45  ;;  %3783 = vmatprep.subr.bf16.mxu0 %v3512_v30  ;;  %v3619_v45 = vld [vmem:[#allocation7 + $0x460] sm:$0xff]  ;;  %v3530_v30 = vld [vmem:[#allocation7 + $0x198] sm:$0xff] }
 0xc30   :  { %3824 = vmatprep.subr.bf16.mxu1 %v3608_v14  ;;  %v3626_v14 = vld [vmem:[#allocation7 + $0x498] sm:$0xff] }
 0xc32   :  { %3784 = vmatpush1.bf16.msra.mxu0 %v3511_v36  ;;  %v3529_v36 = vld [vmem:[#allocation7 + $0x190] sm:$0xff] }
 0xc33   :  { %3825 = vmatpush1.bf16.msra.mxu1 %v3607_v16  ;;  %3785 = vmatprep.subr.bf16.mxu0 %v3518_v35  ;;  %v3625_v16 = vld [vmem:[#allocation7 + $0x490] sm:$0xff]  ;;  %v3536_v35 = vld [vmem:[#allocation7 + $0x1c8] sm:$0xff] }
 0xc34   :  { %3826 = vmatprep.subr.bf16.mxu1 %v3614_v24  ;;  %v3632_v24 = vld [vmem:[#allocation7 + $0x4c8] sm:$0xff] }
 0xc36   :  { %3786 = vmatpush1.bf16.msra.mxu0 %v3517_v39  ;;  %v3535_v39 = vld [vmem:[#allocation7 + $0x1c0] sm:$0xff] }
 0xc37   :  { %3827 = vmatpush1.bf16.msra.mxu1 %v3613_v7  ;;  %3787 = vmatprep.subr.bf16.mxu0 %v3524_v13  ;;  %v3631_v7 = vld [vmem:[#allocation7 + $0x4c0] sm:$0xff]  ;;  %v3542_v13 = vld [vmem:[#allocation7 + $0x1f8] sm:$0xff] }
 0xc38   :  { %3828 = vmatprep.subr.bf16.mxu1 %v3620_v19  ;;  %v3638_v19 = vld [vmem:[#allocation7 + $0x4f8] sm:$0xff] }
 0xc3a   :  { %3788 = vmatpush1.bf16.msra.mxu0 %v3523_v15  ;;  %v3541_v15 = vld [vmem:[#allocation7 + $0x1f0] sm:$0xff] }
 0xc3b   :  { %3829 = vmatpush1.bf16.msra.mxu1 %v3619_v45  ;;  %3789 = vmatprep.subr.bf16.mxu0 %v3530_v30  ;;  %v3637_v45 = vld [vmem:[#allocation7 + $0x4f0] sm:$0xff]  ;;  %v3548_v30 = vld [vmem:[#allocation7 + $0x228] sm:$0xff] }
 0xc3c   :  { %3830 = vmatprep.subr.bf16.mxu1 %v3626_v14  ;;  %v3644_v14 = vld [vmem:[#allocation7 + $0x528] sm:$0xff] }
 0xc3e   :  { %3790 = vmatpush1.bf16.msra.mxu0 %v3529_v36  ;;  %v3547_v36 = vld [vmem:[#allocation7 + $0x220] sm:$0xff] }
 0xc3f   :  { %3831 = vmatpush1.bf16.msra.mxu1 %v3625_v16  ;;  %3791 = vmatprep.subr.bf16.mxu0 %v3536_v35  ;;  %v3643_v16 = vld [vmem:[#allocation7 + $0x520] sm:$0xff]  ;;  %v3554_v35 = vld [vmem:[#allocation7 + $0x258] sm:$0xff] }
 0xc40   :  { %3832 = vmatprep.subr.bf16.mxu1 %v3632_v24  ;;  %v3650_v24 = vld [vmem:[#allocation7 + $0x558] sm:$0xff] }
 0xc42   :  { %3792 = vmatpush1.bf16.msra.mxu0 %v3535_v39  ;;  %v3553_v39 = vld [vmem:[#allocation7 + $0x250] sm:$0xff] }
 0xc43   :  { %3833 = vmatpush1.bf16.msra.mxu1 %v3631_v7  ;;  %3793 = vmatprep.subr.bf16.mxu0 %v3542_v13  ;;  %v3649_v7 = vld [vmem:[#allocation7 + $0x550] sm:$0xff]  ;;  %v3560_v13 = vld [vmem:[#allocation7 + $0x288] sm:$0xff] }
 0xc44   :  { %3834 = vmatprep.subr.bf16.mxu1 %v3638_v19  ;;  %v3656_v19 = vld [vmem:[#allocation7 + $0x588] sm:$0xff] }
 0xc46   :  { %3794 = vmatpush1.bf16.msra.mxu0 %v3541_v15  ;;  %v3559_v15 = vld [vmem:[#allocation7 + $0x280] sm:$0xff] }
 0xc47   :  { %3835 = vmatpush1.bf16.msra.mxu1 %v3637_v45  ;;  %3795 = vmatprep.subr.bf16.mxu0 %v3548_v30  ;;  %v3655_v45 = vld [vmem:[#allocation7 + $0x580] sm:$0xff]  ;;  %v3566_v30 = vld [vmem:[#allocation7 + $0x2b8] sm:$0xff] }
 0xc48   :  { %3836 = vmatprep.subr.bf16.mxu1 %v3644_v14  ;;  %v3662_v14 = vld [vmem:[#allocation7 + $0x5b8] sm:$0xff] }
 0xc4a   :  { %3796 = vmatpush1.bf16.msra.mxu0 %v3547_v36  ;;  %v3565_v36 = vld [vmem:[#allocation7 + $0x2b0] sm:$0xff] }
 0xc4b   :  { %3837 = vmatpush1.bf16.msra.mxu1 %v3643_v16  ;;  %3797 = vmatprep.subr.bf16.mxu0 %v3554_v35  ;;  %v3661_v16 = vld [vmem:[#allocation7 + $0x5b0] sm:$0xff]  ;;  %v3572_v35 = vld [vmem:[#allocation7 + $0x2e8] sm:$0xff] }
 0xc4c   :  { %3838 = vmatprep.subr.bf16.mxu1 %v3650_v24  ;;  %v3668_v24 = vld [vmem:[#allocation7 + $0x5e8] sm:$0xff] }
 0xc4e   :  { %3798 = vmatpush1.bf16.msra.mxu0 %v3553_v39  ;;  %v3571_v39 = vld [vmem:[#allocation7 + $0x2e0] sm:$0xff] }
 0xc4f   :  { %3839 = vmatpush1.bf16.msra.mxu1 %v3649_v7  ;;  %3799 = vmatprep.subr.bf16.mxu0 %v3560_v13  ;;  %v3667_v7 = vld [vmem:[#allocation7 + $0x5e0] sm:$0xff]  ;;  %v3484_v13 = vld [vmem:[#allocation7 + $0x28] sm:$0xff] }
 0xc50   :  { %3840 = vmatprep.subr.bf16.mxu1 %v3656_v19  ;;  %v3580_v19 = vld [vmem:[#allocation7 + $0x328] sm:$0xff] }
 0xc52   :  { %3800 = vmatpush1.bf16.msra.mxu0 %v3559_v15  ;;  %v3483_v15 = vld [vmem:[#allocation7 + $0x20] sm:$0xff] }
 0xc53   :  { %3841 = vmatpush1.bf16.msra.mxu1 %v3655_v45  ;;  %3801 = vmatprep.subr.bf16.mxu0 %v3566_v30  ;;  %v3579_v45 = vld [vmem:[#allocation7 + $0x320] sm:$0xff]  ;;  %v3490_v30 = vld [vmem:[#allocation7 + $0x58] sm:$0xff] }
 0xc54   :  { %3842 = vmatprep.subr.bf16.mxu1 %v3662_v14  ;;  %v3586_v14 = vld [vmem:[#allocation7 + $0x358] sm:$0xff] }
 0xc56   :  { %3802 = vmatpush1.bf16.msra.mxu0 %v3565_v36  ;;  %v3489_v36 = vld [vmem:[#allocation7 + $0x50] sm:$0xff] }
 0xc57   :  { %3843 = vmatpush1.bf16.msra.mxu1 %v3661_v16  ;;  %3803 = vmatprep.subr.bf16.mxu0 %v3572_v35  ;;  %v3585_v16 = vld [vmem:[#allocation7 + $0x350] sm:$0xff]  ;;  %v3496_v35 = vld [vmem:[#allocation7 + $0x88] sm:$0xff] }
 0xc58   :  { %3844 = vmatprep.subr.bf16.mxu1 %v3668_v24  ;;  %v3592_v24 = vld [vmem:[#allocation7 + $0x388] sm:$0xff] }
 0xc5a   :  { %3804 = vmatpush1.bf16.msra.mxu0 %v3571_v39  ;;  %v3495_v39 = vld [vmem:[#allocation7 + $0x80] sm:$0xff] }
 0xc5b   :  { %3845 = vmatpush1.bf16.msra.mxu1 %v3667_v7  ;;  %3855 = vmatprep.subr.bf16.mxu0 %v3484_v13  ;;  %v3591_v7 = vld [vmem:[#allocation7 + $0x380] sm:$0xff]  ;;  %v3502_v13 = vld [vmem:[#allocation7 + $0xb8] sm:$0xff] }
 0xc5c   :  { %3896 = vmatprep.subr.bf16.mxu1 %v3580_v19  ;;  %v3598_v19 = vld [vmem:[#allocation7 + $0x3b8] sm:$0xff] }
 0xc5d   :  { %3806 = vmatmul.mubr.bf16.vlgmr.msra.gmra.mrb[24].mxu0 %v8896_v29 }
 0xc5e   :  { %3847 = vmatmul.mubr.bf16.vlgmr.msra.gmra.mrb[24].mxu1 %v8900_v56  ;;  %3856 = vmatpush1.bf16.msra.mxu0 %v3483_v15  ;;  %v3501_v15 = vld [vmem:[#allocation7 + $0xb0] sm:$0xff] }
 0xc5f   :  { %3897 = vmatpush1.bf16.msra.mxu1 %v3579_v45  ;;  %3857 = vmatprep.subr.bf16.mxu0 %v3490_v30  ;;  %v3597_v45 = vld [vmem:[#allocation7 + $0x3b0] sm:$0xff]  ;;  %v3508_v30 = vld [vmem:[#allocation7 + $0xe8] sm:$0xff] }
 0xc60   :  { %3898 = vmatprep.subr.bf16.mxu1 %v3586_v14  ;;  %3887 = vmatprep.mubr.bf16.mxu0 %v8886_v12  ;;  %v3604_v14 = vld [vmem:[#allocation7 + $0x3e8] sm:$0xff]  ;;  %v3507_v12 = vld [vmem:[#allocation7 + $0xe0] sm:$0xff] }
 0xc61   :  { %3928 = vmatprep.mubr.bf16.mxu1 %v8890_v62  ;;  %v3603_v62 = vld [vmem:[#allocation7 + $0x3e0] sm:$0xff] }
 0xc62   :  { %3858 = vmatpush1.bf16.msra.mxu0 %v3489_v36  ;;  %v3514_v36 = vld [vmem:[#allocation7 + $0x118] sm:$0xff] }
 0xc63   :  { %3899 = vmatpush1.bf16.msra.mxu1 %v3585_v16  ;;  %3859 = vmatprep.subr.bf16.mxu0 %v3496_v35  ;;  %v3610_v16 = vld [vmem:[#allocation7 + $0x418] sm:$0xff]  ;;  %v3513_v35 = vld [vmem:[#allocation7 + $0x110] sm:$0xff] }
 0xc64   :  { %3900 = vmatprep.subr.bf16.mxu1 %v3592_v24  ;;  %v3609_v24 = vld [vmem:[#allocation7 + $0x410] sm:$0xff] }
 0xc66   :  { %3860 = vmatpush1.bf16.msra.mxu0 %v3495_v39  ;;  %v3520_v39 = vld [vmem:[#allocation7 + $0x148] sm:$0xff] }
 0xc67   :  { %3901 = vmatpush1.bf16.msra.mxu1 %v3591_v7  ;;  %3861 = vmatprep.subr.bf16.mxu0 %v3502_v13  ;;  %v3616_v7 = vld [vmem:[#allocation7 + $0x448] sm:$0xff]  ;;  %v3519_v13 = vld [vmem:[#allocation7 + $0x140] sm:$0xff] }
 0xc68   :  { %3902 = vmatprep.subr.bf16.mxu1 %v3598_v19  ;;  %v3615_v19 = vld [vmem:[#allocation7 + $0x440] sm:$0xff] }
 0xc6a   :  { %3862 = vmatpush1.bf16.msra.mxu0 %v3501_v15  ;;  %v3526_v15 = vld [vmem:[#allocation7 + $0x178] sm:$0xff] }
 0xc6b   :  { %3903 = vmatpush1.bf16.msra.mxu1 %v3597_v45  ;;  %3863 = vmatprep.subr.bf16.mxu0 %v3508_v30  ;;  %v3622_v45 = vld [vmem:[#allocation7 + $0x478] sm:$0xff]  ;;  %v3525_v30 = vld [vmem:[#allocation7 + $0x170] sm:$0xff] }
 0xc6c   :  { %3904 = vmatprep.subr.bf16.mxu1 %v3604_v14  ;;  %v3621_v14 = vld [vmem:[#allocation7 + $0x470] sm:$0xff] }
 0xc6e   :  { %3864 = vmatpush1.bf16.msra.mxu0 %v3507_v12  ;;  %v3532_v12 = vld [vmem:[#allocation7 + $0x1a8] sm:$0xff] }
 0xc6f   :  { %3905 = vmatpush1.bf16.msra.mxu1 %v3603_v62  ;;  %3865 = vmatprep.subr.bf16.mxu0 %v3514_v36  ;;  %v3628_v62 = vld [vmem:[#allocation7 + $0x4a8] sm:$0xff]  ;;  %v3531_v36 = vld [vmem:[#allocation7 + $0x1a0] sm:$0xff] }
 0xc70   :  { %3906 = vmatprep.subr.bf16.mxu1 %v3610_v16  ;;  %v3627_v16 = vld [vmem:[#allocation7 + $0x4a0] sm:$0xff] }
 0xc72   :  { %3866 = vmatpush1.bf16.msra.mxu0 %v3513_v35  ;;  %v3538_v35 = vld [vmem:[#allocation7 + $0x1d8] sm:$0xff] }
 0xc73   :  { %3907 = vmatpush1.bf16.msra.mxu1 %v3609_v24  ;;  %3867 = vmatprep.subr.bf16.mxu0 %v3520_v39  ;;  %v3634_v24 = vld [vmem:[#allocation7 + $0x4d8] sm:$0xff]  ;;  %v3537_v39 = vld [vmem:[#allocation7 + $0x1d0] sm:$0xff] }
 0xc74   :  { %3908 = vmatprep.subr.bf16.mxu1 %v3616_v7  ;;  %v3633_v7 = vld [vmem:[#allocation7 + $0x4d0] sm:$0xff] }
 0xc76   :  { %3868 = vmatpush1.bf16.msra.mxu0 %v3519_v13  ;;  %v3544_v13 = vld [vmem:[#allocation7 + $0x208] sm:$0xff] }
 0xc77   :  { %3909 = vmatpush1.bf16.msra.mxu1 %v3615_v19  ;;  %3869 = vmatprep.subr.bf16.mxu0 %v3526_v15  ;;  %v3640_v19 = vld [vmem:[#allocation7 + $0x508] sm:$0xff]  ;;  %v3543_v15 = vld [vmem:[#allocation7 + $0x200] sm:$0xff] }
 0xc78   :  { %3910 = vmatprep.subr.bf16.mxu1 %v3622_v45  ;;  %v3639_v45 = vld [vmem:[#allocation7 + $0x500] sm:$0xff] }
 0xc7a   :  { %3870 = vmatpush1.bf16.msra.mxu0 %v3525_v30  ;;  %v3550_v30 = vld [vmem:[#allocation7 + $0x238] sm:$0xff] }
 0xc7b   :  { %3911 = vmatpush1.bf16.msra.mxu1 %v3621_v14  ;;  %3871 = vmatprep.subr.bf16.mxu0 %v3532_v12  ;;  %v3646_v14 = vld [vmem:[#allocation7 + $0x538] sm:$0xff]  ;;  %v3549_v12 = vld [vmem:[#allocation7 + $0x230] sm:$0xff] }
 0xc7c   :  { %3912 = vmatprep.subr.bf16.mxu1 %v3628_v62  ;;  %v3645_v62 = vld [vmem:[#allocation7 + $0x530] sm:$0xff] }
 0xc7e   :  { %3872 = vmatpush1.bf16.msra.mxu0 %v3531_v36  ;;  %v3556_v36 = vld [vmem:[#allocation7 + $0x268] sm:$0xff] }
 0xc7f   :  { %3913 = vmatpush1.bf16.msra.mxu1 %v3627_v16  ;;  %3873 = vmatprep.subr.bf16.mxu0 %v3538_v35  ;;  %v3652_v16 = vld [vmem:[#allocation7 + $0x568] sm:$0xff]  ;;  %v3555_v35 = vld [vmem:[#allocation7 + $0x260] sm:$0xff] }
 0xc80   :  { %3914 = vmatprep.subr.bf16.mxu1 %v3634_v24  ;;  %v3651_v24 = vld [vmem:[#allocation7 + $0x560] sm:$0xff] }
 0xc82   :  { %3874 = vmatpush1.bf16.msra.mxu0 %v3537_v39  ;;  %v3562_v39 = vld [vmem:[#allocation7 + $0x298] sm:$0xff] }
 0xc83   :  { %3915 = vmatpush1.bf16.msra.mxu1 %v3633_v7  ;;  %3875 = vmatprep.subr.bf16.mxu0 %v3544_v13  ;;  %v3658_v7 = vld [vmem:[#allocation7 + $0x598] sm:$0xff]  ;;  %v3561_v13 = vld [vmem:[#allocation7 + $0x290] sm:$0xff] }
 0xc84   :  { %3916 = vmatprep.subr.bf16.mxu1 %v3640_v19  ;;  %v3657_v19 = vld [vmem:[#allocation7 + $0x590] sm:$0xff] }
 0xc86   :  { %3876 = vmatpush1.bf16.msra.mxu0 %v3543_v15  ;;  %v3568_v15 = vld [vmem:[#allocation7 + $0x2c8] sm:$0xff] }
 0xc87   :  { %3917 = vmatpush1.bf16.msra.mxu1 %v3639_v45  ;;  %3877 = vmatprep.subr.bf16.mxu0 %v3550_v30  ;;  %v3664_v45 = vld [vmem:[#allocation7 + $0x5c8] sm:$0xff]  ;;  %v3567_v30 = vld [vmem:[#allocation7 + $0x2c0] sm:$0xff] }
 0xc88   :  { %3918 = vmatprep.subr.bf16.mxu1 %v3646_v14  ;;  %v3663_v14 = vld [vmem:[#allocation7 + $0x5c0] sm:$0xff] }
 0xc8a   :  { %3878 = vmatpush1.bf16.msra.mxu0 %v3549_v12  ;;  %v3574_v12 = vld [vmem:[#allocation7 + $0x2f8] sm:$0xff] }
 0xc8b   :  { %3919 = vmatpush1.bf16.msra.mxu1 %v3645_v62  ;;  %3879 = vmatprep.subr.bf16.mxu0 %v3556_v36  ;;  %v3670_v62 = vld [vmem:[#allocation7 + $0x5f8] sm:$0xff]  ;;  %v3573_v36 = vld [vmem:[#allocation7 + $0x2f0] sm:$0xff] }
 0xc8c   :  { %3920 = vmatprep.subr.bf16.mxu1 %v3652_v16  ;;  %v3669_v16 = vld [vmem:[#allocation7 + $0x5f0] sm:$0xff] }
 0xc8e   :  { %3880 = vmatpush1.bf16.msra.mxu0 %v3555_v35  ;;  %v8914_v35 = vpack.c.bf16 %v8372_v61, %v8372_v61 }
 0xc8f   :  { %3921 = vmatpush1.bf16.msra.mxu1 %v3651_v24  ;;  %3881 = vmatprep.subr.bf16.mxu0 %v3562_v39  ;;  %v8918_v24 = vpack.c.bf16 %v8376_v63, %v8376_v63 }
 0xc90   :  { %3922 = vmatprep.subr.bf16.mxu1 %v3658_v7 }
 0xc92   :  { %3882 = vmatpush1.bf16.msra.mxu0 %v3561_v13 }
 0xc93   :  { %3923 = vmatpush1.bf16.msra.mxu1 %v3657_v19  ;;  %3883 = vmatprep.subr.bf16.mxu0 %v3568_v15 }
 0xc94   :  { %3924 = vmatprep.subr.bf16.mxu1 %v3664_v45 }
 0xc96   :  { %3884 = vmatpush1.bf16.msra.mxu0 %v3567_v30  ;;  %v9737_v30 = vld [vmem:[#allocation103_spill] sm:$0xff] }
 0xc97   :  { %3925 = vmatpush1.bf16.msra.mxu1 %v3663_v14  ;;  %3885 = vmatprep.subr.bf16.mxu0 %v3574_v12  ;;  %v9738_v14 = vld [vmem:[#allocation176_spill] sm:$0xff] }
 0xc98   :  { %3926 = vmatprep.subr.bf16.mxu1 %v3670_v62 }
 0xc9a   :  { %3886 = vmatpush1.bf16.msra.mxu0 %v3573_v36  ;;  %v9739_v36 = vld [vmem:[#allocation108_spill] sm:$0xff] }
 0xc9b   :  { %3927 = vmatpush1.bf16.msra.mxu1 %v3669_v16  ;;  %3937 = vmatprep.subr.bf16.mxu0 %v8502_v51  ;;  %v9703_v51 = vld [vmem:[#allocation138_spill] sm:$0xff]  ;;  %v9740_v16 = vld [vmem:[#allocation181_spill] sm:$0xff] }
 0xc9c   :  { %3978 = vmatprep.subr.bf16.mxu1 %v8694_v49  ;;  %v9695_v49 = vld [vmem:[#allocation127_spill] sm:$0xff] }
 0xc9d   :  { %3888 = vmatmul.mubr.bf16.vlgmr.msra.gmra.mrb[28].mxu0 %v8896_v29 }
 0xc9e   :  { %3929 = vmatmul.mubr.bf16.vlgmr.msra.gmra.mrb[28].mxu1 %v8900_v56  ;;  %3938 = vmatpush1.bf16.msra.mxu0 %v8500_v44  ;;  %v9702_v44 = vld [vmem:[#allocation213_spill] sm:$0xff] }
 0xc9f   :  { %3979 = vmatpush1.bf16.msra.mxu1 %v8692_v46  ;;  %3939 = vmatprep.subr.bf16.mxu0 %v8514_v10  ;;  %v9706_v10 = vld [vmem:[#allocation219_spill] sm:$0xff] }
 0xca0   :  { %3980 = vmatprep.subr.bf16.mxu1 %v8706_v11  ;;  %3969 = vmatprep.mubr.bf16.mxu0 %v8914_v35  ;;  %v9730_v11 = vld [vmem:[#allocation168_spill] sm:$0xff]  ;;  %v9733_v46 = vld [vmem:[#allocation99_spill] sm:$0xff] }
 0xca1   :  { %4010 = vmatprep.mubr.bf16.mxu1 %v8918_v24 }
 0xca2   :  { %3940 = vmatpush1.bf16.msra.mxu0 %v8512_v23  ;;  %v9705_v23 = vld [vmem:[#allocation145_spill] sm:$0xff] }
 0xca3   :  { %3981 = vmatpush1.bf16.msra.mxu1 %v8704_v2  ;;  %3941 = vmatprep.subr.bf16.mxu0 %v8526_v31  ;;  %v9708_v31 = vld [vmem:[#allocation218_spill] sm:$0xff]  ;;  %v9727_v2 = vld [vmem:[#allocation96_spill] sm:$0xff] }
 0xca4   :  { %3982 = vmatprep.subr.bf16.mxu1 %v8718_v27  ;;  %v9722_v27 = vld [vmem:[#allocation160_spill] sm:$0xff] }
 0xca6   :  { %3942 = vmatpush1.bf16.msra.mxu0 %v8524_v25  ;;  %v9707_v25 = vld [vmem:[#allocation144_spill] sm:$0xff] }
 0xca7   :  { %3983 = vmatpush1.bf16.msra.mxu1 %v8716_v38  ;;  %3943 = vmatprep.subr.bf16.mxu0 %v8538_v41  ;;  %v9721_v38 = vld [vmem:[#allocation87_spill] sm:$0xff] }
 0xca8   :  { %3984 = vmatprep.subr.bf16.mxu1 %v8730_v3 }
 0xcaa   :  { %3944 = vmatpush1.bf16.msra.mxu0 %v8536_v50  ;;  %v9711_v50 = vld [vmem:[#allocation78_spill] sm:$0xff] }
 0xcab   :  { %3985 = vmatpush1.bf16.msra.mxu1 %v8728_v6  ;;  %3945 = vmatprep.subr.bf16.mxu0 %v8550_v33  ;;  %v8986_v41 = vpack.c.bf16 %v9711_v50, %v9711_v50  ;;  %v9712_v6 = vld [vmem:[#allocation79_spill] sm:$0xff]  ;;  %v9715_v33 = vld [vmem:[#allocation84_spill] sm:$0xff] }
 0xcac   :  { %3986 = vmatprep.subr.bf16.mxu1 %v8742_v9  ;;  %v8990_v3 = vpack.c.bf16 %v9712_v6, %v9712_v6  ;;  %v9716_v9 = vld [vmem:[#allocation157_spill] sm:$0xff] }
 0xcae   :  { %3946 = vmatpush1.bf16.msra.mxu0 %v8548_v28  ;;  %v9714_v28 = vld [vmem:[#allocation224_spill] sm:$0xff] }
 0xcaf   :  { %3987 = vmatpush1.bf16.msra.mxu1 %v8740_v34  ;;  %3947 = vmatprep.subr.bf16.mxu0 %v8562_v37  ;;  %v9710_v34 = vld [vmem:[#allocation225_spill] sm:$0xff] }
 0xcb0   :  { %3988 = vmatprep.subr.bf16.mxu1 %v8754_v20  ;;  %v9709_v20 = vld [vmem:[#allocation151_spill] sm:$0xff]  ;;  %v9720_v37 = vld [vmem:[#allocation161_spill] sm:$0xff] }
 0xcb2   :  { %3948 = vmatpush1.bf16.msra.mxu0 %v8560_v26  ;;  %v9719_v26 = vld [vmem:[#allocation88_spill] sm:$0xff] }
 0xcb3   :  { %3989 = vmatpush1.bf16.msra.mxu1 %v8752_v54  ;;  %3949 = vmatprep.subr.bf16.mxu0 %v8574_v40  ;;  %v9697_v54 = vld [vmem:[#allocation133_spill] sm:$0xff]  ;;  %v9726_v40 = vld [vmem:[#allocation164_spill] sm:$0xff] }
 0xcb4   :  { %3990 = vmatprep.subr.bf16.mxu1 %v8766_v57  ;;  %v9735_v57 = vld [vmem:[#allocation104_spill] sm:$0xff] }
 0xcb6   :  { %3950 = vmatpush1.bf16.msra.mxu0 %v8572_v48  ;;  %v9725_v48 = vld [vmem:[#allocation91_spill] sm:$0xff] }
 0xcb7   :  { %3991 = vmatpush1.bf16.msra.mxu1 %v8764_v22  ;;  %3951 = vmatprep.subr.bf16.mxu0 %v8586_v4  ;;  %v9718_v22 = vld [vmem:[#allocation156_spill] sm:$0xff]  ;;  %v9732_v4 = vld [vmem:[#allocation173_spill] sm:$0xff] }
 0xcb8   :  { %3992 = vmatprep.subr.bf16.mxu1 %v8778_v59  ;;  %v9699_v59 = vld [vmem:[#allocation132_spill] sm:$0xff] }
 0xcba   :  { %3952 = vmatpush1.bf16.msra.mxu0 %v8584_v32  ;;  %v9731_v32 = vld [vmem:[#allocation100_spill] sm:$0xff] }
 0xcbb   :  { %3993 = vmatpush1.bf16.msra.mxu1 %v8776_v17  ;;  %3953 = vmatprep.subr.bf16.mxu0 %v8598_v43  ;;  %v9694_v43 = vld [vmem:[#allocation201_spill] sm:$0xff]  ;;  %v9704_v17 = vld [vmem:[#allocation212_spill] sm:$0xff] }
 0xcbc   :  { %3994 = vmatprep.subr.bf16.mxu1 %v8790_v21  ;;  %v9734_v21 = vld [vmem:[#allocation172_spill] sm:$0xff] }
 0xcbe   :  { %3954 = vmatpush1.bf16.msra.mxu0 %v8596_v0  ;;  %v9736_v0 = vld [vmem:[#allocation177_spill] sm:$0xff] }
 0xcbf   :  { %3995 = vmatpush1.bf16.msra.mxu1 %v8788_v60  ;;  %3955 = vmatprep.subr.bf16.mxu0 %v8610_v47  ;;  %v9696_v47 = vld [vmem:[#allocation200_spill] sm:$0xff]  ;;  %v9700_v60 = vld [vmem:[#allocation206_spill] sm:$0xff] }
 0xcc0   :  { %3996 = vmatprep.subr.bf16.mxu1 %v8802_v53  ;;  %v9728_v53 = vld [vmem:[#allocation169_spill] sm:$0xff] }
 0xcc2   :  { %3956 = vmatpush1.bf16.msra.mxu0 %v8608_v5  ;;  %v9698_v5 = vld [vmem:[#allocation207_spill] sm:$0xff] }
 0xcc3   :  { %3997 = vmatpush1.bf16.msra.mxu1 %v8800_v58  ;;  %3957 = vmatprep.subr.bf16.mxu0 %v8622_v8  ;;  %v9701_v58 = vld [vmem:[#allocation139_spill] sm:$0xff]  ;;  %v9724_v8 = vld [vmem:[#allocation165_spill] sm:$0xff] }
 0xcc4   :  { %3998 = vmatprep.subr.bf16.mxu1 %v8814_v52  ;;  %v9717_v52 = vld [vmem:[#allocation83_spill] sm:$0xff] }
 0xcc6   :  { %3958 = vmatpush1.bf16.msra.mxu0 %v8620_v42  ;;  %v9723_v42 = vld [vmem:[#allocation92_spill] sm:$0xff] }
 0xcc7   :  { %3999 = vmatpush1.bf16.msra.mxu1 %v8812_v55  ;;  %3959 = vmatprep.subr.bf16.mxu0 %v8634_v18  ;;  %v9713_v18 = vld [vmem:[#allocation150_spill] sm:$0xff]  ;;  %v9729_v55 = vld [vmem:[#allocation95_spill] sm:$0xff] }
 0xcc8   :  { %4000 = vmatprep.subr.bf16.mxu1 %v9694_v43  ;;  %v9741_v43 = vld [vmem:[#allocation107_spill] sm:$0xff] }
 0xcca   :  { %3960 = vmatpush1.bf16.msra.mxu0 %v9695_v49  ;;  %v9742_v49 = vld [vmem:[#allocation180_spill] sm:$0xff] }
 0xccb   :  { %4001 = vmatpush1.bf16.msra.mxu1 %v9696_v47  ;;  %3961 = vmatprep.subr.bf16.mxu0 %v9697_v54  ;;  %v9743_v47 = vld [vmem:[#allocation112_spill] sm:$0xff]  ;;  %v9744_v54 = vld [vmem:[#allocation185_spill] sm:$0xff] }
 0xccc   :  { %4002 = vmatprep.subr.bf16.mxu1 %v9698_v5  ;;  %v9745_v5 = vld [vmem:[#allocation111_spill] sm:$0xff] }
 0xcce   :  { %3962 = vmatpush1.bf16.msra.mxu0 %v9699_v59  ;;  %v9746_v59 = vld [vmem:[#allocation184_spill] sm:$0xff] }
 0xccf   :  { %4003 = vmatpush1.bf16.msra.mxu1 %v9700_v60  ;;  %3963 = vmatprep.subr.bf16.mxu0 %v9701_v58  ;;  %v9747_v60 = vld [vmem:[#allocation116_spill] sm:$0xff]  ;;  %v9748_v58 = vld [vmem:[#allocation189_spill] sm:$0xff] }
 0xcd0   :  { %4004 = vmatprep.subr.bf16.mxu1 %v9702_v44  ;;  %v9749_v44 = vld [vmem:[#allocation115_spill] sm:$0xff] }
 0xcd2   :  { %3964 = vmatpush1.bf16.msra.mxu0 %v9703_v51  ;;  %v9750_v51 = vld [vmem:[#allocation188_spill] sm:$0xff] }
 0xcd3   :  { %4005 = vmatpush1.bf16.msra.mxu1 %v9704_v17  ;;  %3965 = vmatprep.subr.bf16.mxu0 %v9705_v23  ;;  %v9751_v17 = vld [vmem:[#allocation120_spill] sm:$0xff]  ;;  %v9752_v23 = vld [vmem:[#allocation193_spill] sm:$0xff] }
 0xcd4   :  { %4006 = vmatprep.subr.bf16.mxu1 %v9706_v10  ;;  %v9753_v10 = vld [vmem:[#allocation119_spill] sm:$0xff] }
 0xcd6   :  { %3966 = vmatpush1.bf16.msra.mxu0 %v9707_v25  ;;  %v9754_v25 = vld [vmem:[#allocation192_spill] sm:$0xff] }
 0xcd7   :  { %4007 = vmatpush1.bf16.msra.mxu1 %v9708_v31  ;;  %3967 = vmatprep.subr.bf16.mxu0 %v9709_v20  ;;  %v9755_v31 = vld [vmem:[#allocation124_spill] sm:$0xff]  ;;  %v9756_v20 = vld [vmem:[#allocation197_spill] sm:$0xff] }
 0xcd8   :  { %4008 = vmatprep.subr.bf16.mxu1 %v9710_v34  ;;  %v9757_v34 = vld [vmem:[#allocation123_spill] sm:$0xff] }
 0xcda   :  { %3968 = vmatpush1.bf16.msra.mxu0 %v9713_v18  ;;  %v9758_v18 = vld [vmem:[#allocation196_spill] sm:$0xff] }
 0xcdb   :  { %4009 = vmatpush1.bf16.msra.mxu1 %v9714_v28  ;;  %4019 = vmatprep.subr.bf16.mxu0 %v9715_v33  ;;  %v9759_v28 = vld [vmem:[#allocation129_spill] sm:$0xff]  ;;  %v9760_v33 = vld [vmem:[#allocation203_spill] sm:$0xff] }
 0xcdc   :  { %4060 = vmatprep.subr.bf16.mxu1 %v9716_v9  ;;  %v9761_v9 = vld [vmem:[#allocation128_spill] sm:$0xff] }
 0xcdd   :  { %3970 = vmatmul.mubr.bf16.vlgmr.msra.gmra.mrb[32].mxu0 %v8986_v41 }
 0xcde   :  { %4011 = vmatmul.mubr.bf16.vlgmr.msra.gmra.mrb[32].mxu1 %v8990_v3  ;;  %4020 = vmatpush1.bf16.msra.mxu0 %v9717_v52  ;;  %v9762_v52 = vld [vmem:[#allocation202_spill] sm:$0xff] }
 0xcdf   :  { %4061 = vmatpush1.bf16.msra.mxu1 %v9718_v22  ;;  %4021 = vmatprep.subr.bf16.mxu0 %v9719_v26  ;;  %v9763_v22 = vld [vmem:[#allocation135_spill] sm:$0xff]  ;;  %v9764_v26 = vld [vmem:[#allocation209_spill] sm:$0xff] }
 0xce0   :  { %4062 = vmatprep.subr.bf16.mxu1 %v9720_v37  ;;  %4051 = vmatprep.mubr.bf16.mxu0 %v8914_v35  ;;  %v9765_v37 = vld [vmem:[#allocation134_spill] sm:$0xff] }
 0xce1   :  { %4092 = vmatprep.mubr.bf16.mxu1 %v8918_v24 }
 0xce2   :  { %4022 = vmatpush1.bf16.msra.mxu0 %v9721_v38  ;;  %v9766_v38 = vld [vmem:[#allocation208_spill] sm:$0xff] }
 0xce3   :  { %4063 = vmatpush1.bf16.msra.mxu1 %v9722_v27  ;;  %4023 = vmatprep.subr.bf16.mxu0 %v9723_v42  ;;  %v9767_v27 = vld [vmem:[#allocation141_spill] sm:$0xff]  ;;  %v9768_v42 = vld [vmem:[#allocation215_spill] sm:$0xff] }
 0xce4   :  { %4064 = vmatprep.subr.bf16.mxu1 %v9724_v8  ;;  %v9769_v8 = vld [vmem:[#allocation140_spill] sm:$0xff] }
 0xce6   :  { %4024 = vmatpush1.bf16.msra.mxu0 %v9725_v48  ;;  %v9770_v48 = vld [vmem:[#allocation214_spill] sm:$0xff] }
 0xce7   :  { %4065 = vmatpush1.bf16.msra.mxu1 %v9726_v40  ;;  %4025 = vmatprep.subr.bf16.mxu0 %v9727_v2  ;;  %v9771_v40 = vld [vmem:[#allocation147_spill] sm:$0xff]  ;;  %v9772_v2 = vld [vmem:[#allocation221_spill] sm:$0xff] }
 0xce8   :  { %4066 = vmatprep.subr.bf16.mxu1 %v9728_v53  ;;  %v9773_v53 = vld [vmem:[#allocation146_spill] sm:$0xff] }
 0xcea   :  { %4026 = vmatpush1.bf16.msra.mxu0 %v9729_v55  ;;  %v9774_v55 = vld [vmem:[#allocation220_spill] sm:$0xff] }
 0xceb   :  { %4067 = vmatpush1.bf16.msra.mxu1 %v9730_v11  ;;  %4027 = vmatprep.subr.bf16.mxu0 %v9731_v32  ;;  %v9775_v11 = vld [vmem:[#allocation153_spill] sm:$0xff]  ;;  %v9776_v32 = vld [vmem:[#allocation227_spill] sm:$0xff] }
 0xcec   :  { %4068 = vmatprep.subr.bf16.mxu1 %v9732_v4  ;;  %v9777_v4 = vld [vmem:[#allocation152_spill] sm:$0xff] }
 0xcee   :  { %4028 = vmatpush1.bf16.msra.mxu0 %v9733_v46  ;;  %v9778_v46 = vld [vmem:[#allocation226_spill] sm:$0xff] }
 0xcef   :  { %4069 = vmatpush1.bf16.msra.mxu1 %v9734_v21  ;;  %4029 = vmatprep.subr.bf16.mxu0 %v9735_v57  ;;  %v9779_v21 = vld [vmem:[#allocation86_spill] sm:$0xff]  ;;  %v9780_v57 = vld [vmem:[#allocation159_spill] sm:$0xff] }
 0xcf0   :  { %4070 = vmatprep.subr.bf16.mxu1 %v9736_v0  ;;  %v3725_v29 = vpop.f32.mrb[20].mxu0  ;;  %v9781_v0 = vld [vmem:[#allocation85_spill] sm:$0xff] }
 0xcf1   :  { %v3766_v56 = vpop.f32.mrb[20].mxu1  ;;  %v3727_v7 = vpop.f32.mrb[21].mxu0 }
 0xcf2   :  { %v9020_v39 = vadd.f32 %v3766_v56, %v3725_v29  ;;  %v3768_v13 = vpop.f32.mrb[21].mxu1  ;;  %v3729_v15 = vpop.f32.mrb[22].mxu0  ;;  %4030 = vmatpush1.bf16.msra.mxu0 %v9737_v30  ;;  %v9782_v29 = vld [vmem:[#allocation158_spill] sm:$0xff]  ;;  %v9788_v30 = vld [vmem:[#allocation167_spill] sm:$0xff] }
 0xcf3   :  { %v9022_v19 = vadd.f32 %v3768_v13, %v3727_v7  ;;  %v3770_v45 = vpop.f32.mrb[22].mxu1  ;;  %4071 = vmatpush1.bf16.msra.mxu1 %v9738_v14  ;;  %v3730_v12 = vpop.f32.mrb[23].mxu0  ;;  %4031 = vmatprep.subr.bf16.mxu0 %v9739_v36  ;;  %v9783_v56 = vld [vmem:[#allocation90_spill] sm:$0xff]  ;;  %v9784_v7 = vld [vmem:[#allocation163_spill] sm:$0xff]  ;;  %v9785_v13 = vld [vmem:[#allocation89_spill] sm:$0xff] }
 0xcf4   :  { %v3771_v62 = vpop.f32.mrb[23].mxu1  ;;  %4072 = vmatprep.subr.bf16.mxu1 %v9740_v16  ;;  %v9786_v15 = vld [vmem:[#allocation162_spill] sm:$0xff]  ;;  %v9789_v14 = vld [vmem:[#allocation93_spill] sm:$0xff]  ;;  %v9792_v36 = vld [vmem:[#allocation171_spill] sm:$0xff] }
 0xcf5   :  { %v9787_v45 = vld [vmem:[#allocation94_spill] sm:$0xff]  ;;  %v9793_v16 = vld [vmem:[#allocation97_spill] sm:$0xff] }
 0xcf6   :  { %4032 = vmatpush1.bf16.msra.mxu0 %v9741_v43  ;;  %v9790_v12 = vld [vmem:[#allocation166_spill] sm:$0xff]  ;;  %v9796_v43 = vld [vmem:[#allocation175_spill] sm:$0xff] }
 0xcf7   :  { %4073 = vmatpush1.bf16.msra.mxu1 %v9742_v49  ;;  %4033 = vmatprep.subr.bf16.mxu0 %v9743_v47  ;;  %v9791_v62 = vld [vmem:[#allocation98_spill] sm:$0xff]  ;;  %v9797_v49 = vld [vmem:[#allocation101_spill] sm:$0xff] }
 0xcf8   :  { %4074 = vmatprep.subr.bf16.mxu1 %v9744_v54  ;;  %v9798_v47 = vld [vmem:[#allocation174_spill] sm:$0xff] }
 0xcf9   :  { %v9799_v54 = vld [vmem:[#allocation106_spill] sm:$0xff] }
 0xcfa   :  { %4034 = vmatpush1.bf16.msra.mxu0 %v9745_v5  ;;  %v9800_v5 = vld [vmem:[#allocation179_spill] sm:$0xff] }
 0xcfb   :  { %4075 = vmatpush1.bf16.msra.mxu1 %v9746_v59  ;;  %4035 = vmatprep.subr.bf16.mxu0 %v9747_v60 }
 0xcfc   :  { %4076 = vmatprep.subr.bf16.mxu1 %v9748_v58 }
 0xcfe   :  { %4036 = vmatpush1.bf16.msra.mxu0 %v9749_v44 }
 0xcff   :  { %4077 = vmatpush1.bf16.msra.mxu1 %v9750_v51  ;;  %4037 = vmatprep.subr.bf16.mxu0 %v9751_v17 }
 0xd00   :  { %4078 = vmatprep.subr.bf16.mxu1 %v9752_v23 }
 0xd02   :  { %4038 = vmatpush1.bf16.msra.mxu0 %v9753_v10 }
 0xd03   :  { %4079 = vmatpush1.bf16.msra.mxu1 %v9754_v25  ;;  %4039 = vmatprep.subr.bf16.mxu0 %v9755_v31  ;;  %v9801_v25 = vld [vmem:[#allocation105_spill] sm:$0xff]  ;;  %v9802_v31 = vld [vmem:[#allocation178_spill] sm:$0xff] }
 0xd04   :  { %4080 = vmatprep.subr.bf16.mxu1 %v9756_v20 }
 0xd06   :  { %4040 = vmatpush1.bf16.msra.mxu0 %v9757_v34 }
 0xd07   :  { %4081 = vmatpush1.bf16.msra.mxu1 %v9758_v18  ;;  %4041 = vmatprep.subr.bf16.mxu0 %v9759_v28  ;;  %v9803_v18 = vld [vmem:[#allocation110_spill] sm:$0xff]  ;;  %v9804_v28 = vld [vmem:[#allocation183_spill] sm:$0xff] }
 0xd08   :  { %4082 = vmatprep.subr.bf16.mxu1 %v9760_v33  ;;  %v9805_v33 = vld [vmem:[#allocation109_spill] sm:$0xff] }
 0xd0a   :  { %4042 = vmatpush1.bf16.msra.mxu0 %v9761_v9  ;;  %v9806_v9 = vld [vmem:[#allocation182_spill] sm:$0xff] }
 0xd0b   :  { %4083 = vmatpush1.bf16.msra.mxu1 %v9762_v52  ;;  %4043 = vmatprep.subr.bf16.mxu0 %v9763_v22  ;;  %v9807_v52 = vld [vmem:[#allocation114_spill] sm:$0xff]  ;;  %v9808_v22 = vld [vmem:[#allocation187_spill] sm:$0xff] }
 0xd0c   :  { %4084 = vmatprep.subr.bf16.mxu1 %v9764_v26  ;;  %v9809_v26 = vld [vmem:[#allocation113_spill] sm:$0xff] }
 0xd0e   :  { %4044 = vmatpush1.bf16.msra.mxu0 %v9765_v37  ;;  %v9810_v37 = vld [vmem:[#allocation186_spill] sm:$0xff] }
 0xd0f   :  { %4085 = vmatpush1.bf16.msra.mxu1 %v9766_v38  ;;  %4045 = vmatprep.subr.bf16.mxu0 %v9767_v27  ;;  %v9811_v38 = vld [vmem:[#allocation118_spill] sm:$0xff]  ;;  %v9812_v27 = vld [vmem:[#allocation191_spill] sm:$0xff] }
 0xd10   :  { %4086 = vmatprep.subr.bf16.mxu1 %v9768_v42  ;;  %v9813_v42 = vld [vmem:[#allocation117_spill] sm:$0xff] }
 0xd12   :  { %4046 = vmatpush1.bf16.msra.mxu0 %v9769_v8  ;;  %v9814_v8 = vld [vmem:[#allocation190_spill] sm:$0xff] }
 0xd13   :  { %4087 = vmatpush1.bf16.msra.mxu1 %v9770_v48  ;;  %4047 = vmatprep.subr.bf16.mxu0 %v9771_v40  ;;  %v9815_v48 = vld [vmem:[#allocation122_spill] sm:$0xff]  ;;  %v9816_v40 = vld [vmem:[#allocation195_spill] sm:$0xff] }
 0xd14   :  { %4088 = vmatprep.subr.bf16.mxu1 %v9772_v2  ;;  %v9817_v2 = vld [vmem:[#allocation121_spill] sm:$0xff] }
 0xd16   :  { %4048 = vmatpush1.bf16.msra.mxu0 %v9773_v53  ;;  %v9818_v53 = vld [vmem:[#allocation194_spill] sm:$0xff] }
 0xd17   :  { %4089 = vmatpush1.bf16.msra.mxu1 %v9774_v55  ;;  %4049 = vmatprep.subr.bf16.mxu0 %v9775_v11  ;;  %v9819_v55 = vld [vmem:[#allocation126_spill] sm:$0xff]  ;;  %v9820_v11 = vld [vmem:[#allocation199_spill] sm:$0xff] }
 0xd18   :  { %4090 = vmatprep.subr.bf16.mxu1 %v9776_v32  ;;  %v9821_v32 = vld [vmem:[#allocation125_spill] sm:$0xff] }
 0xd1a   :  { %4050 = vmatpush1.bf16.msra.mxu0 %v9777_v4  ;;  %v9822_v4 = vld [vmem:[#allocation198_spill] sm:$0xff] }
 0xd1b   :  { %4091 = vmatpush1.bf16.msra.mxu1 %v9778_v46  ;;  %4101 = vmatprep.subr.bf16.mxu0 %v9779_v21  ;;  %v9823_v46 = vld [vmem:[#allocation131_spill] sm:$0xff]  ;;  %v9824_v21 = vld [vmem:[#allocation205_spill] sm:$0xff] }
 0xd1c   :  { %4142 = vmatprep.subr.bf16.mxu1 %v9780_v57  ;;  %v9825_v57 = vld [vmem:[#allocation130_spill] sm:$0xff] }
 0xd1d   :  { %4052 = vmatmul.mubr.bf16.vlgmr.msra.gmra.mrb[36].mxu0 %v8986_v41 }
 0xd1e   :  { %4093 = vmatmul.mubr.bf16.vlgmr.msra.gmra.mrb[36].mxu1 %v8990_v3  ;;  %4102 = vmatpush1.bf16.msra.mxu0 %v9781_v0  ;;  %v9826_v0 = vld [vmem:[#allocation204_spill] sm:$0xff] }
 0xd1f   :  { %4143 = vmatpush1.bf16.msra.mxu1 %v9782_v29  ;;  %4103 = vmatprep.subr.bf16.mxu0 %v9783_v56  ;;  %v9827_v29 = vld [vmem:[#allocation137_spill] sm:$0xff]  ;;  %v9828_v56 = vld [vmem:[#allocation211_spill] sm:$0xff] }
 0xd20   :  { %4144 = vmatprep.subr.bf16.mxu1 %v9784_v7  ;;  %4133 = vmatprep.mubr.bf16.mxu0 %v8914_v35  ;;  %v9794_v35 = vld [vmem:[#allocation170_spill] sm:$0xff]  ;;  %v9829_v7 = vld [vmem:[#allocation136_spill] sm:$0xff] }
 0xd21   :  { %4174 = vmatprep.mubr.bf16.mxu1 %v8918_v24  ;;  %v9795_v24 = vld [vmem:[#allocation102_spill] sm:$0xff] }
 0xd22   :  { %4104 = vmatpush1.bf16.msra.mxu0 %v9785_v13  ;;  %v9830_v13 = vld [vmem:[#allocation210_spill] sm:$0xff] }
 0xd23   :  { %4145 = vmatpush1.bf16.msra.mxu1 %v9786_v15  ;;  %4105 = vmatprep.subr.bf16.mxu0 %v9787_v45  ;;  %v9831_v15 = vld [vmem:[#allocation143_spill] sm:$0xff]  ;;  %v9832_v45 = vld [vmem:[#allocation217_spill] sm:$0xff] }
 0xd24   :  { %4146 = vmatprep.subr.bf16.mxu1 %v9788_v30  ;;  %v9833_v30 = vld [vmem:[#allocation142_spill] sm:$0xff] }
 0xd26   :  { %4106 = vmatpush1.bf16.msra.mxu0 %v9789_v14  ;;  %v9834_v14 = vld [vmem:[#allocation216_spill] sm:$0xff] }
 0xd27   :  { %4147 = vmatpush1.bf16.msra.mxu1 %v9790_v12  ;;  %4107 = vmatprep.subr.bf16.mxu0 %v9791_v62  ;;  %v9835_v12 = vld [vmem:[#allocation149_spill] sm:$0xff]  ;;  %v9836_v62 = vld [vmem:[#allocation223_spill] sm:$0xff] }
 0xd28   :  { %4148 = vmatprep.subr.bf16.mxu1 %v9792_v36  ;;  %v9837_v36 = vld [vmem:[#allocation148_spill] sm:$0xff] }
 0xd2a   :  { %4108 = vmatpush1.bf16.msra.mxu0 %v9793_v16  ;;  %v9838_v16 = vld [vmem:[#allocation222_spill] sm:$0xff] }
 0xd2b   :  { %4149 = vmatpush1.bf16.msra.mxu1 %v9794_v35  ;;  %4109 = vmatprep.subr.bf16.mxu0 %v9795_v24  ;;  %v9839_v35 = vld [vmem:[#allocation155_spill] sm:$0xff]  ;;  %v9840_v24 = vld [vmem:[#allocation229_spill] sm:$0xff] }
 0xd2c   :  { %4150 = vmatprep.subr.bf16.mxu1 %v9796_v43  ;;  %v9841_v43 = vld [vmem:[#allocation154_spill] sm:$0xff] }
 0xd2e   :  { %4110 = vmatpush1.bf16.msra.mxu0 %v9797_v49  ;;  %v9842_v49 = vld [vmem:[#allocation228_spill] sm:$0xff] }
 0xd2f   :  { %4151 = vmatpush1.bf16.msra.mxu1 %v9798_v47  ;;  %4111 = vmatprep.subr.bf16.mxu0 %v9799_v54 }
 0xd30   :  { %4152 = vmatprep.subr.bf16.mxu1 %v9800_v5  ;;  %v3807_v59 = vpop.f32.mrb[24].mxu0 }
 0xd31   :  { %v3848_v60 = vpop.f32.mrb[24].mxu1  ;;  %v3809_v44 = vpop.f32.mrb[25].mxu0 }
 0xd32   :  { %v9092_v58 = vadd.f32 %v3848_v60, %v3807_v59  ;;  %v3850_v51 = vpop.f32.mrb[25].mxu1  ;;  %v3811_v23 = vpop.f32.mrb[26].mxu0  ;;  %4112 = vmatpush1.bf16.msra.mxu0 %v9801_v25 }
 0xd33   :  { %v9094_v17 = vadd.f32 %v3850_v51, %v3809_v44  ;;  %v3852_v10 = vpop.f32.mrb[26].mxu1  ;;  %4153 = vmatpush1.bf16.msra.mxu1 %v9802_v31  ;;  %v3812_v20 = vpop.f32.mrb[27].mxu0  ;;  %4113 = vmatprep.subr.bf16.mxu0 %v9803_v18 }
 0xd34   :  { %v3853_v34 = vpop.f32.mrb[27].mxu1  ;;  %4154 = vmatprep.subr.bf16.mxu1 %v9804_v28 }
 0xd36   :  { %4114 = vmatpush1.bf16.msra.mxu0 %v9805_v33 }
 0xd37   :  { %4155 = vmatpush1.bf16.msra.mxu1 %v9806_v9  ;;  %4115 = vmatprep.subr.bf16.mxu0 %v9807_v52 }
 0xd38   :  { %4156 = vmatprep.subr.bf16.mxu1 %v9808_v22 }
 0xd3a   :  { %4116 = vmatpush1.bf16.msra.mxu0 %v9809_v26 }
 0xd3b   :  { %4157 = vmatpush1.bf16.msra.mxu1 %v9810_v37  ;;  %4117 = vmatprep.subr.bf16.mxu0 %v9811_v38 }
 0xd3c   :  { %4158 = vmatprep.subr.bf16.mxu1 %v9812_v27 }
 0xd3e   :  { %4118 = vmatpush1.bf16.msra.mxu0 %v9813_v42 }
 0xd3f   :  { %4159 = vmatpush1.bf16.msra.mxu1 %v9814_v8  ;;  %4119 = vmatprep.subr.bf16.mxu0 %v9815_v48 }
 0xd40   :  { %4160 = vmatprep.subr.bf16.mxu1 %v9816_v40 }
 0xd42   :  { %4120 = vmatpush1.bf16.msra.mxu0 %v9817_v2 }
 0xd43   :  { %4161 = vmatpush1.bf16.msra.mxu1 %v9818_v53  ;;  %4121 = vmatprep.subr.bf16.mxu0 %v9819_v55 }
 0xd44   :  { %4162 = vmatprep.subr.bf16.mxu1 %v9820_v11  ;;  %v3672_v11 = vld [vmem:[#allocation22 + $0x44] ss:$8 sm:$0xf] }
 0xd46   :  { %4122 = vmatpush1.bf16.msra.mxu0 %v9821_v32  ;;  %v3673_v32 = vld [vmem:[#allocation22 + $0x44] ss:$8 sm:$0x30] }
 0xd47   :  { %4163 = vmatpush1.bf16.msra.mxu1 %v9822_v4  ;;  %4123 = vmatprep.subr.bf16.mxu0 %v9823_v46  ;;  %v3674_v4 = vor.u32 %v3673_v32, %v3672_v11  ;;  %v9843_v46 = vld [vmem:[#allocation72_spill] sm:$0xff]  ;;  %v3681_v11 = vld [vmem:[#allocation22 + $0x46] ss:$8 sm:$0x30] }
 0xd48   :  { %4164 = vmatprep.subr.bf16.mxu1 %v9824_v21 }
 0xd49   :  { %v4187_v21 = vrot.slane %v3674_v4, %v9843_v46 }
 0xd4a   :  { %4124 = vmatpush1.bf16.msra.mxu0 %v9825_v57  ;;  %v9844_v57 = vld [vmem:[#allocation73_spill] sm:$0xff] }
 0xd4b   :  { %4165 = vmatpush1.bf16.msra.mxu1 %v9826_v0  ;;  %4125 = vmatprep.subr.bf16.mxu0 %v9827_v29  ;;  %v4191_v0 = vrot.slane %v3674_v4, %v9844_v57  ;;  %v9845_v29 = vld [vmem:[#allocation74_spill] sm:$0xff] }
 0xd4c   :  { %4166 = vmatprep.subr.bf16.mxu1 %v9828_v56  ;;  %v4195_v56 = vrot.slane %v3674_v4, %v9845_v29 }
 0xd4e   :  { %4126 = vmatpush1.bf16.msra.mxu0 %v9829_v7 }
 0xd4f   :  { %4167 = vmatpush1.bf16.msra.mxu1 %v9830_v13  ;;  %4127 = vmatprep.subr.bf16.mxu0 %v9831_v15  ;;  %v9846_v13 = vld [vmem:[#allocation75_spill] sm:$0xff] }
 0xd50   :  { %4168 = vmatprep.subr.bf16.mxu1 %v9832_v45  ;;  %v4199_v15 = vrot.slane %v3674_v4, %v9846_v13 }
 0xd52   :  { %4128 = vmatpush1.bf16.msra.mxu0 %v9833_v30 }
 0xd53   :  { %4169 = vmatpush1.bf16.msra.mxu1 %v9834_v14  ;;  %4129 = vmatprep.subr.bf16.mxu0 %v9835_v12 }
 0xd54   :  { %4170 = vmatprep.subr.bf16.mxu1 %v9836_v62 }
 0xd56   :  { %4130 = vmatpush1.bf16.msra.mxu0 %v9837_v36 }
 0xd57   :  { %4171 = vmatpush1.bf16.msra.mxu1 %v9838_v16  ;;  %4131 = vmatprep.subr.bf16.mxu0 %v9839_v35 }
 0xd58   :  { %4172 = vmatprep.subr.bf16.mxu1 %v9840_v24 }
 0xd5a   :  { %4132 = vmatpush1.bf16.msra.mxu0 %v9841_v43  ;;  %v9847_v43 = vld [vmem:[#allocation76_spill] sm:$0xff] }
 0xd5b   :  { %4173 = vmatpush1.bf16.msra.mxu1 %v9842_v49  ;;  %v4203_v49 = vrot.slane %v3674_v4, %v9847_v43 }
 0xd5d   :  { %4134 = vmatmul.mubr.bf16.vlgmr.msra.gmra.mrb[40].mxu0 %v8986_v41 }
 0xd5e   :  { %4175 = vmatmul.mubr.bf16.vlgmr.msra.gmra.mrb[40].mxu1 %v8990_v3 }
 0xd70   :  { %v3889_v47 = vpop.f32.mrb[28].mxu0 }
 0xd71   :  { %v3930_v54 = vpop.f32.mrb[28].mxu1  ;;  %v3891_v59 = vpop.f32.mrb[29].mxu0 }
 0xd72   :  { %v3931_v5 = vadd.f32 %v3930_v54, %v3889_v47  ;;  %v3932_v60 = vpop.f32.mrb[29].mxu1  ;;  %v3893_v51 = vpop.f32.mrb[30].mxu0 }
 0xd73   :  { %v3933_v44 = vadd.f32 %v3932_v60, %v3891_v59  ;;  %v3934_v23 = vpop.f32.mrb[30].mxu1  ;;  %v3894_v10 = vpop.f32.mrb[31].mxu0  ;;  %v9848_v51 = vld [vmem:[#allocation77_spill] sm:$0xff] }
 0xd74   :  { %v3935_v25 = vpop.f32.mrb[31].mxu1  ;;  %v4207_v23 = vrot.slane %v3674_v4, %v9848_v51 }
 0xdb0   :  { %v3971_v31 = vpop.f32.mrb[32].mxu0 }
 0xdb1   :  { %v4012_v20 = vpop.f32.mrb[32].mxu1  ;;  %v3972_v34 = vadd.f32 %v3971_v31, %v9020_v39  ;;  %v3973_v18 = vpop.f32.mrb[33].mxu0 }
 0xdb2   :  { %v4014_v28 = vpop.f32.mrb[33].mxu1  ;;  %v3974_v41 = vadd.f32 %v3973_v18, %v9022_v19  ;;  %v3975_v33 = vpop.f32.mrb[34].mxu0 }
 0xdb3   :  { %v4016_v3 = vpop.f32.mrb[34].mxu1  ;;  %v4013_v9 = vadd.f32 %v4012_v20, %v3972_v34  ;;  %v3976_v52 = vpop.f32.mrb[35].mxu0 }
 0xdb4   :  { %v4017_v22 = vpop.f32.mrb[35].mxu1  ;;  %v4015_v26 = vadd.f32 %v4014_v28, %v3974_v41 }
 0xdb6   :  { %v9149_v7 = vadd.f32 %v4191_v0, %v4015_v26 }
 0xdb8   :  { %v4229_v30 = vmul.f32 %v9149_v7, %v9149_v7 }
 0xdf0   :  { %v4053_v37 = vpop.f32.mrb[36].mxu0 }
 0xdf1   :  { %v4094_v38 = vpop.f32.mrb[36].mxu1  ;;  %v4054_v27 = vadd.f32 %v4053_v37, %v9092_v58  ;;  %v4055_v42 = vpop.f32.mrb[37].mxu0  ;;  %v9147_v58 = vadd.f32 %v4187_v21, %v4013_v9 }
 0xdf2   :  { %v4096_v8 = vpop.f32.mrb[37].mxu1  ;;  %v4056_v48 = vadd.f32 %v4055_v42, %v9094_v17  ;;  %v4057_v40 = vpop.f32.mrb[38].mxu0 }
 0xdf3   :  { %v4098_v39 = vpop.f32.mrb[38].mxu1  ;;  %v4095_v2 = vadd.f32 %v4094_v38, %v4054_v27  ;;  %v4058_v53 = vpop.f32.mrb[39].mxu0  ;;  %v4228_v45 = vmul.f32 %v9147_v58, %v9147_v58  ;;  %v4220_v14 = vadd.f32 %v9149_v7, %v9147_v58 }
 0xdf4   :  { %v4099_v55 = vpop.f32.mrb[39].mxu1  ;;  %v4097_v19 = vadd.f32 %v4096_v8, %v4056_v48  ;;  %v3676_v53 = vld [vmem:[#allocation22 + $0x45] ss:$8 sm:$0xf] }
 0xdf5   :  { %v9151_v17 = vadd.f32 %v4195_v56, %v4095_v2  ;;  %v4234_v35 = vadd.f32 %v4229_v30, %v4228_v45  ;;  %v3677_v55 = vld [vmem:[#allocation22 + $0x45] ss:$8 sm:$0x30] }
 0xdf6   :  { %v9162_v62 = vadd.f32 %v4199_v15, %v4097_v19  ;;  %v3680_v19 = vld [vmem:[#allocation22 + $0x46] ss:$8 sm:$0xf]  ;;  %v3678_v32 = vor.u32 %v3677_v55, %v3676_v53 }
 0xdf7   :  { %v4230_v12 = vmul.f32 %v9151_v17, %v9151_v17  ;;  %v4221_v59 = vadd.f32 %v4220_v14, %v9151_v17  ;;  %v3682_v4 = vor.u32 %v3681_v11, %v3680_v19 }
 0xdf8   :  { %v4231_v31 = vmul.f32 %v9162_v62, %v9162_v62  ;;  %v4262_v21 = vrot.slane %v3678_v32, %v9843_v46  ;;  %v4266_v0 = vrot.slane %v3678_v32, %v9844_v57  ;;  %v4270_v56 = vrot.slane %v3678_v32, %v9845_v29 }
 0xdf9   :  { %v4235_v28 = vadd.f32 %v4234_v35, %v4230_v12  ;;  %v4222_v33 = vadd.f32 %v4221_v59, %v9162_v62  ;;  %v4274_v15 = vrot.slane %v3678_v32, %v9846_v13  ;;  %v4278_v45 = vrot.slane %v3678_v32, %v9847_v43 }
 0xdfa   :  { %v4282_v30 = vrot.slane %v3678_v32, %v9848_v51  ;;  %v4299_v14 = vrot.slane %v3682_v4, %v9843_v46  ;;  %v4303_v12 = vrot.slane %v3682_v4, %v9844_v57  ;;  %v4307_v59 = vrot.slane %v3682_v4, %v9845_v29 }
 0xdfb   :  { %v4236_v22 = vadd.f32 %v4235_v28, %v4231_v31 }
 0xe30   :  { %v4135_v36 = vpop.f32.mrb[40].mxu0 }
 0xe31   :  { %v4176_v16 = vpop.f32.mrb[40].mxu1  ;;  %v4136_v24 = vadd.f32 %v4135_v36, %v3931_v5  ;;  %v4137_v47 = vpop.f32.mrb[41].mxu0 }
 0xe32   :  { %v4178_v54 = vpop.f32.mrb[41].mxu1  ;;  %v4138_v60 = vadd.f32 %v4137_v47, %v3933_v44  ;;  %v4139_v10 = vpop.f32.mrb[42].mxu0 }
 0xe33   :  { %v4180_v25 = vpop.f32.mrb[42].mxu1  ;;  %v4177_v20 = vadd.f32 %v4176_v16, %v4136_v24  ;;  %v4140_v34 = vpop.f32.mrb[43].mxu0 }
 0xe34   :  { %v4181_v18 = vpop.f32.mrb[43].mxu1  ;;  %v4179_v41 = vadd.f32 %v4178_v54, %v4138_v60  ;;  %v4311_v60 = vrot.slane %v3682_v4, %v9846_v13 }
 0xe35   :  { %v4218_v5 = vadd.f32 %v4203_v49, %v4177_v20  ;;  %v4315_v20 = vrot.slane %v3682_v4, %v9847_v43 }
 0xe36   :  { %v4219_v3 = vadd.f32 %v4207_v23, %v4179_v41 }
 0xe37   :  { %v4223_v9 = vadd.f32 %v4222_v33, %v4218_v5  ;;  %v4232_v52 = vmul.f32 %v4218_v5, %v4218_v5 }
 0xe38   :  { %v4233_v26 = vmul.f32 %v4219_v3, %v4219_v3 }
 0xe39   :  { %v4224_v44 = vadd.f32 %v4223_v9, %v4219_v3  ;;  %v4237_v37 = vadd.f32 %v4236_v22, %v4232_v52 }
 0xe3b   :  { %4225 = vadd.xlane.f32.xlu0 %v4224_v44  ;;  %v4238_v38 = vadd.f32 %v4237_v37, %v4233_v26 }
 0xe3f   :  { %4239 = vadd.xlane.f32.xlu0 %v4238_v38 }
 0xec8   :  { %v4226_v27 = vpop.xlane.xlu0 %4225 }
 0xec9   :  { %v4227_v42 = vmul.f32 0.0013020834, %v4226_v27 }
 0xecb   :  { %v4242_v48 = vmul.f32 %v4227_v42, %v4227_v42  ;;  %v4244_v36 = vsub.f32 %v9147_v58, %v4227_v42  ;;  %v4245_v16 = vsub.f32 %v9149_v7, %v4227_v42  ;;  %v4246_v35 = vsub.f32 %v9151_v17, %v4227_v42 }
 0xecc   :  { %v4240_v8 = vpop.xlane.xlu0 %4239  ;;  %v4247_v24 = vsub.f32 %v9162_v62, %v4227_v42  ;;  %v4248_v47 = vsub.f32 %v4218_v5, %v4227_v42  ;;  %v4249_v54 = vsub.f32 %v4219_v3, %v4227_v42  ;;  %v4319_v58 = vrot.slane %v3682_v4, %v9848_v51 }
 0xecd   :  { %v4241_v40 = vmul.f32 0.0013020834, %v4240_v8 }
 0xecf   :  { %v4243_v39 = vsub.f32 %v4241_v40, %v4242_v48 }
 0xed1   :  { %v4250_v2 = vadd.f32 1e-05, %v4243_v39 }
 0xed3   :  { %7639 = vrsqrt.f32 %v4250_v2 }
 0xedd   :  { %v7640_v49 = vpop.eup %7639 }
 0xede   :  { %v4252_v23 = vmul.f32 %v7640_v49, %v4244_v36  ;;  %v4253_v10 = vmul.f32 %v7640_v49, %v4245_v16  ;;  %v4254_v25 = vmul.f32 %v7640_v49, %v4246_v35  ;;  %v4255_v31 = vmul.f32 %v7640_v49, %v4247_v24 }
 0xedf   :  { %v4256_v7 = vmul.f32 %v7640_v49, %v4248_v47  ;;  %v4257_v34 = vmul.f32 %v7640_v49, %v4249_v54 }
 0xee0   :  { %v4289_v17 = vmul.f32 %v4262_v21, %v4252_v23  ;;  %v4290_v18 = vmul.f32 %v4266_v0, %v4253_v10  ;;  %v4291_v62 = vmul.f32 %v4270_v56, %v4254_v25  ;;  %v4292_v28 = vmul.f32 %v4274_v15, %v4255_v31 }
 0xee1   :  { %v4293_v41 = vmul.f32 %v4278_v45, %v4256_v7  ;;  %v4294_v5 = vmul.f32 %v4282_v30, %v4257_v34 }
 0xee2   :  { %v9186_v33 = vadd.f32 %v4299_v14, %v4289_v17  ;;  %v4327_v3 = vadd.f32 %v4303_v12, %v4290_v18  ;;  %v9188_v9 = vadd.f32 %v4307_v59, %v4291_v62  ;;  %v9190_v52 = vadd.f32 %v4311_v60, %v4292_v28 }
 0xee3   :  { %v9192_v22 = vadd.f32 %v4315_v20, %v4293_v41  ;;  %v9194_v44 = vadd.f32 %v4319_v58, %v4294_v5 }
 0xee4   :  { %v4332_v26 = vmax.f32 %v9186_v33, 0.0  ;;  %v4333_v37 = vmax.f32 %v4327_v3, 0.0  ;;  %v4334_v38 = vmax.f32 %v9188_v9, 0.0  ;;  %v4335_v27 = vmax.f32 %v9190_v52, 0.0 }
 0xee5   :  { %v4336_v42 = vmax.f32 %v9192_v22, 0.0  ;;  %v4337_v8 = vmax.f32 %v9194_v44, 0.0 }
 0xee6   :  { %7821 = dma.done.wait [#allocation16 + $0x6], 24576 }
 0xee7   :  { %7822 = vsyncadd [#allocation16 + $0x6], 4294942720  ;;  %v4539_v48 = vpack.c.bf16 %v4333_v37, %v4333_v37  ;;  %v4341_v40 = vld [vmem:[#allocation8 + $0x8] sm:$0xff]  ;;  %v4343_v39 = vld [vmem:[#allocation8 + $0x18] sm:$0xff] }
 0xee8   :  { %v4340_v2 = vld [vmem:[#allocation8] sm:$0xff]  ;;  %4565 = vmatprep.subr.bf16.mxu0 %v4341_v40  ;;  %4688 = vmatprep.subr.bf16.mxu1 %v4343_v39  ;;  %v4342_v53 = vld [vmem:[#allocation8 + $0x10] sm:$0xff]  ;;  %v4345_v55 = vld [vmem:[#allocation8 + $0x28] sm:$0xff] }
 0xee9   :  { %4597 = vmatprep.mubr.bf16.mxu0 %v4539_v48  ;;  %4720 = vmatprep.mubr.bf16.mxu1 %v4539_v48  ;;  %v4347_v19 = vld [vmem:[#allocation8 + $0x38] sm:$0xff]  ;;  %v4344_v11 = vld [vmem:[#allocation8 + $0x20] sm:$0xff]  ;;  %v4346_v32 = vld [vmem:[#allocation8 + $0x30] sm:$0xff] }
 0xeea   :  { %4566 = vmatpush1.bf16.msra.mxu0 %v4340_v2  ;;  %4689 = vmatpush1.bf16.msra.mxu1 %v4342_v53  ;;  %v4349_v4 = vld [vmem:[#allocation8 + $0x48] sm:$0xff]  ;;  %v4351_v21 = vld [vmem:[#allocation8 + $0x58] sm:$0xff]  ;;  %v4348_v0 = vld [vmem:[#allocation8 + $0x40] sm:$0xff] }
 0xeeb   :  { %4567 = vmatprep.subr.bf16.mxu0 %v4345_v55  ;;  %4690 = vmatprep.subr.bf16.mxu1 %v4347_v19  ;;  %v4350_v56 = vld [vmem:[#allocation8 + $0x50] sm:$0xff]  ;;  %v4353_v15 = vld [vmem:[#allocation8 + $0x68] sm:$0xff]  ;;  %v4355_v45 = vld [vmem:[#allocation8 + $0x78] sm:$0xff] }
 0xeec   :  { %v4352_v30 = vld [vmem:[#allocation8 + $0x60] sm:$0xff]  ;;  %v4354_v14 = vld [vmem:[#allocation8 + $0x70] sm:$0xff]  ;;  %v4357_v12 = vld [vmem:[#allocation8 + $0x88] sm:$0xff] }
 0xeed   :  { %v4359_v36 = vld [vmem:[#allocation8 + $0x98] sm:$0xff]  ;;  %v4356_v16 = vld [vmem:[#allocation8 + $0x80] sm:$0xff]  ;;  %v4358_v35 = vld [vmem:[#allocation8 + $0x90] sm:$0xff] }
 0xeee   :  { %4568 = vmatpush1.bf16.msra.mxu0 %v4344_v11  ;;  %4691 = vmatpush1.bf16.msra.mxu1 %v4346_v32  ;;  %v4361_v24 = vld [vmem:[#allocation8 + $0xa8] sm:$0xff]  ;;  %v4363_v49 = vld [vmem:[#allocation8 + $0xb8] sm:$0xff]  ;;  %v4360_v47 = vld [vmem:[#allocation8 + $0xa0] sm:$0xff] }
 0xeef   :  { %4569 = vmatprep.subr.bf16.mxu0 %v4349_v4  ;;  %4692 = vmatprep.subr.bf16.mxu1 %v4351_v21  ;;  %v4362_v54 = vld [vmem:[#allocation8 + $0xb0] sm:$0xff]  ;;  %v4365_v59 = vld [vmem:[#allocation8 + $0xc8] sm:$0xff]  ;;  %v4367_v60 = vld [vmem:[#allocation8 + $0xd8] sm:$0xff] }
 0xef0   :  { %v4364_v23 = vld [vmem:[#allocation8 + $0xc0] sm:$0xff]  ;;  %v4366_v10 = vld [vmem:[#allocation8 + $0xd0] sm:$0xff]  ;;  %v4369_v25 = vld [vmem:[#allocation8 + $0xe8] sm:$0xff] }
 0xef1   :  { %v4371_v31 = vld [vmem:[#allocation8 + $0xf8] sm:$0xff]  ;;  %v4368_v20 = vld [vmem:[#allocation8 + $0xe0] sm:$0xff]  ;;  %v4370_v58 = vld [vmem:[#allocation8 + $0xf0] sm:$0xff] }
 0xef2   :  { %4570 = vmatpush1.bf16.msra.mxu0 %v4348_v0  ;;  %4693 = vmatpush1.bf16.msra.mxu1 %v4350_v56  ;;  %v4373_v7 = vld [vmem:[#allocation8 + $0x108] sm:$0xff]  ;;  %v4375_v34 = vld [vmem:[#allocation8 + $0x118] sm:$0xff]  ;;  %v4372_v17 = vld [vmem:[#allocation8 + $0x100] sm:$0xff] }
 0xef3   :  { %4571 = vmatprep.subr.bf16.mxu0 %v4353_v15  ;;  %4694 = vmatprep.subr.bf16.mxu1 %v4355_v45  ;;  %v4374_v18 = vld [vmem:[#allocation8 + $0x110] sm:$0xff]  ;;  %v4377_v62 = vld [vmem:[#allocation8 + $0x128] sm:$0xff]  ;;  %v4379_v28 = vld [vmem:[#allocation8 + $0x138] sm:$0xff] }
 0xef4   :  { %v4376_v41 = vld [vmem:[#allocation8 + $0x120] sm:$0xff]  ;;  %v4378_v5 = vld [vmem:[#allocation8 + $0x130] sm:$0xff]  ;;  %v4381_v3 = vld [vmem:[#allocation8 + $0x148] sm:$0xff] }
 0xef5   :  { %v4383_v37 = vld [vmem:[#allocation8 + $0x158] sm:$0xff]  ;;  %v4380_v48 = vld [vmem:[#allocation8 + $0x140] sm:$0xff]  ;;  %v4382_v40 = vld [vmem:[#allocation8 + $0x150] sm:$0xff] }
 0xef6   :  { %4572 = vmatpush1.bf16.msra.mxu0 %v4352_v30  ;;  %4695 = vmatpush1.bf16.msra.mxu1 %v4354_v14  ;;  %v4385_v39 = vld [vmem:[#allocation8 + $0x168] sm:$0xff]  ;;  %v4387_v2 = vld [vmem:[#allocation8 + $0x178] sm:$0xff]  ;;  %v4384_v53 = vld [vmem:[#allocation8 + $0x160] sm:$0xff] }
 0xef7   :  { %4573 = vmatprep.subr.bf16.mxu0 %v4357_v12  ;;  %4696 = vmatprep.subr.bf16.mxu1 %v4359_v36  ;;  %v4386_v55 = vld [vmem:[#allocation8 + $0x170] sm:$0xff]  ;;  %v4389_v19 = vld [vmem:[#allocation8 + $0x188] sm:$0xff]  ;;  %v4391_v11 = vld [vmem:[#allocation8 + $0x198] sm:$0xff] }
 0xef8   :  { %v4388_v32 = vld [vmem:[#allocation8 + $0x180] sm:$0xff]  ;;  %v4390_v4 = vld [vmem:[#allocation8 + $0x190] sm:$0xff]  ;;  %v4393_v21 = vld [vmem:[#allocation8 + $0x1a8] sm:$0xff] }
 0xef9   :  { %v4395_v0 = vld [vmem:[#allocation8 + $0x1b8] sm:$0xff]  ;;  %v4392_v56 = vld [vmem:[#allocation8 + $0x1a0] sm:$0xff]  ;;  %v4394_v15 = vld [vmem:[#allocation8 + $0x1b0] sm:$0xff] }
 0xefa   :  { %4574 = vmatpush1.bf16.msra.mxu0 %v4356_v16  ;;  %4697 = vmatpush1.bf16.msra.mxu1 %v4358_v35  ;;  %v4397_v45 = vld [vmem:[#allocation8 + $0x1c8] sm:$0xff]  ;;  %v4399_v30 = vld [vmem:[#allocation8 + $0x1d8] sm:$0xff]  ;;  %v4396_v14 = vld [vmem:[#allocation8 + $0x1c0] sm:$0xff] }
 0xefb   :  { %4575 = vmatprep.subr.bf16.mxu0 %v4361_v24  ;;  %4698 = vmatprep.subr.bf16.mxu1 %v4363_v49  ;;  %v4398_v12 = vld [vmem:[#allocation8 + $0x1d0] sm:$0xff]  ;;  %v4401_v36 = vld [vmem:[#allocation8 + $0x1e8] sm:$0xff]  ;;  %v4403_v16 = vld [vmem:[#allocation8 + $0x1f8] sm:$0xff] }
 0xefc   :  { %v4400_v35 = vld [vmem:[#allocation8 + $0x1e0] sm:$0xff]  ;;  %v4402_v24 = vld [vmem:[#allocation8 + $0x1f0] sm:$0xff]  ;;  %v4405_v49 = vld [vmem:[#allocation8 + $0x208] sm:$0xff] }
 0xefd   :  { %v4408_v33 = vld [vmem:[#allocation8 + $0x220] sm:$0xff]  ;;  %v4414_v52 = vld [vmem:[#allocation8 + $0x250] sm:$0xff] }
 0xefe   :  { %4576 = vmatpush1.bf16.msra.mxu0 %v4360_v47  ;;  %4699 = vmatpush1.bf16.msra.mxu1 %v4362_v54  ;;  %v4407_v47 = vld [vmem:[#allocation8 + $0x218] sm:$0xff]  ;;  %v4538_v54 = vpack.c.bf16 %v4332_v26, %v4332_v26  ;;  %v4410_v26 = vld [vmem:[#allocation8 + $0x230] sm:$0xff]  ;;  %v4472_v9 = vld [vmem:[#allocation8 + $0x420] sm:$0xff] }
 0xeff   :  { %4577 = vmatprep.subr.bf16.mxu0 %v4365_v59  ;;  %4700 = vmatprep.subr.bf16.mxu1 %v4367_v60  ;;  %v4404_v59 = vld [vmem:[#allocation8 + $0x200] sm:$0xff]  ;;  %v4406_v60 = vld [vmem:[#allocation8 + $0x210] sm:$0xff] }
 0xf00   :  { %v4478_v44 = vld [vmem:[#allocation8 + $0x450] sm:$0xff] }
 0xf02   :  { %4578 = vmatpush1.bf16.msra.mxu0 %v4364_v23  ;;  %4701 = vmatpush1.bf16.msra.mxu1 %v4366_v10  ;;  %v4409_v23 = vld [vmem:[#allocation8 + $0x228] sm:$0xff]  ;;  %v4411_v10 = vld [vmem:[#allocation8 + $0x238] sm:$0xff] }
 0xf03   :  { %4579 = vmatprep.subr.bf16.mxu0 %v4369_v25  ;;  %4702 = vmatprep.subr.bf16.mxu1 %v4371_v31  ;;  %v4541_v25 = vpack.c.bf16 %v4335_v27, %v4335_v27  ;;  %v4413_v31 = vld [vmem:[#allocation8 + $0x248] sm:$0xff]  ;;  %v4419_v27 = vld [vmem:[#allocation8 + $0x278] sm:$0xff] }
 0xf06   :  { %4580 = vmatpush1.bf16.msra.mxu0 %v4368_v20  ;;  %4703 = vmatpush1.bf16.msra.mxu1 %v4370_v58  ;;  %v4415_v20 = vld [vmem:[#allocation8 + $0x258] sm:$0xff]  ;;  %v4412_v58 = vld [vmem:[#allocation8 + $0x240] sm:$0xff] }
 0xf07   :  { %4581 = vmatprep.subr.bf16.mxu0 %v4373_v7  ;;  %4704 = vmatprep.subr.bf16.mxu1 %v4375_v34  ;;  %v4417_v7 = vld [vmem:[#allocation8 + $0x268] sm:$0xff]  ;;  %v4416_v34 = vld [vmem:[#allocation8 + $0x260] sm:$0xff] }
 0xf0a   :  { %4582 = vmatpush1.bf16.msra.mxu0 %v4372_v17  ;;  %4705 = vmatpush1.bf16.msra.mxu1 %v4374_v18  ;;  %v4418_v17 = vld [vmem:[#allocation8 + $0x270] sm:$0xff]  ;;  %v4421_v18 = vld [vmem:[#allocation8 + $0x288] sm:$0xff] }
 0xf0b   :  { %4583 = vmatprep.subr.bf16.mxu0 %v4377_v62  ;;  %4706 = vmatprep.subr.bf16.mxu1 %v4379_v28  ;;  %v4423_v62 = vld [vmem:[#allocation8 + $0x298] sm:$0xff]  ;;  %v4420_v28 = vld [vmem:[#allocation8 + $0x280] sm:$0xff] }
 0xf0e   :  { %4584 = vmatpush1.bf16.msra.mxu0 %v4376_v41  ;;  %4707 = vmatpush1.bf16.msra.mxu1 %v4378_v5  ;;  %v4422_v41 = vld [vmem:[#allocation8 + $0x290] sm:$0xff]  ;;  %v4425_v5 = vld [vmem:[#allocation8 + $0x2a8] sm:$0xff] }
 0xf0f   :  { %4585 = vmatprep.subr.bf16.mxu0 %v4381_v3  ;;  %4708 = vmatprep.subr.bf16.mxu1 %v4383_v37  ;;  %v4427_v3 = vld [vmem:[#allocation8 + $0x2b8] sm:$0xff]  ;;  %v4424_v37 = vld [vmem:[#allocation8 + $0x2a0] sm:$0xff] }
 0xf12   :  { %4586 = vmatpush1.bf16.msra.mxu0 %v4380_v48  ;;  %4709 = vmatpush1.bf16.msra.mxu1 %v4382_v40  ;;  %v4426_v48 = vld [vmem:[#allocation8 + $0x2b0] sm:$0xff]  ;;  %v4429_v40 = vld [vmem:[#allocation8 + $0x2c8] sm:$0xff] }
 0xf13   :  { %4587 = vmatprep.subr.bf16.mxu0 %v4385_v39  ;;  %4710 = vmatprep.subr.bf16.mxu1 %v4387_v2  ;;  %v4431_v39 = vld [vmem:[#allocation8 + $0x2d8] sm:$0xff]  ;;  %v4428_v2 = vld [vmem:[#allocation8 + $0x2c0] sm:$0xff] }
 0xf16   :  { %4588 = vmatpush1.bf16.msra.mxu0 %v4384_v53  ;;  %4711 = vmatpush1.bf16.msra.mxu1 %v4386_v55  ;;  %v4430_v53 = vld [vmem:[#allocation8 + $0x2d0] sm:$0xff]  ;;  %v4433_v55 = vld [vmem:[#allocation8 + $0x2e8] sm:$0xff] }
 0xf17   :  { %4589 = vmatprep.subr.bf16.mxu0 %v4389_v19  ;;  %4712 = vmatprep.subr.bf16.mxu1 %v4391_v11  ;;  %v4435_v19 = vld [vmem:[#allocation8 + $0x2f8] sm:$0xff]  ;;  %v4432_v11 = vld [vmem:[#allocation8 + $0x2e0] sm:$0xff] }
 0xf1a   :  { %4590 = vmatpush1.bf16.msra.mxu0 %v4388_v32  ;;  %4713 = vmatpush1.bf16.msra.mxu1 %v4390_v4  ;;  %v4434_v32 = vld [vmem:[#allocation8 + $0x2f0] sm:$0xff]  ;;  %v4437_v4 = vld [vmem:[#allocation8 + $0x308] sm:$0xff] }
 0xf1b   :  { %4591 = vmatprep.subr.bf16.mxu0 %v4393_v21  ;;  %4714 = vmatprep.subr.bf16.mxu1 %v4395_v0  ;;  %v4439_v21 = vld [vmem:[#allocation8 + $0x318] sm:$0xff]  ;;  %v4436_v0 = vld [vmem:[#allocation8 + $0x300] sm:$0xff] }
 0xf1e   :  { %4592 = vmatpush1.bf16.msra.mxu0 %v4392_v56  ;;  %4715 = vmatpush1.bf16.msra.mxu1 %v4394_v15  ;;  %v4438_v56 = vld [vmem:[#allocation8 + $0x310] sm:$0xff]  ;;  %v4441_v15 = vld [vmem:[#allocation8 + $0x328] sm:$0xff] }
 0xf1f   :  { %4593 = vmatprep.subr.bf16.mxu0 %v4397_v45  ;;  %4716 = vmatprep.subr.bf16.mxu1 %v4399_v30  ;;  %v4443_v45 = vld [vmem:[#allocation8 + $0x338] sm:$0xff]  ;;  %v4440_v30 = vld [vmem:[#allocation8 + $0x320] sm:$0xff] }
 0xf22   :  { %4594 = vmatpush1.bf16.msra.mxu0 %v4396_v14  ;;  %4717 = vmatpush1.bf16.msra.mxu1 %v4398_v12  ;;  %v4442_v14 = vld [vmem:[#allocation8 + $0x330] sm:$0xff]  ;;  %v4445_v12 = vld [vmem:[#allocation8 + $0x348] sm:$0xff] }
 0xf23   :  { %4595 = vmatprep.subr.bf16.mxu0 %v4401_v36  ;;  %4718 = vmatprep.subr.bf16.mxu1 %v4403_v16  ;;  %v4447_v36 = vld [vmem:[#allocation8 + $0x358] sm:$0xff]  ;;  %v4444_v16 = vld [vmem:[#allocation8 + $0x340] sm:$0xff] }
 0xf26   :  { %4596 = vmatpush1.bf16.msra.mxu0 %v4400_v35  ;;  %4719 = vmatpush1.bf16.msra.mxu1 %v4402_v24  ;;  %v4446_v35 = vld [vmem:[#allocation8 + $0x350] sm:$0xff]  ;;  %v4449_v24 = vld [vmem:[#allocation8 + $0x368] sm:$0xff] }
 0xf27   :  { %4606 = vmatprep.subr.bf16.mxu0 %v4405_v49  ;;  %4729 = vmatprep.subr.bf16.mxu1 %v4407_v47  ;;  %v4451_v49 = vld [vmem:[#allocation8 + $0x378] sm:$0xff]  ;;  %v4448_v47 = vld [vmem:[#allocation8 + $0x360] sm:$0xff] }
 0xf29   :  { %4598 = vmatmul.mubr.bf16.vlgmr.msra.gmra.mrb[44].mxu0 %v4538_v54  ;;  %4721 = vmatmul.mubr.bf16.vlgmr.msra.gmra.mrb[44].mxu1 %v4538_v54  ;;  %v4450_v54 = vld [vmem:[#allocation8 + $0x370] sm:$0xff] }
 0xf2a   :  { %4607 = vmatpush1.bf16.msra.mxu0 %v4404_v59  ;;  %4730 = vmatpush1.bf16.msra.mxu1 %v4406_v60  ;;  %v4453_v59 = vld [vmem:[#allocation8 + $0x388] sm:$0xff]  ;;  %v4455_v60 = vld [vmem:[#allocation8 + $0x398] sm:$0xff] }
 0xf2b   :  { %4608 = vmatprep.subr.bf16.mxu0 %v4409_v23  ;;  %4731 = vmatprep.subr.bf16.mxu1 %v4411_v10  ;;  %v4452_v23 = vld [vmem:[#allocation8 + $0x380] sm:$0xff]  ;;  %v4454_v10 = vld [vmem:[#allocation8 + $0x390] sm:$0xff] }
 0xf2c   :  { %4638 = vmatprep.mubr.bf16.mxu0 %v4541_v25  ;;  %4761 = vmatprep.mubr.bf16.mxu1 %v4541_v25  ;;  %v4457_v25 = vld [vmem:[#allocation8 + $0x3a8] sm:$0xff] }
 0xf2e   :  { %4609 = vmatpush1.bf16.msra.mxu0 %v4408_v33  ;;  %4732 = vmatpush1.bf16.msra.mxu1 %v4410_v26  ;;  %v4459_v33 = vld [vmem:[#allocation8 + $0x3b8] sm:$0xff]  ;;  %v4456_v26 = vld [vmem:[#allocation8 + $0x3a0] sm:$0xff] }
 0xf2f   :  { %4610 = vmatprep.subr.bf16.mxu0 %v4413_v31  ;;  %4733 = vmatprep.subr.bf16.mxu1 %v4415_v20  ;;  %v4458_v31 = vld [vmem:[#allocation8 + $0x3b0] sm:$0xff]  ;;  %v4461_v20 = vld [vmem:[#allocation8 + $0x3c8] sm:$0xff] }
 0xf32   :  { %4611 = vmatpush1.bf16.msra.mxu0 %v4412_v58  ;;  %4734 = vmatpush1.bf16.msra.mxu1 %v4414_v52  ;;  %v4463_v58 = vld [vmem:[#allocation8 + $0x3d8] sm:$0xff]  ;;  %v4460_v52 = vld [vmem:[#allocation8 + $0x3c0] sm:$0xff] }
 0xf33   :  { %4612 = vmatprep.subr.bf16.mxu0 %v4417_v7  ;;  %4735 = vmatprep.subr.bf16.mxu1 %v4419_v27  ;;  %v4462_v7 = vld [vmem:[#allocation8 + $0x3d0] sm:$0xff]  ;;  %v4465_v27 = vld [vmem:[#allocation8 + $0x3e8] sm:$0xff] }
 0xf36   :  { %4613 = vmatpush1.bf16.msra.mxu0 %v4416_v34  ;;  %4736 = vmatpush1.bf16.msra.mxu1 %v4418_v17  ;;  %v4467_v34 = vld [vmem:[#allocation8 + $0x3f8] sm:$0xff]  ;;  %v4464_v17 = vld [vmem:[#allocation8 + $0x3e0] sm:$0xff] }
 0xf37   :  { %4614 = vmatprep.subr.bf16.mxu0 %v4421_v18  ;;  %4737 = vmatprep.subr.bf16.mxu1 %v4423_v62  ;;  %v4466_v18 = vld [vmem:[#allocation8 + $0x3f0] sm:$0xff]  ;;  %v4469_v62 = vld [vmem:[#allocation8 + $0x408] sm:$0xff] }
 0xf3a   :  { %4615 = vmatpush1.bf16.msra.mxu0 %v4420_v28  ;;  %4738 = vmatpush1.bf16.msra.mxu1 %v4422_v41  ;;  %v4471_v28 = vld [vmem:[#allocation8 + $0x418] sm:$0xff]  ;;  %v4540_v41 = vpack.c.bf16 %v4334_v38, %v4334_v38  ;;  %v4474_v38 = vld [vmem:[#allocation8 + $0x430] sm:$0xff] }
 0xf3b   :  { %4616 = vmatprep.subr.bf16.mxu0 %v4425_v5  ;;  %4739 = vmatprep.subr.bf16.mxu1 %v4427_v3  ;;  %v4468_v5 = vld [vmem:[#allocation8 + $0x400] sm:$0xff]  ;;  %v4470_v3 = vld [vmem:[#allocation8 + $0x410] sm:$0xff] }
 0xf3e   :  { %4617 = vmatpush1.bf16.msra.mxu0 %v4424_v37  ;;  %4740 = vmatpush1.bf16.msra.mxu1 %v4426_v48  ;;  %v4473_v37 = vld [vmem:[#allocation8 + $0x428] sm:$0xff]  ;;  %v4475_v48 = vld [vmem:[#allocation8 + $0x438] sm:$0xff] }
 0xf3f   :  { %4618 = vmatprep.subr.bf16.mxu0 %v4429_v40  ;;  %4741 = vmatprep.subr.bf16.mxu1 %v4431_v39  ;;  %v4543_v40 = vpack.c.bf16 %v4337_v8, %v4337_v8  ;;  %v4477_v39 = vld [vmem:[#allocation8 + $0x448] sm:$0xff]  ;;  %v4483_v8 = vld [vmem:[#allocation8 + $0x478] sm:$0xff] }
 0xf42   :  { %4619 = vmatpush1.bf16.msra.mxu0 %v4428_v2  ;;  %4742 = vmatpush1.bf16.msra.mxu1 %v4430_v53  ;;  %v4479_v2 = vld [vmem:[#allocation8 + $0x458] sm:$0xff]  ;;  %v4476_v53 = vld [vmem:[#allocation8 + $0x440] sm:$0xff] }
 0xf43   :  { %4620 = vmatprep.subr.bf16.mxu0 %v4433_v55  ;;  %4743 = vmatprep.subr.bf16.mxu1 %v4435_v19  ;;  %v4481_v55 = vld [vmem:[#allocation8 + $0x468] sm:$0xff]  ;;  %v4480_v19 = vld [vmem:[#allocation8 + $0x460] sm:$0xff] }
 0xf46   :  { %4621 = vmatpush1.bf16.msra.mxu0 %v4432_v11  ;;  %4744 = vmatpush1.bf16.msra.mxu1 %v4434_v32  ;;  %v4482_v11 = vld [vmem:[#allocation8 + $0x470] sm:$0xff]  ;;  %v4485_v32 = vld [vmem:[#allocation8 + $0x488] sm:$0xff] }
 0xf47   :  { %4622 = vmatprep.subr.bf16.mxu0 %v4437_v4  ;;  %4745 = vmatprep.subr.bf16.mxu1 %v4439_v21  ;;  %v4487_v4 = vld [vmem:[#allocation8 + $0x498] sm:$0xff]  ;;  %v4484_v21 = vld [vmem:[#allocation8 + $0x480] sm:$0xff] }
 0xf4a   :  { %4623 = vmatpush1.bf16.msra.mxu0 %v4436_v0  ;;  %4746 = vmatpush1.bf16.msra.mxu1 %v4438_v56  ;;  %v4486_v0 = vld [vmem:[#allocation8 + $0x490] sm:$0xff]  ;;  %v4489_v56 = vld [vmem:[#allocation8 + $0x4a8] sm:$0xff] }
 0xf4b   :  { %4624 = vmatprep.subr.bf16.mxu0 %v4441_v15  ;;  %4747 = vmatprep.subr.bf16.mxu1 %v4443_v45  ;;  %v4491_v15 = vld [vmem:[#allocation8 + $0x4b8] sm:$0xff]  ;;  %v4488_v45 = vld [vmem:[#allocation8 + $0x4a0] sm:$0xff] }
 0xf4e   :  { %4625 = vmatpush1.bf16.msra.mxu0 %v4440_v30  ;;  %4748 = vmatpush1.bf16.msra.mxu1 %v4442_v14  ;;  %v4490_v30 = vld [vmem:[#allocation8 + $0x4b0] sm:$0xff]  ;;  %v4493_v14 = vld [vmem:[#allocation8 + $0x4c8] sm:$0xff] }
 0xf4f   :  { %4626 = vmatprep.subr.bf16.mxu0 %v4445_v12  ;;  %4749 = vmatprep.subr.bf16.mxu1 %v4447_v36  ;;  %v4495_v12 = vld [vmem:[#allocation8 + $0x4d8] sm:$0xff]  ;;  %v4492_v36 = vld [vmem:[#allocation8 + $0x4c0] sm:$0xff] }
 0xf52   :  { %4627 = vmatpush1.bf16.msra.mxu0 %v4444_v16  ;;  %4750 = vmatpush1.bf16.msra.mxu1 %v4446_v35  ;;  %v4494_v16 = vld [vmem:[#allocation8 + $0x4d0] sm:$0xff]  ;;  %v4497_v35 = vld [vmem:[#allocation8 + $0x4e8] sm:$0xff] }
 0xf53   :  { %4628 = vmatprep.subr.bf16.mxu0 %v4449_v24  ;;  %4751 = vmatprep.subr.bf16.mxu1 %v4451_v49  ;;  %v4499_v24 = vld [vmem:[#allocation8 + $0x4f8] sm:$0xff]  ;;  %v4496_v49 = vld [vmem:[#allocation8 + $0x4e0] sm:$0xff] }
 0xf56   :  { %4629 = vmatpush1.bf16.msra.mxu0 %v4448_v47  ;;  %4752 = vmatpush1.bf16.msra.mxu1 %v4450_v54  ;;  %v4498_v47 = vld [vmem:[#allocation8 + $0x4f0] sm:$0xff]  ;;  %v4501_v54 = vld [vmem:[#allocation8 + $0x508] sm:$0xff] }
 0xf57   :  { %4630 = vmatprep.subr.bf16.mxu0 %v4453_v59  ;;  %4753 = vmatprep.subr.bf16.mxu1 %v4455_v60  ;;  %v4503_v59 = vld [vmem:[#allocation8 + $0x518] sm:$0xff]  ;;  %v4500_v60 = vld [vmem:[#allocation8 + $0x500] sm:$0xff] }
 0xf5a   :  { %4631 = vmatpush1.bf16.msra.mxu0 %v4452_v23  ;;  %4754 = vmatpush1.bf16.msra.mxu1 %v4454_v10  ;;  %v4502_v23 = vld [vmem:[#allocation8 + $0x510] sm:$0xff]  ;;  %v4505_v10 = vld [vmem:[#allocation8 + $0x528] sm:$0xff] }
 0xf5b   :  { %4632 = vmatprep.subr.bf16.mxu0 %v4457_v25  ;;  %4755 = vmatprep.subr.bf16.mxu1 %v4459_v33  ;;  %v4507_v25 = vld [vmem:[#allocation8 + $0x538] sm:$0xff]  ;;  %v4504_v33 = vld [vmem:[#allocation8 + $0x520] sm:$0xff] }
 0xf5e   :  { %4633 = vmatpush1.bf16.msra.mxu0 %v4456_v26  ;;  %4756 = vmatpush1.bf16.msra.mxu1 %v4458_v31  ;;  %v4506_v26 = vld [vmem:[#allocation8 + $0x530] sm:$0xff]  ;;  %v4509_v31 = vld [vmem:[#allocation8 + $0x548] sm:$0xff] }
 0xf5f   :  { %4634 = vmatprep.subr.bf16.mxu0 %v4461_v20  ;;  %4757 = vmatprep.subr.bf16.mxu1 %v4463_v58  ;;  %v4511_v20 = vld [vmem:[#allocation8 + $0x558] sm:$0xff]  ;;  %v4508_v58 = vld [vmem:[#allocation8 + $0x540] sm:$0xff] }
 0xf62   :  { %4635 = vmatpush1.bf16.msra.mxu0 %v4460_v52  ;;  %4758 = vmatpush1.bf16.msra.mxu1 %v4462_v7  ;;  %v4510_v52 = vld [vmem:[#allocation8 + $0x550] sm:$0xff]  ;;  %v4513_v7 = vld [vmem:[#allocation8 + $0x568] sm:$0xff] }
 0xf63   :  { %4636 = vmatprep.subr.bf16.mxu0 %v4465_v27  ;;  %4759 = vmatprep.subr.bf16.mxu1 %v4467_v34  ;;  %v4515_v27 = vld [vmem:[#allocation8 + $0x578] sm:$0xff]  ;;  %v4512_v34 = vld [vmem:[#allocation8 + $0x560] sm:$0xff] }
 0xf66   :  { %4637 = vmatpush1.bf16.msra.mxu0 %v4464_v17  ;;  %4760 = vmatpush1.bf16.msra.mxu1 %v4466_v18  ;;  %v4514_v17 = vld [vmem:[#allocation8 + $0x570] sm:$0xff]  ;;  %v4517_v18 = vld [vmem:[#allocation8 + $0x588] sm:$0xff] }
 0xf67   :  { %4647 = vmatprep.subr.bf16.mxu0 %v4469_v62  ;;  %4770 = vmatprep.subr.bf16.mxu1 %v4471_v28  ;;  %v4519_v62 = vld [vmem:[#allocation8 + $0x598] sm:$0xff]  ;;  %v4516_v28 = vld [vmem:[#allocation8 + $0x580] sm:$0xff] }
 0xf69   :  { %4639 = vmatmul.mubr.bf16.vlgmr.msra.gmra.mrb[44].mxu0 %v4540_v41  ;;  %4762 = vmatmul.mubr.bf16.vlgmr.msra.gmra.mrb[44].mxu1 %v4540_v41  ;;  %v4518_v41 = vld [vmem:[#allocation8 + $0x590] sm:$0xff] }
 0xf6a   :  { %4648 = vmatpush1.bf16.msra.mxu0 %v4468_v5  ;;  %4771 = vmatpush1.bf16.msra.mxu1 %v4470_v3  ;;  %v4521_v5 = vld [vmem:[#allocation8 + $0x5a8] sm:$0xff]  ;;  %v4523_v3 = vld [vmem:[#allocation8 + $0x5b8] sm:$0xff] }
 0xf6b   :  { %4649 = vmatprep.subr.bf16.mxu0 %v4473_v37  ;;  %4772 = vmatprep.subr.bf16.mxu1 %v4475_v48  ;;  %v4520_v37 = vld [vmem:[#allocation8 + $0x5a0] sm:$0xff]  ;;  %v4522_v48 = vld [vmem:[#allocation8 + $0x5b0] sm:$0xff] }
 0xf6c   :  { %4679 = vmatprep.mubr.bf16.mxu0 %v4543_v40  ;;  %4802 = vmatprep.mubr.bf16.mxu1 %v4543_v40  ;;  %v4525_v40 = vld [vmem:[#allocation8 + $0x5c8] sm:$0xff] }
 0xf6e   :  { %4650 = vmatpush1.bf16.msra.mxu0 %v4472_v9  ;;  %4773 = vmatpush1.bf16.msra.mxu1 %v4474_v38  ;;  %v4527_v9 = vld [vmem:[#allocation8 + $0x5d8] sm:$0xff]  ;;  %v4524_v38 = vld [vmem:[#allocation8 + $0x5c0] sm:$0xff] }
 0xf6f   :  { %4651 = vmatprep.subr.bf16.mxu0 %v4477_v39  ;;  %4774 = vmatprep.subr.bf16.mxu1 %v4479_v2  ;;  %v4526_v39 = vld [vmem:[#allocation8 + $0x5d0] sm:$0xff]  ;;  %v4529_v2 = vld [vmem:[#allocation8 + $0x5e8] sm:$0xff] }
 0xf72   :  { %4652 = vmatpush1.bf16.msra.mxu0 %v4476_v53  ;;  %4775 = vmatpush1.bf16.msra.mxu1 %v4478_v44  ;;  %v4531_v53 = vld [vmem:[#allocation8 + $0x5f8] sm:$0xff]  ;;  %v4528_v44 = vld [vmem:[#allocation8 + $0x5e0] sm:$0xff] }
 0xf73   :  { %4653 = vmatprep.subr.bf16.mxu0 %v4481_v55  ;;  %4776 = vmatprep.subr.bf16.mxu1 %v4483_v8  ;;  %v4530_v55 = vld [vmem:[#allocation8 + $0x5f0] sm:$0xff]  ;;  %v4542_v8 = vpack.c.bf16 %v4336_v42, %v4336_v42 }
 0xf76   :  { %4654 = vmatpush1.bf16.msra.mxu0 %v4480_v19  ;;  %4777 = vmatpush1.bf16.msra.mxu1 %v4482_v11  ;;  %v4533_v19 = vld [vmem:[#allocation22 + $0x47] ss:$8 sm:$0xf] }
 0xf77   :  { %4655 = vmatprep.subr.bf16.mxu0 %v4485_v32  ;;  %4778 = vmatprep.subr.bf16.mxu1 %v4487_v4  ;;  %v4548_v11 = vrot.slane %v4533_v19, %v9843_v46  ;;  %v4556_v32 = vrot.slane %v4533_v19, %v9845_v29  ;;  %v4552_v4 = vrot.slane %v4533_v19, %v9844_v57 }
 0xf78   :  { %v4560_v42 = vrot.slane %v4533_v19, %v9846_v13 }
 0xf7a   :  { %4656 = vmatpush1.bf16.msra.mxu0 %v4484_v21  ;;  %4779 = vmatpush1.bf16.msra.mxu1 %v4486_v0 }
 0xf7b   :  { %4657 = vmatprep.subr.bf16.mxu0 %v4489_v56  ;;  %4780 = vmatprep.subr.bf16.mxu1 %v4491_v15 }
 0xf7e   :  { %4658 = vmatpush1.bf16.msra.mxu0 %v4488_v45  ;;  %4781 = vmatpush1.bf16.msra.mxu1 %v4490_v30 }
 0xf7f   :  { %4659 = vmatprep.subr.bf16.mxu0 %v4493_v14  ;;  %4782 = vmatprep.subr.bf16.mxu1 %v4495_v12 }
 0xf82   :  { %4660 = vmatpush1.bf16.msra.mxu0 %v4492_v36  ;;  %4783 = vmatpush1.bf16.msra.mxu1 %v4494_v16 }
 0xf83   :  { %4661 = vmatprep.subr.bf16.mxu0 %v4497_v35  ;;  %4784 = vmatprep.subr.bf16.mxu1 %v4499_v24 }
 0xf86   :  { %4662 = vmatpush1.bf16.msra.mxu0 %v4496_v49  ;;  %4785 = vmatpush1.bf16.msra.mxu1 %v4498_v47 }
 0xf87   :  { %4663 = vmatprep.subr.bf16.mxu0 %v4501_v54  ;;  %4786 = vmatprep.subr.bf16.mxu1 %v4503_v59 }
 0xf8a   :  { %4664 = vmatpush1.bf16.msra.mxu0 %v4500_v60  ;;  %4787 = vmatpush1.bf16.msra.mxu1 %v4502_v23 }
 0xf8b   :  { %4665 = vmatprep.subr.bf16.mxu0 %v4505_v10  ;;  %4788 = vmatprep.subr.bf16.mxu1 %v4507_v25 }
 0xf8e   :  { %4666 = vmatpush1.bf16.msra.mxu0 %v4504_v33  ;;  %4789 = vmatpush1.bf16.msra.mxu1 %v4506_v26 }
 0xf8f   :  { %4667 = vmatprep.subr.bf16.mxu0 %v4509_v31  ;;  %4790 = vmatprep.subr.bf16.mxu1 %v4511_v20 }
 0xf92   :  { %4668 = vmatpush1.bf16.msra.mxu0 %v4508_v58  ;;  %4791 = vmatpush1.bf16.msra.mxu1 %v4510_v52 }
 0xf93   :  { %4669 = vmatprep.subr.bf16.mxu0 %v4513_v7  ;;  %4792 = vmatprep.subr.bf16.mxu1 %v4515_v27 }
 0xf96   :  { %4670 = vmatpush1.bf16.msra.mxu0 %v4512_v34  ;;  %4793 = vmatpush1.bf16.msra.mxu1 %v4514_v17  ;;  %v4535_v34 = vld [vmem:[#allocation22 + $0x80] ss:$8 sm:$0xf]  ;;  %v4537_v17 = vld [vmem:[#allocation22 + $0x81] ss:$8 sm:$0xf] }
 0xf97   :  { %4671 = vmatprep.subr.bf16.mxu0 %v4517_v18  ;;  %4794 = vmatprep.subr.bf16.mxu1 %v4519_v62  ;;  %v4843_v18 = vrot.slane %v4535_v34, %v9843_v46  ;;  %v4847_v62 = vrot.slane %v4535_v34, %v9844_v57 }
 0xf9a   :  { %4672 = vmatpush1.bf16.msra.mxu0 %v4516_v28  ;;  %4795 = vmatpush1.bf16.msra.mxu1 %v4518_v41  ;;  %v4851_v28 = vrot.slane %v4535_v34, %v9845_v29  ;;  %v4855_v41 = vrot.slane %v4535_v34, %v9846_v13 }
 0xf9b   :  { %4673 = vmatprep.subr.bf16.mxu0 %v4521_v5  ;;  %4796 = vmatprep.subr.bf16.mxu1 %v4523_v3 }
 0xf9e   :  { %4674 = vmatpush1.bf16.msra.mxu0 %v4520_v37  ;;  %4797 = vmatpush1.bf16.msra.mxu1 %v4522_v48 }
 0xf9f   :  { %4675 = vmatprep.subr.bf16.mxu0 %v4525_v40  ;;  %4798 = vmatprep.subr.bf16.mxu1 %v4527_v9  ;;  %v4868_v9 = vrot.slane %v4537_v17, %v9843_v46 }
 0xfa2   :  { %4676 = vmatpush1.bf16.msra.mxu0 %v4524_v38  ;;  %4799 = vmatpush1.bf16.msra.mxu1 %v4526_v39  ;;  %v4872_v38 = vrot.slane %v4537_v17, %v9844_v57  ;;  %v4876_v39 = vrot.slane %v4537_v17, %v9845_v29 }
 0xfa3   :  { %4677 = vmatprep.subr.bf16.mxu0 %v4529_v2  ;;  %4800 = vmatprep.subr.bf16.mxu1 %v4531_v53  ;;  %v4880_v2 = vrot.slane %v4537_v17, %v9846_v13 }
 0xfa6   :  { %4678 = vmatpush1.bf16.msra.mxu0 %v4528_v44  ;;  %4801 = vmatpush1.bf16.msra.mxu1 %v4530_v55 }
 0xfa9   :  { %4680 = vmatmul.mubr.bf16.vlgmr.msra.gmra.mrb[44].mxu0 %v4542_v8  ;;  %4803 = vmatmul.mubr.bf16.vlgmr.msra.gmra.mrb[44].mxu1 %v4542_v8 }
0x107c   :  { %v4681_v21 = vpop.f32.mrb[44].mxu0  ;;  %v4804_v0 = vpop.f32.mrb[44].mxu1 }
0x107d   :  { %v7445_v56 = vadd.f32 %v4681_v21, %v4548_v11  ;;  %v4683_v15 = vpop.f32.mrb[45].mxu0  ;;  %v4806_v45 = vpop.f32.mrb[45].mxu1  ;;  %v7447_v30 = vadd.f32 %v4804_v0, %v4556_v32 }
0x107e   :  { %v7446_v22 = vadd.f32 %v4683_v15, %v4552_v4  ;;  %v4685_v14 = vpop.f32.mrb[46].mxu0  ;;  %v4808_v12 = vpop.f32.mrb[46].mxu1  ;;  %v7448_v54 = vadd.f32 %v4806_v45, %v4560_v42 }
0x107f   :  { %v4817_v36 = vmul.f32 %v7445_v56, %v7445_v56  ;;  %v4686_v16 = vpop.f32.mrb[47].mxu0  ;;  %v4809_v35 = vpop.f32.mrb[47].mxu1  ;;  %v4819_v47 = vmul.f32 %v7447_v30, %v7447_v30 }
0x1080   :  { %v4818_v24 = vmul.f32 %v7446_v22, %v7446_v22  ;;  %v4811_v49 = vadd.f32 %v7446_v22, %v7445_v56  ;;  %v4820_v25 = vmul.f32 %v7448_v54, %v7448_v54 }
0x1082   :  { %v4812_v59 = vadd.f32 %v7447_v30, %v4811_v49  ;;  %v4821_v60 = vadd.f32 %v4818_v24, %v4817_v36 }
0x1084   :  { %v4813_v23 = vadd.f32 %v7448_v54, %v4812_v59  ;;  %v4822_v10 = vadd.f32 %v4821_v60, %v4819_v47 }
0x1086   :  { %4814 = vadd.xlane.f32.xlu0 %v4813_v23  ;;  %v4823_v33 = vadd.f32 %v4822_v10, %v4820_v25 }
0x108a   :  { %4824 = vadd.xlane.f32.xlu0 %v4823_v33 }
0x1113   :  { %v4815_v26 = vpop.xlane.xlu0 %4814 }
0x1114   :  { %v4816_v31 = vmul.f32 0.001953125, %v4815_v26 }
0x1116   :  { %v4827_v58 = vmul.f32 %v4816_v31, %v4816_v31  ;;  %v4829_v5 = vsub.f32 %v7445_v56, %v4816_v31  ;;  %v4830_v3 = vsub.f32 %v7446_v22, %v4816_v31  ;;  %v4831_v37 = vsub.f32 %v7447_v30, %v4816_v31 }
0x1117   :  { %v4825_v20 = vpop.xlane.xlu0 %4824  ;;  %v4832_v48 = vsub.f32 %v7448_v54, %v4816_v31 }
0x1118   :  { %v4826_v52 = vmul.f32 0.001953125, %v4825_v20 }
0x111a   :  { %v4828_v7 = vsub.f32 %v4826_v52, %v4827_v58 }
0x111c   :  { %v4833_v27 = vadd.f32 1e-05, %v4828_v7 }
0x111e   :  { %7641 = vrsqrt.f32 %v4833_v27 }
0x1128   :  { %v7642_v40 = vpop.eup %7641 }
0x1129   :  { %v4835_v53 = vmul.f32 %v7642_v40, %v4829_v5  ;;  %v4836_v44 = vmul.f32 %v7642_v40, %v4830_v3  ;;  %v4837_v55 = vmul.f32 %v7642_v40, %v4831_v37  ;;  %v4838_v8 = vmul.f32 %v7642_v40, %v4832_v48 }
0x112b   :  { %v4860_v19 = vmul.f32 %v4843_v18, %v4835_v53  ;;  %v4861_v11 = vmul.f32 %v4847_v62, %v4836_v44  ;;  %v4862_v32 = vmul.f32 %v4851_v28, %v4837_v55  ;;  %v4863_v4 = vmul.f32 %v4855_v41, %v4838_v8 }
0x112d   :  { %v9228_v21 = vadd.f32 %v4868_v9, %v4860_v19  ;;  %v4886_v0 = vadd.f32 %v4872_v38, %v4861_v11  ;;  %v9230_v56 = vadd.f32 %v4876_v39, %v4862_v32  ;;  %v9232_v15 = vadd.f32 %v4880_v2, %v4863_v4 }
0x112f   :  { %v4889_v45 = vmax.f32 %v9228_v21, 0.0  ;;  %v4890_v30 = vmax.f32 %v4886_v0, 0.0  ;;  %v4891_v22 = vmax.f32 %v9230_v56, 0.0  ;;  %v4892_v42 = vmax.f32 %v9232_v15, 0.0 }
0x1130   :  { %7823 = dma.done.wait [#allocation16 + $0x7], 8192 }
0x1131   :  { %7824 = vsyncadd [#allocation16 + $0x7], 4294959104  ;;  %v4967_v14 = vpack.c.bf16 %v4890_v30, %v4890_v30  ;;  %v4897_v12 = vld [vmem:[#allocation9 + $0x8] sm:$0xff]  ;;  %v4896_v36 = vld [vmem:[#allocation9] sm:$0xff]  ;;  %v4966_v38 = vpack.c.bf16 %v4889_v45, %v4889_v45  ;;  %v4969_v39 = vpack.c.bf16 %v4892_v42, %v4892_v42 }
0x1132   :  { %v4899_v16 = vld [vmem:[#allocation9 + $0x18] sm:$0xff]  ;;  %4981 = vmatprep.subr.bf16.mxu0 %v4897_v12  ;;  %v4898_v35 = vld [vmem:[#allocation9 + $0x10] sm:$0xff]  ;;  %v4901_v24 = vld [vmem:[#allocation9 + $0x28] sm:$0xff] }
0x1133   :  { %5013 = vmatprep.mubr.bf16.mxu0 %v4967_v14  ;;  %4982 = vmatpush1.bf16.msra.mxu0 %v4896_v36  ;;  %v4900_v49 = vld [vmem:[#allocation9 + $0x20] sm:$0xff]  ;;  %v4903_v47 = vld [vmem:[#allocation9 + $0x38] sm:$0xff]  ;;  %v4902_v54 = vld [vmem:[#allocation9 + $0x30] sm:$0xff] }
0x1134   :  { %4983 = vmatprep.subr.bf16.mxu0 %v4899_v16  ;;  %v4905_v59 = vld [vmem:[#allocation9 + $0x48] sm:$0xff]  ;;  %v4904_v60 = vld [vmem:[#allocation9 + $0x40] sm:$0xff]  ;;  %v4907_v23 = vld [vmem:[#allocation9 + $0x58] sm:$0xff] }
0x1135   :  { %v4906_v10 = vld [vmem:[#allocation9 + $0x50] sm:$0xff]  ;;  %v4909_v25 = vld [vmem:[#allocation9 + $0x68] sm:$0xff]  ;;  %v4908_v33 = vld [vmem:[#allocation9 + $0x60] sm:$0xff] }
0x1136   :  { %v4911_v26 = vld [vmem:[#allocation9 + $0x78] sm:$0xff]  ;;  %v4910_v31 = vld [vmem:[#allocation9 + $0x70] sm:$0xff]  ;;  %v4913_v20 = vld [vmem:[#allocation9 + $0x88] sm:$0xff] }
0x1137   :  { %4984 = vmatpush1.bf16.msra.mxu0 %v4898_v35  ;;  %v4912_v58 = vld [vmem:[#allocation9 + $0x80] sm:$0xff]  ;;  %v4915_v52 = vld [vmem:[#allocation9 + $0x98] sm:$0xff]  ;;  %v4914_v7 = vld [vmem:[#allocation9 + $0x90] sm:$0xff] }
0x1138   :  { %4985 = vmatprep.subr.bf16.mxu0 %v4901_v24  ;;  %v4917_v27 = vld [vmem:[#allocation9 + $0xa8] sm:$0xff]  ;;  %v4916_v34 = vld [vmem:[#allocation9 + $0xa0] sm:$0xff]  ;;  %v4919_v17 = vld [vmem:[#allocation9 + $0xb8] sm:$0xff] }
0x1139   :  { %v4918_v18 = vld [vmem:[#allocation9 + $0xb0] sm:$0xff]  ;;  %v4921_v62 = vld [vmem:[#allocation9 + $0xc8] sm:$0xff]  ;;  %v4920_v28 = vld [vmem:[#allocation9 + $0xc0] sm:$0xff] }
0x113a   :  { %v4923_v41 = vld [vmem:[#allocation9 + $0xd8] sm:$0xff]  ;;  %v4922_v5 = vld [vmem:[#allocation9 + $0xd0] sm:$0xff]  ;;  %v4925_v3 = vld [vmem:[#allocation9 + $0xe8] sm:$0xff] }
0x113b   :  { %4986 = vmatpush1.bf16.msra.mxu0 %v4900_v49  ;;  %v4924_v37 = vld [vmem:[#allocation9 + $0xe0] sm:$0xff]  ;;  %v4927_v48 = vld [vmem:[#allocation9 + $0xf8] sm:$0xff]  ;;  %v4926_v40 = vld [vmem:[#allocation9 + $0xf0] sm:$0xff] }
0x113c   :  { %4987 = vmatprep.subr.bf16.mxu0 %v4903_v47  ;;  %v4929_v9 = vld [vmem:[#allocation9 + $0x108] sm:$0xff]  ;;  %v4928_v2 = vld [vmem:[#allocation9 + $0x100] sm:$0xff]  ;;  %v4931_v53 = vld [vmem:[#allocation9 + $0x118] sm:$0xff] }
0x113d   :  { %v4930_v44 = vld [vmem:[#allocation9 + $0x110] sm:$0xff]  ;;  %v4933_v55 = vld [vmem:[#allocation9 + $0x128] sm:$0xff]  ;;  %v4932_v8 = vld [vmem:[#allocation9 + $0x120] sm:$0xff] }
0x113e   :  { %v4935_v19 = vld [vmem:[#allocation9 + $0x138] sm:$0xff]  ;;  %v4934_v11 = vld [vmem:[#allocation9 + $0x130] sm:$0xff]  ;;  %v4937_v32 = vld [vmem:[#allocation9 + $0x148] sm:$0xff] }
0x113f   :  { %4988 = vmatpush1.bf16.msra.mxu0 %v4902_v54  ;;  %v4936_v4 = vld [vmem:[#allocation9 + $0x140] sm:$0xff]  ;;  %v4939_v21 = vld [vmem:[#allocation9 + $0x158] sm:$0xff]  ;;  %v4938_v0 = vld [vmem:[#allocation9 + $0x150] sm:$0xff] }
0x1140   :  { %4989 = vmatprep.subr.bf16.mxu0 %v4905_v59  ;;  %v4941_v15 = vld [vmem:[#allocation9 + $0x168] sm:$0xff]  ;;  %v4940_v45 = vld [vmem:[#allocation9 + $0x160] sm:$0xff]  ;;  %v4943_v30 = vld [vmem:[#allocation9 + $0x178] sm:$0xff] }
0x1141   :  { %v4942_v42 = vld [vmem:[#allocation9 + $0x170] sm:$0xff]  ;;  %v4945_v14 = vld [vmem:[#allocation9 + $0x188] sm:$0xff]  ;;  %v4944_v12 = vld [vmem:[#allocation9 + $0x180] sm:$0xff] }
0x1142   :  { %v4947_v36 = vld [vmem:[#allocation9 + $0x198] sm:$0xff]  ;;  %v4946_v16 = vld [vmem:[#allocation9 + $0x190] sm:$0xff]  ;;  %v4949_v35 = vld [vmem:[#allocation9 + $0x1a8] sm:$0xff] }
0x1143   :  { %4990 = vmatpush1.bf16.msra.mxu0 %v4904_v60  ;;  %v4948_v24 = vld [vmem:[#allocation9 + $0x1a0] sm:$0xff]  ;;  %v4951_v49 = vld [vmem:[#allocation9 + $0x1b8] sm:$0xff]  ;;  %v4950_v47 = vld [vmem:[#allocation9 + $0x1b0] sm:$0xff] }
0x1144   :  { %4991 = vmatprep.subr.bf16.mxu0 %v4907_v23  ;;  %v4953_v54 = vld [vmem:[#allocation9 + $0x1c8] sm:$0xff]  ;;  %v4952_v59 = vld [vmem:[#allocation9 + $0x1c0] sm:$0xff]  ;;  %v4955_v60 = vld [vmem:[#allocation9 + $0x1d8] sm:$0xff] }
0x1145   :  { %v4954_v23 = vld [vmem:[#allocation9 + $0x1d0] sm:$0xff] }
0x1147   :  { %4992 = vmatpush1.bf16.msra.mxu0 %v4906_v10  ;;  %v4957_v10 = vld [vmem:[#allocation9 + $0x1e8] sm:$0xff] }
0x1148   :  { %4993 = vmatprep.subr.bf16.mxu0 %v4909_v25  ;;  %v4956_v25 = vld [vmem:[#allocation9 + $0x1e0] sm:$0xff] }
0x114b   :  { %4994 = vmatpush1.bf16.msra.mxu0 %v4908_v33  ;;  %v4959_v33 = vld [vmem:[#allocation9 + $0x1f8] sm:$0xff] }
0x114c   :  { %4995 = vmatprep.subr.bf16.mxu0 %v4911_v26  ;;  %v4958_v26 = vld [vmem:[#allocation9 + $0x1f0] sm:$0xff] }
0x114f   :  { %4996 = vmatpush1.bf16.msra.mxu0 %v4910_v31  ;;  %v4968_v31 = vpack.c.bf16 %v4891_v22, %v4891_v22 }
0x1150   :  { %4997 = vmatprep.subr.bf16.mxu0 %v4913_v20  ;;  %v4961_v20 = vld [vmem:[#allocation22 + $0x82] ss:$8 sm:$0x3] }
0x1153   :  { %4998 = vmatpush1.bf16.msra.mxu0 %v4912_v58  ;;  %v4974_v58 = vrot.slane %v4961_v20, %v9843_v46 }
0x1154   :  { %4999 = vmatprep.subr.bf16.mxu0 %v4915_v52  ;;  %v4978_v52 = vrot.slane %v4961_v20, %v9844_v57 }
0x1157   :  { %5000 = vmatpush1.bf16.msra.mxu0 %v4914_v7 }
0x1158   :  { %5001 = vmatprep.subr.bf16.mxu0 %v4917_v27 }
0x115b   :  { %5002 = vmatpush1.bf16.msra.mxu0 %v4916_v34 }
0x115c   :  { %5003 = vmatprep.subr.bf16.mxu0 %v4919_v17 }
0x115f   :  { %5004 = vmatpush1.bf16.msra.mxu0 %v4918_v18 }
0x1160   :  { %5005 = vmatprep.subr.bf16.mxu0 %v4921_v62 }
0x1163   :  { %5006 = vmatpush1.bf16.msra.mxu0 %v4920_v28 }
0x1164   :  { %5007 = vmatprep.subr.bf16.mxu0 %v4923_v41 }
0x1167   :  { %5008 = vmatpush1.bf16.msra.mxu0 %v4922_v5 }
0x1168   :  { %5009 = vmatprep.subr.bf16.mxu0 %v4925_v3 }
0x116b   :  { %5010 = vmatpush1.bf16.msra.mxu0 %v4924_v37 }
0x116c   :  { %5011 = vmatprep.subr.bf16.mxu0 %v4927_v48 }
0x116f   :  { %5012 = vmatpush1.bf16.msra.mxu0 %v4926_v40 }
0x1170   :  { %5022 = vmatprep.subr.bf16.mxu0 %v4929_v9 }
0x1172   :  { %5014 = vmatmul.mubr.bf16.vlgmr.msra.gmra.mrb[48].mxu0 %v4966_v38 }
0x1173   :  { %5023 = vmatpush1.bf16.msra.mxu0 %v4928_v2  ;;  %5054 = vmatprep.mubr.bf16.mxu0 %v4969_v39  ;;  %v4963_v39 = vld [vmem:[#allocation22 + $0x83] ss:$8 sm:$0x3]  ;;  %v4965_v2 = vld [vmem:[#allocation22 + $0x84] ss:$8 sm:$0x3] }
0x1174   :  { %5024 = vmatprep.subr.bf16.mxu0 %v4931_v53 }
0x1177   :  { %5025 = vmatpush1.bf16.msra.mxu0 %v4930_v44 }
0x1178   :  { %5026 = vmatprep.subr.bf16.mxu0 %v4933_v55  ;;  %v5086_v55 = vrot.slane %v4963_v39, %v9843_v46 }
0x117b   :  { %5027 = vmatpush1.bf16.msra.mxu0 %v4932_v8  ;;  %v5090_v8 = vrot.slane %v4963_v39, %v9844_v57 }
0x117c   :  { %5028 = vmatprep.subr.bf16.mxu0 %v4935_v19 }
0x117f   :  { %5029 = vmatpush1.bf16.msra.mxu0 %v4934_v11 }
0x1180   :  { %5030 = vmatprep.subr.bf16.mxu0 %v4937_v32 }
0x1183   :  { %5031 = vmatpush1.bf16.msra.mxu0 %v4936_v4  ;;  %v5099_v4 = vrot.slane %v4965_v2, %v9843_v46 }
0x1184   :  { %5032 = vmatprep.subr.bf16.mxu0 %v4939_v21  ;;  %v5103_v21 = vrot.slane %v4965_v2, %v9844_v57 }
0x1187   :  { %5033 = vmatpush1.bf16.msra.mxu0 %v4938_v0  ;;  %v5111_v0 = vld [vmem:[#allocation22 + $0x85] ss:$8 sm:$0x3] }
0x1188   :  { %5034 = vmatprep.subr.bf16.mxu0 %v4941_v15 }
0x118b   :  { %5035 = vmatpush1.bf16.msra.mxu0 %v4940_v45 }
0x118c   :  { %5036 = vmatprep.subr.bf16.mxu0 %v4943_v30 }
0x118f   :  { %5037 = vmatpush1.bf16.msra.mxu0 %v4942_v42 }
0x1190   :  { %5038 = vmatprep.subr.bf16.mxu0 %v4945_v14  ;;  %v5117_v14 = vrot.slane %v5111_v0, %v9843_v46 }
0x1193   :  { %5039 = vmatpush1.bf16.msra.mxu0 %v4944_v12  ;;  %v5121_v12 = vrot.slane %v5111_v0, %v9844_v57 }
0x1194   :  { %5040 = vmatprep.subr.bf16.mxu0 %v4947_v36 }
0x1197   :  { %5041 = vmatpush1.bf16.msra.mxu0 %v4946_v16 }
0x1198   :  { %5042 = vmatprep.subr.bf16.mxu0 %v4949_v35 }
0x119b   :  { %5043 = vmatpush1.bf16.msra.mxu0 %v4948_v24 }
0x119c   :  { %5044 = vmatprep.subr.bf16.mxu0 %v4951_v49 }
0x119f   :  { %5045 = vmatpush1.bf16.msra.mxu0 %v4950_v47  ;;  %v7893_v47 = vmov 0  }
0x11a0   :  { %5046 = vmatprep.subr.bf16.mxu0 %v4953_v54  ;;  %7643 = vset.pattern.permute.xlu1 %v7893_v47  ;;  %v5112_v54 = vld [vmem:[#allocation22 + $0x86] ss:$0 sm:$0xff] }
0x11a1   :  { %7644 = vset.pattern.permute.xlu0 %v7893_v47 }
0x11a3   :  { %5047 = vmatpush1.bf16.msra.mxu0 %v4952_v59 }
0x11a4   :  { %5048 = vmatprep.subr.bf16.mxu0 %v4955_v60 }
0x11a7   :  { %5049 = vmatpush1.bf16.msra.mxu0 %v4954_v23 }
0x11a8   :  { %5050 = vmatprep.subr.bf16.mxu0 %v4957_v10 }
0x11ab   :  { %5051 = vmatpush1.bf16.msra.mxu0 %v4956_v25 }
0x11ac   :  { %5052 = vmatprep.subr.bf16.mxu0 %v4959_v33 }
0x11af   :  { %5053 = vmatpush1.bf16.msra.mxu0 %v4958_v26 }
0x11b2   :  { %5055 = vmatmul.mubr.bf16.vlgmr.msra.gmra.mrb[48].mxu0 %v4968_v31 }
0x1285   :  { %v5056_v7 = vpop.f32.mrb[48].mxu0 }
0x1286   :  { %v7449_v27 = vadd.f32 %v5056_v7, %v4974_v58  ;;  %v5058_v34 = vpop.f32.mrb[49].mxu0 }
0x1287   :  { %v7450_v17 = vadd.f32 %v5058_v34, %v4978_v52  ;;  %v5060_v18 = vpop.f32.mrb[50].mxu0 }
0x1288   :  { %v5061_v62 = vpop.f32.mrb[51].mxu0  ;;  %v5068_v41 = vmul.f32 %v7449_v27, %v7449_v27  ;;  %v9849_v18 = vld [vmem:[#allocation80_spill] sm:$0xff] }
0x1289   :  { %v5063_v28 = vadd.f32 %v7450_v17, %v7449_v27  ;;  %v5069_v5 = vmul.f32 %v7450_v17, %v7450_v17 }
0x128b   :  { %5064 = vadd.xlane.f32.xlu0 %v5063_v28  ;;  %v5070_v56 = vadd.f32 %v5069_v5, %v5068_v41  ;;  %v9850_v28 = vld [vmem:[#allocation81_spill] sm:$0xff]  ;;  %v9851_v5 = vld [vmem:[#allocation82_spill] sm:$0xff] }
0x128f   :  { %5071 = vadd.xlane.f32.xlu0 %v5070_v56 }
0x1318   :  { %v5065_v22 = vpop.xlane.xlu0 %5064 }
0x1319   :  { %v5067_v3 = vmul.f32 0.00390625, %v5065_v22 }
0x131b   :  { %v5074_v48 = vmul.f32 %v5067_v3, %v5067_v3  ;;  %v5076_v53 = vsub.f32 %v7449_v27, %v5067_v3  ;;  %v5077_v44 = vsub.f32 %v7450_v17, %v5067_v3 }
0x131c   :  { %v5072_v37 = vpop.xlane.xlu0 %5071 }
0x131d   :  { %v5073_v40 = vmul.f32 0.00390625, %v5072_v37 }
0x131f   :  { %v5075_v9 = vsub.f32 %v5073_v40, %v5074_v48 }
0x1321   :  { %v5078_v38 = vadd.f32 1e-05, %v5075_v9 }
0x1323   :  { %7645 = vrsqrt.f32 %v5078_v38 }
0x132d   :  { %v7646_v19 = vpop.eup %7645 }
0x132e   :  { %v5080_v11 = vmul.f32 %v7646_v19, %v5076_v53  ;;  %v5081_v32 = vmul.f32 %v7646_v19, %v5077_v44 }
0x1330   :  { %v5093_v15 = vmul.f32 %v5086_v55, %v5080_v11  ;;  %v5094_v45 = vmul.f32 %v5090_v8, %v5081_v32 }
0x1332   :  { %v5106_v30 = vadd.f32 %v5099_v4, %v5093_v15  ;;  %v5107_v42 = vadd.f32 %v5103_v21, %v5094_v45 }
0x1334   :  { %v5108_v36 = vmax.f32 %v5106_v30, 0.0  ;;  %v5109_v16 = vmax.f32 %v5107_v42, 0.0 }
0x1336   :  { %v5124_v35 = vmul.f32 %v5117_v14, %v5108_v36  ;;  %v5125_v24 = vmul.f32 %v5121_v12, %v5109_v16 }
0x1338   :  { %v5126_v49 = vadd.f32 %v5125_v24, %v5124_v35 }
0x133a   :  { %5127 = vadd.xlane.f32.xlu1 %v5126_v49 }
0x13c7   :  { %v5128_v59 = vpop.xlane.xlu1 %5127 }
0x13c8   :  { %v5129_v60 = vadd.f32 %v5128_v59, %v5112_v54 }
0x13ca   :  { %v5130_v23 = vsub.f32 0.0, %v5129_v60 }
0x13cc   :  { %v5131_v10 = vmul.f32 1.442695, %v5130_v23 }
0x13ce   :  { %7647 = vpow2.f32 %v5131_v10 }
0x13d8   :  { %v7648_v25 = vpop.eup %7647 }
0x13d9   :  { %v5133_v33 = vadd.f32 1.0, %v7648_v25 }
0x13db   :  { %7649 = vrcp.f32 %v5133_v33 }
0x13e5   :  { %v7650_v26 = vpop.eup %7649 }
0x13e6   :  { %5139 = vperm.xlu1 %7643, %v7650_v26   ;;  %v5136_v31 = vsub.f32 1.0, %v7650_v26 }
0x13e8   :  { %5148 = vperm.xlu0 %7644, %v5136_v31  }
0x1465   :  { %v5140_v20 = vpop.permute.xlu1 %5139 }
0x1466   :  { %v5142_v58 = vmul.f32 %v5140_v20, %v9711_v50  ;;  %v5143_v52 = vmul.f32 %v5140_v20, %v8372_v61  ;;  %v5144_v7 = vmul.f32 %v5140_v20, %v9712_v6  ;;  %v5145_v27 = vmul.f32 %v5140_v20, %v8376_v63 }
0x1467   :  { %v5149_v34 = vpop.permute.xlu0 %5148 }
0x1468   :  { %v5151_v17 = vmul.f32 %v5149_v34, %v8492_v1  ;;  %v5152_v62 = vmul.f32 %v5149_v34, %v9849_v18  ;;  %v5153_v41 = vmul.f32 %v5149_v34, %v9850_v28  ;;  %v5154_v56 = vmul.f32 %v5149_v34, %v9851_v5 }
0x146a   :  { %v9264_v22 = vadd.f32 %v5151_v17, %v5142_v58  ;;  %v5156_v3 = vadd.f32 %v5152_v62, %v5143_v52  ;;  %v9266_v37 = vadd.f32 %v5153_v41, %v5144_v7  ;;  %v9268_v50 = vadd.f32 %v5154_v56, %v5145_v27 }
0x146b   :  { %7825 = dma.done.wait [#allocation16 + $0x8], 16384 }
0x146c   :  { %7826 = vsyncadd [#allocation16 + $0x8], 4294950912  ;;  %v5297_v61 = vpack.c.bf16 %v5156_v3, %v5156_v3  ;;  %v5163_v63 = vld [vmem:[#allocation10 + $0x8] sm:$0xff]  ;;  %v5165_v1 = vld [vmem:[#allocation10 + $0x18] sm:$0xff] }
0x146d   :  { %v5162_v6 = vld [vmem:[#allocation10] sm:$0xff]  ;;  %5321 = vmatprep.subr.bf16.mxu1 %v5163_v63  ;;  %5403 = vmatprep.subr.bf16.mxu0 %v5165_v1  ;;  %v5164_v48 = vld [vmem:[#allocation10 + $0x10] sm:$0xff]  ;;  %v5167_v40 = vld [vmem:[#allocation10 + $0x28] sm:$0xff] }
0x146e   :  { %5353 = vmatprep.mubr.bf16.mxu1 %v5297_v61  ;;  %5435 = vmatprep.mubr.bf16.mxu0 %v5297_v61  ;;  %v5169_v9 = vld [vmem:[#allocation10 + $0x38] sm:$0xff]  ;;  %v5166_v38 = vld [vmem:[#allocation10 + $0x20] sm:$0xff]  ;;  %v5168_v39 = vld [vmem:[#allocation10 + $0x30] sm:$0xff] }
0x146f   :  { %5322 = vmatpush1.bf16.msra.mxu1 %v5162_v6  ;;  %5404 = vmatpush1.bf16.msra.mxu0 %v5164_v48  ;;  %v5171_v2 = vld [vmem:[#allocation10 + $0x48] sm:$0xff]  ;;  %v5173_v53 = vld [vmem:[#allocation10 + $0x58] sm:$0xff]  ;;  %v5170_v44 = vld [vmem:[#allocation10 + $0x40] sm:$0xff] }
0x1470   :  { %5323 = vmatprep.subr.bf16.mxu1 %v5167_v40  ;;  %5405 = vmatprep.subr.bf16.mxu0 %v5169_v9  ;;  %v5172_v55 = vld [vmem:[#allocation10 + $0x50] sm:$0xff]  ;;  %v5175_v8 = vld [vmem:[#allocation10 + $0x68] sm:$0xff]  ;;  %v5177_v19 = vld [vmem:[#allocation10 + $0x78] sm:$0xff] }
0x1471   :  { %v5174_v11 = vld [vmem:[#allocation10 + $0x60] sm:$0xff]  ;;  %v5176_v32 = vld [vmem:[#allocation10 + $0x70] sm:$0xff]  ;;  %v5179_v4 = vld [vmem:[#allocation10 + $0x88] sm:$0xff] }
0x1472   :  { %v5181_v21 = vld [vmem:[#allocation10 + $0x98] sm:$0xff]  ;;  %v5178_v0 = vld [vmem:[#allocation10 + $0x80] sm:$0xff]  ;;  %v5180_v15 = vld [vmem:[#allocation10 + $0x90] sm:$0xff] }
0x1473   :  { %5324 = vmatpush1.bf16.msra.mxu1 %v5166_v38  ;;  %5406 = vmatpush1.bf16.msra.mxu0 %v5168_v39  ;;  %v5183_v45 = vld [vmem:[#allocation10 + $0xa8] sm:$0xff]  ;;  %v5185_v30 = vld [vmem:[#allocation10 + $0xb8] sm:$0xff]  ;;  %v5182_v42 = vld [vmem:[#allocation10 + $0xa0] sm:$0xff] }
0x1474   :  { %5325 = vmatprep.subr.bf16.mxu1 %v5171_v2  ;;  %5407 = vmatprep.subr.bf16.mxu0 %v5173_v53  ;;  %v5184_v14 = vld [vmem:[#allocation10 + $0xb0] sm:$0xff]  ;;  %v5187_v12 = vld [vmem:[#allocation10 + $0xc8] sm:$0xff]  ;;  %v5189_v36 = vld [vmem:[#allocation10 + $0xd8] sm:$0xff] }
0x1475   :  { %v5186_v16 = vld [vmem:[#allocation10 + $0xc0] sm:$0xff]  ;;  %v5188_v35 = vld [vmem:[#allocation10 + $0xd0] sm:$0xff]  ;;  %v5191_v24 = vld [vmem:[#allocation10 + $0xe8] sm:$0xff] }
0x1476   :  { %v5193_v49 = vld [vmem:[#allocation10 + $0xf8] sm:$0xff]  ;;  %v5190_v54 = vld [vmem:[#allocation10 + $0xe0] sm:$0xff]  ;;  %v5192_v59 = vld [vmem:[#allocation10 + $0xf0] sm:$0xff] }
0x1477   :  { %5326 = vmatpush1.bf16.msra.mxu1 %v5170_v44  ;;  %5408 = vmatpush1.bf16.msra.mxu0 %v5172_v55  ;;  %v5195_v60 = vld [vmem:[#allocation10 + $0x108] sm:$0xff]  ;;  %v5197_v23 = vld [vmem:[#allocation10 + $0x118] sm:$0xff]  ;;  %v5194_v10 = vld [vmem:[#allocation10 + $0x100] sm:$0xff] }
0x1478   :  { %5327 = vmatprep.subr.bf16.mxu1 %v5175_v8  ;;  %5409 = vmatprep.subr.bf16.mxu0 %v5177_v19  ;;  %v5196_v25 = vld [vmem:[#allocation10 + $0x110] sm:$0xff]  ;;  %v5199_v33 = vld [vmem:[#allocation10 + $0x128] sm:$0xff]  ;;  %v5201_v26 = vld [vmem:[#allocation10 + $0x138] sm:$0xff]  ;;  %v5296_v8 = vpack.c.bf16 %v9264_v22, %v9264_v22 }
0x1479   :  { %v5198_v31 = vld [vmem:[#allocation10 + $0x120] sm:$0xff]  ;;  %v5200_v20 = vld [vmem:[#allocation10 + $0x130] sm:$0xff]  ;;  %v5203_v58 = vld [vmem:[#allocation10 + $0x148] sm:$0xff] }
0x147a   :  { %v5205_v52 = vld [vmem:[#allocation10 + $0x158] sm:$0xff]  ;;  %v5202_v7 = vld [vmem:[#allocation10 + $0x140] sm:$0xff]  ;;  %v5204_v27 = vld [vmem:[#allocation10 + $0x150] sm:$0xff] }
0x147b   :  { %5328 = vmatpush1.bf16.msra.mxu1 %v5174_v11  ;;  %5410 = vmatpush1.bf16.msra.mxu0 %v5176_v32  ;;  %v5207_v34 = vld [vmem:[#allocation10 + $0x168] sm:$0xff]  ;;  %v5209_v17 = vld [vmem:[#allocation10 + $0x178] sm:$0xff]  ;;  %v5206_v18 = vld [vmem:[#allocation10 + $0x160] sm:$0xff] }
0x147c   :  { %5329 = vmatprep.subr.bf16.mxu1 %v5179_v4  ;;  %5411 = vmatprep.subr.bf16.mxu0 %v5181_v21  ;;  %v5208_v62 = vld [vmem:[#allocation10 + $0x170] sm:$0xff]  ;;  %v5211_v28 = vld [vmem:[#allocation10 + $0x188] sm:$0xff]  ;;  %v5213_v41 = vld [vmem:[#allocation10 + $0x198] sm:$0xff]  ;;  %v5299_v21 = vpack.c.bf16 %v9268_v50, %v9268_v50 }
0x147d   :  { %v5210_v5 = vld [vmem:[#allocation10 + $0x180] sm:$0xff]  ;;  %v5212_v56 = vld [vmem:[#allocation10 + $0x190] sm:$0xff]  ;;  %v5215_v3 = vld [vmem:[#allocation10 + $0x1a8] sm:$0xff] }
0x147e   :  { %v5217_v61 = vld [vmem:[#allocation10 + $0x1b8] sm:$0xff]  ;;  %v5214_v63 = vld [vmem:[#allocation10 + $0x1a0] sm:$0xff]  ;;  %v5216_v1 = vld [vmem:[#allocation10 + $0x1b0] sm:$0xff] }
0x147f   :  { %5330 = vmatpush1.bf16.msra.mxu1 %v5178_v0  ;;  %5412 = vmatpush1.bf16.msra.mxu0 %v5180_v15  ;;  %v5219_v6 = vld [vmem:[#allocation10 + $0x1c8] sm:$0xff]  ;;  %v5221_v48 = vld [vmem:[#allocation10 + $0x1d8] sm:$0xff]  ;;  %v5218_v40 = vld [vmem:[#allocation10 + $0x1c0] sm:$0xff] }
0x1480   :  { %5331 = vmatprep.subr.bf16.mxu1 %v5183_v45  ;;  %5413 = vmatprep.subr.bf16.mxu0 %v5185_v30  ;;  %v5220_v9 = vld [vmem:[#allocation10 + $0x1d0] sm:$0xff]  ;;  %v5223_v38 = vld [vmem:[#allocation10 + $0x1e8] sm:$0xff]  ;;  %v5225_v39 = vld [vmem:[#allocation10 + $0x1f8] sm:$0xff] }
0x1481   :  { %v5222_v2 = vld [vmem:[#allocation10 + $0x1e0] sm:$0xff]  ;;  %v5224_v53 = vld [vmem:[#allocation10 + $0x1f0] sm:$0xff]  ;;  %v5227_v44 = vld [vmem:[#allocation10 + $0x208] sm:$0xff] }
0x1482   :  { %v5229_v55 = vld [vmem:[#allocation10 + $0x218] sm:$0xff]  ;;  %v5226_v19 = vld [vmem:[#allocation10 + $0x200] sm:$0xff]  ;;  %v5228_v11 = vld [vmem:[#allocation10 + $0x210] sm:$0xff] }
0x1483   :  { %5332 = vmatpush1.bf16.msra.mxu1 %v5182_v42  ;;  %5414 = vmatpush1.bf16.msra.mxu0 %v5184_v14  ;;  %v5231_v32 = vld [vmem:[#allocation10 + $0x228] sm:$0xff]  ;;  %v5233_v4 = vld [vmem:[#allocation10 + $0x238] sm:$0xff]  ;;  %v5230_v0 = vld [vmem:[#allocation10 + $0x220] sm:$0xff] }
0x1484   :  { %5333 = vmatprep.subr.bf16.mxu1 %v5187_v12  ;;  %5415 = vmatprep.subr.bf16.mxu0 %v5189_v36  ;;  %v5232_v15 = vld [vmem:[#allocation10 + $0x230] sm:$0xff]  ;;  %v5235_v22 = vld [vmem:[#allocation10 + $0x248] sm:$0xff]  ;;  %v5237_v45 = vld [vmem:[#allocation10 + $0x258] sm:$0xff] }
0x1485   :  { %v5234_v30 = vld [vmem:[#allocation10 + $0x240] sm:$0xff]  ;;  %v5236_v42 = vld [vmem:[#allocation10 + $0x250] sm:$0xff]  ;;  %v5239_v14 = vld [vmem:[#allocation10 + $0x268] sm:$0xff] }
0x1486   :  { %v5241_v50 = vld [vmem:[#allocation10 + $0x278] sm:$0xff]  ;;  %v5238_v12 = vld [vmem:[#allocation10 + $0x260] sm:$0xff]  ;;  %v5240_v36 = vld [vmem:[#allocation10 + $0x270] sm:$0xff] }
0x1487   :  { %5334 = vmatpush1.bf16.msra.mxu1 %v5186_v16  ;;  %5416 = vmatpush1.bf16.msra.mxu0 %v5188_v35  ;;  %v5243_v16 = vld [vmem:[#allocation10 + $0x288] sm:$0xff]  ;;  %v5245_v35 = vld [vmem:[#allocation10 + $0x298] sm:$0xff] }
0x1488   :  { %5335 = vmatprep.subr.bf16.mxu1 %v5191_v24  ;;  %5417 = vmatprep.subr.bf16.mxu0 %v5193_v49  ;;  %v5242_v24 = vld [vmem:[#allocation10 + $0x280] sm:$0xff]  ;;  %v5244_v49 = vld [vmem:[#allocation10 + $0x290] sm:$0xff] }
0x148b   :  { %5336 = vmatpush1.bf16.msra.mxu1 %v5190_v54  ;;  %5418 = vmatpush1.bf16.msra.mxu0 %v5192_v59  ;;  %v5247_v54 = vld [vmem:[#allocation10 + $0x2a8] sm:$0xff]  ;;  %v5249_v59 = vld [vmem:[#allocation10 + $0x2b8] sm:$0xff] }
0x148c   :  { %5337 = vmatprep.subr.bf16.mxu1 %v5195_v60  ;;  %5419 = vmatprep.subr.bf16.mxu0 %v5197_v23  ;;  %v5246_v60 = vld [vmem:[#allocation10 + $0x2a0] sm:$0xff]  ;;  %v5248_v23 = vld [vmem:[#allocation10 + $0x2b0] sm:$0xff] }
0x148f   :  { %5338 = vmatpush1.bf16.msra.mxu1 %v5194_v10  ;;  %5420 = vmatpush1.bf16.msra.mxu0 %v5196_v25  ;;  %v5251_v10 = vld [vmem:[#allocation10 + $0x2c8] sm:$0xff]  ;;  %v5253_v25 = vld [vmem:[#allocation10 + $0x2d8] sm:$0xff] }
0x1490   :  { %5339 = vmatprep.subr.bf16.mxu1 %v5199_v33  ;;  %5421 = vmatprep.subr.bf16.mxu0 %v5201_v26  ;;  %v5250_v33 = vld [vmem:[#allocation10 + $0x2c0] sm:$0xff]  ;;  %v5252_v26 = vld [vmem:[#allocation10 + $0x2d0] sm:$0xff] }
0x1493   :  { %5340 = vmatpush1.bf16.msra.mxu1 %v5198_v31  ;;  %5422 = vmatpush1.bf16.msra.mxu0 %v5200_v20  ;;  %v5255_v31 = vld [vmem:[#allocation10 + $0x2e8] sm:$0xff]  ;;  %v5257_v20 = vld [vmem:[#allocation10 + $0x2f8] sm:$0xff] }
0x1494   :  { %5341 = vmatprep.subr.bf16.mxu1 %v5203_v58  ;;  %5423 = vmatprep.subr.bf16.mxu0 %v5205_v52  ;;  %v5254_v58 = vld [vmem:[#allocation10 + $0x2e0] sm:$0xff]  ;;  %v5256_v52 = vld [vmem:[#allocation10 + $0x2f0] sm:$0xff] }
0x1497   :  { %5342 = vmatpush1.bf16.msra.mxu1 %v5202_v7  ;;  %5424 = vmatpush1.bf16.msra.mxu0 %v5204_v27  ;;  %v5259_v7 = vld [vmem:[#allocation10 + $0x308] sm:$0xff]  ;;  %v5261_v27 = vld [vmem:[#allocation10 + $0x318] sm:$0xff] }
0x1498   :  { %5343 = vmatprep.subr.bf16.mxu1 %v5207_v34  ;;  %5425 = vmatprep.subr.bf16.mxu0 %v5209_v17  ;;  %v5258_v34 = vld [vmem:[#allocation10 + $0x300] sm:$0xff]  ;;  %v5260_v17 = vld [vmem:[#allocation10 + $0x310] sm:$0xff] }
0x149b   :  { %5344 = vmatpush1.bf16.msra.mxu1 %v5206_v18  ;;  %5426 = vmatpush1.bf16.msra.mxu0 %v5208_v62  ;;  %v5263_v18 = vld [vmem:[#allocation10 + $0x328] sm:$0xff]  ;;  %v5265_v62 = vld [vmem:[#allocation10 + $0x338] sm:$0xff] }
0x149c   :  { %5345 = vmatprep.subr.bf16.mxu1 %v5211_v28  ;;  %5427 = vmatprep.subr.bf16.mxu0 %v5213_v41  ;;  %v5262_v28 = vld [vmem:[#allocation10 + $0x320] sm:$0xff]  ;;  %v5264_v41 = vld [vmem:[#allocation10 + $0x330] sm:$0xff] }
0x149f   :  { %5346 = vmatpush1.bf16.msra.mxu1 %v5210_v5  ;;  %5428 = vmatpush1.bf16.msra.mxu0 %v5212_v56  ;;  %v5267_v5 = vld [vmem:[#allocation10 + $0x348] sm:$0xff]  ;;  %v5269_v56 = vld [vmem:[#allocation10 + $0x358] sm:$0xff] }
0x14a0   :  { %5347 = vmatprep.subr.bf16.mxu1 %v5215_v3  ;;  %5429 = vmatprep.subr.bf16.mxu0 %v5217_v61  ;;  %v5266_v3 = vld [vmem:[#allocation10 + $0x340] sm:$0xff]  ;;  %v5268_v61 = vld [vmem:[#allocation10 + $0x350] sm:$0xff] }
0x14a3   :  { %5348 = vmatpush1.bf16.msra.mxu1 %v5214_v63  ;;  %5430 = vmatpush1.bf16.msra.mxu0 %v5216_v1  ;;  %v5271_v63 = vld [vmem:[#allocation10 + $0x368] sm:$0xff]  ;;  %v5273_v1 = vld [vmem:[#allocation10 + $0x378] sm:$0xff] }
0x14a4   :  { %5349 = vmatprep.subr.bf16.mxu1 %v5219_v6  ;;  %5431 = vmatprep.subr.bf16.mxu0 %v5221_v48  ;;  %v5270_v6 = vld [vmem:[#allocation10 + $0x360] sm:$0xff]  ;;  %v5272_v48 = vld [vmem:[#allocation10 + $0x370] sm:$0xff] }
0x14a7   :  { %5350 = vmatpush1.bf16.msra.mxu1 %v5218_v40  ;;  %5432 = vmatpush1.bf16.msra.mxu0 %v5220_v9  ;;  %v5275_v40 = vld [vmem:[#allocation10 + $0x388] sm:$0xff]  ;;  %v5277_v9 = vld [vmem:[#allocation10 + $0x398] sm:$0xff] }
0x14a8   :  { %5351 = vmatprep.subr.bf16.mxu1 %v5223_v38  ;;  %5433 = vmatprep.subr.bf16.mxu0 %v5225_v39  ;;  %v5274_v38 = vld [vmem:[#allocation10 + $0x380] sm:$0xff]  ;;  %v5276_v39 = vld [vmem:[#allocation10 + $0x390] sm:$0xff] }
0x14ab   :  { %5352 = vmatpush1.bf16.msra.mxu1 %v5222_v2  ;;  %5434 = vmatpush1.bf16.msra.mxu0 %v5224_v53  ;;  %v5279_v2 = vld [vmem:[#allocation10 + $0x3a8] sm:$0xff]  ;;  %v5281_v53 = vld [vmem:[#allocation10 + $0x3b8] sm:$0xff] }
0x14ac   :  { %5362 = vmatprep.subr.bf16.mxu1 %v5227_v44  ;;  %5444 = vmatprep.subr.bf16.mxu0 %v5229_v55  ;;  %v5278_v44 = vld [vmem:[#allocation10 + $0x3a0] sm:$0xff]  ;;  %v5280_v55 = vld [vmem:[#allocation10 + $0x3b0] sm:$0xff] }
0x14ae   :  { %5354 = vmatmul.mubr.bf16.vlgmr.msra.gmra.mrb[48].mxu1 %v5296_v8  ;;  %5436 = vmatmul.mubr.bf16.vlgmr.msra.gmra.mrb[52].mxu0 %v5296_v8  ;;  %v5283_v8 = vld [vmem:[#allocation10 + $0x3c8] sm:$0xff] }
0x14af   :  { %5363 = vmatpush1.bf16.msra.mxu1 %v5226_v19  ;;  %5445 = vmatpush1.bf16.msra.mxu0 %v5228_v11  ;;  %v5285_v19 = vld [vmem:[#allocation10 + $0x3d8] sm:$0xff]  ;;  %v5282_v11 = vld [vmem:[#allocation10 + $0x3c0] sm:$0xff] }
0x14b0   :  { %5364 = vmatprep.subr.bf16.mxu1 %v5231_v32  ;;  %5446 = vmatprep.subr.bf16.mxu0 %v5233_v4  ;;  %v5284_v32 = vld [vmem:[#allocation10 + $0x3d0] sm:$0xff]  ;;  %v5287_v4 = vld [vmem:[#allocation10 + $0x3e8] sm:$0xff] }
0x14b1   :  { %5394 = vmatprep.mubr.bf16.mxu1 %v5299_v21  ;;  %5476 = vmatprep.mubr.bf16.mxu0 %v5299_v21  ;;  %v5289_v21 = vld [vmem:[#allocation10 + $0x3f8] sm:$0xff] }
0x14b3   :  { %5365 = vmatpush1.bf16.msra.mxu1 %v5230_v0  ;;  %5447 = vmatpush1.bf16.msra.mxu0 %v5232_v15  ;;  %v5286_v0 = vld [vmem:[#allocation10 + $0x3e0] sm:$0xff]  ;;  %v5288_v15 = vld [vmem:[#allocation10 + $0x3f0] sm:$0xff] }
0x14b4   :  { %5366 = vmatprep.subr.bf16.mxu1 %v5235_v22  ;;  %5448 = vmatprep.subr.bf16.mxu0 %v5237_v45  ;;  %v5298_v22 = vpack.c.bf16 %v9266_v37, %v9266_v37  ;;  %v5291_v45 = vld [vmem:[#allocation22 + $0x87] ss:$8 sm:$0xf] }
0x14b5   :  { %v5316_v37 = vrot.slane %v5291_v45, %v9846_v13 }
0x14b7   :  { %5367 = vmatpush1.bf16.msra.mxu1 %v5234_v30  ;;  %5449 = vmatpush1.bf16.msra.mxu0 %v5236_v42  ;;  %v5304_v30 = vrot.slane %v5291_v45, %v9843_v46  ;;  %v5312_v42 = vrot.slane %v5291_v45, %v9845_v29 }
0x14b8   :  { %5368 = vmatprep.subr.bf16.mxu1 %v5239_v14  ;;  %5450 = vmatprep.subr.bf16.mxu0 %v5241_v50  ;;  %v5308_v14 = vrot.slane %v5291_v45, %v9844_v57 }
0x14bb   :  { %5369 = vmatpush1.bf16.msra.mxu1 %v5238_v12  ;;  %5451 = vmatpush1.bf16.msra.mxu0 %v5240_v36 }
0x14bc   :  { %5370 = vmatprep.subr.bf16.mxu1 %v5243_v16  ;;  %5452 = vmatprep.subr.bf16.mxu0 %v5245_v35 }
0x14bf   :  { %5371 = vmatpush1.bf16.msra.mxu1 %v5242_v24  ;;  %5453 = vmatpush1.bf16.msra.mxu0 %v5244_v49 }
0x14c0   :  { %5372 = vmatprep.subr.bf16.mxu1 %v5247_v54  ;;  %5454 = vmatprep.subr.bf16.mxu0 %v5249_v59 }
0x14c3   :  { %5373 = vmatpush1.bf16.msra.mxu1 %v5246_v60  ;;  %5455 = vmatpush1.bf16.msra.mxu0 %v5248_v23 }
0x14c4   :  { %5374 = vmatprep.subr.bf16.mxu1 %v5251_v10  ;;  %5456 = vmatprep.subr.bf16.mxu0 %v5253_v25 }
0x14c7   :  { %5375 = vmatpush1.bf16.msra.mxu1 %v5250_v33  ;;  %5457 = vmatpush1.bf16.msra.mxu0 %v5252_v26 }
0x14c8   :  { %5376 = vmatprep.subr.bf16.mxu1 %v5255_v31  ;;  %5458 = vmatprep.subr.bf16.mxu0 %v5257_v20 }
0x14cb   :  { %5377 = vmatpush1.bf16.msra.mxu1 %v5254_v58  ;;  %5459 = vmatpush1.bf16.msra.mxu0 %v5256_v52 }
0x14cc   :  { %5378 = vmatprep.subr.bf16.mxu1 %v5259_v7  ;;  %5460 = vmatprep.subr.bf16.mxu0 %v5261_v27 }
0x14cf   :  { %5379 = vmatpush1.bf16.msra.mxu1 %v5258_v34  ;;  %5461 = vmatpush1.bf16.msra.mxu0 %v5260_v17 }
0x14d0   :  { %5380 = vmatprep.subr.bf16.mxu1 %v5263_v18  ;;  %5462 = vmatprep.subr.bf16.mxu0 %v5265_v62 }
0x14d3   :  { %5381 = vmatpush1.bf16.msra.mxu1 %v5262_v28  ;;  %5463 = vmatpush1.bf16.msra.mxu0 %v5264_v41 }
0x14d4   :  { %5382 = vmatprep.subr.bf16.mxu1 %v5267_v5  ;;  %5464 = vmatprep.subr.bf16.mxu0 %v5269_v56 }
0x14d7   :  { %5383 = vmatpush1.bf16.msra.mxu1 %v5266_v3  ;;  %5465 = vmatpush1.bf16.msra.mxu0 %v5268_v61  ;;  %v5293_v3 = vld [vmem:[#allocation22 + $0xc0] ss:$8 sm:$0xf]  ;;  %v5295_v61 = vld [vmem:[#allocation22 + $0xc1] ss:$8 sm:$0xf] }
0x14d8   :  { %5384 = vmatprep.subr.bf16.mxu1 %v5271_v63  ;;  %5466 = vmatprep.subr.bf16.mxu0 %v5273_v1  ;;  %v5517_v63 = vrot.slane %v5293_v3, %v9843_v46  ;;  %v5521_v1 = vrot.slane %v5293_v3, %v9844_v57 }
0x14db   :  { %5385 = vmatpush1.bf16.msra.mxu1 %v5270_v6  ;;  %5467 = vmatpush1.bf16.msra.mxu0 %v5272_v48  ;;  %v5525_v6 = vrot.slane %v5293_v3, %v9845_v29  ;;  %v5529_v48 = vrot.slane %v5293_v3, %v9846_v13 }
0x14dc   :  { %5386 = vmatprep.subr.bf16.mxu1 %v5275_v40  ;;  %5468 = vmatprep.subr.bf16.mxu0 %v5277_v9 }
0x14df   :  { %5387 = vmatpush1.bf16.msra.mxu1 %v5274_v38  ;;  %5469 = vmatpush1.bf16.msra.mxu0 %v5276_v39 }
0x14e0   :  { %5388 = vmatprep.subr.bf16.mxu1 %v5279_v2  ;;  %5470 = vmatprep.subr.bf16.mxu0 %v5281_v53  ;;  %v5542_v53 = vrot.slane %v5295_v61, %v9843_v46 }
0x14e3   :  { %5389 = vmatpush1.bf16.msra.mxu1 %v5278_v44  ;;  %5471 = vmatpush1.bf16.msra.mxu0 %v5280_v55  ;;  %v5546_v44 = vrot.slane %v5295_v61, %v9844_v57  ;;  %v5550_v55 = vrot.slane %v5295_v61, %v9845_v29 }
0x14e4   :  { %5390 = vmatprep.subr.bf16.mxu1 %v5283_v8  ;;  %5472 = vmatprep.subr.bf16.mxu0 %v5285_v19  ;;  %v5554_v8 = vrot.slane %v5295_v61, %v9846_v13 }
0x14e7   :  { %5391 = vmatpush1.bf16.msra.mxu1 %v5282_v11  ;;  %5473 = vmatpush1.bf16.msra.mxu0 %v5284_v32 }
0x14e8   :  { %5392 = vmatprep.subr.bf16.mxu1 %v5287_v4  ;;  %5474 = vmatprep.subr.bf16.mxu0 %v5289_v21 }
0x14eb   :  { %5393 = vmatpush1.bf16.msra.mxu1 %v5286_v0  ;;  %5475 = vmatpush1.bf16.msra.mxu0 %v5288_v15 }
0x14ee   :  { %5395 = vmatmul.mubr.bf16.vlgmr.msra.gmra.mrb[48].mxu1 %v5298_v22  ;;  %5477 = vmatmul.mubr.bf16.vlgmr.msra.gmra.mrb[52].mxu0 %v5298_v22 }
0x15c1   :  { %v5396_v50 = vpop.f32.mrb[48].mxu1  ;;  %v5478_v12 = vpop.f32.mrb[52].mxu0 }
0x15c2   :  { %v7451_v36 = vadd.f32 %v5396_v50, %v5304_v30  ;;  %v5398_v16 = vpop.f32.mrb[49].mxu1  ;;  %v5480_v35 = vpop.f32.mrb[53].mxu0  ;;  %v7453_v24 = vadd.f32 %v5478_v12, %v5312_v42 }
0x15c3   :  { %v7452_v49 = vadd.f32 %v5398_v16, %v5308_v14  ;;  %v5400_v54 = vpop.f32.mrb[50].mxu1  ;;  %v5482_v59 = vpop.f32.mrb[54].mxu0  ;;  %v7454_v31 = vadd.f32 %v5480_v35, %v5316_v37 }
0x15c4   :  { %v5491_v60 = vmul.f32 %v7451_v36, %v7451_v36  ;;  %v5401_v23 = vpop.f32.mrb[51].mxu1  ;;  %v5483_v10 = vpop.f32.mrb[55].mxu0  ;;  %v5493_v26 = vmul.f32 %v7453_v24, %v7453_v24 }
0x15c5   :  { %v5492_v25 = vmul.f32 %v7452_v49, %v7452_v49  ;;  %v5485_v33 = vadd.f32 %v7452_v49, %v7451_v36  ;;  %v5494_v27 = vmul.f32 %v7454_v31, %v7454_v31 }
0x15c7   :  { %v5486_v20 = vadd.f32 %v7453_v24, %v5485_v33  ;;  %v5495_v58 = vadd.f32 %v5492_v25, %v5491_v60 }
0x15c9   :  { %v5487_v52 = vadd.f32 %v7454_v31, %v5486_v20  ;;  %v5496_v7 = vadd.f32 %v5495_v58, %v5493_v26 }
0x15cb   :  { %5488 = vadd.xlane.f32.xlu0 %v5487_v52  ;;  %v5497_v34 = vadd.f32 %v5496_v7, %v5494_v27 }
0x15cf   :  { %5498 = vadd.xlane.f32.xlu0 %v5497_v34 }
0x1658   :  { %v5489_v17 = vpop.xlane.xlu0 %5488 }
0x1659   :  { %v5490_v18 = vmul.f32 0.001953125, %v5489_v17 }
0x165b   :  { %v5501_v28 = vmul.f32 %v5490_v18, %v5490_v18  ;;  %v5503_v40 = vsub.f32 %v7451_v36, %v5490_v18  ;;  %v5504_v9 = vsub.f32 %v7452_v49, %v5490_v18  ;;  %v5505_v38 = vsub.f32 %v7453_v24, %v5490_v18 }
0x165c   :  { %v5499_v62 = vpop.xlane.xlu0 %5498  ;;  %v5506_v39 = vsub.f32 %v7454_v31, %v5490_v18 }
0x165d   :  { %v5500_v41 = vmul.f32 0.001953125, %v5499_v62 }
0x165f   :  { %v5502_v5 = vsub.f32 %v5500_v41, %v5501_v28 }
0x1661   :  { %v5507_v56 = vadd.f32 1e-05, %v5502_v5 }
0x1663   :  { %7651 = vrsqrt.f32 %v5507_v56 }
0x166d   :  { %v7652_v2 = vpop.eup %7651 }
0x166e   :  { %v5509_v19 = vmul.f32 %v7652_v2, %v5503_v40  ;;  %v5510_v11 = vmul.f32 %v7652_v2, %v5504_v9  ;;  %v5511_v32 = vmul.f32 %v7652_v2, %v5505_v38  ;;  %v5512_v4 = vmul.f32 %v7652_v2, %v5506_v39 }
0x1670   :  { %v5534_v21 = vmul.f32 %v5517_v63, %v5509_v19  ;;  %v5535_v0 = vmul.f32 %v5521_v1, %v5510_v11  ;;  %v5536_v15 = vmul.f32 %v5525_v6, %v5511_v32  ;;  %v5537_v22 = vmul.f32 %v5529_v48, %v5512_v4 }
0x1672   :  { %v9288_v45 = vadd.f32 %v5542_v53, %v5534_v21  ;;  %v5560_v30 = vadd.f32 %v5546_v44, %v5535_v0  ;;  %v9290_v42 = vadd.f32 %v5550_v55, %v5536_v15  ;;  %v9292_v14 = vadd.f32 %v5554_v8, %v5537_v22 }
0x1674   :  { %v5563_v50 = vmax.f32 %v9288_v45, 0.0  ;;  %v5564_v12 = vmax.f32 %v5560_v30, 0.0  ;;  %v5565_v36 = vmax.f32 %v9290_v42, 0.0  ;;  %v5566_v16 = vmax.f32 %v9292_v14, 0.0 }
0x1675   :  { %7827 = dma.done.wait [#allocation16 + $0x9], 12288 }
0x1676   :  { %7828 = vsyncadd [#allocation16 + $0x9], 4294955008  ;;  %v5673_v35 = vpack.c.bf16 %v5564_v12, %v5564_v12  ;;  %v5571_v24 = vld [vmem:[#allocation11 + $0x8] sm:$0xff]  ;;  %v5570_v49 = vld [vmem:[#allocation11] sm:$0xff]  ;;  %v5672_v21 = vpack.c.bf16 %v5563_v50, %v5563_v50 }
0x1677   :  { %v5574_v37 = vld [vmem:[#allocation11 + $0x20] sm:$0xff]  ;;  %5692 = vmatprep.subr.bf16.mxu1 %v5571_v24  ;;  %v5573_v54 = vld [vmem:[#allocation11 + $0x18] sm:$0xff]  ;;  %v5576_v60 = vld [vmem:[#allocation11 + $0x30] sm:$0xff] }
0x1678   :  { %5724 = vmatprep.mubr.bf16.mxu1 %v5673_v35  ;;  %5806 = vmatprep.mubr.bf16.mxu0 %v5673_v35  ;;  %v5577_v59 = vld [vmem:[#allocation11 + $0x38] sm:$0xff]  ;;  %v5580_v23 = vld [vmem:[#allocation11 + $0x50] sm:$0xff]  ;;  %v5579_v10 = vld [vmem:[#allocation11 + $0x48] sm:$0xff]  ;;  %v9303_v35 = vpack.c.bf16 %v5566_v16, %v5566_v16 }
0x1679   :  { %5693 = vmatpush1.bf16.msra.mxu1 %v5570_v49  ;;  %v5583_v25 = vld [vmem:[#allocation11 + $0x68] sm:$0xff]  ;;  %v5582_v33 = vld [vmem:[#allocation11 + $0x60] sm:$0xff]  ;;  %v5585_v31 = vld [vmem:[#allocation11 + $0x78] sm:$0xff] }
0x167a   :  { %5694 = vmatprep.subr.bf16.mxu1 %v5574_v37  ;;  %v5586_v26 = vld [vmem:[#allocation11 + $0x80] sm:$0xff]  ;;  %v5589_v20 = vld [vmem:[#allocation11 + $0x98] sm:$0xff]  ;;  %v5596_v58 = vld [vmem:[#allocation11 + $0xd0] sm:$0xff] }
0x167b   :  { %7249 = vmatprep.subr.bf16.mxu0 %v5596_v58  ;;  %v5572_v52 = vld [vmem:[#allocation11 + $0x10] sm:$0xff]  ;;  %v5599_v7 = vld [vmem:[#allocation11 + $0xe8] sm:$0xff]  ;;  %v5602_v18 = vld [vmem:[#allocation11 + $0x100] sm:$0xff] }
0x167c   :  { %7250 = vmatpush3.bf16.msra.mxu0 %v5572_v52  ;;  %v5588_v27 = vld [vmem:[#allocation11 + $0x90] sm:$0xff]  ;;  %v5575_v34 = vld [vmem:[#allocation11 + $0x28] sm:$0xff]  ;;  %v5578_v28 = vld [vmem:[#allocation11 + $0x40] sm:$0xff] }
0x167d   :  { %5695 = vmatpush1.bf16.msra.mxu1 %v5573_v54  ;;  %7251 = vmatprep.subr.bf16.mxu0 %v5599_v7  ;;  %v5592_v17 = vld [vmem:[#allocation11 + $0xb0] sm:$0xff]  ;;  %v5591_v62 = vld [vmem:[#allocation11 + $0xa8] sm:$0xff]  ;;  %v5605_v5 = vld [vmem:[#allocation11 + $0x118] sm:$0xff] }
0x167e   :  { %5696 = vmatprep.subr.bf16.mxu1 %v5577_v59  ;;  %v5595_v41 = vld [vmem:[#allocation11 + $0xc8] sm:$0xff]  ;;  %v5594_v56 = vld [vmem:[#allocation11 + $0xc0] sm:$0xff]  ;;  %v5581_v3 = vld [vmem:[#allocation11 + $0x58] sm:$0xff] }
0x167f   :  { %v5598_v61 = vld [vmem:[#allocation11 + $0xe0] sm:$0xff]  ;;  %v5608_v63 = vld [vmem:[#allocation11 + $0x130] sm:$0xff]  ;;  %v5597_v1 = vld [vmem:[#allocation11 + $0xd8] sm:$0xff] }
0x1680   :  { %7252 = vmatpush3.bf16.msra.mxu0 %v5575_v34  ;;  %v5584_v6 = vld [vmem:[#allocation11 + $0x70] sm:$0xff]  ;;  %v5601_v48 = vld [vmem:[#allocation11 + $0xf8] sm:$0xff]  ;;  %v5611_v40 = vld [vmem:[#allocation11 + $0x148] sm:$0xff] }
0x1681   :  { %5697 = vmatpush1.bf16.msra.mxu1 %v5576_v60  ;;  %7253 = vmatprep.subr.bf16.mxu0 %v5602_v18  ;;  %v5600_v9 = vld [vmem:[#allocation11 + $0xf0] sm:$0xff]  ;;  %v5587_v38 = vld [vmem:[#allocation11 + $0x88] sm:$0xff]  ;;  %v5614_v2 = vld [vmem:[#allocation11 + $0x160] sm:$0xff] }
0x1682   :  { %5698 = vmatprep.subr.bf16.mxu1 %v5580_v23  ;;  %v5604_v39 = vld [vmem:[#allocation11 + $0x110] sm:$0xff]  ;;  %v5603_v53 = vld [vmem:[#allocation11 + $0x108] sm:$0xff]  ;;  %v5590_v44 = vld [vmem:[#allocation11 + $0xa0] sm:$0xff] }
0x1683   :  { %v5607_v55 = vld [vmem:[#allocation11 + $0x128] sm:$0xff]  ;;  %v5617_v8 = vld [vmem:[#allocation11 + $0x178] sm:$0xff]  ;;  %v5606_v19 = vld [vmem:[#allocation11 + $0x120] sm:$0xff] }
0x1684   :  { %7254 = vmatpush3.bf16.msra.mxu0 %v5578_v28  ;;  %v5593_v11 = vld [vmem:[#allocation11 + $0xb8] sm:$0xff]  ;;  %v5610_v32 = vld [vmem:[#allocation11 + $0x140] sm:$0xff]  ;;  %v5612_v15 = vld [vmem:[#allocation11 + $0x150] sm:$0xff] }
0x1685   :  { %5699 = vmatpush1.bf16.msra.mxu1 %v5579_v10  ;;  %7255 = vmatprep.subr.bf16.mxu0 %v5605_v5  ;;  %v5609_v4 = vld [vmem:[#allocation11 + $0x138] sm:$0xff]  ;;  %v5616_v22 = vld [vmem:[#allocation11 + $0x170] sm:$0xff]  ;;  %v5615_v30 = vld [vmem:[#allocation11 + $0x168] sm:$0xff] }
0x1686   :  { %5700 = vmatprep.subr.bf16.mxu1 %v5583_v25  ;;  %v5613_v0 = vld [vmem:[#allocation11 + $0x158] sm:$0xff]  ;;  %v5619_v12 = vld [vmem:[#allocation11 + $0x188] sm:$0xff]  ;;  %v5618_v45 = vld [vmem:[#allocation11 + $0x180] sm:$0xff] }
0x1687   :  { %v5622_v24 = vld [vmem:[#allocation11 + $0x1a0] sm:$0xff]  ;;  %v5621_v50 = vld [vmem:[#allocation11 + $0x198] sm:$0xff]  ;;  %v5624_v37 = vld [vmem:[#allocation11 + $0x1b0] sm:$0xff] }
0x1688   :  { %7256 = vmatpush3.bf16.msra.mxu0 %v5581_v3  ;;  %v5625_v49 = vld [vmem:[#allocation11 + $0x1b8] sm:$0xff]  ;;  %v5628_v54 = vld [vmem:[#allocation11 + $0x1d0] sm:$0xff]  ;;  %v5627_v14 = vld [vmem:[#allocation11 + $0x1c8] sm:$0xff] }
0x1689   :  { %5701 = vmatpush1.bf16.msra.mxu1 %v5582_v33  ;;  %7257 = vmatprep.subr.bf16.mxu0 %v5608_v63  ;;  %v5631_v59 = vld [vmem:[#allocation11 + $0x1e8] sm:$0xff]  ;;  %v5630_v16 = vld [vmem:[#allocation11 + $0x1e0] sm:$0xff]  ;;  %v5633_v23 = vld [vmem:[#allocation11 + $0x1f8] sm:$0xff] }
0x168a   :  { %5702 = vmatprep.subr.bf16.mxu1 %v5586_v26  ;;  %v5634_v60 = vld [vmem:[#allocation11 + $0x200] sm:$0xff]  ;;  %v5637_v10 = vld [vmem:[#allocation11 + $0x218] sm:$0xff]  ;;  %v5636_v25 = vld [vmem:[#allocation11 + $0x210] sm:$0xff] }
0x168b   :  { %v5640_v33 = vld [vmem:[#allocation11 + $0x230] sm:$0xff]  ;;  %v5639_v26 = vld [vmem:[#allocation11 + $0x228] sm:$0xff]  ;;  %v5646_v58 = vld [vmem:[#allocation11 + $0x260] sm:$0xff] }
0x168c   :  { %7258 = vmatpush3.bf16.msra.mxu0 %v5584_v6  ;;  %v5645_v52 = vld [vmem:[#allocation11 + $0x258] sm:$0xff]  ;;  %v5652_v34 = vld [vmem:[#allocation11 + $0x290] sm:$0xff]  ;;  %v5655_v18 = vld [vmem:[#allocation11 + $0x2a8] sm:$0xff] }
0x168d   :  { %5703 = vmatpush1.bf16.msra.mxu1 %v5585_v31  ;;  %7259 = vmatprep.subr.bf16.mxu0 %v5611_v40  ;;  %v5643_v31 = vld [vmem:[#allocation11 + $0x248] sm:$0xff]  ;;  %v5649_v7 = vld [vmem:[#allocation11 + $0x278] sm:$0xff]  ;;  %v5658_v28 = vld [vmem:[#allocation11 + $0x2c0] sm:$0xff] }
0x168e   :  { %5704 = vmatprep.subr.bf16.mxu1 %v5589_v20  ;;  %v5642_v20 = vld [vmem:[#allocation11 + $0x240] sm:$0xff]  ;;  %v5661_v5 = vld [vmem:[#allocation11 + $0x2d8] sm:$0xff]  ;;  %v5664_v3 = vld [vmem:[#allocation11 + $0x2f0] sm:$0xff] }
0x168f   :  { %v5644_v63 = vld [vmem:[#allocation11 + $0x250] sm:$0xff]  ;;  %v5623_v40 = vld [vmem:[#allocation11 + $0x1a8] sm:$0xff]  ;;  %v5629_v42 = vld [vmem:[#allocation11 + $0x1d8] sm:$0xff] }
0x1690   :  { %7260 = vmatpush3.bf16.msra.mxu0 %v5587_v38  ;;  %v5620_v6 = vld [vmem:[#allocation11 + $0x190] sm:$0xff]  ;;  %v5626_v38 = vld [vmem:[#allocation11 + $0x1c0] sm:$0xff] }
0x1691   :  { %5705 = vmatpush1.bf16.msra.mxu1 %v5588_v27  ;;  %7261 = vmatprep.subr.bf16.mxu0 %v5614_v2  ;;  %v5648_v27 = vld [vmem:[#allocation11 + $0x270] sm:$0xff] }
0x1692   :  { %5706 = vmatprep.subr.bf16.mxu1 %v5592_v17  ;;  %v5651_v17 = vld [vmem:[#allocation11 + $0x288] sm:$0xff]  ;;  %v5656_v2 = vld [vmem:[#allocation11 + $0x2b0] sm:$0xff] }
0x1694   :  { %7262 = vmatpush3.bf16.msra.mxu0 %v5590_v44  ;;  %v5635_v44 = vld [vmem:[#allocation11 + $0x208] sm:$0xff] }
0x1695   :  { %5707 = vmatpush1.bf16.msra.mxu1 %v5591_v62  ;;  %7263 = vmatprep.subr.bf16.mxu0 %v5617_v8  ;;  %v5654_v62 = vld [vmem:[#allocation11 + $0x2a0] sm:$0xff] }
0x1696   :  { %5708 = vmatprep.subr.bf16.mxu1 %v5595_v41  ;;  %v5657_v41 = vld [vmem:[#allocation11 + $0x2b8] sm:$0xff]  ;;  %v5638_v8 = vld [vmem:[#allocation11 + $0x220] sm:$0xff] }
0x1698   :  { %7264 = vmatpush3.bf16.msra.mxu0 %v5593_v11  ;;  %v5641_v11 = vld [vmem:[#allocation11 + $0x238] sm:$0xff] }
0x1699   :  { %5709 = vmatpush1.bf16.msra.mxu1 %v5594_v56  ;;  %v5660_v56 = vld [vmem:[#allocation11 + $0x2d0] sm:$0xff] }
0x169a   :  { %5710 = vmatprep.subr.bf16.mxu1 %v5598_v61  ;;  %v5663_v61 = vld [vmem:[#allocation11 + $0x2e8] sm:$0xff] }
0x169b   :  { %5807 = vmatmul.mubr.bf16.vlgmr.msra.gmra.mrb[56].mxu0 %v5672_v21 }
0x169d   :  { %5711 = vmatpush1.bf16.msra.mxu1 %v5597_v1  ;;  %v5674_v1 = vpack.c.bf16 %v5565_v36, %v5565_v36  ;;  %v5632_v36 = vld [vmem:[#allocation11 + $0x1f0] sm:$0xff] }
0x169e   :  { %5712 = vmatprep.subr.bf16.mxu1 %v5601_v48  ;;  %v5647_v48 = vld [vmem:[#allocation11 + $0x268] sm:$0xff] }
0x16a1   :  { %5713 = vmatpush1.bf16.msra.mxu1 %v5600_v9  ;;  %v5650_v9 = vld [vmem:[#allocation11 + $0x280] sm:$0xff] }
0x16a2   :  { %5714 = vmatprep.subr.bf16.mxu1 %v5604_v39  ;;  %v5653_v39 = vld [vmem:[#allocation11 + $0x298] sm:$0xff] }
0x16a5   :  { %5715 = vmatpush1.bf16.msra.mxu1 %v5603_v53  ;;  %v5659_v53 = vld [vmem:[#allocation11 + $0x2c8] sm:$0xff] }
0x16a6   :  { %5716 = vmatprep.subr.bf16.mxu1 %v5607_v55  ;;  %v5662_v55 = vld [vmem:[#allocation11 + $0x2e0] sm:$0xff] }
0x16a9   :  { %5717 = vmatpush1.bf16.msra.mxu1 %v5606_v19  ;;  %v5665_v19 = vld [vmem:[#allocation11 + $0x2f8] sm:$0xff] }
0x16aa   :  { %5718 = vmatprep.subr.bf16.mxu1 %v5610_v32 }
0x16ad   :  { %5719 = vmatpush1.bf16.msra.mxu1 %v5609_v4 }
0x16ae   :  { %5720 = vmatprep.subr.bf16.mxu1 %v5613_v0 }
0x16b1   :  { %5721 = vmatpush1.bf16.msra.mxu1 %v5612_v15 }
0x16b2   :  { %5722 = vmatprep.subr.bf16.mxu1 %v5616_v22 }
0x16b5   :  { %5723 = vmatpush1.bf16.msra.mxu1 %v5615_v30 }
0x16b6   :  { %5733 = vmatprep.subr.bf16.mxu1 %v5619_v12 }
0x16b8   :  { %5725 = vmatmul.mubr.bf16.vlgmr.msra.gmra.mrb[52].mxu1 %v5672_v21 }
0x16b9   :  { %5734 = vmatpush1.bf16.msra.mxu1 %v5618_v45  ;;  %5765 = vmatprep.mubr.bf16.mxu1 %v9303_v35  ;;  %v5667_v45 = vld [vmem:[#allocation22 + $0xc2] ss:$8 sm:$0x7] }
0x16ba   :  { %5735 = vmatprep.subr.bf16.mxu1 %v5622_v24  ;;  %v5680_v24 = vrot.slane %v5667_v45, %v9843_v46 }
0x16bd   :  { %5736 = vmatpush1.bf16.msra.mxu1 %v5621_v50  ;;  %v5684_v50 = vrot.slane %v5667_v45, %v9844_v57 }
0x16be   :  { %5737 = vmatprep.subr.bf16.mxu1 %v5625_v49  ;;  %v5688_v49 = vrot.slane %v5667_v45, %v9845_v29 }
0x16c1   :  { %5738 = vmatpush1.bf16.msra.mxu1 %v5624_v37 }
0x16c2   :  { %5739 = vmatprep.subr.bf16.mxu1 %v5628_v54 }
0x16c5   :  { %5740 = vmatpush1.bf16.msra.mxu1 %v5627_v14 }
0x16c6   :  { %5741 = vmatprep.subr.bf16.mxu1 %v5631_v59 }
0x16c9   :  { %5742 = vmatpush1.bf16.msra.mxu1 %v5630_v16 }
0x16ca   :  { %5743 = vmatprep.subr.bf16.mxu1 %v5634_v60 }
0x16cd   :  { %5744 = vmatpush1.bf16.msra.mxu1 %v5633_v23 }
0x16ce   :  { %5745 = vmatprep.subr.bf16.mxu1 %v5637_v10 }
0x16d1   :  { %5746 = vmatpush1.bf16.msra.mxu1 %v5636_v25 }
0x16d2   :  { %5747 = vmatprep.subr.bf16.mxu1 %v5640_v33 }
0x16d5   :  { %5748 = vmatpush1.bf16.msra.mxu1 %v5639_v26 }
0x16d6   :  { %5749 = vmatprep.subr.bf16.mxu1 %v5643_v31 }
0x16d9   :  { %5750 = vmatpush1.bf16.msra.mxu1 %v5642_v20 }
0x16da   :  { %5751 = vmatprep.subr.bf16.mxu1 %v5646_v58 }
0x16dd   :  { %5752 = vmatpush1.bf16.msra.mxu1 %v5645_v52 }
0x16de   :  { %5753 = vmatprep.subr.bf16.mxu1 %v5649_v7 }
0x16e1   :  { %5754 = vmatpush1.bf16.msra.mxu1 %v5648_v27 }
0x16e2   :  { %5755 = vmatprep.subr.bf16.mxu1 %v5652_v34 }
0x16e5   :  { %5756 = vmatpush1.bf16.msra.mxu1 %v5651_v17 }
0x16e6   :  { %5757 = vmatprep.subr.bf16.mxu1 %v5655_v18 }
0x16e9   :  { %5758 = vmatpush1.bf16.msra.mxu1 %v5654_v62 }
0x16ea   :  { %5759 = vmatprep.subr.bf16.mxu1 %v5658_v28 }
0x16ed   :  { %5760 = vmatpush1.bf16.msra.mxu1 %v5657_v41 }
0x16ee   :  { %5761 = vmatprep.subr.bf16.mxu1 %v5661_v5  ;;  %v5669_v5 = vld [vmem:[#allocation22 + $0xc3] ss:$8 sm:$0x7] }
0x16f1   :  { %5762 = vmatpush1.bf16.msra.mxu1 %v5660_v56  ;;  %v5671_v56 = vld [vmem:[#allocation22 + $0xc4] ss:$8 sm:$0x7] }
0x16f2   :  { %5763 = vmatprep.subr.bf16.mxu1 %v5664_v3  ;;  %v5882_v3 = vrot.slane %v5669_v5, %v9843_v46 }
0x16f5   :  { %5764 = vmatpush1.bf16.msra.mxu1 %v5663_v61  ;;  %v5886_v61 = vrot.slane %v5669_v5, %v9844_v57 }
0x16f6   :  { %7271 = vmatprep.subr.bf16.mxu1 %v5644_v63 }
0x16f8   :  { %5766 = vmatmul.mubr.bf16.vlgmr.msra.gmra.mrb[52].mxu1 %v5674_v1 }
0x16f9   :  { %7272 = vmatpush3.bf16.msra.mxu1 %v5620_v6  ;;  %5846 = vmatprep.mubr.bf16.mxu1 %v9303_v35 }
0x16fa   :  { %7273 = vmatprep.subr.bf16.mxu1 %v5647_v48  ;;  %v5890_v48 = vrot.slane %v5669_v5, %v9845_v29 }
0x16fd   :  { %7274 = vmatpush3.bf16.msra.mxu1 %v5623_v40 }
0x16fe   :  { %7275 = vmatprep.subr.bf16.mxu1 %v5650_v9  ;;  %v5901_v9 = vrot.slane %v5671_v56, %v9843_v46 }
0x1701   :  { %7276 = vmatpush3.bf16.msra.mxu1 %v5626_v38  ;;  %v5905_v38 = vrot.slane %v5671_v56, %v9844_v57 }
0x1702   :  { %7277 = vmatprep.subr.bf16.mxu1 %v5653_v39  ;;  %v5909_v39 = vrot.slane %v5671_v56, %v9845_v29 }
0x1705   :  { %7278 = vmatpush3.bf16.msra.mxu1 %v5629_v42 }
0x1706   :  { %7279 = vmatprep.subr.bf16.mxu1 %v5656_v2 }
0x1709   :  { %7280 = vmatpush3.bf16.msra.mxu1 %v5632_v36 }
0x170a   :  { %7281 = vmatprep.subr.bf16.mxu1 %v5659_v53 }
0x170d   :  { %7282 = vmatpush3.bf16.msra.mxu1 %v5635_v44 }
0x170e   :  { %7283 = vmatprep.subr.bf16.mxu1 %v5662_v55 }
0x1711   :  { %7284 = vmatpush3.bf16.msra.mxu1 %v5638_v8 }
0x1712   :  { %7285 = vmatprep.subr.bf16.mxu1 %v5665_v19 }
0x1715   :  { %7286 = vmatpush3.bf16.msra.mxu1 %v5641_v11 }
0x1718   :  { %5847 = vmatmul.mubr.bf16.vlgmr.msra.gmra.mrb[56].mxu1 %v5674_v1 }
0x176e   :  { %v7265_v32 = vpop.f32.mrb[56].mxu0 }
0x176f   :  { %v7266_v4 = vpop.f32.mrb[57].mxu0 }
0x1770   :  { %v7267_v21 = vadd.f32 %v7266_v4, %v7265_v32  ;;  %v7268_v0 = vpop.f32.mrb[58].mxu0 }
0x1771   :  { %v7269_v15 = vpop.f32.mrb[59].mxu0 }
0x1772   :  { %v5809_v14 = vadd.f32 %v7267_v21, %v5688_v49 }
0x17cb   :  { %v5767_v22 = vpop.f32.mrb[52].mxu1 }
0x17cc   :  { %v5769_v30 = vpop.f32.mrb[53].mxu1  ;;  %v7455_v37 = vadd.f32 %v5767_v22, %v5680_v24 }
0x17cd   :  { %v5771_v12 = vpop.f32.mrb[54].mxu1  ;;  %v7456_v54 = vadd.f32 %v5769_v30, %v5684_v50 }
0x17ce   :  { %v5772_v35 = vpop.f32.mrb[55].mxu1  ;;  %v5860_v25 = vmul.f32 %v7455_v37, %v7455_v37 }
0x17cf   :  { %v5861_v33 = vmul.f32 %v7456_v54, %v7456_v54  ;;  %v5854_v31 = vadd.f32 %v7456_v54, %v7455_v37 }
0x17d1   :  { %v5863_v52 = vadd.f32 %v5861_v33, %v5860_v25 }
0x17eb   :  { %v7287_v59 = vpop.f32.mrb[56].mxu1 }
0x17ec   :  { %v7288_v16 = vpop.f32.mrb[57].mxu1 }
0x17ed   :  { %v7289_v60 = vadd.f32 %v7288_v16, %v7287_v59  ;;  %v7290_v23 = vpop.f32.mrb[58].mxu1 }
0x17ee   :  { %v7291_v10 = vpop.f32.mrb[59].mxu1 }
0x17ef   :  { %v5849_v26 = vadd.f32 %v7289_v60, %v5809_v14 }
0x17f1   :  { %v5855_v20 = vadd.f32 %v5854_v31, %v5849_v26  ;;  %v5862_v58 = vmul.f32 %v5849_v26, %v5849_v26 }
0x17f3   :  { %5856 = vadd.xlane.f32.xlu0 %v5855_v20  ;;  %v5864_v7 = vadd.f32 %v5863_v52, %v5862_v58 }
0x17f7   :  { %5865 = vadd.xlane.f32.xlu0 %v5864_v7 }
0x1880   :  { %v5857_v27 = vpop.xlane.xlu0 %5856 }
0x1881   :  { %v5859_v34 = vmul.f32 0.0026041667, %v5857_v27 }
0x1883   :  { %v5868_v18 = vmul.f32 %v5859_v34, %v5859_v34  ;;  %v5870_v63 = vsub.f32 %v7455_v37, %v5859_v34  ;;  %v5871_v1 = vsub.f32 %v7456_v54, %v5859_v34  ;;  %v5872_v6 = vsub.f32 %v5849_v26, %v5859_v34 }
0x1884   :  { %v5866_v17 = vpop.xlane.xlu0 %5865 }
0x1885   :  { %v5867_v62 = vmul.f32 0.0026041667, %v5866_v17 }
0x1887   :  { %v5869_v28 = vsub.f32 %v5867_v62, %v5868_v18 }
0x1889   :  { %v5873_v41 = vadd.f32 1e-05, %v5869_v28 }
0x188b   :  { %7653 = vrsqrt.f32 %v5873_v41 }
0x1895   :  { %v7654_v40 = vpop.eup %7653 }
0x1896   :  { %v5875_v42 = vmul.f32 %v7654_v40, %v5870_v63  ;;  %v5876_v2 = vmul.f32 %v7654_v40, %v5871_v1  ;;  %v5877_v36 = vmul.f32 %v7654_v40, %v5872_v6 }
0x1898   :  { %v5894_v53 = vmul.f32 %v5882_v3, %v5875_v42  ;;  %v5895_v44 = vmul.f32 %v5886_v61, %v5876_v2  ;;  %v5896_v55 = vmul.f32 %v5890_v48, %v5877_v36 }
0x189a   :  { %v9319_v8 = vadd.f32 %v5901_v9, %v5894_v53  ;;  %v5914_v19 = vadd.f32 %v5905_v38, %v5895_v44  ;;  %v9321_v11 = vadd.f32 %v5909_v39, %v5896_v55 }
0x189c   :  { %v5916_v32 = vmax.f32 %v9319_v8, 0.0  ;;  %v5917_v4 = vmax.f32 %v5914_v19, 0.0  ;;  %v5918_v21 = vmax.f32 %v9321_v11, 0.0 }
0x189d   :  { %7829 = dma.done.wait [#allocation16 + $0xa], 6144 }
0x189e   :  { %7830 = vsyncadd [#allocation16 + $0xa], 4294961152  ;;  %v5978_v0 = vpack.c.bf16 %v5917_v4, %v5917_v4  ;;  %v5924_v15 = vld [vmem:[#allocation12 + $0x8] sm:$0xff]  ;;  %v5923_v22 = vld [vmem:[#allocation12] sm:$0xff]  ;;  %v5977_v56 = vpack.c.bf16 %v5916_v32, %v5916_v32  ;;  %v5979_v44 = vpack.c.bf16 %v5918_v21, %v5918_v21 }
0x189f   :  { %v5926_v30 = vld [vmem:[#allocation12 + $0x18] sm:$0xff]  ;;  %5991 = vmatprep.subr.bf16.mxu0 %v5924_v15  ;;  %v5925_v12 = vld [vmem:[#allocation12 + $0x10] sm:$0xff]  ;;  %v5928_v35 = vld [vmem:[#allocation12 + $0x28] sm:$0xff] }
0x18a0   :  { %6023 = vmatprep.mubr.bf16.mxu0 %v5978_v0  ;;  %5992 = vmatpush1.bf16.msra.mxu0 %v5923_v22  ;;  %v5927_v45 = vld [vmem:[#allocation12 + $0x20] sm:$0xff]  ;;  %v5930_v24 = vld [vmem:[#allocation12 + $0x38] sm:$0xff]  ;;  %v5929_v50 = vld [vmem:[#allocation12 + $0x30] sm:$0xff] }
0x18a1   :  { %5993 = vmatprep.subr.bf16.mxu0 %v5926_v30  ;;  %v5932_v49 = vld [vmem:[#allocation12 + $0x48] sm:$0xff]  ;;  %v5931_v37 = vld [vmem:[#allocation12 + $0x40] sm:$0xff]  ;;  %v5934_v54 = vld [vmem:[#allocation12 + $0x58] sm:$0xff] }
0x18a2   :  { %v5933_v14 = vld [vmem:[#allocation12 + $0x50] sm:$0xff]  ;;  %v5936_v59 = vld [vmem:[#allocation12 + $0x68] sm:$0xff]  ;;  %v5935_v16 = vld [vmem:[#allocation12 + $0x60] sm:$0xff] }
0x18a3   :  { %v5938_v60 = vld [vmem:[#allocation12 + $0x78] sm:$0xff]  ;;  %v5937_v23 = vld [vmem:[#allocation12 + $0x70] sm:$0xff]  ;;  %v5940_v10 = vld [vmem:[#allocation12 + $0x88] sm:$0xff] }
0x18a4   :  { %5994 = vmatpush1.bf16.msra.mxu0 %v5925_v12  ;;  %v5939_v25 = vld [vmem:[#allocation12 + $0x80] sm:$0xff]  ;;  %v5942_v33 = vld [vmem:[#allocation12 + $0x98] sm:$0xff]  ;;  %v5941_v26 = vld [vmem:[#allocation12 + $0x90] sm:$0xff] }
0x18a5   :  { %5995 = vmatprep.subr.bf16.mxu0 %v5928_v35  ;;  %v5944_v31 = vld [vmem:[#allocation12 + $0xa8] sm:$0xff]  ;;  %v5943_v20 = vld [vmem:[#allocation12 + $0xa0] sm:$0xff]  ;;  %v5946_v58 = vld [vmem:[#allocation12 + $0xb8] sm:$0xff] }
0x18a6   :  { %v5945_v52 = vld [vmem:[#allocation12 + $0xb0] sm:$0xff]  ;;  %v5948_v7 = vld [vmem:[#allocation12 + $0xc8] sm:$0xff]  ;;  %v5947_v27 = vld [vmem:[#allocation12 + $0xc0] sm:$0xff] }
0x18a7   :  { %v5950_v34 = vld [vmem:[#allocation12 + $0xd8] sm:$0xff]  ;;  %v5949_v17 = vld [vmem:[#allocation12 + $0xd0] sm:$0xff]  ;;  %v5952_v18 = vld [vmem:[#allocation12 + $0xe8] sm:$0xff] }
0x18a8   :  { %5996 = vmatpush1.bf16.msra.mxu0 %v5927_v45  ;;  %v5951_v62 = vld [vmem:[#allocation12 + $0xe0] sm:$0xff]  ;;  %v5954_v28 = vld [vmem:[#allocation12 + $0xf8] sm:$0xff]  ;;  %v5953_v41 = vld [vmem:[#allocation12 + $0xf0] sm:$0xff] }
0x18a9   :  { %5997 = vmatprep.subr.bf16.mxu0 %v5930_v24  ;;  %v5956_v5 = vld [vmem:[#allocation12 + $0x108] sm:$0xff]  ;;  %v5955_v3 = vld [vmem:[#allocation12 + $0x100] sm:$0xff]  ;;  %v5958_v61 = vld [vmem:[#allocation12 + $0x118] sm:$0xff] }
0x18aa   :  { %v5957_v63 = vld [vmem:[#allocation12 + $0x110] sm:$0xff]  ;;  %v5960_v1 = vld [vmem:[#allocation12 + $0x128] sm:$0xff]  ;;  %v5959_v6 = vld [vmem:[#allocation12 + $0x120] sm:$0xff] }
0x18ab   :  { %v5962_v48 = vld [vmem:[#allocation12 + $0x138] sm:$0xff]  ;;  %v5961_v40 = vld [vmem:[#allocation12 + $0x130] sm:$0xff]  ;;  %v5964_v9 = vld [vmem:[#allocation12 + $0x148] sm:$0xff] }
0x18ac   :  { %5998 = vmatpush1.bf16.msra.mxu0 %v5929_v50  ;;  %v5963_v38 = vld [vmem:[#allocation12 + $0x140] sm:$0xff]  ;;  %v5966_v39 = vld [vmem:[#allocation12 + $0x158] sm:$0xff]  ;;  %v5965_v42 = vld [vmem:[#allocation12 + $0x150] sm:$0xff] }
0x18ad   :  { %5999 = vmatprep.subr.bf16.mxu0 %v5932_v49  ;;  %v5968_v2 = vld [vmem:[#allocation12 + $0x168] sm:$0xff]  ;;  %v5970_v36 = vld [vmem:[#allocation12 + $0x178] sm:$0xff]  ;;  %v5969_v53 = vld [vmem:[#allocation12 + $0x170] sm:$0xff] }
0x18ae   :  { %v5972_v55 = vld [vmem:[#allocation22 + $0xc5] ss:$8 sm:$0x3] }
0x18af   :  { %v5984_v8 = vrot.slane %v5972_v55, %v9843_v46  ;;  %v5988_v19 = vrot.slane %v5972_v55, %v9844_v57 }
0x18b0   :  { %6000 = vmatpush1.bf16.msra.mxu0 %v5931_v37 }
0x18b1   :  { %6001 = vmatprep.subr.bf16.mxu0 %v5934_v54 }
0x18b4   :  { %6002 = vmatpush1.bf16.msra.mxu0 %v5933_v14 }
0x18b5   :  { %6003 = vmatprep.subr.bf16.mxu0 %v5936_v59  ;;  %v5974_v59 = vld [vmem:[#allocation22 + $0xc6] ss:$8 sm:$0x3] }
0x18b8   :  { %6004 = vmatpush1.bf16.msra.mxu0 %v5935_v16  ;;  %v5976_v16 = vld [vmem:[#allocation22 + $0xc7] ss:$8 sm:$0x3] }
0x18b9   :  { %6005 = vmatprep.subr.bf16.mxu0 %v5938_v60 }
0x18bc   :  { %6006 = vmatpush1.bf16.msra.mxu0 %v5937_v23 }
0x18bd   :  { %6007 = vmatprep.subr.bf16.mxu0 %v5940_v10  ;;  %v6095_v10 = vrot.slane %v5974_v59, %v9843_v46 }
0x18c0   :  { %6008 = vmatpush1.bf16.msra.mxu0 %v5939_v25  ;;  %v6099_v25 = vrot.slane %v5974_v59, %v9844_v57 }
0x18c1   :  { %6009 = vmatprep.subr.bf16.mxu0 %v5942_v33 }
0x18c4   :  { %6010 = vmatpush1.bf16.msra.mxu0 %v5941_v26  ;;  %v6108_v26 = vrot.slane %v5976_v16, %v9843_v46 }
0x18c5   :  { %6011 = vmatprep.subr.bf16.mxu0 %v5944_v31  ;;  %v6112_v31 = vrot.slane %v5976_v16, %v9844_v57 }
0x18c8   :  { %6012 = vmatpush1.bf16.msra.mxu0 %v5943_v20 }
0x18c9   :  { %6013 = vmatprep.subr.bf16.mxu0 %v5946_v58 }
0x18cc   :  { %6014 = vmatpush1.bf16.msra.mxu0 %v5945_v52 }
0x18cd   :  { %6015 = vmatprep.subr.bf16.mxu0 %v5948_v7 }
0x18d0   :  { %6016 = vmatpush1.bf16.msra.mxu0 %v5947_v27 }
0x18d1   :  { %6017 = vmatprep.subr.bf16.mxu0 %v5950_v34 }
0x18d4   :  { %6018 = vmatpush1.bf16.msra.mxu0 %v5949_v17 }
0x18d5   :  { %6019 = vmatprep.subr.bf16.mxu0 %v5952_v18 }
0x18d8   :  { %6020 = vmatpush1.bf16.msra.mxu0 %v5951_v62 }
0x18d9   :  { %6021 = vmatprep.subr.bf16.mxu0 %v5954_v28 }
0x18dc   :  { %6022 = vmatpush1.bf16.msra.mxu0 %v5953_v41 }
0x18dd   :  { %6032 = vmatprep.subr.bf16.mxu0 %v5956_v5 }
0x18df   :  { %6024 = vmatmul.mubr.bf16.vlgmr.msra.gmra.mrb[60].mxu0 %v5977_v56 }
0x18e0   :  { %6033 = vmatpush1.bf16.msra.mxu0 %v5955_v3  ;;  %6064 = vmatprep.mubr.bf16.mxu0 %v7893_v47  ;;  %v5967_v47 = vld [vmem:[#allocation12 + $0x160] sm:$0xff] }
0x18e1   :  { %6034 = vmatprep.subr.bf16.mxu0 %v5958_v61 }
0x18e4   :  { %6035 = vmatpush1.bf16.msra.mxu0 %v5957_v63 }
0x18e5   :  { %6036 = vmatprep.subr.bf16.mxu0 %v5960_v1 }
0x18e8   :  { %6037 = vmatpush1.bf16.msra.mxu0 %v5959_v6 }
0x18e9   :  { %6038 = vmatprep.subr.bf16.mxu0 %v5962_v48 }
0x18ec   :  { %6039 = vmatpush1.bf16.msra.mxu0 %v5961_v40 }
0x18ed   :  { %6040 = vmatprep.subr.bf16.mxu0 %v5964_v9 }
0x18f0   :  { %6041 = vmatpush1.bf16.msra.mxu0 %v5963_v38 }
0x18f1   :  { %6042 = vmatprep.subr.bf16.mxu0 %v5966_v39 }
0x18f4   :  { %6043 = vmatpush1.bf16.msra.mxu0 %v5965_v42 }
0x18f5   :  { %6044 = vmatprep.subr.bf16.mxu0 %v5968_v2 }
0x18f8   :  { %6045 = vmatpush1.bf16.msra.mxu0 %v5967_v47 }
0x18f9   :  { %6046 = vmatprep.subr.bf16.mxu0 %v5970_v36 }
0x18fc   :  { %6047 = vmatpush1.bf16.msra.mxu0 %v5969_v53 }
0x18ff   :  { %6065 = vmatmul.mubr.bf16.vlgmr.msra.gmra.mrb[60].mxu0 %v5979_v44 }
0x19d2   :  { %v6066_v32 = vpop.f32.mrb[60].mxu0 }
0x19d3   :  { %v7457_v4 = vadd.f32 %v6066_v32, %v5984_v8  ;;  %v6068_v0 = vpop.f32.mrb[61].mxu0 }
0x19d4   :  { %v7458_v15 = vadd.f32 %v6068_v0, %v5988_v19  ;;  %v6070_v22 = vpop.f32.mrb[62].mxu0 }
0x19d5   :  { %v6071_v30 = vpop.f32.mrb[63].mxu0  ;;  %v6077_v35 = vmul.f32 %v7457_v4, %v7457_v4 }
0x19d6   :  { %v6073_v12 = vadd.f32 %v7458_v15, %v7457_v4  ;;  %v6078_v45 = vmul.f32 %v7458_v15, %v7458_v15 }
0x19d8   :  { %6074 = vadd.xlane.f32.xlu0 %v6073_v12  ;;  %v6079_v11 = vadd.f32 %v6078_v45, %v6077_v35 }
0x19dc   :  { %6080 = vadd.xlane.f32.xlu0 %v6079_v11 }
0x1a65   :  { %v6075_v21 = vpop.xlane.xlu0 %6074 }
0x1a66   :  { %v6076_v24 = vmul.f32 0.00390625, %v6075_v21 }
0x1a68   :  { %v6083_v49 = vmul.f32 %v6076_v24, %v6076_v24  ;;  %v6085_v60 = vsub.f32 %v7457_v4, %v6076_v24  ;;  %v6086_v23 = vsub.f32 %v7458_v15, %v6076_v24 }
0x1a69   :  { %v6081_v50 = vpop.xlane.xlu0 %6080 }
0x1a6a   :  { %v6082_v37 = vmul.f32 0.00390625, %v6081_v50 }
0x1a6c   :  { %v6084_v54 = vsub.f32 %v6082_v37, %v6083_v49 }
0x1a6e   :  { %v6087_v14 = vadd.f32 1e-05, %v6084_v54 }
0x1a70   :  { %7655 = vrsqrt.f32 %v6087_v14 }
0x1a7a   :  { %v7656_v33 = vpop.eup %7655 }
0x1a7b   :  { %v6089_v20 = vmul.f32 %v7656_v33, %v6085_v60  ;;  %v6090_v58 = vmul.f32 %v7656_v33, %v6086_v23 }
0x1a7d   :  { %v6102_v52 = vmul.f32 %v6095_v10, %v6089_v20  ;;  %v6103_v7 = vmul.f32 %v6099_v25, %v6090_v58 }
0x1a7f   :  { %v9338_v27 = vadd.f32 %v6108_v26, %v6102_v52  ;;  %v6116_v34 = vadd.f32 %v6112_v31, %v6103_v7 }
0x1a81   :  { %v6117_v17 = vmax.f32 %v9338_v27, 0.0  ;;  %v6118_v18 = vmax.f32 %v6116_v34, 0.0 }
0x1a82   :  { %7831 = dma.done.wait [#allocation16 + $0xb], 16384 }
0x1a83   :  { %7832 = vsyncadd [#allocation16 + $0xb], 4294950912  ;;  %v9341_v62 = vpack.c.bf16 %v6118_v18, %v6118_v18  ;;  %v6124_v28 = vld [vmem:[#allocation13 + $0x8] sm:$0xff]  ;;  %v6123_v41 = vld [vmem:[#allocation13] sm:$0xff] }
0x1a84   :  { %v6132_v5 = vld [vmem:[#allocation13 + $0x48] sm:$0xff]  ;;  %6298 = vmatprep.subr.bf16.mxu1 %v6124_v28  ;;  %v6131_v56 = vld [vmem:[#allocation13 + $0x40] sm:$0xff]  ;;  %v6126_v34 = vld [vmem:[#allocation13 + $0x18] sm:$0xff]  ;;  %v9348_v28 = vpack.c.bf16 %v6117_v17, %v6117_v17 }
0x1a85   :  { %6330 = vmatprep.mubr.bf16.mxu1 %v9341_v62  ;;  %6412 = vmatprep.mubr.bf16.mxu0 %v9341_v62  ;;  %v6140_v3 = vld [vmem:[#allocation13 + $0x88] sm:$0xff]  ;;  %v6139_v61 = vld [vmem:[#allocation13 + $0x80] sm:$0xff]  ;;  %v6142_v27 = vld [vmem:[#allocation13 + $0x98] sm:$0xff] }
0x1a86   :  { %6299 = vmatpush1.bf16.msra.mxu1 %v6123_v41  ;;  %v6148_v63 = vld [vmem:[#allocation13 + $0xc8] sm:$0xff]  ;;  %v6147_v1 = vld [vmem:[#allocation13 + $0xc0] sm:$0xff] }
0x1a87   :  { %6300 = vmatprep.subr.bf16.mxu1 %v6132_v5  ;;  %v6156_v6 = vld [vmem:[#allocation13 + $0x108] sm:$0xff]  ;;  %v6155_v48 = vld [vmem:[#allocation13 + $0x100] sm:$0xff]  ;;  %v6125_v5 = vld [vmem:[#allocation13 + $0x10] sm:$0xff] }
0x1a88   :  { %v6164_v40 = vld [vmem:[#allocation13 + $0x148] sm:$0xff]  ;;  %v6163_v9 = vld [vmem:[#allocation13 + $0x140] sm:$0xff] }
0x1a89   :  { %v6172_v38 = vld [vmem:[#allocation13 + $0x188] sm:$0xff]  ;;  %v6127_v42 = vld [vmem:[#allocation13 + $0x20] sm:$0xff] }
0x1a8a   :  { %6301 = vmatpush1.bf16.msra.mxu1 %v6131_v56  ;;  %v6128_v39 = vld [vmem:[#allocation13 + $0x28] sm:$0xff]  ;;  %v6171_v47 = vld [vmem:[#allocation13 + $0x180] sm:$0xff]  ;;  %v6134_v56 = vld [vmem:[#allocation13 + $0x58] sm:$0xff] }
0x1a8b   :  { %6302 = vmatprep.subr.bf16.mxu1 %v6140_v3  ;;  %6380 = vmatprep.subr.bf16.mxu0 %v6128_v39  ;;  %v6136_v2 = vld [vmem:[#allocation13 + $0x68] sm:$0xff]  ;;  %v6135_v53 = vld [vmem:[#allocation13 + $0x60] sm:$0xff]  ;;  %v6158_v39 = vld [vmem:[#allocation13 + $0x118] sm:$0xff] }
0x1a8c   :  { %6381 = vmatpush1.bf16.msra.mxu0 %v6127_v42  ;;  %v6180_v36 = vld [vmem:[#allocation13 + $0x1c8] sm:$0xff]  ;;  %v6179_v55 = vld [vmem:[#allocation13 + $0x1c0] sm:$0xff] }
0x1a8d   :  { %6382 = vmatprep.subr.bf16.mxu0 %v6136_v2  ;;  %v6144_v44 = vld [vmem:[#allocation13 + $0xa8] sm:$0xff]  ;;  %v6143_v19 = vld [vmem:[#allocation13 + $0xa0] sm:$0xff] }
0x1a8e   :  { %6303 = vmatpush1.bf16.msra.mxu1 %v6139_v61  ;;  %v6188_v8 = vld [vmem:[#allocation13 + $0x208] sm:$0xff]  ;;  %v6187_v4 = vld [vmem:[#allocation13 + $0x200] sm:$0xff] }
0x1a8f   :  { %6304 = vmatprep.subr.bf16.mxu1 %v6148_v63  ;;  %v6152_v32 = vld [vmem:[#allocation13 + $0xe8] sm:$0xff]  ;;  %v6151_v15 = vld [vmem:[#allocation13 + $0xe0] sm:$0xff]  ;;  %v6133_v63 = vld [vmem:[#allocation13 + $0x50] sm:$0xff] }
0x1a90   :  { %6383 = vmatpush1.bf16.msra.mxu0 %v6135_v53  ;;  %v6196_v0 = vld [vmem:[#allocation13 + $0x248] sm:$0xff]  ;;  %v6195_v30 = vld [vmem:[#allocation13 + $0x240] sm:$0xff] }
0x1a91   :  { %6384 = vmatprep.subr.bf16.mxu0 %v6144_v44  ;;  %v6160_v22 = vld [vmem:[#allocation13 + $0x128] sm:$0xff]  ;;  %v6159_v35 = vld [vmem:[#allocation13 + $0x120] sm:$0xff]  ;;  %v6165_v44 = vld [vmem:[#allocation13 + $0x150] sm:$0xff] }
0x1a92   :  { %6305 = vmatpush1.bf16.msra.mxu1 %v6147_v1  ;;  %v6204_v12 = vld [vmem:[#allocation13 + $0x288] sm:$0xff]  ;;  %v6203_v11 = vld [vmem:[#allocation13 + $0x280] sm:$0xff] }
0x1a93   :  { %6306 = vmatprep.subr.bf16.mxu1 %v6156_v6  ;;  %v6168_v45 = vld [vmem:[#allocation13 + $0x168] sm:$0xff]  ;;  %v6167_v24 = vld [vmem:[#allocation13 + $0x160] sm:$0xff]  ;;  %v6141_v6 = vld [vmem:[#allocation13 + $0x90] sm:$0xff] }
0x1a94   :  { %6385 = vmatpush1.bf16.msra.mxu0 %v6143_v19  ;;  %v6212_v21 = vld [vmem:[#allocation13 + $0x2c8] sm:$0xff]  ;;  %v6211_v49 = vld [vmem:[#allocation13 + $0x2c0] sm:$0xff]  ;;  %v6182_v19 = vld [vmem:[#allocation13 + $0x1d8] sm:$0xff] }
0x1a95   :  { %6386 = vmatprep.subr.bf16.mxu0 %v6152_v32  ;;  %v6176_v50 = vld [vmem:[#allocation13 + $0x1a8] sm:$0xff]  ;;  %v6175_v54 = vld [vmem:[#allocation13 + $0x1a0] sm:$0xff]  ;;  %v6181_v32 = vld [vmem:[#allocation13 + $0x1d0] sm:$0xff] }
0x1a96   :  { %6307 = vmatpush1.bf16.msra.mxu1 %v6155_v48  ;;  %v6220_v37 = vld [vmem:[#allocation13 + $0x308] sm:$0xff]  ;;  %v6219_v59 = vld [vmem:[#allocation13 + $0x300] sm:$0xff]  ;;  %v6150_v48 = vld [vmem:[#allocation13 + $0xd8] sm:$0xff] }
0x1a97   :  { %6308 = vmatprep.subr.bf16.mxu1 %v6164_v40  ;;  %v6184_v14 = vld [vmem:[#allocation13 + $0x1e8] sm:$0xff]  ;;  %v6183_v60 = vld [vmem:[#allocation13 + $0x1e0] sm:$0xff] }
0x1a98   :  { %6387 = vmatpush1.bf16.msra.mxu0 %v6151_v15  ;;  %v6228_v16 = vld [vmem:[#allocation13 + $0x348] sm:$0xff]  ;;  %v6227_v10 = vld [vmem:[#allocation13 + $0x340] sm:$0xff]  ;;  %v6198_v15 = vld [vmem:[#allocation13 + $0x258] sm:$0xff] }
0x1a99   :  { %6388 = vmatprep.subr.bf16.mxu0 %v6160_v22  ;;  %v6192_v23 = vld [vmem:[#allocation13 + $0x228] sm:$0xff]  ;;  %v6191_v33 = vld [vmem:[#allocation13 + $0x220] sm:$0xff]  ;;  %v6197_v22 = vld [vmem:[#allocation13 + $0x250] sm:$0xff] }
0x1a9a   :  { %6309 = vmatpush1.bf16.msra.mxu1 %v6163_v9  ;;  %v6236_v25 = vld [vmem:[#allocation13 + $0x388] sm:$0xff]  ;;  %v6235_v31 = vld [vmem:[#allocation13 + $0x380] sm:$0xff] }
0x1a9b   :  { %6310 = vmatprep.subr.bf16.mxu1 %v6172_v38  ;;  %v6200_v26 = vld [vmem:[#allocation13 + $0x268] sm:$0xff]  ;;  %v6199_v58 = vld [vmem:[#allocation13 + $0x260] sm:$0xff]  ;;  %v6149_v38 = vld [vmem:[#allocation13 + $0xd0] sm:$0xff] }
0x1a9c   :  { %6389 = vmatpush1.bf16.msra.mxu0 %v6159_v35  ;;  %v6244_v20 = vld [vmem:[#allocation13 + $0x3c8] sm:$0xff]  ;;  %v6243_v7 = vld [vmem:[#allocation13 + $0x3c0] sm:$0xff]  ;;  %v6214_v35 = vld [vmem:[#allocation13 + $0x2d8] sm:$0xff] }
0x1a9d   :  { %6390 = vmatprep.subr.bf16.mxu0 %v6168_v45  ;;  %v6208_v52 = vld [vmem:[#allocation13 + $0x2a8] sm:$0xff]  ;;  %v6207_v18 = vld [vmem:[#allocation13 + $0x2a0] sm:$0xff]  ;;  %v6213_v45 = vld [vmem:[#allocation13 + $0x2d0] sm:$0xff] }
0x1a9e   :  { %6311 = vmatpush1.bf16.msra.mxu1 %v6171_v47  ;;  %v6216_v41 = vld [vmem:[#allocation13 + $0x2e8] sm:$0xff]  ;;  %v6215_v3 = vld [vmem:[#allocation13 + $0x2e0] sm:$0xff]  ;;  %v6157_v47 = vld [vmem:[#allocation13 + $0x110] sm:$0xff] }
0x1a9f   :  { %6312 = vmatprep.subr.bf16.mxu1 %v6180_v36  ;;  %v6224_v61 = vld [vmem:[#allocation13 + $0x328] sm:$0xff]  ;;  %v6223_v17 = vld [vmem:[#allocation13 + $0x320] sm:$0xff]  ;;  %v6166_v36 = vld [vmem:[#allocation13 + $0x158] sm:$0xff] }
0x1aa0   :  { %6391 = vmatpush1.bf16.msra.mxu0 %v6167_v24  ;;  %v6232_v1 = vld [vmem:[#allocation13 + $0x368] sm:$0xff]  ;;  %v6231_v40 = vld [vmem:[#allocation13 + $0x360] sm:$0xff]  ;;  %v6230_v24 = vld [vmem:[#allocation13 + $0x358] sm:$0xff] }
0x1aa1   :  { %6392 = vmatprep.subr.bf16.mxu0 %v6176_v50  ;;  %v6240_v9 = vld [vmem:[#allocation13 + $0x3a8] sm:$0xff]  ;;  %v6239_v42 = vld [vmem:[#allocation13 + $0x3a0] sm:$0xff]  ;;  %v6229_v50 = vld [vmem:[#allocation13 + $0x350] sm:$0xff] }
0x1aa2   :  { %6313 = vmatpush1.bf16.msra.mxu1 %v6179_v55  ;;  %v6248_v2 = vld [vmem:[#allocation13 + $0x3e8] sm:$0xff]  ;;  %v6247_v53 = vld [vmem:[#allocation13 + $0x3e0] sm:$0xff]  ;;  %v6174_v55 = vld [vmem:[#allocation13 + $0x198] sm:$0xff] }
0x1aa3   :  { %6314 = vmatprep.subr.bf16.mxu1 %v6188_v8  ;;  %v6173_v8 = vld [vmem:[#allocation13 + $0x190] sm:$0xff] }
0x1aa4   :  { %6393 = vmatpush1.bf16.msra.mxu0 %v6175_v54  ;;  %v6246_v54 = vld [vmem:[#allocation13 + $0x3d8] sm:$0xff] }
0x1aa5   :  { %6394 = vmatprep.subr.bf16.mxu0 %v6184_v14  ;;  %v6245_v14 = vld [vmem:[#allocation13 + $0x3d0] sm:$0xff] }
0x1aa6   :  { %6315 = vmatpush1.bf16.msra.mxu1 %v6187_v4  ;;  %v6190_v4 = vld [vmem:[#allocation13 + $0x218] sm:$0xff] }
0x1aa7   :  { %6316 = vmatprep.subr.bf16.mxu1 %v6196_v0  ;;  %v6189_v0 = vld [vmem:[#allocation13 + $0x210] sm:$0xff] }
0x1aa8   :  { %6395 = vmatpush1.bf16.msra.mxu0 %v6183_v60  ;;  %v6138_v60 = vld [vmem:[#allocation13 + $0x78] sm:$0xff] }
0x1aa9   :  { %6396 = vmatprep.subr.bf16.mxu0 %v6192_v23  ;;  %v6137_v23 = vld [vmem:[#allocation13 + $0x70] sm:$0xff] }
0x1aaa   :  { %6317 = vmatpush1.bf16.msra.mxu1 %v6195_v30  ;;  %v6206_v30 = vld [vmem:[#allocation13 + $0x298] sm:$0xff] }
0x1aab   :  { %6318 = vmatprep.subr.bf16.mxu1 %v6204_v12  ;;  %v6205_v12 = vld [vmem:[#allocation13 + $0x290] sm:$0xff] }
0x1aac   :  { %6397 = vmatpush1.bf16.msra.mxu0 %v6191_v33  ;;  %v6154_v33 = vld [vmem:[#allocation13 + $0xf8] sm:$0xff] }
0x1aad   :  { %6398 = vmatprep.subr.bf16.mxu0 %v6200_v26  ;;  %v6153_v26 = vld [vmem:[#allocation13 + $0xf0] sm:$0xff] }
0x1aae   :  { %6319 = vmatpush1.bf16.msra.mxu1 %v6203_v11  ;;  %v6222_v11 = vld [vmem:[#allocation13 + $0x318] sm:$0xff] }
0x1aaf   :  { %6320 = vmatprep.subr.bf16.mxu1 %v6212_v21  ;;  %v6221_v21 = vld [vmem:[#allocation13 + $0x310] sm:$0xff] }
0x1ab0   :  { %6399 = vmatpush1.bf16.msra.mxu0 %v6199_v58  ;;  %v6170_v58 = vld [vmem:[#allocation13 + $0x178] sm:$0xff] }
0x1ab1   :  { %6400 = vmatprep.subr.bf16.mxu0 %v6208_v52  ;;  %v6169_v52 = vld [vmem:[#allocation13 + $0x170] sm:$0xff] }
0x1ab2   :  { %6321 = vmatpush1.bf16.msra.mxu1 %v6211_v49  ;;  %v6238_v49 = vld [vmem:[#allocation13 + $0x398] sm:$0xff] }
0x1ab3   :  { %6322 = vmatprep.subr.bf16.mxu1 %v6220_v37  ;;  %v6237_v37 = vld [vmem:[#allocation13 + $0x390] sm:$0xff] }
0x1ab4   :  { %6401 = vmatpush1.bf16.msra.mxu0 %v6207_v18  ;;  %v6185_v18 = vld [vmem:[#allocation13 + $0x1f0] sm:$0xff] }
0x1ab5   :  { %6402 = vmatprep.subr.bf16.mxu0 %v6216_v41  ;;  %v6194_v41 = vld [vmem:[#allocation13 + $0x238] sm:$0xff] }
0x1ab6   :  { %6323 = vmatpush1.bf16.msra.mxu1 %v6219_v59  ;;  %v6130_v59 = vld [vmem:[#allocation13 + $0x38] sm:$0xff] }
0x1ab7   :  { %6324 = vmatprep.subr.bf16.mxu1 %v6228_v16  ;;  %v6129_v16 = vld [vmem:[#allocation13 + $0x30] sm:$0xff] }
0x1ab8   :  { %6403 = vmatpush1.bf16.msra.mxu0 %v6215_v3  ;;  %v6201_v3 = vld [vmem:[#allocation13 + $0x270] sm:$0xff] }
0x1ab9   :  { %6404 = vmatprep.subr.bf16.mxu0 %v6224_v61  ;;  %v6210_v61 = vld [vmem:[#allocation13 + $0x2b8] sm:$0xff] }
0x1aba   :  { %6325 = vmatpush1.bf16.msra.mxu1 %v6227_v10  ;;  %v6146_v10 = vld [vmem:[#allocation13 + $0xb8] sm:$0xff] }
0x1abb   :  { %6326 = vmatprep.subr.bf16.mxu1 %v6236_v25  ;;  %v6145_v25 = vld [vmem:[#allocation13 + $0xb0] sm:$0xff] }
0x1abc   :  { %6405 = vmatpush1.bf16.msra.mxu0 %v6223_v17  ;;  %v6217_v17 = vld [vmem:[#allocation13 + $0x2f0] sm:$0xff] }
0x1abd   :  { %6406 = vmatprep.subr.bf16.mxu0 %v6232_v1  ;;  %v6226_v1 = vld [vmem:[#allocation13 + $0x338] sm:$0xff] }
0x1abe   :  { %6327 = vmatpush1.bf16.msra.mxu1 %v6235_v31  ;;  %v6162_v31 = vld [vmem:[#allocation13 + $0x138] sm:$0xff] }
0x1abf   :  { %6328 = vmatprep.subr.bf16.mxu1 %v6244_v20  ;;  %v6161_v20 = vld [vmem:[#allocation13 + $0x130] sm:$0xff] }
0x1ac0   :  { %6407 = vmatpush1.bf16.msra.mxu0 %v6231_v40  ;;  %v6233_v40 = vld [vmem:[#allocation13 + $0x370] sm:$0xff] }
0x1ac1   :  { %6408 = vmatprep.subr.bf16.mxu0 %v6240_v9  ;;  %v6242_v9 = vld [vmem:[#allocation13 + $0x3b8] sm:$0xff] }
0x1ac2   :  { %6329 = vmatpush1.bf16.msra.mxu1 %v6243_v7  ;;  %v6178_v7 = vld [vmem:[#allocation13 + $0x1b8] sm:$0xff] }
0x1ac3   :  { %6339 = vmatprep.subr.bf16.mxu1 %v6126_v34  ;;  %v6186_v34 = vld [vmem:[#allocation13 + $0x1f8] sm:$0xff] }
0x1ac4   :  { %6409 = vmatpush1.bf16.msra.mxu0 %v6239_v42  ;;  %v6249_v42 = vld [vmem:[#allocation13 + $0x3f0] sm:$0xff] }
0x1ac5   :  { %6331 = vmatmul.mubr.bf16.vlgmr.msra.gmra.mrb[60].mxu1 %v9348_v28  ;;  %6410 = vmatprep.subr.bf16.mxu0 %v6248_v2  ;;  %v6252_v2 = vld [vmem:[#allocation22 + $0x100] ss:$8 sm:$0xf] }
0x1ac6   :  { %6340 = vmatpush1.bf16.msra.mxu1 %v6125_v5  ;;  %6371 = vmatprep.mubr.bf16.mxu1 %v9341_v62  ;;  %v6193_v5 = vld [vmem:[#allocation13 + $0x230] sm:$0xff] }
0x1ac7   :  { %6341 = vmatprep.subr.bf16.mxu1 %v6134_v56  ;;  %v6202_v56 = vld [vmem:[#allocation13 + $0x278] sm:$0xff] }
0x1ac8   :  { %6411 = vmatpush1.bf16.msra.mxu0 %v6247_v53 }
0x1aca   :  { %6342 = vmatpush1.bf16.msra.mxu1 %v6133_v63  ;;  %v6209_v63 = vld [vmem:[#allocation13 + $0x2b0] sm:$0xff] }
0x1acb   :  { %6343 = vmatprep.subr.bf16.mxu1 %v6142_v27  ;;  %6413 = vmatmul.mubr.bf16.vlgmr.msra.gmra.mrb[64].mxu0 %v9348_v28  ;;  %v6218_v27 = vld [vmem:[#allocation13 + $0x2f8] sm:$0xff] }
0x1ace   :  { %6344 = vmatpush1.bf16.msra.mxu1 %v6141_v6  ;;  %v6225_v6 = vld [vmem:[#allocation13 + $0x330] sm:$0xff] }
0x1acf   :  { %6345 = vmatprep.subr.bf16.mxu1 %v6150_v48  ;;  %v6234_v48 = vld [vmem:[#allocation13 + $0x378] sm:$0xff] }
0x1ad2   :  { %6346 = vmatpush1.bf16.msra.mxu1 %v6149_v38  ;;  %v6241_v38 = vld [vmem:[#allocation13 + $0x3b0] sm:$0xff] }
0x1ad3   :  { %6347 = vmatprep.subr.bf16.mxu1 %v6158_v39  ;;  %v6250_v39 = vld [vmem:[#allocation13 + $0x3f8] sm:$0xff] }
0x1ad6   :  { %6348 = vmatpush1.bf16.msra.mxu1 %v6157_v47  ;;  %v6253_v47 = vld [vmem:[#allocation22 + $0x100] ss:$8 sm:$0xf0] }
0x1ad7   :  { %6349 = vmatprep.subr.bf16.mxu1 %v6166_v36  ;;  %v6254_v36 = vor.u32 %v6253_v47, %v6252_v2 }
0x1ad9   :  { %v6261_v53 = vrot.slane %v6254_v36, %v9843_v46 }
0x1ada   :  { %6350 = vmatpush1.bf16.msra.mxu1 %v6165_v44  ;;  %v6265_v44 = vrot.slane %v6254_v36, %v9844_v57 }
0x1adb   :  { %6351 = vmatprep.subr.bf16.mxu1 %v6174_v55 }
0x1ade   :  { %6352 = vmatpush1.bf16.msra.mxu1 %v6173_v8 }
0x1adf   :  { %6353 = vmatprep.subr.bf16.mxu1 %v6182_v19 }
0x1ae2   :  { %6354 = vmatpush1.bf16.msra.mxu1 %v6181_v32 }
0x1ae3   :  { %6355 = vmatprep.subr.bf16.mxu1 %v6190_v4 }
0x1ae6   :  { %6356 = vmatpush1.bf16.msra.mxu1 %v6189_v0 }
0x1ae7   :  { %6357 = vmatprep.subr.bf16.mxu1 %v6198_v15  ;;  %v6277_v15 = vrot.slane %v6254_v36, %v9847_v43 }
0x1aea   :  { %6358 = vmatpush1.bf16.msra.mxu1 %v6197_v22  ;;  %v6281_v22 = vrot.slane %v6254_v36, %v9848_v51 }
0x1aeb   :  { %6359 = vmatprep.subr.bf16.mxu1 %v6206_v30 }
0x1aee   :  { %6360 = vmatpush1.bf16.msra.mxu1 %v6205_v12 }
0x1aef   :  { %6361 = vmatprep.subr.bf16.mxu1 %v6214_v35 }
0x1af2   :  { %6362 = vmatpush1.bf16.msra.mxu1 %v6213_v45 }
0x1af3   :  { %6363 = vmatprep.subr.bf16.mxu1 %v6222_v11 }
0x1af6   :  { %6364 = vmatpush1.bf16.msra.mxu1 %v6221_v21  ;;  %v6269_v21 = vrot.slane %v6254_v36, %v9845_v29 }
0x1af7   :  { %6365 = vmatprep.subr.bf16.mxu1 %v6230_v24  ;;  %v6273_v24 = vrot.slane %v6254_v36, %v9846_v13 }
0x1afa   :  { %6366 = vmatpush1.bf16.msra.mxu1 %v6229_v50 }
0x1afb   :  { %6367 = vmatprep.subr.bf16.mxu1 %v6238_v49 }
0x1afe   :  { %6368 = vmatpush1.bf16.msra.mxu1 %v6237_v37 }
0x1aff   :  { %6369 = vmatprep.subr.bf16.mxu1 %v6246_v54 }
0x1b02   :  { %6370 = vmatpush1.bf16.msra.mxu1 %v6245_v14  ;;  %v9852_v14 = vld [vmem:[#allocation71_spill] sm:$0xff] }
0x1b03   :  { %6421 = vmatprep.subr.bf16.mxu1 %v6130_v59  ;;  %v6284_v59 = vsub.s32 6, %v9852_v14 }
0x1b05   :  { %6372 = vmatmul.mubr.bf16.vlgmr.msra.gmra.mrb[64].mxu1 %v9348_v28 }
0x1b06   :  { %6422 = vmatpush1.bf16.msra.mxu1 %v6129_v16  ;;  %6453 = vmatprep.mubr.bf16.mxu1 %v9341_v62  ;;  %v6177_v62 = vld [vmem:[#allocation13 + $0x1b0] sm:$0xff]  ;;  %v6288_v16 = vsub.s32 7, %v9852_v14 }
0x1b07   :  { %6423 = vmatprep.subr.bf16.mxu1 %v6138_v60  ;;  %v6285_v60 = vrot.slane %v6254_v36, %v6284_v59 }
0x1b0a   :  { %6424 = vmatpush1.bf16.msra.mxu1 %v6137_v23  ;;  %v6289_v23 = vrot.slane %v6254_v36, %v6288_v16 }
0x1b0b   :  { %6425 = vmatprep.subr.bf16.mxu1 %v6146_v10 }
0x1b0e   :  { %6426 = vmatpush1.bf16.msra.mxu1 %v6145_v25 }
0x1b0f   :  { %6427 = vmatprep.subr.bf16.mxu1 %v6154_v33 }
0x1b12   :  { %6428 = vmatpush1.bf16.msra.mxu1 %v6153_v26 }
0x1b13   :  { %6429 = vmatprep.subr.bf16.mxu1 %v6162_v31 }
0x1b16   :  { %6430 = vmatpush1.bf16.msra.mxu1 %v6161_v20 }
0x1b17   :  { %6431 = vmatprep.subr.bf16.mxu1 %v6170_v58 }
0x1b1a   :  { %6432 = vmatpush1.bf16.msra.mxu1 %v6169_v52 }
0x1b1b   :  { %6433 = vmatprep.subr.bf16.mxu1 %v6178_v7 }
0x1b1e   :  { %6434 = vmatpush1.bf16.msra.mxu1 %v6177_v62 }
0x1b1f   :  { %6435 = vmatprep.subr.bf16.mxu1 %v6186_v34 }
0x1b22   :  { %6436 = vmatpush1.bf16.msra.mxu1 %v6185_v18 }
0x1b23   :  { %6437 = vmatprep.subr.bf16.mxu1 %v6194_v41 }
0x1b26   :  { %6438 = vmatpush1.bf16.msra.mxu1 %v6193_v5 }
0x1b27   :  { %6439 = vmatprep.subr.bf16.mxu1 %v6202_v56 }
0x1b2a   :  { %6440 = vmatpush1.bf16.msra.mxu1 %v6201_v3 }
0x1b2b   :  { %6441 = vmatprep.subr.bf16.mxu1 %v6210_v61 }
0x1b2e   :  { %6442 = vmatpush1.bf16.msra.mxu1 %v6209_v63 }
0x1b2f   :  { %6443 = vmatprep.subr.bf16.mxu1 %v6218_v27 }
0x1b32   :  { %6444 = vmatpush1.bf16.msra.mxu1 %v6217_v17 }
0x1b33   :  { %6445 = vmatprep.subr.bf16.mxu1 %v6226_v1 }
0x1b36   :  { %6446 = vmatpush1.bf16.msra.mxu1 %v6225_v6 }
0x1b37   :  { %6447 = vmatprep.subr.bf16.mxu1 %v6234_v48 }
0x1b3a   :  { %6448 = vmatpush1.bf16.msra.mxu1 %v6233_v40 }
0x1b3b   :  { %6449 = vmatprep.subr.bf16.mxu1 %v6242_v9 }
0x1b3e   :  { %6450 = vmatpush1.bf16.msra.mxu1 %v6241_v38 }
0x1b3f   :  { %6451 = vmatprep.subr.bf16.mxu1 %v6250_v39 }
0x1b42   :  { %6452 = vmatpush1.bf16.msra.mxu1 %v6249_v42 }
0x1b45   :  { %6454 = vmatmul.mubr.bf16.vlgmr.msra.gmra.mrb[68].mxu1 %v9348_v28 }
0x1b98   :  { %v6332_v55 = vpop.f32.mrb[60].mxu1 }
0x1b99   :  { %v9358_v8 = vadd.f32 %v6332_v55, %v6261_v53  ;;  %v6334_v19 = vpop.f32.mrb[61].mxu1 }
0x1b9a   :  { %v9360_v32 = vadd.f32 %v6334_v19, %v6265_v44  ;;  %v6336_v4 = vpop.f32.mrb[62].mxu1 }
0x1b9b   :  { %v6337_v0 = vpop.f32.mrb[63].mxu1  ;;  %v6538_v20 = vmul.f32 %v9358_v8, %v9358_v8 }
0x1b9c   :  { %v6534_v31 = vadd.f32 %v9360_v32, %v9358_v8  ;;  %v6539_v58 = vmul.f32 %v9360_v32, %v9360_v32 }
0x1b9e   :  { %v6414_v28 = vpop.f32.mrb[64].mxu0 }
0x1b9f   :  { %v9364_v30 = vadd.f32 %v6414_v28, %v6277_v15  ;;  %v6416_v12 = vpop.f32.mrb[65].mxu0 }
0x1ba0   :  { %v9366_v35 = vadd.f32 %v6416_v12, %v6281_v22  ;;  %v6418_v45 = vpop.f32.mrb[66].mxu0 }
0x1ba1   :  { %v6419_v11 = vpop.f32.mrb[67].mxu0 }
0x1bd8   :  { %v6373_v50 = vpop.f32.mrb[64].mxu1 }
0x1bd9   :  { %v9370_v49 = vadd.f32 %v6373_v50, %v6269_v21  ;;  %v6375_v37 = vpop.f32.mrb[65].mxu1 }
0x1bda   :  { %v9372_v54 = vadd.f32 %v6375_v37, %v6273_v24  ;;  %v6377_v43 = vpop.f32.mrb[66].mxu1 }
0x1bdb   :  { %v6378_v51 = vpop.f32.mrb[67].mxu1 }
0x1c18   :  { %v6455_v10 = vpop.f32.mrb[68].mxu1 }
0x1c19   :  { %v9376_v25 = vadd.f32 %v6455_v10, %v6285_v60  ;;  %v6457_v29 = vpop.f32.mrb[69].mxu1 }
0x1c1a   :  { %v9378_v33 = vadd.f32 %v6457_v29, %v6289_v23  ;;  %v6459_v13 = vpop.f32.mrb[70].mxu1 }
0x1c1b   :  { %v6460_v26 = vpop.f32.mrb[71].mxu1 }
0x1c1c   :  { %7833 = dma.done.wait [#allocation16 + $0xc], 8192 }
0x1c1d   :  { %7834 = vsyncadd [#allocation16 + $0xc], 4294959104  ;;  %v6646_v52 = vadd.f32 %v9372_v54, %v9370_v49  ;;  %v6650_v7 = vmul.f32 %v9370_v49, %v9370_v49  ;;  %6535 = vadd.xlane.f32.xlu0 %v6534_v31  ;;  %v6540_v62 = vadd.f32 %v6539_v58, %v6538_v20  ;;  %v6651_v34 = vmul.f32 %v9372_v54, %v9372_v54  ;;  %v6474_v1 = vld [vmem:[#allocation14 + $0x40] sm:$0xff]  ;;  %v6475_v48 = vld [vmem:[#allocation14 + $0x48] sm:$0xff] }
0x1c1e   :  { %v6757_v41 = vadd.f32 %v9366_v35, %v9364_v30  ;;  %v6761_v5 = vmul.f32 %v9364_v30, %v9364_v30  ;;  %v6762_v56 = vmul.f32 %v9366_v35, %v9366_v35  ;;  %v6868_v3 = vadd.f32 %v9378_v33, %v9376_v25  ;;  %7293 = vmatprep.subr.bf16.mxu0 %v6474_v1  ;;  %v6466_v6 = vld [vmem:[#allocation14] sm:$0xff]  ;;  %v6467_v40 = vld [vmem:[#allocation14 + $0x8] sm:$0xff]  ;;  %v6476_v9 = vld [vmem:[#allocation14 + $0x50] sm:$0xff] }
0x1c1f   :  { %6647 = vadd.xlane.f32.xlu1 %v6646_v52  ;;  %v6652_v18 = vadd.f32 %v6651_v34, %v6650_v7  ;;  %v6872_v61 = vmul.f32 %v9376_v25, %v9376_v25  ;;  %v6873_v63 = vmul.f32 %v9378_v33, %v9378_v33  ;;  %7294 = vmatpush3.bf16.msra.mxu0 %v6466_v6  ;;  %v6468_v38 = vld [vmem:[#allocation14 + $0x10] sm:$0xff]  ;;  %v6506_v39 = vld [vmem:[#allocation14 + $0x140] sm:$0xff]  ;;  %v6477_v2 = vld [vmem:[#allocation14 + $0x58] sm:$0xff] }
0x1c20   :  { %v6763_v27 = vadd.f32 %v6762_v56, %v6761_v5  ;;  %7295 = vmatprep.subr.bf16.mxu0 %v6475_v48  ;;  %7337 = vmatprep.subr.bf16.mxu1 %v6506_v39  ;;  %v6498_v42 = vld [vmem:[#allocation14 + $0x100] sm:$0xff]  ;;  %v6469_v47 = vld [vmem:[#allocation14 + $0x18] sm:$0xff]  ;;  %v6507_v36 = vld [vmem:[#allocation14 + $0x148] sm:$0xff] }
0x1c21   :  { %6541 = vadd.xlane.f32.xlu0 %v6540_v62  ;;  %v6874_v17 = vadd.f32 %v6873_v63, %v6872_v61  ;;  %7338 = vmatpush3.bf16.msra.mxu1 %v6498_v42  ;;  %v6499_v53 = vld [vmem:[#allocation14 + $0x108] sm:$0xff]  ;;  %v6478_v44 = vld [vmem:[#allocation14 + $0x60] sm:$0xff]  ;;  %v6508_v19 = vld [vmem:[#allocation14 + $0x150] sm:$0xff] }
0x1c22   :  { %7339 = vmatprep.subr.bf16.mxu1 %v6507_v36  ;;  %v6470_v55 = vld [vmem:[#allocation14 + $0x20] sm:$0xff]  ;;  %v6500_v4 = vld [vmem:[#allocation14 + $0x110] sm:$0xff]  ;;  %v6479_v0 = vld [vmem:[#allocation14 + $0x68] sm:$0xff] }
0x1c23   :  { %6653 = vadd.xlane.f32.xlu1 %v6652_v18  ;;  %7296 = vmatpush3.bf16.msra.mxu0 %v6467_v40  ;;  %v6471_v15 = vld [vmem:[#allocation14 + $0x28] sm:$0xff]  ;;  %v6509_v22 = vld [vmem:[#allocation14 + $0x158] sm:$0xff]  ;;  %v6480_v12 = vld [vmem:[#allocation14 + $0x70] sm:$0xff] }
0x1c24   :  { %7297 = vmatprep.subr.bf16.mxu0 %v6476_v9  ;;  %v6501_v28 = vld [vmem:[#allocation14 + $0x118] sm:$0xff]  ;;  %v6510_v45 = vld [vmem:[#allocation14 + $0x160] sm:$0xff]  ;;  %v6472_v11 = vld [vmem:[#allocation14 + $0x30] sm:$0xff] }
0x1c25   :  { %6758 = vadd.xlane.f32.xlu0 %v6757_v41  ;;  %7340 = vmatpush3.bf16.msra.mxu1 %v6499_v53  ;;  %v6502_v21 = vld [vmem:[#allocation14 + $0x120] sm:$0xff]  ;;  %v6481_v24 = vld [vmem:[#allocation14 + $0x78] sm:$0xff]  ;;  %v6511_v50 = vld [vmem:[#allocation14 + $0x168] sm:$0xff] }
0x1c26   :  { %7341 = vmatprep.subr.bf16.mxu1 %v6508_v19  ;;  %v6473_v37 = vld [vmem:[#allocation14 + $0x38] sm:$0xff]  ;;  %v6503_v43 = vld [vmem:[#allocation14 + $0x128] sm:$0xff]  ;;  %v6490_v51 = vld [vmem:[#allocation14 + $0xc0] sm:$0xff] }
0x1c27   :  { %6869 = vadd.xlane.f32.xlu1 %v6868_v3  ;;  %7298 = vmatpush3.bf16.msra.mxu0 %v6468_v38  ;;  %v6512_v14 = vld [vmem:[#allocation14 + $0x170] sm:$0xff]  ;;  %v6513_v16 = vld [vmem:[#allocation14 + $0x178] sm:$0xff]  ;;  %v6531_v6 = vld [vmem:[#allocation22 + $0x101] ss:$8 sm:$0x3] }
0x1c28   :  { %7299 = vmatprep.subr.bf16.mxu0 %v6477_v2  ;;  %v6504_v59 = vld [vmem:[#allocation14 + $0x130] sm:$0xff]  ;;  %v6505_v60 = vld [vmem:[#allocation14 + $0x138] sm:$0xff]  ;;  %v9410_v40 = vld [vmem:[#allocation22 + $0x106] ss:$8 sm:$0x3]  ;;  %v6560_v36 = vrot.slane %v6531_v6, %v9844_v57 }
0x1c29   :  { %6764 = vadd.xlane.f32.xlu0 %v6763_v27  ;;  %7342 = vmatpush3.bf16.msra.mxu1 %v6500_v4  ;;  %v6533_v39 = vld [vmem:[#allocation22 + $0x102] ss:$8 sm:$0x3]  ;;  %v9418_v53 = vld [vmem:[#allocation22 + $0x107] ss:$8 sm:$0x3] }
0x1c2a   :  { %7343 = vmatprep.subr.bf16.mxu1 %v6509_v22 }
0x1c2b   :  { %6875 = vadd.xlane.f32.xlu1 %v6874_v17  ;;  %7300 = vmatpush3.bf16.msra.mxu0 %v6469_v47  ;;  %v6556_v47 = vrot.slane %v6531_v6, %v9843_v46 }
0x1c2c   :  { %7301 = vmatprep.subr.bf16.mxu0 %v6478_v44 }
0x1c2d   :  { %7344 = vmatpush3.bf16.msra.mxu1 %v6501_v28  ;;  %v6685_v28 = vrot.slane %v9418_v53, %v9844_v57 }
0x1c2e   :  { %7345 = vmatprep.subr.bf16.mxu1 %v6510_v45 }
0x1c2f   :  { %7302 = vmatpush3.bf16.msra.mxu0 %v6470_v55  ;;  %v6672_v55 = vrot.slane %v9410_v40, %v9844_v57 }
0x1c30   :  { %7303 = vmatprep.subr.bf16.mxu0 %v6479_v0 }
0x1c31   :  { %7346 = vmatpush3.bf16.msra.mxu1 %v6502_v21 }
0x1c32   :  { %7347 = vmatprep.subr.bf16.mxu1 %v6511_v50 }
0x1c33   :  { %7304 = vmatpush3.bf16.msra.mxu0 %v6471_v15 }
0x1c34   :  { %7305 = vmatprep.subr.bf16.mxu0 %v6480_v12 }
0x1c35   :  { %7348 = vmatpush3.bf16.msra.mxu1 %v6503_v43 }
0x1c36   :  { %7349 = vmatprep.subr.bf16.mxu1 %v6512_v14  ;;  %v6756_v14 = vld [vmem:[#allocation22 + $0x144] ss:$8 sm:$0x3] }
0x1c37   :  { %7306 = vmatpush3.bf16.msra.mxu0 %v6472_v11  ;;  %v6754_v11 = vld [vmem:[#allocation22 + $0x143] ss:$8 sm:$0x3] }
0x1c38   :  { %7307 = vmatprep.subr.bf16.mxu0 %v6481_v24 }
0x1c39   :  { %7350 = vmatpush3.bf16.msra.mxu1 %v6504_v59 }
0x1c3a   :  { %7351 = vmatprep.subr.bf16.mxu1 %v6513_v16 }
0x1c3b   :  { %7308 = vmatpush3.bf16.msra.mxu0 %v6473_v37 }
0x1c3c   :  { %7315 = vmatprep.subr.bf16.mxu0 %v6490_v51 }
0x1c3d   :  { %7352 = vmatpush3.bf16.msra.mxu1 %v6505_v60 }
0x1caa   :  { %v6536_v23 = vpop.xlane.xlu0 %6535 }
0x1cab   :  { %v6537_v10 = vmul.f32 0.00390625, %v6536_v23  ;;  %v6779_v23 = vrot.slane %v6754_v11, %v9843_v46 }
0x1cac   :  { %v6648_v29 = vpop.xlane.xlu1 %6647 }
0x1cad   :  { %v9404_v13 = vmul.f32 0.00390625, %v6648_v29  ;;  %v6544_v20 = vmul.f32 %v6537_v10, %v6537_v10  ;;  %v6546_v42 = vsub.f32 %v9358_v8, %v6537_v10  ;;  %v6547_v2 = vsub.f32 %v9360_v32, %v6537_v10 }
0x1cae   :  { %v6542_v26 = vpop.xlane.xlu0 %6541  ;;  %v6569_v8 = vrot.slane %v6533_v39, %v9843_v46  ;;  %v6573_v32 = vrot.slane %v6533_v39, %v9844_v57  ;;  %v6783_v10 = vrot.slane %v6754_v11, %v9844_v57 }
0x1caf   :  { %v6656_v31 = vmul.f32 %v9404_v13, %v9404_v13  ;;  %v6543_v58 = vmul.f32 0.00390625, %v6542_v26  ;;  %v6659_v38 = vsub.f32 %v9372_v54, %v9404_v13  ;;  %v6792_v26 = vrot.slane %v6756_v14, %v9843_v46 }
0x1cb0   :  { %v6654_v52 = vpop.xlane.xlu1 %6653 }
0x1cb1   :  { %v6655_v7 = vmul.f32 0.00390625, %v6654_v52  ;;  %v6545_v62 = vsub.f32 %v6543_v58, %v6544_v20 }
0x1cb2   :  { %v6759_v34 = vpop.xlane.xlu0 %6758 }
0x1cb3   :  { %v6657_v18 = vsub.f32 %v6655_v7, %v6656_v31  ;;  %v6548_v41 = vadd.f32 1e-05, %v6545_v62  ;;  %v6760_v5 = vmul.f32 0.00390625, %v6759_v34  ;;  %v6796_v31 = vrot.slane %v6756_v14, %v9844_v57  ;;  %v6482_v62 = vld [vmem:[#allocation14 + $0x80] sm:$0xff]  ;;  %v6515_v14 = vld [vmem:[#allocation14 + $0x188] sm:$0xff] }
0x1cb4   :  { %v6870_v63 = vpop.xlane.xlu1 %6869 }
0x1cb5   :  { %v6660_v56 = vadd.f32 1e-05, %v6657_v18  ;;  %7657 = vrsqrt.f32 %v6548_v41  ;;  %v6767_v3 = vmul.f32 %v6760_v5, %v6760_v5  ;;  %v9408_v48 = vmul.f32 0.00390625, %v6870_v63  ;;  %v6491_v18 = vld [vmem:[#allocation14 + $0xc8] sm:$0xff]  ;;  %v6492_v63 = vld [vmem:[#allocation14 + $0xd0] sm:$0xff] }
0x1cb6   :  { %v6765_v61 = vpop.xlane.xlu0 %6764  ;;  %v6769_v50 = vsub.f32 %v9364_v30, %v6760_v5  ;;  %v6770_v37 = vsub.f32 %v9366_v35, %v6760_v5 }
0x1cb7   :  { %7659 = vrsqrt.f32 %v6660_v56  ;;  %v6766_v27 = vmul.f32 0.00390625, %v6765_v61  ;;  %v6878_v19 = vmul.f32 %v9408_v48, %v9408_v48  ;;  %v6483_v61 = vld [vmem:[#allocation14 + $0x88] sm:$0xff]  ;;  %v6881_v39 = vsub.f32 %v9378_v33, %v9408_v48 }
0x1cb8   :  { %v6876_v9 = vpop.xlane.xlu1 %6875 }
0x1cb9   :  { %v6768_v17 = vsub.f32 %v6766_v27, %v6767_v3  ;;  %v6877_v4 = vmul.f32 0.00390625, %v6876_v9  ;;  %v6484_v9 = vld [vmem:[#allocation14 + $0x90] sm:$0xff] }
0x1cbb   :  { %v6771_v1 = vadd.f32 1e-05, %v6768_v17  ;;  %v6879_v24 = vsub.f32 %v6877_v4, %v6878_v19  ;;  %v6668_v4 = vrot.slane %v9410_v40, %v9843_v46  ;;  %v6488_v40 = vld [vmem:[#allocation14 + $0xb0] sm:$0xff] }
0x1cbd   :  { %7661 = vrsqrt.f32 %v6771_v1  ;;  %v6882_v58 = vadd.f32 1e-05, %v6879_v24  ;;  %v6489_v24 = vld [vmem:[#allocation14 + $0xb8] sm:$0xff] }
0x1cbf   :  { %v7658_v44 = vpop.eup %7657  ;;  %7663 = vrsqrt.f32 %v6882_v58  ;;  %v6527_v58 = vld [vmem:[#allocation14 + $0x1e8] sm:$0xff] }
0x1cc0   :  { %v6551_v0 = vmul.f32 %v7658_v44, %v6547_v2  ;;  %v6550_v15 = vmul.f32 %v7658_v44, %v6546_v42  ;;  %v6658_v2 = vsub.f32 %v9370_v49, %v9404_v13  ;;  %v6494_v44 = vld [vmem:[#allocation14 + $0xe0] sm:$0xff] }
0x1cc1   :  { %v9424_v54 = vpop.eup %7659 }
0x1cc2   :  { %v6663_v22 = vmul.f32 %v9424_v54, %v6659_v38  ;;  %v6564_v12 = vmul.f32 %v6560_v36, %v6551_v0  ;;  %v6563_v45 = vmul.f32 %v6556_v47, %v6550_v15  ;;  %v6493_v38 = vld [vmem:[#allocation14 + $0xd8] sm:$0xff]  ;;  %v9441_v36 = vld [vmem:[#allocation22 + $0x180] ss:$8 sm:$0x3]  ;;  %v6662_v33 = vmul.f32 %v9424_v54, %v6658_v2 }
0x1cc3   :  { %v6485_v47 = vld [vmem:[#allocation14 + $0x98] sm:$0xff]  ;;  %v6894_v19 = vrot.slane %v9441_v36, %v9844_v57  ;;  %v6486_v0 = vld [vmem:[#allocation14 + $0xa0] sm:$0xff]  ;;  %v6681_v15 = vrot.slane %v9418_v53, %v9843_v46 }
0x1cc4   :  { %v6676_v21 = vmul.f32 %v6672_v55, %v6663_v22  ;;  %v6577_v43 = vadd.f32 %v6573_v32, %v6564_v12  ;;  %v6576_v51 = vadd.f32 %v6569_v8, %v6563_v45  ;;  %v6867_v8 = vld [vmem:[#allocation22 + $0x181] ss:$8 sm:$0x3]  ;;  %v6496_v12 = vld [vmem:[#allocation14 + $0xf0] sm:$0xff] }
0x1cc5   :  { %v6495_v32 = vld [vmem:[#allocation14 + $0xe8] sm:$0xff]  ;;  %v6907_v13 = vrot.slane %v6867_v8, %v9844_v57  ;;  %v6514_v53 = vld [vmem:[#allocation14 + $0x180] sm:$0xff] }
0x1cc6   :  { %v6689_v59 = vadd.f32 %v6685_v28, %v6676_v21  ;;  %v6579_v16 = vmax.f32 %v6577_v43, 0.0  ;;  %v6578_v60 = vmax.f32 %v6576_v51, 0.0  ;;  %v6487_v22 = vld [vmem:[#allocation14 + $0xa8] sm:$0xff]  ;;  %v6675_v28 = vmul.f32 %v6668_v4, %v6662_v33  ;;  %v6497_v21 = vld [vmem:[#allocation14 + $0xf8] sm:$0xff] }
0x1cc7   :  { %v7662_v29 = vpop.eup %7661  ;;  %v6523_v51 = vld [vmem:[#allocation14 + $0x1c8] sm:$0xff] }
0x1cc8   :  { %v6691_v20 = vmax.f32 %v6689_v59, 0.0  ;;  %v6584_v30 = vpack.c.bf16 %v6579_v16, %v6579_v16  ;;  %v6583_v52 = vpack.c.bf16 %v6578_v60, %v6578_v60  ;;  %v6774_v35 = vmul.f32 %v7662_v29, %v6770_v37  ;;  %v6522_v37 = vld [vmem:[#allocation14 + $0x1c0] sm:$0xff]  ;;  %v6524_v59 = vld [vmem:[#allocation14 + $0x1d0] sm:$0xff]  ;;  %v6525_v60 = vld [vmem:[#allocation14 + $0x1d8] sm:$0xff] }
0x1cc9   :  { %v6773_v7 = vmul.f32 %v7662_v29, %v6769_v50  ;;  %v7664_v42 = vpop.eup %7663  ;;  %v6688_v11 = vadd.f32 %v6681_v15, %v6675_v28  ;;  %v6516_v16 = vld [vmem:[#allocation14 + $0x190] sm:$0xff]  ;;  %v6526_v29 = vld [vmem:[#allocation14 + $0x1e0] sm:$0xff] }
0x1cca   :  { %v6696_v34 = vpack.c.bf16 %v6691_v20, %v6691_v20  ;;  %6617 = vmatprep.mubr.bf16.mxu0 %v6584_v30  ;;  %v6787_v41 = vmul.f32 %v6783_v10, %v6774_v35  ;;  %v6885_v55 = vmul.f32 %v7664_v42, %v6881_v39  ;;  %v6517_v10 = vld [vmem:[#allocation14 + $0x198] sm:$0xff]  ;;  %v6903_v30 = vrot.slane %v6867_v8, %v9843_v46 }
0x1ccb   :  { %v6786_v5 = vmul.f32 %v6779_v23, %v6773_v7  ;;  %6618 = vmatmul.mubr.bf16.vlgmr.msra.gmra.mrb[68].mxu0 %v6583_v52  ;;  %v6690_v50 = vmax.f32 %v6688_v11, 0.0  ;;  %v6880_v23 = vsub.f32 %v9376_v25, %v9408_v48  ;;  %v6519_v52 = vld [vmem:[#allocation14 + $0x1a8] sm:$0xff]  ;;  %v6528_v7 = vld [vmem:[#allocation14 + $0x1f0] sm:$0xff] }
0x1ccc   :  { %7316 = vmatpush3.bf16.msra.mxu0 %v6482_v62  ;;  %v6800_v56 = vadd.f32 %v6796_v31, %v6787_v41  ;;  %6729 = vmatprep.mubr.bf16.mxu0 %v6696_v34  ;;  %v6898_v49 = vmul.f32 %v6894_v19, %v6885_v55  ;;  %v6518_v31 = vld [vmem:[#allocation14 + $0x1a0] sm:$0xff]  ;;  %v6520_v25 = vld [vmem:[#allocation14 + $0x1b0] sm:$0xff]  ;;  %v6529_v62 = vld [vmem:[#allocation14 + $0x1f8] sm:$0xff] }
0x1ccd   :  { %v6799_v3 = vadd.f32 %v6792_v26, %v6786_v5  ;;  %7317 = vmatprep.subr.bf16.mxu0 %v6491_v18  ;;  %v6695_v43 = vpack.c.bf16 %v6690_v50, %v6690_v50  ;;  %v6890_v26 = vrot.slane %v9441_v36, %v9843_v46  ;;  %v6884_v20 = vmul.f32 %v7664_v42, %v6880_v23  ;;  %v6521_v34 = vld [vmem:[#allocation14 + $0x1b8] sm:$0xff] }
0x1cce   :  { %v6802_v27 = vmax.f32 %v6800_v56, 0.0  ;;  %v6911_v45 = vadd.f32 %v6907_v13, %v6898_v49  ;;  %v6580_v56 = vld [vmem:[#allocation22 + $0x103] ss:$0 sm:$0xff]  ;;  %v6914_v49 = vld [vmem:[#allocation22 + $0x182] ss:$0 sm:$0xff] }
0x1ccf   :  { %v6801_v17 = vmax.f32 %v6799_v3, 0.0  ;;  %v6897_v35 = vmul.f32 %v6890_v26, %v6884_v20  ;;  %v6582_v26 = vld [vmem:[#allocation22 + $0x105] ss:$0 sm:$0xff] }
0x1cd0   :  { %7318 = vmatpush3.bf16.msra.mxu0 %v6483_v61  ;;  %v6807_v1 = vpack.c.bf16 %v6802_v27, %v6802_v27  ;;  %v6913_v54 = vmax.f32 %v6911_v45, 0.0 }
0x1cd1   :  { %v6806_v6 = vpack.c.bf16 %v6801_v17, %v6801_v17  ;;  %7319 = vmatprep.subr.bf16.mxu0 %v6492_v63  ;;  %v6910_v48 = vadd.f32 %v6903_v30, %v6897_v35 }
0x1cd2   :  { %6840 = vmatprep.mubr.bf16.mxu1 %v6807_v1  ;;  %v6918_v57 = vpack.c.bf16 %v6913_v54, %v6913_v54  ;;  %v6803_v1 = vld [vmem:[#allocation22 + $0x145] ss:$0 sm:$0xff] }
0x1cd3   :  { %6841 = vmatmul.mubr.bf16.vlgmr.msra.gmra.mrb[72].mxu1 %v6806_v6  ;;  %v6912_v18 = vmax.f32 %v6910_v48, 0.0  ;;  %v6805_v48 = vld [vmem:[#allocation22 + $0x147] ss:$0 sm:$0xff] }
0x1cd4   :  { %7320 = vmatpush3.bf16.msra.mxu0 %v6484_v9 }
0x1cd5   :  { %7321 = vmatprep.subr.bf16.mxu0 %v6493_v38  ;;  %v6917_v41 = vpack.c.bf16 %v6912_v18, %v6912_v18 }
0x1cd8   :  { %7322 = vmatpush3.bf16.msra.mxu0 %v6485_v47 }
0x1cd9   :  { %7323 = vmatprep.subr.bf16.mxu0 %v6494_v44  ;;  %v6692_v44 = vld [vmem:[#allocation22 + $0x140] ss:$0 sm:$0xff] }
0x1cdc   :  { %7324 = vmatpush3.bf16.msra.mxu0 %v6486_v0 }
0x1cdd   :  { %7325 = vmatprep.subr.bf16.mxu0 %v6495_v32 }
0x1ce0   :  { %7326 = vmatpush3.bf16.msra.mxu0 %v6487_v22 }
0x1ce1   :  { %7327 = vmatprep.subr.bf16.mxu0 %v6496_v12 }
0x1ce4   :  { %7328 = vmatpush3.bf16.msra.mxu0 %v6488_v40 }
0x1ce5   :  { %7329 = vmatprep.subr.bf16.mxu0 %v6497_v21 }
0x1ce8   :  { %7330 = vmatpush3.bf16.msra.mxu0 %v6489_v24 }
0x1ce9   :  { %7359 = vmatprep.subr.bf16.mxu0 %v6522_v37 }
0x1ceb   :  { %6730 = vmatmul.mubr.bf16.vlgmr.msra.gmra.mrb[72].mxu0 %v6695_v43 }
0x1cec   :  { %7360 = vmatpush3.bf16.msra.mxu0 %v6514_v53  ;;  %6951 = vmatprep.mubr.bf16.mxu0 %v6918_v57 }
0x1ced   :  { %7361 = vmatprep.subr.bf16.mxu0 %v6523_v51 }
0x1cf0   :  { %7362 = vmatpush3.bf16.msra.mxu0 %v6515_v14 }
0x1cf1   :  { %7363 = vmatprep.subr.bf16.mxu0 %v6524_v59 }
0x1cf4   :  { %7364 = vmatpush3.bf16.msra.mxu0 %v6516_v16 }
0x1cf5   :  { %7365 = vmatprep.subr.bf16.mxu0 %v6525_v60 }
0x1cf8   :  { %7366 = vmatpush3.bf16.msra.mxu0 %v6517_v10  ;;  %v6581_v10 = vld [vmem:[#allocation22 + $0x104] ss:$0 sm:$0xff] }
0x1cf9   :  { %7367 = vmatprep.subr.bf16.mxu0 %v6526_v29 }
0x1cfc   :  { %7368 = vmatpush3.bf16.msra.mxu0 %v6518_v31 }
0x1cfd   :  { %7369 = vmatprep.subr.bf16.mxu0 %v6527_v58 }
0x1d00   :  { %7370 = vmatpush3.bf16.msra.mxu0 %v6519_v52  ;;  %v6804_v52 = vld [vmem:[#allocation22 + $0x146] ss:$0 sm:$0xff] }
0x1d01   :  { %7371 = vmatprep.subr.bf16.mxu0 %v6528_v7 }
0x1d04   :  { %7372 = vmatpush3.bf16.msra.mxu0 %v6520_v25 }
0x1d05   :  { %7373 = vmatprep.subr.bf16.mxu0 %v6529_v62 }
0x1d08   :  { %7374 = vmatpush3.bf16.msra.mxu0 %v6521_v34 }
0x1d0b   :  { %6952 = vmatmul.mubr.bf16.vlgmr.msra.gmra.mrb[76].mxu0 %v6917_v41 }
0x1d9e   :  { %v7309_v5 = vpop.f32.mrb[68].mxu0 }
0x1d9f   :  { %v7310_v3 = vpop.f32.mrb[69].mxu0 }
0x1da0   :  { %v7311_v46 = vadd.f32 %v7310_v3, %v7309_v5  ;;  %v7312_v61 = vpop.f32.mrb[70].mxu0 }
0x1da1   :  { %v7313_v63 = vpop.f32.mrb[71].mxu0 }
0x1da2   :  { %v6620_v27 = vadd.f32 %v7311_v46, %v6580_v56 }
0x1da4   :  { %6625 = vadd.xlane.f32.xlu0 %v6620_v27  ;;  %v6629_v2 = vmul.f32 %v6620_v27, %v6620_v27 }
0x1da6   :  { %v7353_v17 = vpop.f32.mrb[72].mxu1 }
0x1da7   :  { %v7354_v6 = vpop.f32.mrb[73].mxu1 }
0x1da8   :  { %v7355_v9 = vadd.f32 %v7354_v6, %v7353_v17  ;;  %v7356_v38 = vpop.f32.mrb[74].mxu1  ;;  %v6693_v17 = vld [vmem:[#allocation22 + $0x141] ss:$0 sm:$0xff]  ;;  %v6694_v6 = vld [vmem:[#allocation22 + $0x142] ss:$0 sm:$0xff] }
0x1da9   :  { %v7357_v39 = vpop.f32.mrb[75].mxu1 }
0x1daa   :  { %v6843_v42 = vadd.f32 %v7355_v9, %v6803_v1 }
0x1dac   :  { %6848 = vadd.xlane.f32.xlu0 %v6843_v42  ;;  %v6851_v47 = vmul.f32 %v6843_v42, %v6843_v42 }
0x1db0   :  { %6630 = vadd.xlane.f32.xlu0 %v6629_v2 }
0x1db4   :  { %6852 = vadd.xlane.f32.xlu0 %v6851_v47 }
0x1dbe   :  { %v7331_v36 = vpop.f32.mrb[72].mxu0 }
0x1dbf   :  { %v7332_v55 = vpop.f32.mrb[73].mxu0 }
0x1dc0   :  { %v7333_v19 = vadd.f32 %v7332_v55, %v7331_v36  ;;  %v7334_v4 = vpop.f32.mrb[74].mxu0 }
0x1dc1   :  { %v7335_v0 = vpop.f32.mrb[75].mxu0 }
0x1dc2   :  { %v6732_v33 = vadd.f32 %v7333_v19, %v6692_v44 }
0x1dc4   :  { %6737 = vadd.xlane.f32.xlu1 %v6732_v33  ;;  %v6740_v8 = vmul.f32 %v6732_v33, %v6732_v33 }
0x1dc8   :  { %6741 = vadd.xlane.f32.xlu1 %v6740_v8  ;;  %v6915_v8 = vld [vmem:[#allocation22 + $0x183] ss:$0 sm:$0xff] }
0x1dde   :  { %v7375_v32 = vpop.f32.mrb[76].mxu0 }
0x1ddf   :  { %v7376_v13 = vpop.f32.mrb[77].mxu0 }
0x1de0   :  { %v7377_v15 = vadd.f32 %v7376_v13, %v7375_v32  ;;  %v7378_v22 = vpop.f32.mrb[78].mxu0  ;;  %v6916_v32 = vld [vmem:[#allocation22 + $0x184] ss:$0 sm:$0xff] }
0x1de1   :  { %v7379_v28 = vpop.f32.mrb[79].mxu0 }
0x1de2   :  { %v9456_v12 = vadd.f32 %v7377_v15, %v6914_v49 }
0x1de4   :  { %6959 = vadd.xlane.f32.xlu1 %v9456_v12  ;;  %v6962_v45 = vmul.f32 %v9456_v12, %v9456_v12 }
0x1de8   :  { %6963 = vadd.xlane.f32.xlu1 %v6962_v45 }
0x1e31   :  { %v6626_v40 = vpop.xlane.xlu0 %6625 }
0x1e32   :  { %v6628_v21 = vmul.f32 0.0078125, %v6626_v40 }
0x1e34   :  { %v6633_v24 = vmul.f32 %v6628_v21, %v6628_v21  ;;  %v6635_v60 = vsub.f32 %v6620_v27, %v6628_v21 }
0x1e39   :  { %v6849_v11 = vpop.xlane.xlu0 %6848 }
0x1e3a   :  { %v6850_v50 = vmul.f32 0.0078125, %v6849_v11 }
0x1e3c   :  { %v6855_v57 = vmul.f32 %v6850_v50, %v6850_v50  ;;  %v6857_v31 = vsub.f32 %v6843_v42, %v6850_v50 }
0x1e3d   :  { %v6631_v54 = vpop.xlane.xlu0 %6630 }
0x1e3e   :  { %v6632_v37 = vmul.f32 0.0078125, %v6631_v54 }
0x1e40   :  { %v6634_v43 = vsub.f32 %v6632_v37, %v6633_v24 }
0x1e41   :  { %v6853_v53 = vpop.xlane.xlu0 %6852 }
0x1e42   :  { %v6636_v51 = vadd.f32 1e-05, %v6634_v43  ;;  %v6854_v14 = vmul.f32 0.0078125, %v6853_v53 }
0x1e44   :  { %7665 = vrsqrt.f32 %v6636_v51  ;;  %v6856_v59 = vsub.f32 %v6854_v14, %v6855_v57 }
0x1e46   :  { %v6858_v16 = vadd.f32 1e-05, %v6856_v59 }
0x1e48   :  { %7667 = vrsqrt.f32 %v6858_v16 }
0x1e4e   :  { %v7666_v23 = vpop.eup %7665 }
0x1e4f   :  { %v6638_v29 = vmul.f32 %v7666_v23, %v6635_v60 }
0x1e51   :  { %v6639_v20 = vmul.f32 %v6638_v29, %v6581_v10  ;;  %v6738_v58 = vpop.xlane.xlu1 %6737 }
0x1e52   :  { %v7668_v30 = vpop.eup %7667  ;;  %v6739_v35 = vmul.f32 0.0078125, %v6738_v58 }
0x1e53   :  { %v9461_v7 = vadd.f32 %v6639_v20, %v6582_v26  ;;  %v6860_v25 = vmul.f32 %v7668_v30, %v6857_v31 }
0x1e54   :  { %v6744_v41 = vmul.f32 %v6739_v35, %v6739_v35  ;;  %v6746_v63 = vsub.f32 %v6732_v33, %v6739_v35 }
0x1e55   :  { %v6641_v62 = vmax.f32 %v9461_v7, 0.0  ;;  %v6861_v34 = vmul.f32 %v6860_v25, %v6804_v52  ;;  %v6742_v18 = vpop.xlane.xlu1 %6741 }
0x1e56   :  { %v6743_v5 = vmul.f32 0.0078125, %v6742_v18 }
0x1e57   :  { %v9464_v56 = vadd.f32 %v6861_v34, %v6805_v48 }
0x1e58   :  { %v6745_v3 = vsub.f32 %v6743_v5, %v6744_v41 }
0x1e59   :  { %v6863_v46 = vmax.f32 %v9464_v56, 0.0 }
0x1e5a   :  { %v6747_v61 = vadd.f32 1e-05, %v6745_v3 }
0x1e5c   :  { %7669 = vrsqrt.f32 %v6747_v61 }
0x1e66   :  { %v7670_v27 = vpop.eup %7669 }
0x1e67   :  { %v6749_v1 = vmul.f32 %v7670_v27, %v6746_v63 }
0x1e69   :  { %v6750_v9 = vmul.f32 %v6749_v1, %v6693_v17 }
0x1e6b   :  { %v6751_v38 = vadd.f32 %v6750_v9, %v6694_v6 }
0x1e6d   :  { %v6752_v39 = vmax.f32 %v6751_v38, 0.0 }
0x1e71   :  { %v6960_v42 = vpop.xlane.xlu1 %6959 }
0x1e72   :  { %v6961_v2 = vmul.f32 0.0078125, %v6960_v42 }
0x1e74   :  { %v6966_v36 = vmul.f32 %v6961_v2, %v6961_v2  ;;  %v6968_v4 = vsub.f32 %v9456_v12, %v6961_v2 }
0x1e75   :  { %v6964_v47 = vpop.xlane.xlu1 %6963 }
0x1e76   :  { %v6965_v44 = vmul.f32 0.0078125, %v6964_v47 }
0x1e78   :  { %v6967_v55 = vsub.f32 %v6965_v44, %v6966_v36 }
0x1e7a   :  { %v6969_v19 = vadd.f32 1e-05, %v6967_v55 }
0x1e7c   :  { %7671 = vrsqrt.f32 %v6969_v19 }
0x1e86   :  { %v7672_v0 = vpop.eup %7671 }
0x1e87   :  { %v6971_v33 = vmul.f32 %v7672_v0, %v6968_v4 }
0x1e89   :  { %v6972_v49 = vmul.f32 %v6971_v33, %v6915_v8 }
0x1e8b   :  { %v6973_v13 = vadd.f32 %v6972_v49, %v6916_v32 }
0x1e8d   :  { %v6974_v15 = vmax.f32 %v6973_v13, 0.0 }
0x1e8e   :  { %7835 = dma.done.wait [#allocation16 + $0xd], 4096 }
0x1e8f   :  { %7836 = vsyncadd [#allocation16 + $0xd], 4294963200  ;;  %v7012_v22 = vpack.c.bf16 %v6752_v39, %v6752_v39  ;;  %v7014_v28 = vpack.c.bf16 %v6974_v15, %v6974_v15  ;;  %v6986_v45 = vld [vmem:[#allocation15 + $0x40] sm:$0xff]  ;;  %v6987_v12 = vld [vmem:[#allocation15 + $0x48] sm:$0xff]  ;;  %v7011_v5 = vpack.c.bf16 %v6641_v62, %v6641_v62  ;;  %v7013_v3 = vpack.c.bf16 %v6863_v46, %v6863_v46  ;;  %s7894_s16 = smov [#allocation23]  }
0x1e90   :  { %v7002_v40 = vld [vmem:[#allocation15 + $0xc0] sm:$0xff]  ;;  %7381 = vmatprep.subr.bf16.mxu1 %v6986_v45  ;;  %v7003_v54 = vld [vmem:[#allocation15 + $0xc8] sm:$0xff]  ;;  %v6988_v37 = vld [vmem:[#allocation15 + $0x50] sm:$0xff]  ;;  %s7104_s4 = sshll.u32 %s7894_s16, 4  ;;  %vm7096_vm0 = vcmask 113664   ;;  %s7105_s4 = int_to_ptr.vmem [resolvable:$true] %s7104_s4 }
0x1e91   :  { %7047 = vmatprep.mubr.bf16.mxu1 %v7012_v22  ;;  %7087 = vmatprep.mubr.bf16.mxu0 %v7014_v28  ;;  %v6978_v11 = vld [vmem:[#allocation15] sm:$0xff]  ;;  %v6979_v24 = vld [vmem:[#allocation15 + $0x8] sm:$0xff]  ;;  %v7004_v57 = vld [vmem:[#allocation15 + $0xd0] sm:$0xff]  ;;  %s7783_s23 = scalar_lea.vmem %s7105_s4, 128  ;;  %p7788_p13 = scmp.lt.s32.totalorder %s7105_s4, %s7105_s4 }
0x1e92   :  { %7403 = vmatprep.subr.bf16.mxu0 %v7002_v40  ;;  %v6994_v21 = vld [vmem:[#allocation15 + $0x80] sm:$0xff]  ;;  %7382 = vmatpush3.bf16.msra.mxu1 %v6978_v11  ;;  %v6995_v50 = vld [vmem:[#allocation15 + $0x88] sm:$0xff]  ;;  %v6980_v43 = vld [vmem:[#allocation15 + $0x10] sm:$0xff]  ;;  %p7784_p12 = scmp.ne.s32.totalorder %s7105_s4, %s7783_s23  ;;  %p7789_p0 = scmp.lt.s32.totalorder %s7783_s23, %s7783_s23 }
0x1e93   :  { %7404 = vmatpush3.bf16.msra.mxu0 %v6994_v21  ;;  %7383 = vmatprep.subr.bf16.mxu1 %v6987_v12  ;;  %v6996_v53 = vld [vmem:[#allocation15 + $0x90] sm:$0xff]  ;;  %v6989_v51 = vld [vmem:[#allocation15 + $0x58] sm:$0xff]  ;;  %v6990_v60 = vld [vmem:[#allocation15 + $0x60] sm:$0xff] }
0x1e94   :  { %7405 = vmatprep.subr.bf16.mxu0 %v7003_v54  ;;  %v7005_v14 = vld [vmem:[#allocation15 + $0xd8] sm:$0xff]  ;;  %v7006_v23 = vld [vmem:[#allocation15 + $0xe0] sm:$0xff]  ;;  %v6991_v26 = vld [vmem:[#allocation15 + $0x68] sm:$0xff]  ;;  %p7790_p1 = por %p7789_p0, %p7788_p13 }
0x1e95   :  { %v6981_v59 = vld [vmem:[#allocation15 + $0x18] sm:$0xff]  ;;  %v6982_v10 = vld [vmem:[#allocation15 + $0x20] sm:$0xff]  ;;  %v7007_v31 = vld [vmem:[#allocation15 + $0xe8] sm:$0xff] }
0x1e96   :  { %7384 = vmatpush3.bf16.msra.mxu1 %v6979_v24  ;;  %v6997_v16 = vld [vmem:[#allocation15 + $0x98] sm:$0xff]  ;;  %v6998_v29 = vld [vmem:[#allocation15 + $0xa0] sm:$0xff]  ;;  %v6983_v20 = vld [vmem:[#allocation15 + $0x28] sm:$0xff]  ;;  %p7791_p2 = pnand %p7790_p1, %p7784_p12 }
0x1e97   :  { %7406 = vmatpush3.bf16.msra.mxu0 %v6995_v50  ;;  %7385 = vmatprep.subr.bf16.mxu1 %v6988_v37  ;;  %v6999_v58 = vld [vmem:[#allocation15 + $0xa8] sm:$0xff]  ;;  %v6992_v30 = vld [vmem:[#allocation15 + $0x70] sm:$0xff]  ;;  %v6993_v48 = vld [vmem:[#allocation15 + $0x78] sm:$0xff] }
0x1e98   :  { %7407 = vmatprep.subr.bf16.mxu0 %v7004_v57  ;;  %v7008_v52 = vld [vmem:[#allocation15 + $0xf0] sm:$0xff]  ;;  %v7009_v34 = vld [vmem:[#allocation15 + $0xf8] sm:$0xff]  ;;  %v7010_v39 = vld [vmem:[#allocation22 + $0x185] ss:$0 sm:$0xff] }
0x1e99   :  { %v6984_v35 = vld [vmem:[#allocation15 + $0x30] sm:$0xff]  ;;  %v6985_v18 = vld [vmem:[#allocation15 + $0x38] sm:$0xff] }
0x1e9a   :  { %7386 = vmatpush3.bf16.msra.mxu1 %v6980_v43  ;;  %v7000_v25 = vld [vmem:[#allocation15 + $0xb0] sm:$0xff]  ;;  %v7001_v41 = vld [vmem:[#allocation15 + $0xb8] sm:$0xff] }
0x1e9b   :  { %7408 = vmatpush3.bf16.msra.mxu0 %v6996_v53  ;;  %7387 = vmatprep.subr.bf16.mxu1 %v6989_v51 }
0x1e9c   :  { %7409 = vmatprep.subr.bf16.mxu0 %v7005_v14 }
0x1e9e   :  { %7388 = vmatpush3.bf16.msra.mxu1 %v6981_v59 }
0x1e9f   :  { %7410 = vmatpush3.bf16.msra.mxu0 %v6997_v16  ;;  %7389 = vmatprep.subr.bf16.mxu1 %v6990_v60 }
0x1ea0   :  { %7411 = vmatprep.subr.bf16.mxu0 %v7006_v23 }
0x1ea2   :  { %7390 = vmatpush3.bf16.msra.mxu1 %v6982_v10 }
0x1ea3   :  { %7412 = vmatpush3.bf16.msra.mxu0 %v6998_v29  ;;  %7391 = vmatprep.subr.bf16.mxu1 %v6991_v26 }
0x1ea4   :  { %7413 = vmatprep.subr.bf16.mxu0 %v7007_v31 }
0x1ea6   :  { %7392 = vmatpush3.bf16.msra.mxu1 %v6983_v20 }
0x1ea7   :  { %7414 = vmatpush3.bf16.msra.mxu0 %v6999_v58  ;;  %7393 = vmatprep.subr.bf16.mxu1 %v6992_v30 }
0x1ea8   :  { %7415 = vmatprep.subr.bf16.mxu0 %v7008_v52 }
0x1eaa   :  { %7394 = vmatpush3.bf16.msra.mxu1 %v6984_v35 }
0x1eab   :  { %7416 = vmatpush3.bf16.msra.mxu0 %v7000_v25  ;;  %7395 = vmatprep.subr.bf16.mxu1 %v6993_v48 }
0x1eac   :  { %7417 = vmatprep.subr.bf16.mxu0 %v7009_v34 }
0x1eae   :  { %7396 = vmatpush3.bf16.msra.mxu1 %v6985_v18 }
0x1eaf   :  { %7418 = vmatpush3.bf16.msra.mxu0 %v7001_v41 }
0x1eb1   :  { %7048 = vmatmul.mubr.bf16.vlgmr.msra.gmra.mrb[76].mxu1 %v7011_v5 }
0x1eb2   :  { %7088 = vmatmul.mubr.bf16.vlgmr.msra.gmra.mrb[80].mxu0 %v7013_v3 }
0x1f84   :  { %v7397_v61 = vpop.f32.mrb[76].mxu1 }
0x1f85   :  { %v7419_v63 = vpop.f32.mrb[80].mxu0  ;;  %v7398_v27 = vpop.f32.mrb[77].mxu1 }
0x1f86   :  { %v7420_v17 = vpop.f32.mrb[81].mxu0  ;;  %v7399_v1 = vadd.f32 %v7398_v27, %v7397_v61  ;;  %v7400_v9 = vpop.f32.mrb[78].mxu1 }
0x1f87   :  { %v7421_v6 = vadd.f32 %v7420_v17, %v7419_v63  ;;  %v7422_v38 = vpop.f32.mrb[82].mxu0  ;;  %v7401_v7 = vpop.f32.mrb[79].mxu1 }
0x1f88   :  { %v7423_v42 = vpop.f32.mrb[83].mxu0 }
0x1f89   :  { %v7090_v62 = vadd.f32 %v7421_v6, %v7399_v1 }
0x1f8b   :  { %v7095_v56 = vadd.f32 %v7090_v62, %v7010_v39 }
0x1f8d   :  { %7097 = vst.msk [vmem:[#allocation23] sm:$0xff] %vm7096_vm0, %v7095_v56 }
0x1f8e   :  { %7794 = shalt.err (!%p7791_p2)
}
0x1f8f   :  { %s7795_s3 = scalar_lea.hbm %s9503_s17, 128 }
0x1f90   :  { %p7796_p3 = scmp.ne.s32.totalorder %s9503_s17, %s7795_s3  ;;  %p7799_p4 = scmp.lt.u32.totalorder %s7795_s3, %s9503_s17 }
0x1f92   :  { %p7801_p5 = pnand %p7799_p4, %p7796_p3 }
0x1f94   :  { %7804 = shalt.err (!%p7801_p5)
}
0x1f95   :  { %7107 = dma.vmem_to_hbm [thread:$0]  %s7105_s4, 128, %s9503_s17, [#allocation19]  }
0x1f96   :  { %7837 = dma.done.wait [#allocation19], 128  }
0x1f97   :  { %7838 = vsyncadd [#allocation19], 4294967168 }
0x1f98   :  { %7111 = vsyncpa [#allocation18], 1 }
0x1f99   :  { %7112 = vsyncpa [#allocation21], 1 }
0x1f9a   :  { %7113 = vsyncpa [#allocation19], 1 }
0x1f9b   :  { %7114 = vsyncmov [#allocation16] }
0x1f9e   :  { %s7115_s26 = vpop.sfrf %7114 }
0x1f9f   :  { %p7235_p6 = scmp.ne.s32.totalorder %s7115_s26, 0 }
0x1fa1   :  { %7119 = shalt.err (%p7235_p6)  }
0x1fa2   :  { %7121 = vsyncmov [#allocation16 + $0x1] }
0x1fa5   :  { %s7122_s2 = vpop.sfrf %7121 }
0x1fa6   :  { %p7236_p7 = scmp.ne.s32.totalorder %s7122_s2, 0 }
0x1fa8   :  { %7126 = shalt.err (%p7236_p7)  }
0x1fa9   :  { %7128 = vsyncmov [#allocation16 + $0x2] }
0x1fac   :  { %s7129_s1 = vpop.sfrf %7128 }
0x1fad   :  { %p7237_p8 = scmp.ne.s32.totalorder %s7129_s1, 0 }
0x1faf   :  { %7133 = shalt.err (%p7237_p8)  }
0x1fb0   :  { %7135 = vsyncmov [#allocation16 + $0x3] }
0x1fb3   :  { %s7136_s28 = vpop.sfrf %7135 }
0x1fb4   :  { %p7238_p9 = scmp.ne.s32.totalorder %s7136_s28, 0 }
0x1fb6   :  { %7140 = shalt.err (%p7238_p9)  }
0x1fb7   :  { %7142 = vsyncmov [#allocation16 + $0x4] }
0x1fba   :  { %s7143_s17 = vpop.sfrf %7142 }
0x1fbb   :  { %p7239_p10 = scmp.ne.s32.totalorder %s7143_s17, 0 }
0x1fbd   :  { %7147 = shalt.err (%p7239_p10)  }
0x1fbe   :  { %7149 = vsyncmov [#allocation16 + $0x5] }
0x1fc1   :  { %s7150_s0 = vpop.sfrf %7149 }
0x1fc2   :  { %p7240_p11 = scmp.ne.s32.totalorder %s7150_s0, 0 }
0x1fc4   :  { %7154 = shalt.err (%p7240_p11)  }
0x1fc5   :  { %7156 = vsyncmov [#allocation16 + $0x6] }
0x1fc8   :  { %s7157_s18 = vpop.sfrf %7156 }
0x1fc9   :  { %p7241_p12 = scmp.ne.s32.totalorder %s7157_s18, 0 }
0x1fcb   :  { %7161 = shalt.err (%p7241_p12)  }
0x1fcc   :  { %7163 = vsyncmov [#allocation16 + $0x7] }
0x1fcf   :  { %s7164_s14 = vpop.sfrf %7163 }
0x1fd0   :  { %p7242_p13 = scmp.ne.s32.totalorder %s7164_s14, 0 }
0x1fd2   :  { %7168 = shalt.err (%p7242_p13)  }
0x1fd3   :  { %7170 = vsyncmov [#allocation16 + $0x8] }
0x1fd6   :  { %s7171_s29 = vpop.sfrf %7170 }
0x1fd7   :  { %p7243_p0 = scmp.ne.s32.totalorder %s7171_s29, 0 }
0x1fd9   :  { %7175 = shalt.err (%p7243_p0)  }
0x1fda   :  { %7177 = vsyncmov [#allocation16 + $0x9] }
0x1fdd   :  { %s7178_s9 = vpop.sfrf %7177 }
0x1fde   :  { %p7244_p1 = scmp.ne.s32.totalorder %s7178_s9, 0 }
0x1fe0   :  { %7182 = shalt.err (%p7244_p1)  }
0x1fe1   :  { %7184 = vsyncmov [#allocation16 + $0xa] }
0x1fe4   :  { %s7185_s5 = vpop.sfrf %7184 }
0x1fe5   :  { %p7245_p2 = scmp.ne.s32.totalorder %s7185_s5, 0 }
0x1fe7   :  { %7189 = shalt.err (%p7245_p2)  }
0x1fe8   :  { %7191 = vsyncmov [#allocation16 + $0xb] }
0x1feb   :  { %s7192_s12 = vpop.sfrf %7191 }
0x1fec   :  { %p7246_p3 = scmp.ne.s32.totalorder %s7192_s12, 0 }
0x1fee   :  { %7196 = shalt.err (%p7246_p3)  }
0x1fef   :  { %7198 = vsyncmov [#allocation16 + $0xc] }
0x1ff2   :  { %s7199_s20 = vpop.sfrf %7198 }
0x1ff3   :  { %p7247_p4 = scmp.ne.s32.totalorder %s7199_s20, 0 }
0x1ff5   :  { %7203 = shalt.err (%p7247_p4)  }
0x1ff6   :  { %7205 = vsyncmov [#allocation16 + $0xd] }
0x1ff9   :  { %s7206_s7 = vpop.sfrf %7205 }
0x1ffa   :  { %p7248_p5 = scmp.ne.s32.totalorder %s7206_s7, 0 }
0x1ffc   :  { %7210 = shalt.err (%p7248_p5)  }

</bundles_post_ra>
